<compile_context>
chip_gen: v5e
topology: v5e:2x2
jax: 0.10.0
libtpu: 0.0.40
codegen_flags: <defaults>
</compile_context>

<pallas_src>
import functools

import jax
import jax.numpy as jnp
from jax import lax
from jax.experimental import pallas as pl
from jax.experimental.pallas import tpu as pltpu


def _sigmoid_eup(v):
    # sigmoid(x) = 0.5 * (1 + tanh(x/2)) keeps the transcendental on the EUP.
    return 0.5 * (jnp.tanh(0.5 * v) + 1.0)


def _rot_lanes_left(z, s):
    """out[:, c] = z[:, (c + s) % D] for a static shift (lowers to lane shifts)."""
    if s == 0:
        return z
    return jnp.concatenate([z[:, s:], z[:, :s]], axis=1)


def _fused_glu_kernel(x_ref, w_ref, b_ref, o_ref, pad_ref, *,
                      num_layers, patch_size, pad, lead):
    """All gated-conv layers for one batch row, resident in VMEM.

    x_ref   : (1, L, D)          input block, natural channel order
    w_ref   : (NL*4*P, D//2)     de-interleaved taps; per layer the 4 groups are
                                 [out-even, out-odd, gate-even, gate-odd], P taps each
    b_ref   : (NL*4,   D//2)     biases in the same group order
    o_ref   : (1, L, D)          output block, natural channel order
    pad_ref : (lead + L, D) f32  causal-pad scratch: rows [0, lead) stay zero,
                                 the current layer's activation lives at [lead, lead+L)
    """
    L = x_ref.shape[1]
    D = x_ref.shape[2]
    Dh = D // 2
    P = patch_size

    # Hoisted once per grid step (review: no per-tap ref loads / re-broadcasts).
    w = w_ref[...].astype(jnp.float32)
    bv = b_ref[...].astype(jnp.float32)
    lane = lax.broadcasted_iota(jnp.int32, (1, D), 1)

    def interleave(ye, yo):
        # Natural-order re-interleave: y[:, 2j] = ye[:, j], y[:, 2j+1] = yo[:, j].
        # The grouped conv's 2-per-group fan-out is a perfect-shuffle permutation;
        # realise it with log2(D/2) rotate+select stages in VMEM instead of an
        # HBM round trip per layer.
        z = jnp.concatenate([ye, yo], axis=1)            # [even half | odd half]
        m = Dh
        while m >= 2:
            half = m // 2
            r = jnp.bitwise_and(lane, 2 * m - 1)         # index within a 2m block
            from_lo = jnp.logical_and(r >= m, r < m + half)   # takes z[:, c - half]
            from_hi = jnp.logical_and(r >= half, r < m)       # takes z[:, c + half]
            z = jnp.where(from_lo, _rot_lanes_left(z, D - half),
                          jnp.where(from_hi, _rot_lanes_left(z, half), z))
            m = half
        return z

    # Causal left pad in an 8-row-aligned scratch (single buffer, both halves,
    # every layer). Top rows are written once per grid step and stay zero.
    pad_ref[0:lead, :] = jnp.zeros((lead, D), jnp.float32)
    pad_ref[lead:lead + L, :] = x_ref[0].astype(jnp.float32)

    for layer in range(num_layers):
        base = layer * 4

        def conv_pair(col0, g0, g1):
            # Even / odd output channels share the same half-width input columns
            # [col0, col0 + Dh) of the padded scratch; each tap is one read.
            acc0 = jnp.zeros((L, Dh), jnp.float32)
            acc1 = jnp.zeros((L, Dh), jnp.float32)
            for k in range(P):
                s = pad - k                                       # causal shift
                tap = pad_ref[lead - s:lead - s + L, col0:col0 + Dh]
                r0 = (base + g0) * P + k
                r1 = (base + g1) * P + k
                acc0 = acc0 + w[r0:r0 + 1, :] * tap
                acc1 = acc1 + w[r1:r1 + 1, :] * tap
            acc0 = acc0 + bv[base + g0:base + g0 + 1, :]
            acc1 = acc1 + bv[base + g1:base + g1 + 1, :]
            return acc0, acc1

        out_e, out_o = conv_pair(0, 0, 1)      # "out"  half reads channels [0, Dh)
        gate_e, gate_o = conv_pair(Dh, 2, 3)   # "gate" half reads channels [Dh, D)
        y = interleave(out_e * _sigmoid_eup(gate_e),
                       out_o * _sigmoid_eup(gate_o))

        if layer + 1 < num_layers:
            pad_ref[lead:lead + L, :] = y      # feed the next layer, VMEM only
        else:
            o_ref[0] = y.astype(o_ref.dtype)


def _default_vmem_limit_bytes():
    # Generation-aware VMEM budget (v7x has 64 MiB/TC, v5e/v6e have 128 MiB).
    try:
        cap = int(getattr(pltpu.get_tpu_info(), "vmem_capacity_bytes", 128 << 20))
    except Exception:
        cap = 128 << 20
    return max(16 << 20, min(cap // 2, 64 << 20))


def glu_forward(x, params, patch_size=3, padding=1):
    """Fused gated depthwise-conv (GLU) stack.

    x: (B, L, D); params: list of (weight, bias) with weight (2D, 1, P) grouped
    Conv1d weights and bias (2D,), applied sequentially.
    """
    B, L, D = x.shape
    P = patch_size
    pad = 2 * padding
    NL = len(params)
    assert D % 2 == 0 and (D & (D - 1)) == 0, "d_model must be a power of two"
    # TODO(synk): non-power-of-two d_model needs a general channel permutation.
    assert pad == P - 1, "causal same-length config expected (2*padding == patch_size-1)"
    assert L >= P
    Dh = D // 2
    lead = max(8, ((pad + 7) // 8) * 8)        # 8-aligned causal pad rows

    # De-interleave the grouped-conv weights host-side (tiny arrays): output
    # channel o reads input channel o // 2, so even/odd output channels of the
    # "out" and "gate" halves each see a contiguous half of x.
    w_rows, b_rows = [], []
    for (wt, bs) in params:
        for half_w, half_b in ((wt[:D, 0, :], bs[:D]), (wt[D:, 0, :], bs[D:])):
            for par in (0, 1):
                w_rows.append(half_w[par::2, :].T)       # (P, Dh)
                b_rows.append(half_b[par::2])            # (Dh,)
    w2d = jnp.concatenate(w_rows, axis=0).astype(jnp.float32)   # (NL*4*P, Dh)
    b2d = jnp.stack(b_rows, axis=0).astype(jnp.float32)         # (NL*4,  Dh)

    kernel = functools.partial(_fused_glu_kernel, num_layers=NL, patch_size=P,
                               pad=pad, lead=lead)

    n = B * L * D
    cost = pl.CostEstimate(
        flops=NL * n * (4 * P + 6 + max(Dh.bit_length() - 1, 1)),
        transcendentals=NL * n,                      # one tanh per element per layer
        bytes_accessed=2 * n * x.dtype.itemsize + (w2d.size + b2d.size) * 4)

    return pl.pallas_call(
        kernel,
        out_shape=jax.ShapeDtypeStruct((B, L, D), x.dtype),
        grid=(B,),
        in_specs=[
            pl.BlockSpec((1, L, D), lambda i: (i, 0, 0)),
            pl.BlockSpec(w2d.shape, lambda i: (0, 0)),
            pl.BlockSpec(b2d.shape, lambda i: (0, 0)),
        ],
        out_specs=pl.BlockSpec((1, L, D), lambda i: (i, 0, 0)),
        scratch_shapes=[pltpu.VMEM((lead + L, D), jnp.float32)],
        compiler_params=pltpu.CompilerParams(
            dimension_semantics=("parallel",),
            vmem_limit_bytes=_default_vmem_limit_bytes()),
        cost_estimate=cost,
    )(x, w2d, b2d)
    # TODO(synk): tile the sequence axis (with a (P-1)*num_layers halo) for very
    # long L and for megacore occupancy when B == 1.


def gated_convolution(x, weight, bias, patch_size=3, padding=1):
    """Single gated-conv layer (thin wrapper over the fused kernel)."""
    return glu_forward(x, [(weight, bias)], patch_size, padding)


def init_glu_params(key, d_model, num_layers, patch_size=3):
    """Deterministic per-layer Conv1d weights: (2*d_model, 1, P) and bias (2*d_model,)."""
    params = []
    fan_in = 1 * patch_size  # in_channels/groups * kernel_size
    bound = 1.0 / (fan_in ** 0.5)
    for _ in range(num_layers):
        key, k1, k2 = jax.random.split(key, 3)
        w = jax.random.uniform(k1, (2 * d_model, 1, patch_size), jnp.float32, -bound, bound)
        b = jax.random.uniform(k2, (2 * d_model,), jnp.float32, -bound, bound)
        params.append((w, b))
    return params


def glu_reference(x, params, patch_size=3, padding=1):
    """Pure-JAX reference mirroring the PyTorch module (grouped conv via lax.conv)."""
    pad = padding * 2
    for (w, b) in params:
        d_model = x.shape[-1]
        xt = jnp.transpose(x, (0, 2, 1))                       # (B, D, L)  == NCL
        xt = jnp.pad(xt, ((0, 0), (0, 0), (pad, 0)))
        conv = lax.conv_general_dilated(
            xt, w, window_strides=(1,), padding=[(0, 0)],
            dimension_numbers=('NCH', 'OIH', 'NCH'),
            feature_group_count=d_model,
            precision=lax.Precision.HIGHEST)
        conv = conv + b[None, :, None]
        conv = jnp.transpose(conv, (0, 2, 1))                  # (B, L, 2D)
        out, gate = jnp.split(conv, 2, axis=-1)
        x = out * jax.nn.sigmoid(gate)
    return x


if __name__ == "__main__":
    key = jax.random.PRNGKey(0)
    k_x, k_p = jax.random.split(key)

    # Small but TPU-layout-friendly shapes (D/2 = 128 lanes per half).
    B, L, D = 2, 64, 256
    num_layers = 2
    patch_size, padding = 3, 1

    x = jax.random.normal(k_x, (B, L, D), dtype=jnp.float32)
    params = init_glu_params(k_p, D, num_layers, patch_size)

    fwd = jax.jit(glu_forward, static_argnums=(2, 3))
    y = jax.block_until_ready(fwd(x, params, patch_size, padding))

    y_ref = jax.block_until_ready(glu_reference(x, params, patch_size, padding))
    assert y.shape == (B, L, D), y.shape
    assert jnp.allclose(y, y_ref, atol=3e-5, rtol=3e-5), "mismatch vs reference"

    print("KERNEL_OK")
</pallas_src>

<mosaic_0001>
module attributes {stable_mosaic.version = 11 : i64} {
  func.func @_fused_glu_kernel(%arg0: i32, %arg1: memref<1x64x256xf32, #tpu.memory_space<vmem>>, %arg2: memref<24x128xf32, #tpu.memory_space<vmem>>, %arg3: memref<8x128xf32, #tpu.memory_space<vmem>>, %arg4: memref<1x64x256xf32, #tpu.memory_space<vmem>>, %arg5: memref<72x256xf32, #tpu.memory_space<vmem>>) attributes {dimension_semantics = [#tpu.dimension_semantics<parallel>], iteration_bounds = array<i64: 2>, scalar_prefetch = 0 : i64, scratch_operands = 1 : i64, tpu.core_type = #tpu.core_type<tc>, window_params = [{transform_indices = @transform_0, window_bounds = array<i64: 1, 64, 256>}, {pipeline_mode = #tpu.pipeline_mode<synchronous>, transform_indices = @transform_1, window_bounds = array<i64: 24, 128>}, {pipeline_mode = #tpu.pipeline_mode<synchronous>, transform_indices = @transform_2, window_bounds = array<i64: 8, 128>}, {transform_indices = @transform_3, window_bounds = array<i64: 1, 64, 256>}]} {
    %c0 = arith.constant 0 : index
    %c0_0 = arith.constant 0 : index
    %0 = vector.load %arg2[%c0, %c0_0] : memref<24x128xf32, #tpu.memory_space<vmem>>, vector<24x128xf32>
    %c0_1 = arith.constant 0 : index
    %c0_2 = arith.constant 0 : index
    %1 = vector.load %arg3[%c0_1, %c0_2] : memref<8x128xf32, #tpu.memory_space<vmem>>, vector<8x128xf32>
    %2 = tpu.iota {dimensions = array<i32: 1>} : vector<1x256xi32>
    %cst = arith.constant 0.000000e+00 : f32
    %3 = vector.broadcast %cst : f32 to vector<8x256xf32>
    %c0_3 = arith.constant 0 : index
    %c0_4 = arith.constant 0 : index
    %4 = vector.load %arg5[%c0_3, %c0_4] : memref<72x256xf32, #tpu.memory_space<vmem>>, vector<8x256xf32>
    tpu.vector_store %arg5[%c0_3, %c0_4], %3 {strides = array<i32>} : memref<72x256xf32, #tpu.memory_space<vmem>>, vector<8x256xf32>,
    %c0_5 = arith.constant 0 : index
    %c0_6 = arith.constant 0 : index
    %c0_7 = arith.constant 0 : index
    %5 = vector.load %arg1[%c0_5, %c0_6, %c0_7] : memref<1x64x256xf32, #tpu.memory_space<vmem>>, vector<1x64x256xf32>
    %6 = vector.shape_cast %5 : vector<1x64x256xf32> to vector<64x256xf32>
    %c8 = arith.constant 8 : index
    %c0_8 = arith.constant 0 : index
    %7 = vector.load %arg5[%c8, %c0_8] : memref<72x256xf32, #tpu.memory_space<vmem>>, vector<64x256xf32>
    tpu.vector_store %arg5[%c8, %c0_8], %6 {strides = array<i32>} : memref<72x256xf32, #tpu.memory_space<vmem>>, vector<64x256xf32>,
    %cst_9 = arith.constant 0.000000e+00 : f32
    %8 = vector.broadcast %cst_9 : f32 to vector<64x128xf32>
    %cst_10 = arith.constant 0.000000e+00 : f32
    %9 = vector.broadcast %cst_10 : f32 to vector<64x128xf32>
    %c6 = arith.constant 6 : index
    %c0_11 = arith.constant 0 : index
    %10 = vector.load %arg5[%c6, %c0_11] : memref<72x256xf32, #tpu.memory_space<vmem>>, vector<64x128xf32>
    %11 = vector.extract_strided_slice %0 {offsets = [0, 0], sizes = [1, 128], strides = [1, 1]} : vector<24x128xf32> to vector<1x128xf32>
    %12 = vector.broadcast %11 : vector<1x128xf32> to vector<64x128xf32>
    %13 = arith.mulf %12, %10 : vector<64x128xf32>
    %14 = arith.addf %8, %13 : vector<64x128xf32>
    %15 = vector.extract_strided_slice %0 {offsets = [3, 0], sizes = [1, 128], strides = [1, 1]} : vector<24x128xf32> to vector<1x128xf32>
    %16 = vector.broadcast %15 : vector<1x128xf32> to vector<64x128xf32>
    %17 = arith.mulf %16, %10 : vector<64x128xf32>
    %18 = arith.addf %9, %17 : vector<64x128xf32>
    %c7 = arith.constant 7 : index
    %c0_12 = arith.constant 0 : index
    %19 = vector.load %arg5[%c7, %c0_12] : memref<72x256xf32, #tpu.memory_space<vmem>>, vector<64x128xf32>
    %20 = vector.extract_strided_slice %0 {offsets = [1, 0], sizes = [1, 128], strides = [1, 1]} : vector<24x128xf32> to vector<1x128xf32>
    %21 = vector.broadcast %20 : vector<1x128xf32> to vector<64x128xf32>
    %22 = arith.mulf %21, %19 : vector<64x128xf32>
    %23 = arith.addf %14, %22 : vector<64x128xf32>
    %24 = vector.extract_strided_slice %0 {offsets = [4, 0], sizes = [1, 128], strides = [1, 1]} : vector<24x128xf32> to vector<1x128xf32>
    %25 = vector.broadcast %24 : vector<1x128xf32> to vector<64x128xf32>
    %26 = arith.mulf %25, %19 : vector<64x128xf32>
    %27 = arith.addf %18, %26 : vector<64x128xf32>
    %c8_13 = arith.constant 8 : index
    %c0_14 = arith.constant 0 : index
    %28 = vector.load %arg5[%c8_13, %c0_14] : memref<72x256xf32, #tpu.memory_space<vmem>>, vector<64x128xf32>
    %29 = vector.extract_strided_slice %0 {offsets = [2, 0], sizes = [1, 128], strides = [1, 1]} : vector<24x128xf32> to vector<1x128xf32>
    %30 = vector.broadcast %29 : vector<1x128xf32> to vector<64x128xf32>
    %31 = arith.mulf %30, %28 : vector<64x128xf32>
    %32 = arith.addf %23, %31 : vector<64x128xf32>
    %33 = vector.extract_strided_slice %0 {offsets = [5, 0], sizes = [1, 128], strides = [1, 1]} : vector<24x128xf32> to vector<1x128xf32>
    %34 = vector.broadcast %33 : vector<1x128xf32> to vector<64x128xf32>
    %35 = arith.mulf %34, %28 : vector<64x128xf32>
    %36 = arith.addf %27, %35 : vector<64x128xf32>
    %37 = vector.extract_strided_slice %1 {offsets = [0, 0], sizes = [1, 128], strides = [1, 1]} : vector<8x128xf32> to vector<1x128xf32>
    %38 = vector.broadcast %37 : vector<1x128xf32> to vector<64x128xf32>
    %39 = arith.addf %32, %38 : vector<64x128xf32>
    %40 = vector.extract_strided_slice %1 {offsets = [1, 0], sizes = [1, 128], strides = [1, 1]} : vector<8x128xf32> to vector<1x128xf32>
    %41 = vector.broadcast %40 : vector<1x128xf32> to vector<64x128xf32>
    %42 = arith.addf %36, %41 : vector<64x128xf32>
    %cst_15 = arith.constant 0.000000e+00 : f32
    %43 = vector.broadcast %cst_15 : f32 to vector<64x128xf32>
    %cst_16 = arith.constant 0.000000e+00 : f32
    %44 = vector.broadcast %cst_16 : f32 to vector<64x128xf32>
    %c6_17 = arith.constant 6 : index
    %c128 = arith.constant 128 : index
    %45 = vector.load %arg5[%c6_17, %c128] : memref<72x256xf32, #tpu.memory_space<vmem>>, vector<64x128xf32>
    %46 = vector.extract_strided_slice %0 {offsets = [6, 0], sizes = [1, 128], strides = [1, 1]} : vector<24x128xf32> to vector<1x128xf32>
    %47 = vector.broadcast %46 : vector<1x128xf32> to vector<64x128xf32>
    %48 = arith.mulf %47, %45 : vector<64x128xf32>
    %49 = arith.addf %43, %48 : vector<64x128xf32>
    %50 = vector.extract_strided_slice %0 {offsets = [9, 0], sizes = [1, 128], strides = [1, 1]} : vector<24x128xf32> to vector<1x128xf32>
    %51 = vector.broadcast %50 : vector<1x128xf32> to vector<64x128xf32>
    %52 = arith.mulf %51, %45 : vector<64x128xf32>
    %53 = arith.addf %44, %52 : vector<64x128xf32>
    %c7_18 = arith.constant 7 : index
    %c128_19 = arith.constant 128 : index
    %54 = vector.load %arg5[%c7_18, %c128_19] : memref<72x256xf32, #tpu.memory_space<vmem>>, vector<64x128xf32>
    %55 = vector.extract_strided_slice %0 {offsets = [7, 0], sizes = [1, 128], strides = [1, 1]} : vector<24x128xf32> to vector<1x128xf32>
    %56 = vector.broadcast %55 : vector<1x128xf32> to vector<64x128xf32>
    %57 = arith.mulf %56, %54 : vector<64x128xf32>
    %58 = arith.addf %49, %57 : vector<64x128xf32>
    %59 = vector.extract_strided_slice %0 {offsets = [10, 0], sizes = [1, 128], strides = [1, 1]} : vector<24x128xf32> to vector<1x128xf32>
    %60 = vector.broadcast %59 : vector<1x128xf32> to vector<64x128xf32>
    %61 = arith.mulf %60, %54 : vector<64x128xf32>
    %62 = arith.addf %53, %61 : vector<64x128xf32>
    %c8_20 = arith.constant 8 : index
    %c128_21 = arith.constant 128 : index
    %63 = vector.load %arg5[%c8_20, %c128_21] : memref<72x256xf32, #tpu.memory_space<vmem>>, vector<64x128xf32>
    %64 = vector.extract_strided_slice %0 {offsets = [8, 0], sizes = [1, 128], strides = [1, 1]} : vector<24x128xf32> to vector<1x128xf32>
    %65 = vector.broadcast %64 : vector<1x128xf32> to vector<64x128xf32>
    %66 = arith.mulf %65, %63 : vector<64x128xf32>
    %67 = arith.addf %58, %66 : vector<64x128xf32>
    %68 = vector.extract_strided_slice %0 {offsets = [11, 0], sizes = [1, 128], strides = [1, 1]} : vector<24x128xf32> to vector<1x128xf32>
    %69 = vector.broadcast %68 : vector<1x128xf32> to vector<64x128xf32>
    %70 = arith.mulf %69, %63 : vector<64x128xf32>
    %71 = arith.addf %62, %70 : vector<64x128xf32>
    %72 = vector.extract_strided_slice %1 {offsets = [2, 0], sizes = [1, 128], strides = [1, 1]} : vector<8x128xf32> to vector<1x128xf32>
    %73 = vector.broadcast %72 : vector<1x128xf32> to vector<64x128xf32>
    %74 = arith.addf %67, %73 : vector<64x128xf32>
    %75 = vector.extract_strided_slice %1 {offsets = [3, 0], sizes = [1, 128], strides = [1, 1]} : vector<8x128xf32> to vector<1x128xf32>
    %76 = vector.broadcast %75 : vector<1x128xf32> to vector<64x128xf32>
    %77 = arith.addf %71, %76 : vector<64x128xf32>
    %cst_22 = arith.constant 5.000000e-01 : f32
    %78 = vector.broadcast %cst_22 : f32 to vector<64x128xf32>
    %79 = arith.mulf %78, %74 : vector<64x128xf32>
    %80 = math.tanh %79 : vector<64x128xf32>
    %cst_23 = arith.constant 1.000000e+00 : f32
    %81 = vector.broadcast %cst_23 : f32 to vector<64x128xf32>
    %82 = arith.addf %80, %81 : vector<64x128xf32>
    %cst_24 = arith.constant 5.000000e-01 : f32
    %83 = vector.broadcast %cst_24 : f32 to vector<64x128xf32>
    %84 = arith.mulf %83, %82 : vector<64x128xf32>
    %85 = arith.mulf %39, %84 : vector<64x128xf32>
    %cst_25 = arith.constant 5.000000e-01 : f32
    %86 = vector.broadcast %cst_25 : f32 to vector<64x128xf32>
    %87 = arith.mulf %86, %77 : vector<64x128xf32>
    %88 = math.tanh %87 : vector<64x128xf32>
    %cst_26 = arith.constant 1.000000e+00 : f32
    %89 = vector.broadcast %cst_26 : f32 to vector<64x128xf32>
    %90 = arith.addf %88, %89 : vector<64x128xf32>
    %cst_27 = arith.constant 5.000000e-01 : f32
    %91 = vector.broadcast %cst_27 : f32 to vector<64x128xf32>
    %92 = arith.mulf %91, %90 : vector<64x128xf32>
    %93 = arith.mulf %42, %92 : vector<64x128xf32>
    %94 = tpu.concatenate %85, %93 in 1 : vector<64x128xf32>, vector<64x128xf32> -> vector<64x256xf32>
    %c255_i32 = arith.constant 255 : i32
    %95 = vector.broadcast %c255_i32 : i32 to vector<1x256xi32>
    %96 = arith.andi %2, %95 : vector<1x256xi32>
    %c128_i32 = arith.constant 128 : i32
    %97 = vector.broadcast %c128_i32 : i32 to vector<1x256xi32>
    %98 = arith.cmpi sge, %96, %97 : vector<1x256xi32>
    %c192_i32 = arith.constant 192 : i32
    %99 = vector.broadcast %c192_i32 : i32 to vector<1x256xi32>
    %100 = arith.cmpi slt, %96, %99 : vector<1x256xi32>
    %101 = arith.andi %98, %100 : vector<1x256xi1>
    %c64_i32 = arith.constant 64 : i32
    %102 = vector.broadcast %c64_i32 : i32 to vector<1x256xi32>
    %103 = arith.cmpi sge, %96, %102 : vector<1x256xi32>
    %c128_i32_28 = arith.constant 128 : i32
    %104 = vector.broadcast %c128_i32_28 : i32 to vector<1x256xi32>
    %105 = arith.cmpi slt, %96, %104 : vector<1x256xi32>
    %106 = arith.andi %103, %105 : vector<1x256xi1>
    %107 = vector.extract_strided_slice %94 {offsets = [0, 192], sizes = [64, 64], strides = [1, 1]} : vector<64x256xf32> to vector<64x64xf32>
    %108 = vector.extract_strided_slice %94 {offsets = [0, 0], sizes = [64, 192], strides = [1, 1]} : vector<64x256xf32> to vector<64x192xf32>
    %109 = tpu.concatenate %107, %108 in 1 : vector<64x64xf32>, vector<64x192xf32> -> vector<64x256xf32>
    %110 = vector.extract_strided_slice %94 {offsets = [0, 64], sizes = [64, 192], strides = [1, 1]} : vector<64x256xf32> to vector<64x192xf32>
    %111 = vector.extract_strided_slice %94 {offsets = [0, 0], sizes = [64, 64], strides = [1, 1]} : vector<64x256xf32> to vector<64x64xf32>
    %112 = tpu.concatenate %110, %111 in 1 : vector<64x192xf32>, vector<64x64xf32> -> vector<64x256xf32>
    %113 = vector.shape_cast %106 : vector<1x256xi1> to vector<1x256xi1>
    %114 = vector.broadcast %113 : vector<1x256xi1> to vector<64x256xi1>
    %115 = arith.select %114, %112, %94 : vector<64x256xi1>, vector<64x256xf32>
    %116 = vector.shape_cast %101 : vector<1x256xi1> to vector<1x256xi1>
    %117 = vector.broadcast %116 : vector<1x256xi1> to vector<64x256xi1>
    %118 = arith.select %117, %109, %115 : vector<64x256xi1>, vector<64x256xf32>
    %c127_i32 = arith.constant 127 : i32
    %119 = vector.broadcast %c127_i32 : i32 to vector<1x256xi32>
    %120 = arith.andi %2, %119 : vector<1x256xi32>
    %c64_i32_29 = arith.constant 64 : i32
    %121 = vector.broadcast %c64_i32_29 : i32 to vector<1x256xi32>
    %122 = arith.cmpi sge, %120, %121 : vector<1x256xi32>
    %c96_i32 = arith.constant 96 : i32
    %123 = vector.broadcast %c96_i32 : i32 to vector<1x256xi32>
    %124 = arith.cmpi slt, %120, %123 : vector<1x256xi32>
    %125 = arith.andi %122, %124 : vector<1x256xi1>
    %c32_i32 = arith.constant 32 : i32
    %126 = vector.broadcast %c32_i32 : i32 to vector<1x256xi32>
    %127 = arith.cmpi sge, %120, %126 : vector<1x256xi32>
    %c64_i32_30 = arith.constant 64 : i32
    %128 = vector.broadcast %c64_i32_30 : i32 to vector<1x256xi32>
    %129 = arith.cmpi slt, %120, %128 : vector<1x256xi32>
    %130 = arith.andi %127, %129 : vector<1x256xi1>
    %131 = vector.extract_strided_slice %118 {offsets = [0, 224], sizes = [64, 32], strides = [1, 1]} : vector<64x256xf32> to vector<64x32xf32>
    %132 = vector.extract_strided_slice %118 {offsets = [0, 0], sizes = [64, 224], strides = [1, 1]} : vector<64x256xf32> to vector<64x224xf32>
    %133 = tpu.concatenate %131, %132 in 1 : vector<64x32xf32>, vector<64x224xf32> -> vector<64x256xf32>
    %134 = vector.extract_strided_slice %118 {offsets = [0, 32], sizes = [64, 224], strides = [1, 1]} : vector<64x256xf32> to vector<64x224xf32>
    %135 = vector.extract_strided_slice %118 {offsets = [0, 0], sizes = [64, 32], strides = [1, 1]} : vector<64x256xf32> to vector<64x32xf32>
    %136 = tpu.concatenate %134, %135 in 1 : vector<64x224xf32>, vector<64x32xf32> -> vector<64x256xf32>
    %137 = vector.shape_cast %130 : vector<1x256xi1> to vector<1x256xi1>
    %138 = vector.broadcast %137 : vector<1x256xi1> to vector<64x256xi1>
    %139 = arith.select %138, %136, %118 : vector<64x256xi1>, vector<64x256xf32>
    %140 = vector.shape_cast %125 : vector<1x256xi1> to vector<1x256xi1>
    %141 = vector.broadcast %140 : vector<1x256xi1> to vector<64x256xi1>
    %142 = arith.select %141, %133, %139 : vector<64x256xi1>, vector<64x256xf32>
    %c63_i32 = arith.constant 63 : i32
    %143 = vector.broadcast %c63_i32 : i32 to vector<1x256xi32>
    %144 = arith.andi %2, %143 : vector<1x256xi32>
    %c32_i32_31 = arith.constant 32 : i32
    %145 = vector.broadcast %c32_i32_31 : i32 to vector<1x256xi32>
    %146 = arith.cmpi sge, %144, %145 : vector<1x256xi32>
    %c48_i32 = arith.constant 48 : i32
    %147 = vector.broadcast %c48_i32 : i32 to vector<1x256xi32>
    %148 = arith.cmpi slt, %144, %147 : vector<1x256xi32>
    %149 = arith.andi %146, %148 : vector<1x256xi1>
    %c16_i32 = arith.constant 16 : i32
    %150 = vector.broadcast %c16_i32 : i32 to vector<1x256xi32>
    %151 = arith.cmpi sge, %144, %150 : vector<1x256xi32>
    %c32_i32_32 = arith.constant 32 : i32
    %152 = vector.broadcast %c32_i32_32 : i32 to vector<1x256xi32>
    %153 = arith.cmpi slt, %144, %152 : vector<1x256xi32>
    %154 = arith.andi %151, %153 : vector<1x256xi1>
    %155 = vector.extract_strided_slice %142 {offsets = [0, 240], sizes = [64, 16], strides = [1, 1]} : vector<64x256xf32> to vector<64x16xf32>
    %156 = vector.extract_strided_slice %142 {offsets = [0, 0], sizes = [64, 240], strides = [1, 1]} : vector<64x256xf32> to vector<64x240xf32>
    %157 = tpu.concatenate %155, %156 in 1 : vector<64x16xf32>, vector<64x240xf32> -> vector<64x256xf32>
    %158 = vector.extract_strided_slice %142 {offsets = [0, 16], sizes = [64, 240], strides = [1, 1]} : vector<64x256xf32> to vector<64x240xf32>
    %159 = vector.extract_strided_slice %142 {offsets = [0, 0], sizes = [64, 16], strides = [1, 1]} : vector<64x256xf32> to vector<64x16xf32>
    %160 = tpu.concatenate %158, %159 in 1 : vector<64x240xf32>, vector<64x16xf32> -> vector<64x256xf32>
    %161 = vector.shape_cast %154 : vector<1x256xi1> to vector<1x256xi1>
    %162 = vector.broadcast %161 : vector<1x256xi1> to vector<64x256xi1>
    %163 = arith.select %162, %160, %142 : vector<64x256xi1>, vector<64x256xf32>
    %164 = vector.shape_cast %149 : vector<1x256xi1> to vector<1x256xi1>
    %165 = vector.broadcast %164 : vector<1x256xi1> to vector<64x256xi1>
    %166 = arith.select %165, %157, %163 : vector<64x256xi1>, vector<64x256xf32>
    %c31_i32 = arith.constant 31 : i32
    %167 = vector.broadcast %c31_i32 : i32 to vector<1x256xi32>
    %168 = arith.andi %2, %167 : vector<1x256xi32>
    %c16_i32_33 = arith.constant 16 : i32
    %169 = vector.broadcast %c16_i32_33 : i32 to vector<1x256xi32>
    %170 = arith.cmpi sge, %168, %169 : vector<1x256xi32>
    %c24_i32 = arith.constant 24 : i32
    %171 = vector.broadcast %c24_i32 : i32 to vector<1x256xi32>
    %172 = arith.cmpi slt, %168, %171 : vector<1x256xi32>
    %173 = arith.andi %170, %172 : vector<1x256xi1>
    %c8_i32 = arith.constant 8 : i32
    %174 = vector.broadcast %c8_i32 : i32 to vector<1x256xi32>
    %175 = arith.cmpi sge, %168, %174 : vector<1x256xi32>
    %c16_i32_34 = arith.constant 16 : i32
    %176 = vector.broadcast %c16_i32_34 : i32 to vector<1x256xi32>
    %177 = arith.cmpi slt, %168, %176 : vector<1x256xi32>
    %178 = arith.andi %175, %177 : vector<1x256xi1>
    %179 = vector.extract_strided_slice %166 {offsets = [0, 248], sizes = [64, 8], strides = [1, 1]} : vector<64x256xf32> to vector<64x8xf32>
    %180 = vector.extract_strided_slice %166 {offsets = [0, 0], sizes = [64, 248], strides = [1, 1]} : vector<64x256xf32> to vector<64x248xf32>
    %181 = tpu.concatenate %179, %180 in 1 : vector<64x8xf32>, vector<64x248xf32> -> vector<64x256xf32>
    %182 = vector.extract_strided_slice %166 {offsets = [0, 8], sizes = [64, 248], strides = [1, 1]} : vector<64x256xf32> to vector<64x248xf32>
    %183 = vector.extract_strided_slice %166 {offsets = [0, 0], sizes = [64, 8], strides = [1, 1]} : vector<64x256xf32> to vector<64x8xf32>
    %184 = tpu.concatenate %182, %183 in 1 : vector<64x248xf32>, vector<64x8xf32> -> vector<64x256xf32>
    %185 = vector.shape_cast %178 : vector<1x256xi1> to vector<1x256xi1>
    %186 = vector.broadcast %185 : vector<1x256xi1> to vector<64x256xi1>
    %187 = arith.select %186, %184, %166 : vector<64x256xi1>, vector<64x256xf32>
    %188 = vector.shape_cast %173 : vector<1x256xi1> to vector<1x256xi1>
    %189 = vector.broadcast %188 : vector<1x256xi1> to vector<64x256xi1>
    %190 = arith.select %189, %181, %187 : vector<64x256xi1>, vector<64x256xf32>
    %c15_i32 = arith.constant 15 : i32
    %191 = vector.broadcast %c15_i32 : i32 to vector<1x256xi32>
    %192 = arith.andi %2, %191 : vector<1x256xi32>
    %c8_i32_35 = arith.constant 8 : i32
    %193 = vector.broadcast %c8_i32_35 : i32 to vector<1x256xi32>
    %194 = arith.cmpi sge, %192, %193 : vector<1x256xi32>
    %c12_i32 = arith.constant 12 : i32
    %195 = vector.broadcast %c12_i32 : i32 to vector<1x256xi32>
    %196 = arith.cmpi slt, %192, %195 : vector<1x256xi32>
    %197 = arith.andi %194, %196 : vector<1x256xi1>
    %c4_i32 = arith.constant 4 : i32
    %198 = vector.broadcast %c4_i32 : i32 to vector<1x256xi32>
    %199 = arith.cmpi sge, %192, %198 : vector<1x256xi32>
    %c8_i32_36 = arith.constant 8 : i32
    %200 = vector.broadcast %c8_i32_36 : i32 to vector<1x256xi32>
    %201 = arith.cmpi slt, %192, %200 : vector<1x256xi32>
    %202 = arith.andi %199, %201 : vector<1x256xi1>
    %203 = vector.extract_strided_slice %190 {offsets = [0, 252], sizes = [64, 4], strides = [1, 1]} : vector<64x256xf32> to vector<64x4xf32>
    %204 = vector.extract_strided_slice %190 {offsets = [0, 0], sizes = [64, 252], strides = [1, 1]} : vector<64x256xf32> to vector<64x252xf32>
    %205 = tpu.concatenate %203, %204 in 1 : vector<64x4xf32>, vector<64x252xf32> -> vector<64x256xf32>
    %206 = vector.extract_strided_slice %190 {offsets = [0, 4], sizes = [64, 252], strides = [1, 1]} : vector<64x256xf32> to vector<64x252xf32>
    %207 = vector.extract_strided_slice %190 {offsets = [0, 0], sizes = [64, 4], strides = [1, 1]} : vector<64x256xf32> to vector<64x4xf32>
    %208 = tpu.concatenate %206, %207 in 1 : vector<64x252xf32>, vector<64x4xf32> -> vector<64x256xf32>
    %209 = vector.shape_cast %202 : vector<1x256xi1> to vector<1x256xi1>
    %210 = vector.broadcast %209 : vector<1x256xi1> to vector<64x256xi1>
    %211 = arith.select %210, %208, %190 : vector<64x256xi1>, vector<64x256xf32>
    %212 = vector.shape_cast %197 : vector<1x256xi1> to vector<1x256xi1>
    %213 = vector.broadcast %212 : vector<1x256xi1> to vector<64x256xi1>
    %214 = arith.select %213, %205, %211 : vector<64x256xi1>, vector<64x256xf32>
    %c7_i32 = arith.constant 7 : i32
    %215 = vector.broadcast %c7_i32 : i32 to vector<1x256xi32>
    %216 = arith.andi %2, %215 : vector<1x256xi32>
    %c4_i32_37 = arith.constant 4 : i32
    %217 = vector.broadcast %c4_i32_37 : i32 to vector<1x256xi32>
    %218 = arith.cmpi sge, %216, %217 : vector<1x256xi32>
    %c6_i32 = arith.constant 6 : i32
    %219 = vector.broadcast %c6_i32 : i32 to vector<1x256xi32>
    %220 = arith.cmpi slt, %216, %219 : vector<1x256xi32>
    %221 = arith.andi %218, %220 : vector<1x256xi1>
    %c2_i32 = arith.constant 2 : i32
    %222 = vector.broadcast %c2_i32 : i32 to vector<1x256xi32>
    %223 = arith.cmpi sge, %216, %222 : vector<1x256xi32>
    %c4_i32_38 = arith.constant 4 : i32
    %224 = vector.broadcast %c4_i32_38 : i32 to vector<1x256xi32>
    %225 = arith.cmpi slt, %216, %224 : vector<1x256xi32>
    %226 = arith.andi %223, %225 : vector<1x256xi1>
    %227 = vector.extract_strided_slice %214 {offsets = [0, 254], sizes = [64, 2], strides = [1, 1]} : vector<64x256xf32> to vector<64x2xf32>
    %228 = vector.extract_strided_slice %214 {offsets = [0, 0], sizes = [64, 254], strides = [1, 1]} : vector<64x256xf32> to vector<64x254xf32>
    %229 = tpu.concatenate %227, %228 in 1 : vector<64x2xf32>, vector<64x254xf32> -> vector<64x256xf32>
    %230 = vector.extract_strided_slice %214 {offsets = [0, 2], sizes = [64, 254], strides = [1, 1]} : vector<64x256xf32> to vector<64x254xf32>
    %231 = vector.extract_strided_slice %214 {offsets = [0, 0], sizes = [64, 2], strides = [1, 1]} : vector<64x256xf32> to vector<64x2xf32>
    %232 = tpu.concatenate %230, %231 in 1 : vector<64x254xf32>, vector<64x2xf32> -> vector<64x256xf32>
    %233 = vector.shape_cast %226 : vector<1x256xi1> to vector<1x256xi1>
    %234 = vector.broadcast %233 : vector<1x256xi1> to vector<64x256xi1>
    %235 = arith.select %234, %232, %214 : vector<64x256xi1>, vector<64x256xf32>
    %236 = vector.shape_cast %221 : vector<1x256xi1> to vector<1x256xi1>
    %237 = vector.broadcast %236 : vector<1x256xi1> to vector<64x256xi1>
    %238 = arith.select %237, %229, %235 : vector<64x256xi1>, vector<64x256xf32>
    %c3_i32 = arith.constant 3 : i32
    %239 = vector.broadcast %c3_i32 : i32 to vector<1x256xi32>
    %240 = arith.andi %2, %239 : vector<1x256xi32>
    %c2_i32_39 = arith.constant 2 : i32
    %241 = vector.broadcast %c2_i32_39 : i32 to vector<1x256xi32>
    %242 = arith.cmpi sge, %240, %241 : vector<1x256xi32>
    %c3_i32_40 = arith.constant 3 : i32
    %243 = vector.broadcast %c3_i32_40 : i32 to vector<1x256xi32>
    %244 = arith.cmpi slt, %240, %243 : vector<1x256xi32>
    %245 = arith.andi %242, %244 : vector<1x256xi1>
    %c1_i32 = arith.constant 1 : i32
    %246 = vector.broadcast %c1_i32 : i32 to vector<1x256xi32>
    %247 = arith.cmpi sge, %240, %246 : vector<1x256xi32>
    %c2_i32_41 = arith.constant 2 : i32
    %248 = vector.broadcast %c2_i32_41 : i32 to vector<1x256xi32>
    %249 = arith.cmpi slt, %240, %248 : vector<1x256xi32>
    %250 = arith.andi %247, %249 : vector<1x256xi1>
    %251 = vector.extract_strided_slice %238 {offsets = [0, 255], sizes = [64, 1], strides = [1, 1]} : vector<64x256xf32> to vector<64x1xf32>
    %252 = vector.extract_strided_slice %238 {offsets = [0, 0], sizes = [64, 255], strides = [1, 1]} : vector<64x256xf32> to vector<64x255xf32>
    %253 = tpu.concatenate %251, %252 in 1 : vector<64x1xf32>, vector<64x255xf32> -> vector<64x256xf32>
    %254 = vector.extract_strided_slice %238 {offsets = [0, 1], sizes = [64, 255], strides = [1, 1]} : vector<64x256xf32> to vector<64x255xf32>
    %255 = vector.extract_strided_slice %238 {offsets = [0, 0], sizes = [64, 1], strides = [1, 1]} : vector<64x256xf32> to vector<64x1xf32>
    %256 = tpu.concatenate %254, %255 in 1 : vector<64x255xf32>, vector<64x1xf32> -> vector<64x256xf32>
    %257 = vector.shape_cast %250 : vector<1x256xi1> to vector<1x256xi1>
    %258 = vector.broadcast %257 : vector<1x256xi1> to vector<64x256xi1>
    %259 = arith.select %258, %256, %238 : vector<64x256xi1>, vector<64x256xf32>
    %260 = vector.shape_cast %245 : vector<1x256xi1> to vector<1x256xi1>
    %261 = vector.broadcast %260 : vector<1x256xi1> to vector<64x256xi1>
    %262 = arith.select %261, %253, %259 : vector<64x256xi1>, vector<64x256xf32>
    %c8_42 = arith.constant 8 : index
    %c0_43 = arith.constant 0 : index
    %263 = vector.load %arg5[%c8_42, %c0_43] : memref<72x256xf32, #tpu.memory_space<vmem>>, vector<64x256xf32>
    tpu.vector_store %arg5[%c8_42, %c0_43], %262 {strides = array<i32>} : memref<72x256xf32, #tpu.memory_space<vmem>>, vector<64x256xf32>,
    %cst_44 = arith.constant 0.000000e+00 : f32
    %264 = vector.broadcast %cst_44 : f32 to vector<64x128xf32>
    %cst_45 = arith.constant 0.000000e+00 : f32
    %265 = vector.broadcast %cst_45 : f32 to vector<64x128xf32>
    %c6_46 = arith.constant 6 : index
    %c0_47 = arith.constant 0 : index
    %266 = vector.load %arg5[%c6_46, %c0_47] : memref<72x256xf32, #tpu.memory_space<vmem>>, vector<64x128xf32>
    %267 = vector.extract_strided_slice %0 {offsets = [12, 0], sizes = [1, 128], strides = [1, 1]} : vector<24x128xf32> to vector<1x128xf32>
    %268 = vector.broadcast %267 : vector<1x128xf32> to vector<64x128xf32>
    %269 = arith.mulf %268, %266 : vector<64x128xf32>
    %270 = arith.addf %264, %269 : vector<64x128xf32>
    %271 = vector.extract_strided_slice %0 {offsets = [15, 0], sizes = [1, 128], strides = [1, 1]} : vector<24x128xf32> to vector<1x128xf32>
    %272 = vector.broadcast %271 : vector<1x128xf32> to vector<64x128xf32>
    %273 = arith.mulf %272, %266 : vector<64x128xf32>
    %274 = arith.addf %265, %273 : vector<64x128xf32>
    %c7_48 = arith.constant 7 : index
    %c0_49 = arith.constant 0 : index
    %275 = vector.load %arg5[%c7_48, %c0_49] : memref<72x256xf32, #tpu.memory_space<vmem>>, vector<64x128xf32>
    %276 = vector.extract_strided_slice %0 {offsets = [13, 0], sizes = [1, 128], strides = [1, 1]} : vector<24x128xf32> to vector<1x128xf32>
    %277 = vector.broadcast %276 : vector<1x128xf32> to vector<64x128xf32>
    %278 = arith.mulf %277, %275 : vector<64x128xf32>
    %279 = arith.addf %270, %278 : vector<64x128xf32>
    %280 = vector.extract_strided_slice %0 {offsets = [16, 0], sizes = [1, 128], strides = [1, 1]} : vector<24x128xf32> to vector<1x128xf32>
    %281 = vector.broadcast %280 : vector<1x128xf32> to vector<64x128xf32>
    %282 = arith.mulf %281, %275 : vector<64x128xf32>
    %283 = arith.addf %274, %282 : vector<64x128xf32>
    %c8_50 = arith.constant 8 : index
    %c0_51 = arith.constant 0 : index
    %284 = vector.load %arg5[%c8_50, %c0_51] : memref<72x256xf32, #tpu.memory_space<vmem>>, vector<64x128xf32>
    %285 = vector.extract_strided_slice %0 {offsets = [14, 0], sizes = [1, 128], strides = [1, 1]} : vector<24x128xf32> to vector<1x128xf32>
    %286 = vector.broadcast %285 : vector<1x128xf32> to vector<64x128xf32>
    %287 = arith.mulf %286, %284 : vector<64x128xf32>
    %288 = arith.addf %279, %287 : vector<64x128xf32>
    %289 = vector.extract_strided_slice %0 {offsets = [17, 0], sizes = [1, 128], strides = [1, 1]} : vector<24x128xf32> to vector<1x128xf32>
    %290 = vector.broadcast %289 : vector<1x128xf32> to vector<64x128xf32>
    %291 = arith.mulf %290, %284 : vector<64x128xf32>
    %292 = arith.addf %283, %291 : vector<64x128xf32>
    %293 = vector.extract_strided_slice %1 {offsets = [4, 0], sizes = [1, 128], strides = [1, 1]} : vector<8x128xf32> to vector<1x128xf32>
    %294 = vector.broadcast %293 : vector<1x128xf32> to vector<64x128xf32>
    %295 = arith.addf %288, %294 : vector<64x128xf32>
    %296 = vector.extract_strided_slice %1 {offsets = [5, 0], sizes = [1, 128], strides = [1, 1]} : vector<8x128xf32> to vector<1x128xf32>
    %297 = vector.broadcast %296 : vector<1x128xf32> to vector<64x128xf32>
    %298 = arith.addf %292, %297 : vector<64x128xf32>
    %cst_52 = arith.constant 0.000000e+00 : f32
    %299 = vector.broadcast %cst_52 : f32 to vector<64x128xf32>
    %cst_53 = arith.constant 0.000000e+00 : f32
    %300 = vector.broadcast %cst_53 : f32 to vector<64x128xf32>
    %c6_54 = arith.constant 6 : index
    %c128_55 = arith.constant 128 : index
    %301 = vector.load %arg5[%c6_54, %c128_55] : memref<72x256xf32, #tpu.memory_space<vmem>>, vector<64x128xf32>
    %302 = vector.extract_strided_slice %0 {offsets = [18, 0], sizes = [1, 128], strides = [1, 1]} : vector<24x128xf32> to vector<1x128xf32>
    %303 = vector.broadcast %302 : vector<1x128xf32> to vector<64x128xf32>
    %304 = arith.mulf %303, %301 : vector<64x128xf32>
    %305 = arith.addf %299, %304 : vector<64x128xf32>
    %306 = vector.extract_strided_slice %0 {offsets = [21, 0], sizes = [1, 128], strides = [1, 1]} : vector<24x128xf32> to vector<1x128xf32>
    %307 = vector.broadcast %306 : vector<1x128xf32> to vector<64x128xf32>
    %308 = arith.mulf %307, %301 : vector<64x128xf32>
    %309 = arith.addf %300, %308 : vector<64x128xf32>
    %c7_56 = arith.constant 7 : index
    %c128_57 = arith.constant 128 : index
    %310 = vector.load %arg5[%c7_56, %c128_57] : memref<72x256xf32, #tpu.memory_space<vmem>>, vector<64x128xf32>
    %311 = vector.extract_strided_slice %0 {offsets = [19, 0], sizes = [1, 128], strides = [1, 1]} : vector<24x128xf32> to vector<1x128xf32>
    %312 = vector.broadcast %311 : vector<1x128xf32> to vector<64x128xf32>
    %313 = arith.mulf %312, %310 : vector<64x128xf32>
    %314 = arith.addf %305, %313 : vector<64x128xf32>
    %315 = vector.extract_strided_slice %0 {offsets = [22, 0], sizes = [1, 128], strides = [1, 1]} : vector<24x128xf32> to vector<1x128xf32>
    %316 = vector.broadcast %315 : vector<1x128xf32> to vector<64x128xf32>
    %317 = arith.mulf %316, %310 : vector<64x128xf32>
    %318 = arith.addf %309, %317 : vector<64x128xf32>
    %c8_58 = arith.constant 8 : index
    %c128_59 = arith.constant 128 : index
    %319 = vector.load %arg5[%c8_58, %c128_59] : memref<72x256xf32, #tpu.memory_space<vmem>>, vector<64x128xf32>
    %320 = vector.extract_strided_slice %0 {offsets = [20, 0], sizes = [1, 128], strides = [1, 1]} : vector<24x128xf32> to vector<1x128xf32>
    %321 = vector.broadcast %320 : vector<1x128xf32> to vector<64x128xf32>
    %322 = arith.mulf %321, %319 : vector<64x128xf32>
    %323 = arith.addf %314, %322 : vector<64x128xf32>
    %324 = vector.extract_strided_slice %0 {offsets = [23, 0], sizes = [1, 128], strides = [1, 1]} : vector<24x128xf32> to vector<1x128xf32>
    %325 = vector.broadcast %324 : vector<1x128xf32> to vector<64x128xf32>
    %326 = arith.mulf %325, %319 : vector<64x128xf32>
    %327 = arith.addf %318, %326 : vector<64x128xf32>
    %328 = vector.extract_strided_slice %1 {offsets = [6, 0], sizes = [1, 128], strides = [1, 1]} : vector<8x128xf32> to vector<1x128xf32>
    %329 = vector.broadcast %328 : vector<1x128xf32> to vector<64x128xf32>
    %330 = arith.addf %323, %329 : vector<64x128xf32>
    %331 = vector.extract_strided_slice %1 {offsets = [7, 0], sizes = [1, 128], strides = [1, 1]} : vector<8x128xf32> to vector<1x128xf32>
    %332 = vector.broadcast %331 : vector<1x128xf32> to vector<64x128xf32>
    %333 = arith.addf %327, %332 : vector<64x128xf32>
    %cst_60 = arith.constant 5.000000e-01 : f32
    %334 = vector.broadcast %cst_60 : f32 to vector<64x128xf32>
    %335 = arith.mulf %334, %330 : vector<64x128xf32>
    %336 = math.tanh %335 : vector<64x128xf32>
    %cst_61 = arith.constant 1.000000e+00 : f32
    %337 = vector.broadcast %cst_61 : f32 to vector<64x128xf32>
    %338 = arith.addf %336, %337 : vector<64x128xf32>
    %cst_62 = arith.constant 5.000000e-01 : f32
    %339 = vector.broadcast %cst_62 : f32 to vector<64x128xf32>
    %340 = arith.mulf %339, %338 : vector<64x128xf32>
    %341 = arith.mulf %295, %340 : vector<64x128xf32>
    %cst_63 = arith.constant 5.000000e-01 : f32
    %342 = vector.broadcast %cst_63 : f32 to vector<64x128xf32>
    %343 = arith.mulf %342, %333 : vector<64x128xf32>
    %344 = math.tanh %343 : vector<64x128xf32>
    %cst_64 = arith.constant 1.000000e+00 : f32
    %345 = vector.broadcast %cst_64 : f32 to vector<64x128xf32>
    %346 = arith.addf %344, %345 : vector<64x128xf32>
    %cst_65 = arith.constant 5.000000e-01 : f32
    %347 = vector.broadcast %cst_65 : f32 to vector<64x128xf32>
    %348 = arith.mulf %347, %346 : vector<64x128xf32>
    %349 = arith.mulf %298, %348 : vector<64x128xf32>
    %350 = tpu.concatenate %341, %349 in 1 : vector<64x128xf32>, vector<64x128xf32> -> vector<64x256xf32>
    %c255_i32_66 = arith.constant 255 : i32
    %351 = vector.broadcast %c255_i32_66 : i32 to vector<1x256xi32>
    %352 = arith.andi %2, %351 : vector<1x256xi32>
    %c128_i32_67 = arith.constant 128 : i32
    %353 = vector.broadcast %c128_i32_67 : i32 to vector<1x256xi32>
    %354 = arith.cmpi sge, %352, %353 : vector<1x256xi32>
    %c192_i32_68 = arith.constant 192 : i32
    %355 = vector.broadcast %c192_i32_68 : i32 to vector<1x256xi32>
    %356 = arith.cmpi slt, %352, %355 : vector<1x256xi32>
    %357 = arith.andi %354, %356 : vector<1x256xi1>
    %c64_i32_69 = arith.constant 64 : i32
    %358 = vector.broadcast %c64_i32_69 : i32 to vector<1x256xi32>
    %359 = arith.cmpi sge, %352, %358 : vector<1x256xi32>
    %c128_i32_70 = arith.constant 128 : i32
    %360 = vector.broadcast %c128_i32_70 : i32 to vector<1x256xi32>
    %361 = arith.cmpi slt, %352, %360 : vector<1x256xi32>
    %362 = arith.andi %359, %361 : vector<1x256xi1>
    %363 = vector.extract_strided_slice %350 {offsets = [0, 192], sizes = [64, 64], strides = [1, 1]} : vector<64x256xf32> to vector<64x64xf32>
    %364 = vector.extract_strided_slice %350 {offsets = [0, 0], sizes = [64, 192], strides = [1, 1]} : vector<64x256xf32> to vector<64x192xf32>
    %365 = tpu.concatenate %363, %364 in 1 : vector<64x64xf32>, vector<64x192xf32> -> vector<64x256xf32>
    %366 = vector.extract_strided_slice %350 {offsets = [0, 64], sizes = [64, 192], strides = [1, 1]} : vector<64x256xf32> to vector<64x192xf32>
    %367 = vector.extract_strided_slice %350 {offsets = [0, 0], sizes = [64, 64], strides = [1, 1]} : vector<64x256xf32> to vector<64x64xf32>
    %368 = tpu.concatenate %366, %367 in 1 : vector<64x192xf32>, vector<64x64xf32> -> vector<64x256xf32>
    %369 = vector.shape_cast %362 : vector<1x256xi1> to vector<1x256xi1>
    %370 = vector.broadcast %369 : vector<1x256xi1> to vector<64x256xi1>
    %371 = arith.select %370, %368, %350 : vector<64x256xi1>, vector<64x256xf32>
    %372 = vector.shape_cast %357 : vector<1x256xi1> to vector<1x256xi1>
    %373 = vector.broadcast %372 : vector<1x256xi1> to vector<64x256xi1>
    %374 = arith.select %373, %365, %371 : vector<64x256xi1>, vector<64x256xf32>
    %c127_i32_71 = arith.constant 127 : i32
    %375 = vector.broadcast %c127_i32_71 : i32 to vector<1x256xi32>
    %376 = arith.andi %2, %375 : vector<1x256xi32>
    %c64_i32_72 = arith.constant 64 : i32
    %377 = vector.broadcast %c64_i32_72 : i32 to vector<1x256xi32>
    %378 = arith.cmpi sge, %376, %377 : vector<1x256xi32>
    %c96_i32_73 = arith.constant 96 : i32
    %379 = vector.broadcast %c96_i32_73 : i32 to vector<1x256xi32>
    %380 = arith.cmpi slt, %376, %379 : vector<1x256xi32>
    %381 = arith.andi %378, %380 : vector<1x256xi1>
    %c32_i32_74 = arith.constant 32 : i32
    %382 = vector.broadcast %c32_i32_74 : i32 to vector<1x256xi32>
    %383 = arith.cmpi sge, %376, %382 : vector<1x256xi32>
    %c64_i32_75 = arith.constant 64 : i32
    %384 = vector.broadcast %c64_i32_75 : i32 to vector<1x256xi32>
    %385 = arith.cmpi slt, %376, %384 : vector<1x256xi32>
    %386 = arith.andi %383, %385 : vector<1x256xi1>
    %387 = vector.extract_strided_slice %374 {offsets = [0, 224], sizes = [64, 32], strides = [1, 1]} : vector<64x256xf32> to vector<64x32xf32>
    %388 = vector.extract_strided_slice %374 {offsets = [0, 0], sizes = [64, 224], strides = [1, 1]} : vector<64x256xf32> to vector<64x224xf32>
    %389 = tpu.concatenate %387, %388 in 1 : vector<64x32xf32>, vector<64x224xf32> -> vector<64x256xf32>
    %390 = vector.extract_strided_slice %374 {offsets = [0, 32], sizes = [64, 224], strides = [1, 1]} : vector<64x256xf32> to vector<64x224xf32>
    %391 = vector.extract_strided_slice %374 {offsets = [0, 0], sizes = [64, 32], strides = [1, 1]} : vector<64x256xf32> to vector<64x32xf32>
    %392 = tpu.concatenate %390, %391 in 1 : vector<64x224xf32>, vector<64x32xf32> -> vector<64x256xf32>
    %393 = vector.shape_cast %386 : vector<1x256xi1> to vector<1x256xi1>
    %394 = vector.broadcast %393 : vector<1x256xi1> to vector<64x256xi1>
    %395 = arith.select %394, %392, %374 : vector<64x256xi1>, vector<64x256xf32>
    %396 = vector.shape_cast %381 : vector<1x256xi1> to vector<1x256xi1>
    %397 = vector.broadcast %396 : vector<1x256xi1> to vector<64x256xi1>
    %398 = arith.select %397, %389, %395 : vector<64x256xi1>, vector<64x256xf32>
    %c63_i32_76 = arith.constant 63 : i32
    %399 = vector.broadcast %c63_i32_76 : i32 to vector<1x256xi32>
    %400 = arith.andi %2, %399 : vector<1x256xi32>
    %c32_i32_77 = arith.constant 32 : i32
    %401 = vector.broadcast %c32_i32_77 : i32 to vector<1x256xi32>
    %402 = arith.cmpi sge, %400, %401 : vector<1x256xi32>
    %c48_i32_78 = arith.constant 48 : i32
    %403 = vector.broadcast %c48_i32_78 : i32 to vector<1x256xi32>
    %404 = arith.cmpi slt, %400, %403 : vector<1x256xi32>
    %405 = arith.andi %402, %404 : vector<1x256xi1>
    %c16_i32_79 = arith.constant 16 : i32
    %406 = vector.broadcast %c16_i32_79 : i32 to vector<1x256xi32>
    %407 = arith.cmpi sge, %400, %406 : vector<1x256xi32>
    %c32_i32_80 = arith.constant 32 : i32
    %408 = vector.broadcast %c32_i32_80 : i32 to vector<1x256xi32>
    %409 = arith.cmpi slt, %400, %408 : vector<1x256xi32>
    %410 = arith.andi %407, %409 : vector<1x256xi1>
    %411 = vector.extract_strided_slice %398 {offsets = [0, 240], sizes = [64, 16], strides = [1, 1]} : vector<64x256xf32> to vector<64x16xf32>
    %412 = vector.extract_strided_slice %398 {offsets = [0, 0], sizes = [64, 240], strides = [1, 1]} : vector<64x256xf32> to vector<64x240xf32>
    %413 = tpu.concatenate %411, %412 in 1 : vector<64x16xf32>, vector<64x240xf32> -> vector<64x256xf32>
    %414 = vector.extract_strided_slice %398 {offsets = [0, 16], sizes = [64, 240], strides = [1, 1]} : vector<64x256xf32> to vector<64x240xf32>
    %415 = vector.extract_strided_slice %398 {offsets = [0, 0], sizes = [64, 16], strides = [1, 1]} : vector<64x256xf32> to vector<64x16xf32>
    %416 = tpu.concatenate %414, %415 in 1 : vector<64x240xf32>, vector<64x16xf32> -> vector<64x256xf32>
    %417 = vector.shape_cast %410 : vector<1x256xi1> to vector<1x256xi1>
    %418 = vector.broadcast %417 : vector<1x256xi1> to vector<64x256xi1>
    %419 = arith.select %418, %416, %398 : vector<64x256xi1>, vector<64x256xf32>
    %420 = vector.shape_cast %405 : vector<1x256xi1> to vector<1x256xi1>
    %421 = vector.broadcast %420 : vector<1x256xi1> to vector<64x256xi1>
    %422 = arith.select %421, %413, %419 : vector<64x256xi1>, vector<64x256xf32>
    %c31_i32_81 = arith.constant 31 : i32
    %423 = vector.broadcast %c31_i32_81 : i32 to vector<1x256xi32>
    %424 = arith.andi %2, %423 : vector<1x256xi32>
    %c16_i32_82 = arith.constant 16 : i32
    %425 = vector.broadcast %c16_i32_82 : i32 to vector<1x256xi32>
    %426 = arith.cmpi sge, %424, %425 : vector<1x256xi32>
    %c24_i32_83 = arith.constant 24 : i32
    %427 = vector.broadcast %c24_i32_83 : i32 to vector<1x256xi32>
    %428 = arith.cmpi slt, %424, %427 : vector<1x256xi32>
    %429 = arith.andi %426, %428 : vector<1x256xi1>
    %c8_i32_84 = arith.constant 8 : i32
    %430 = vector.broadcast %c8_i32_84 : i32 to vector<1x256xi32>
    %431 = arith.cmpi sge, %424, %430 : vector<1x256xi32>
    %c16_i32_85 = arith.constant 16 : i32
    %432 = vector.broadcast %c16_i32_85 : i32 to vector<1x256xi32>
    %433 = arith.cmpi slt, %424, %432 : vector<1x256xi32>
    %434 = arith.andi %431, %433 : vector<1x256xi1>
    %435 = vector.extract_strided_slice %422 {offsets = [0, 248], sizes = [64, 8], strides = [1, 1]} : vector<64x256xf32> to vector<64x8xf32>
    %436 = vector.extract_strided_slice %422 {offsets = [0, 0], sizes = [64, 248], strides = [1, 1]} : vector<64x256xf32> to vector<64x248xf32>
    %437 = tpu.concatenate %435, %436 in 1 : vector<64x8xf32>, vector<64x248xf32> -> vector<64x256xf32>
    %438 = vector.extract_strided_slice %422 {offsets = [0, 8], sizes = [64, 248], strides = [1, 1]} : vector<64x256xf32> to vector<64x248xf32>
    %439 = vector.extract_strided_slice %422 {offsets = [0, 0], sizes = [64, 8], strides = [1, 1]} : vector<64x256xf32> to vector<64x8xf32>
    %440 = tpu.concatenate %438, %439 in 1 : vector<64x248xf32>, vector<64x8xf32> -> vector<64x256xf32>
    %441 = vector.shape_cast %434 : vector<1x256xi1> to vector<1x256xi1>
    %442 = vector.broadcast %441 : vector<1x256xi1> to vector<64x256xi1>
    %443 = arith.select %442, %440, %422 : vector<64x256xi1>, vector<64x256xf32>
    %444 = vector.shape_cast %429 : vector<1x256xi1> to vector<1x256xi1>
    %445 = vector.broadcast %444 : vector<1x256xi1> to vector<64x256xi1>
    %446 = arith.select %445, %437, %443 : vector<64x256xi1>, vector<64x256xf32>
    %c15_i32_86 = arith.constant 15 : i32
    %447 = vector.broadcast %c15_i32_86 : i32 to vector<1x256xi32>
    %448 = arith.andi %2, %447 : vector<1x256xi32>
    %c8_i32_87 = arith.constant 8 : i32
    %449 = vector.broadcast %c8_i32_87 : i32 to vector<1x256xi32>
    %450 = arith.cmpi sge, %448, %449 : vector<1x256xi32>
    %c12_i32_88 = arith.constant 12 : i32
    %451 = vector.broadcast %c12_i32_88 : i32 to vector<1x256xi32>
    %452 = arith.cmpi slt, %448, %451 : vector<1x256xi32>
    %453 = arith.andi %450, %452 : vector<1x256xi1>
    %c4_i32_89 = arith.constant 4 : i32
    %454 = vector.broadcast %c4_i32_89 : i32 to vector<1x256xi32>
    %455 = arith.cmpi sge, %448, %454 : vector<1x256xi32>
    %c8_i32_90 = arith.constant 8 : i32
    %456 = vector.broadcast %c8_i32_90 : i32 to vector<1x256xi32>
    %457 = arith.cmpi slt, %448, %456 : vector<1x256xi32>
    %458 = arith.andi %455, %457 : vector<1x256xi1>
    %459 = vector.extract_strided_slice %446 {offsets = [0, 252], sizes = [64, 4], strides = [1, 1]} : vector<64x256xf32> to vector<64x4xf32>
    %460 = vector.extract_strided_slice %446 {offsets = [0, 0], sizes = [64, 252], strides = [1, 1]} : vector<64x256xf32> to vector<64x252xf32>
    %461 = tpu.concatenate %459, %460 in 1 : vector<64x4xf32>, vector<64x252xf32> -> vector<64x256xf32>
    %462 = vector.extract_strided_slice %446 {offsets = [0, 4], sizes = [64, 252], strides = [1, 1]} : vector<64x256xf32> to vector<64x252xf32>
    %463 = vector.extract_strided_slice %446 {offsets = [0, 0], sizes = [64, 4], strides = [1, 1]} : vector<64x256xf32> to vector<64x4xf32>
    %464 = tpu.concatenate %462, %463 in 1 : vector<64x252xf32>, vector<64x4xf32> -> vector<64x256xf32>
    %465 = vector.shape_cast %458 : vector<1x256xi1> to vector<1x256xi1>
    %466 = vector.broadcast %465 : vector<1x256xi1> to vector<64x256xi1>
    %467 = arith.select %466, %464, %446 : vector<64x256xi1>, vector<64x256xf32>
    %468 = vector.shape_cast %453 : vector<1x256xi1> to vector<1x256xi1>
    %469 = vector.broadcast %468 : vector<1x256xi1> to vector<64x256xi1>
    %470 = arith.select %469, %461, %467 : vector<64x256xi1>, vector<64x256xf32>
    %c7_i32_91 = arith.constant 7 : i32
    %471 = vector.broadcast %c7_i32_91 : i32 to vector<1x256xi32>
    %472 = arith.andi %2, %471 : vector<1x256xi32>
    %c4_i32_92 = arith.constant 4 : i32
    %473 = vector.broadcast %c4_i32_92 : i32 to vector<1x256xi32>
    %474 = arith.cmpi sge, %472, %473 : vector<1x256xi32>
    %c6_i32_93 = arith.constant 6 : i32
    %475 = vector.broadcast %c6_i32_93 : i32 to vector<1x256xi32>
    %476 = arith.cmpi slt, %472, %475 : vector<1x256xi32>
    %477 = arith.andi %474, %476 : vector<1x256xi1>
    %c2_i32_94 = arith.constant 2 : i32
    %478 = vector.broadcast %c2_i32_94 : i32 to vector<1x256xi32>
    %479 = arith.cmpi sge, %472, %478 : vector<1x256xi32>
    %c4_i32_95 = arith.constant 4 : i32
    %480 = vector.broadcast %c4_i32_95 : i32 to vector<1x256xi32>
    %481 = arith.cmpi slt, %472, %480 : vector<1x256xi32>
    %482 = arith.andi %479, %481 : vector<1x256xi1>
    %483 = vector.extract_strided_slice %470 {offsets = [0, 254], sizes = [64, 2], strides = [1, 1]} : vector<64x256xf32> to vector<64x2xf32>
    %484 = vector.extract_strided_slice %470 {offsets = [0, 0], sizes = [64, 254], strides = [1, 1]} : vector<64x256xf32> to vector<64x254xf32>
    %485 = tpu.concatenate %483, %484 in 1 : vector<64x2xf32>, vector<64x254xf32> -> vector<64x256xf32>
    %486 = vector.extract_strided_slice %470 {offsets = [0, 2], sizes = [64, 254], strides = [1, 1]} : vector<64x256xf32> to vector<64x254xf32>
    %487 = vector.extract_strided_slice %470 {offsets = [0, 0], sizes = [64, 2], strides = [1, 1]} : vector<64x256xf32> to vector<64x2xf32>
    %488 = tpu.concatenate %486, %487 in 1 : vector<64x254xf32>, vector<64x2xf32> -> vector<64x256xf32>
    %489 = vector.shape_cast %482 : vector<1x256xi1> to vector<1x256xi1>
    %490 = vector.broadcast %489 : vector<1x256xi1> to vector<64x256xi1>
    %491 = arith.select %490, %488, %470 : vector<64x256xi1>, vector<64x256xf32>
    %492 = vector.shape_cast %477 : vector<1x256xi1> to vector<1x256xi1>
    %493 = vector.broadcast %492 : vector<1x256xi1> to vector<64x256xi1>
    %494 = arith.select %493, %485, %491 : vector<64x256xi1>, vector<64x256xf32>
    %c3_i32_96 = arith.constant 3 : i32
    %495 = vector.broadcast %c3_i32_96 : i32 to vector<1x256xi32>
    %496 = arith.andi %2, %495 : vector<1x256xi32>
    %c2_i32_97 = arith.constant 2 : i32
    %497 = vector.broadcast %c2_i32_97 : i32 to vector<1x256xi32>
    %498 = arith.cmpi sge, %496, %497 : vector<1x256xi32>
    %c3_i32_98 = arith.constant 3 : i32
    %499 = vector.broadcast %c3_i32_98 : i32 to vector<1x256xi32>
    %500 = arith.cmpi slt, %496, %499 : vector<1x256xi32>
    %501 = arith.andi %498, %500 : vector<1x256xi1>
    %c1_i32_99 = arith.constant 1 : i32
    %502 = vector.broadcast %c1_i32_99 : i32 to vector<1x256xi32>
    %503 = arith.cmpi sge, %496, %502 : vector<1x256xi32>
    %c2_i32_100 = arith.constant 2 : i32
    %504 = vector.broadcast %c2_i32_100 : i32 to vector<1x256xi32>
    %505 = arith.cmpi slt, %496, %504 : vector<1x256xi32>
    %506 = arith.andi %503, %505 : vector<1x256xi1>
    %507 = vector.extract_strided_slice %494 {offsets = [0, 255], sizes = [64, 1], strides = [1, 1]} : vector<64x256xf32> to vector<64x1xf32>
    %508 = vector.extract_strided_slice %494 {offsets = [0, 0], sizes = [64, 255], strides = [1, 1]} : vector<64x256xf32> to vector<64x255xf32>
    %509 = tpu.concatenate %507, %508 in 1 : vector<64x1xf32>, vector<64x255xf32> -> vector<64x256xf32>
    %510 = vector.extract_strided_slice %494 {offsets = [0, 1], sizes = [64, 255], strides = [1, 1]} : vector<64x256xf32> to vector<64x255xf32>
    %511 = vector.extract_strided_slice %494 {offsets = [0, 0], sizes = [64, 1], strides = [1, 1]} : vector<64x256xf32> to vector<64x1xf32>
    %512 = tpu.concatenate %510, %511 in 1 : vector<64x255xf32>, vector<64x1xf32> -> vector<64x256xf32>
    %513 = vector.shape_cast %506 : vector<1x256xi1> to vector<1x256xi1>
    %514 = vector.broadcast %513 : vector<1x256xi1> to vector<64x256xi1>
    %515 = arith.select %514, %512, %494 : vector<64x256xi1>, vector<64x256xf32>
    %516 = vector.shape_cast %501 : vector<1x256xi1> to vector<1x256xi1>
    %517 = vector.broadcast %516 : vector<1x256xi1> to vector<64x256xi1>
    %518 = arith.select %517, %509, %515 : vector<64x256xi1>, vector<64x256xf32>
    %c0_101 = arith.constant 0 : index
    %c0_102 = arith.constant 0 : index
    %c0_103 = arith.constant 0 : index
    %519 = vector.load %arg4[%c0_101, %c0_102, %c0_103] : memref<1x64x256xf32, #tpu.memory_space<vmem>>, vector<1x64x256xf32>
    %520 = vector.shape_cast %519 : vector<1x64x256xf32> to vector<64x256xf32>
    %521 = vector.shape_cast %518 : vector<64x256xf32> to vector<1x64x256xf32>
    tpu.vector_store %arg4[%c0_101, %c0_102, %c0_103], %521 {strides = array<i32>} : memref<1x64x256xf32, #tpu.memory_space<vmem>>, vector<1x64x256xf32>,
    return
  }
  func.func @transform_0(%arg0: i32) -> (i32, i32, i32) {
    %c0_i32 = arith.constant 0 : i32
    %c0_i32_0 = arith.constant 0 : i32
    %c0_i32_1 = arith.constant 0 : i32
    return %arg0, %c0_i32, %c0_i32_0 : i32, i32, i32
  }
  func.func @transform_1(%arg0: i32) -> (i32, i32) {
    %c0_i32 = arith.constant 0 : i32
    %c0_i32_0 = arith.constant 0 : i32
    %c0_i32_1 = arith.constant 0 : i32
    return %c0_i32, %c0_i32_0 : i32, i32
  }
  func.func @transform_2(%arg0: i32) -> (i32, i32) {
    %c0_i32 = arith.constant 0 : i32
    %c0_i32_0 = arith.constant 0 : i32
    %c0_i32_1 = arith.constant 0 : i32
    return %c0_i32, %c0_i32_0 : i32, i32
  }
  func.func @transform_3(%arg0: i32) -> (i32, i32, i32) {
    %c0_i32 = arith.constant 0 : i32
    %c0_i32_0 = arith.constant 0 : i32
    %c0_i32_1 = arith.constant 0 : i32
    return %arg0, %c0_i32, %c0_i32_0 : i32, i32, i32
  }
}

</mosaic_0001>

<bundles_post_ra>
// kernel: glu_forward.1
= control target key start
LH: loop header
LB: loop body
LE: loop exit
PB: predicated region body
PF: predicated region fallthrough
CT: control target
= control target key end

     0   :  { %8 = vsyncpa [#allocation4], 0  ;;  %s10374_s0 = inlined_call_operand.vmem [shape: f32[2,64,256], index: 0, kind: input, shape index: {}]   ;;  %s10375_s1 = inlined_call_operand.vmem [shape: f32[24,128], index: 1, kind: input, shape index: {}]   ;;  %s10376_s2 = inlined_call_operand.vmem [shape: f32[8,128], index: 2, kind: input, shape index: {}]   ;;  %s10377_s3 = inlined_call_operand.hbm [shape: f32[2,64,256], index: 3, kind: output, shape index: {}]  }
   0x1   :  { %10 = vsyncpa [#allocation4 + $0x1], 0  ;;  %s5021_s12 = smov 0   ;;  %s5023_s13 = smov 0  }
   0x2   :  { %s5025_s14 = smov 0   ;;  %s5027_s15 = smov 0  }
   0x3 LB: > { %s5042_s16 = sadd.s32 4294967295, %s4984_s15   ;;  %s4780_s17 = sadd.s32 4294967294, %s4984_s15   ;;  %s4984_s15 = sphi %s5027_s15, %s11167_s15   ;;  %s4980_s14 = sphi %s5025_s14, %s11166_s14   ;;  %s4976_s13 = sphi %s5023_s13, %s11165_s13   ;;  %s4972_s12 = sphi %s5021_s12, %s11164_s12  }
   0x4   : > { %s5046_s18 = sadd.s32 1, %s4984_s15   ;;  %s91_s19 = sadd.s32 1, %s4980_s14 }
   0x5   : > { %s88_s20 = ssub.s32 %s4984_s15, %s5046_s18  ;;  %p101_p0 = scmp.ne.s32.totalorder %s4980_s14, %s4976_s13 }
   0x6   : > { %p89_p1 = scmp.eq.s32.totalorder %s88_s20, 0  ;;  %p102_p2 = scmp.eq.s32.totalorder %s5042_s16, 1 }
   0x7   : > { %p107_p3 = scmp.ne.s32.totalorder %s4976_s13, %s4972_s12  ;;  %p108_p4 = scmp.eq.s32.totalorder %s4780_s17, 1 }
   0x8   : > { %s5057_s21 = scalar_select %p89_p1, %s4980_s14, %s91_s19  }
   0x9   : > { %p5059_p5 = por %p102_p2, %p101_p0  ;;  %p5063_p6 = por %p108_p4, %p107_p3 }
   0xa   : > { %p4783_p7 = scmp.ge.s32.totalorder %s4984_s15, 1  ;;  %p140_p8 = scmp.lt.s32.totalorder %s4984_s15, 3 }
   0xc   : > { %p141_p9 = pnand %p4783_p7, %p140_p8 }
   0xe   : > { %144 = sbr.rel (%p141_p9) target bundleno = 2746 (0xaba), region = 32 }
  0x13   : > { %p164_p10 = scmp.lt.s32.totalorder %s5042_s16, 1  ;;  %v5073_v0 = vld [vmem:[%s10375_s1] sm:$0xff]  ;;  %v170_v1 = vld [vmem:[%s10375_s1 + $0x8] sm:$0xff]  ;;  %v4986_v5 = vmov 0.0   ;;  %vm10420_vm0 = vcmask 1046528   ;;  %vm10419_vm1 = vcmask 1045504  }
  0x14   : > { %v5080_v2 = vperm.slane %v5073_v0, 4  ;;  %v5085_v3 = vld [vmem:[%s10376_s2] sm:$0xff]  ;;  %v5088_v4 = vperm.slane %v5073_v0, 5  ;;  %176 = vst [vmem:[#allocation2] sm:$0xff] %v4986_v5  ;;  %v5096_v6 = vperm.slane %v5073_v0, 3  ;;  %v5098_v7 = vperm.slane %v170_v1, 2 }
  0x15   : > { %s165_s26 = scalar_select %p164_p10, %s5042_s16, 1  ;;  %177 = vst [vmem:[#allocation2 + $0x38] sm:$0xff] %v4986_v5  ;;  %v5107_v10 = vperm.slane %v5085_v3, 1  ;;  %v5109_v11 = vperm.slane %v170_v1, 1  ;;  %v5111_v12 = vperm.slane %v170_v1, 3  ;;  %v5118_v14 = vperm.slane %v5085_v3, 3 }
  0x16   : > { %v5147_v22 = vperm.slane %v5073_v0, 6  ;;  %v5157_v26 = vperm.slane %v5073_v0, 7  ;;  %v5194_v41 = vperm.slane %v170_v1, 0  ;;  %s4987_s8 = smov 64   ;;  %vm10418_vm2 = vcmask 523264   ;;  %s4988_s9 = smov 32  }
  0x17   : > { %s4792_s29 = sshll.u32 %s165_s26, 7  ;;  %s4989_s10 = smov 96   ;;  %vm10417_vm5 = vcmask 785408   ;;  %vm10416_vm6 = vcmask 261120  }
  0x18   : > { %s5093_s7 = scalar_lea.vmem %s10374_s0, %s4792_s29  ;;  %s4990_s11 = smov 16  }
  0x19   : > { %v5101_v8 = vld [vmem:[%s5093_s7 + $0x70] sm:$0xff]  ;;  %v5104_v9 = vld [vmem:[%s5093_s7 + $0x78] sm:$0xff]  ;;  %v5124_v16 = vld [vmem:[%s5093_s7 + $0x20] sm:$0xff]  ;;  %s4991_s17 = smov 112   ;;  %s4992_s19 = smov 8  }
  0x1a   : > { %v5114_v13 = vld [vmem:[%s5093_s7 + $0x10] sm:$0xff]  ;;  %208 = vst [vmem:[#allocation2 + $0x68] sm:$0xff] %v5101_v8  ;;  %v5121_v15 = vld [vmem:[%s5093_s7 + $0x18] sm:$0xff]  ;;  %v5127_v17 = vld [vmem:[%s5093_s7 + $0x28] sm:$0xff]  ;;  %v5136_v19 = vmul.f32 %v5080_v2, %v5124_v16  ;;  %v5144_v21 = vmul.f32 %v5088_v4, %v5124_v16  ;;  %v5184_v37 = vmul.f32 %v5088_v4, %v5101_v8  ;;  %v5198_v42 = vmul.f32 %v5111_v12, %v5104_v9  ;;  %s4993_s20 = smov 120   ;;  %s4994_s24 = smov 4  }
  0x1b   : > { %10577 = vst [vmem:[#allocation6_spill] sm:$0xff] %v5114_v13  ;;  %v5131_v18 = vmul.f32 %v5080_v2, %v5114_v13  ;;  %v5140_v20 = vmul.f32 %v5088_v4, %v5114_v13  ;;  %v241_v23 = vmul.f32 %v5096_v6, %v5114_v13  ;;  %v5154_v25 = vmul.f32 %v5098_v7, %v5121_v15  ;;  %v5178_v35 = vld [vmem:[%s5093_s7] sm:$0xff]  ;;  %s4995_s25 = smov 124   ;;  %s4996_s26 = smov 2  }
  0x1c   : > { %10578 = vst [vmem:[#allocation7_spill] sm:$0xff] %v5121_v15  ;;  %v10388_v27 = vrot.slane %v5136_v19, 1  ;;  %v10387_v29 = vrot.slane %v5144_v21, 2  ;;  %v5164_v30 = vmul.f32 %v5098_v7, %v5127_v17  ;;  %v521_v31 = vmul.f32 %v5109_v11, %v5121_v15  ;;  %v5180_v36 = vld [vmem:[#allocation2] sm:$0x80]  ;;  %s4997_s27 = smov 126  }
  0x1d   : > { %10579 = vst [vmem:[#allocation8_spill] sm:$0xff] %v5124_v16  ;;  %v10381_v24 = vrot.slane %v5131_v18, 1  ;;  %v10378_v28 = vrot.slane %v5140_v20, 2  ;;  %v10380_v32 = vrot.slane %v5154_v25, 1  ;;  %v5171_v33 = vmul.f32 %v5111_v12, %v5121_v15  ;;  %v5192_v40 = vld [vmem:[#allocation2] sm:$0xc0] }
  0x1e   : > { %10580 = vst [vmem:[#allocation9_spill] sm:$0xff] %v5127_v17  ;;  %v5175_v34 = vmul.f32 %v5111_v12, %v5127_v17  ;;  %v10384_v39 = vrot.slane %v5164_v30, 1  ;;  %v315_v50 = vmul.f32 %v5080_v2, %v5180_v36  ;;  %v5216_v51 = vmul.f32 %v5080_v2, %v5178_v35  ;;  %s4998_s28 = smov 1   ;;  %s4999_s29 = smov 127  }
  0x1f   : > { %209 = vst [vmem:[#allocation2 + $0x60] sm:$0xff] %v5104_v9  ;;  %v339_v38 = vsel %vm10420_vm0, %v10381_v24, %v10388_v27  ;;  %v441_v43 = vsel %vm10419_vm1, %v10378_v28, %v10387_v29  ;;  %v10379_v44 = vrot.slane %v5171_v33, 2  ;;  %v239_v57 = vmul.f32 %v5096_v6, %v5192_v40  ;;  %v5241_v28 = vld [vmem:[%s5093_s7 + $0x8] sm:$0xff]  ;;  %v5256_v24 = vld [vmem:[#allocation2 + $0x38] sm:$0xc0]  ;;  %s4942_s5 = scalar_lea.hbm %s10377_s3, 256 }
  0x20   : > { %v10382_v45 = vrot.slane %v5175_v34, 2  ;;  %v361_v48 = vadd.f32 %v339_v38, %v241_v23  ;;  %v618_v49 = vsel %vm10420_vm0, %v10380_v32, %v10384_v39  ;;  %v333_v61 = vrot.slane %v315_v50, 1  ;;  %v5236_v23 = vld [vmem:[#allocation2 + $0x38] sm:$0x80] }
  0x21   : > { %v218_v46 = vld [vmem:[#allocation2 + $0x68] sm:$0x3f]  ;;  %v640_v56 = vadd.f32 %v618_v49, %v521_v31  ;;  %v10390_v63 = vrot.slane %v5184_v37, 2  ;;  %v10386_v5 = vrot.slane %v5216_v51, 1  ;;  %v10389_v38 = vrot.slane %v5198_v42, 2 }
  0x22   : > { %v258_v47 = vld [vmem:[#allocation2 + $0x68] sm:$0x7f]  ;;  %v247_v52 = vmul.f32 %v5096_v6, %v218_v46  ;;  %v719_v60 = vsel %vm10419_vm1, %v10379_v44, %v10382_v45  ;;  %v463_v49 = vadd.f32 %v441_v43, %v361_v48  ;;  %v5245_v44 = vmul.f32 %v5088_v4, %v5178_v35 }
  0x23   : > { %v5220_v53 = vmul.f32 %v5080_v2, %v258_v47  ;;  %v741_v1 = vadd.f32 %v719_v60, %v640_v56  ;;  %v5251_v60 = vperm.slane %v5073_v0, 0  ;;  %v335_v32 = vsel %vm10420_vm0, %v333_v61, %v10386_v5 }
  0x24   : > { %v5261_v48 = vperm.slane %v5073_v0, 1  ;;  %v359_v45 = vadd.f32 %v335_v32, %v239_v57  ;;  %v5268_v39 = vmul.f32 %v5098_v7, %v5241_v28  ;;  %v5272_v61 = vmul.f32 %v5111_v12, %v5241_v28 }
  0x25   : > { %v10383_v62 = vrot.slane %v5220_v53, 1  ;;  %v761_v56 = vadd.f32 %v5118_v14, %v741_v1  ;;  %v519_v32 = vmul.f32 %v5109_v11, %v5256_v24  ;;  %v228_v29 = vmul.f32 %v5251_v60, %v218_v46 }
  0x26   : > { %v498_v54 = vld [vmem:[#allocation2 + $0x60] sm:$0x3f]  ;;  %v10391_v5 = vrot.slane %v5268_v39, 1 }
  0x27   : > { %v538_v55 = vld [vmem:[#allocation2 + $0x60] sm:$0x7f]  ;;  %v527_v58 = vmul.f32 %v5109_v11, %v498_v54  ;;  %v367_v50 = vadd.f32 %v10383_v62, %v247_v52  ;;  %v594_v52 = vmul.f32 %v5098_v7, %v5236_v23  ;;  %v815_v1 = vmul.f32 0.5, %v761_v56 }
  0x28   : > { %v5226_v59 = vmul.f32 %v5098_v7, %v538_v55  ;;  %v10395_v62 = vrot.slane %v5272_v61, 2  ;;  %v508_v46 = vmul.f32 %v5147_v22, %v498_v54  ;;  %v5314_v54 = vmul.f32 %v5194_v41, %v5104_v9 }
  0x29   : > { %v612_v57 = vrot.slane %v594_v52, 1  ;;  %v469_v56 = vadd.f32 %v10390_v63, %v367_v50  ;;  %4848 = vtanh.f32 %v815_v1  ;;  %v10583_v52 = vrot.slane %v5245_v44, 2 }
  0x2a   : > { %v10385_v31 = vrot.slane %v5226_v59, 1  ;;  %v5300_v1 = vmul.f32 %v5157_v26, %v538_v55  ;;  %10586 = vst [vmem:[#allocation14_spill] sm:$0xff] %v5314_v54  ;;  %v5317_v55 = vperm.slane %v5085_v3, 2  ;;  %v10400_v9 = vrot.slane %v5314_v54, 2 }
  0x2b   : > { %v614_v50 = vsel %vm10420_vm0, %v612_v57, %v10391_v5 }
  0x2c   : > { %v646_v43 = vadd.f32 %v10385_v31, %v527_v58  ;;  %v483_v31 = vadd.f32 %v5107_v10, %v463_v49  ;;  %v5289_v49 = vperm.slane %v5073_v0, 2  ;;  %10584 = vst [vmem:[#allocation12_spill] sm:$0xff] %v5300_v1  ;;  %v10396_v57 = vrot.slane %v5300_v1, 1 }
  0x2e   : > { %v747_v58 = vadd.f32 %v10389_v38, %v646_v43  ;;  %v5286_v43 = vmul.f32 %v5261_v48, %v258_v47  ;;  %10582 = vst [vmem:[#allocation11_spill] sm:$0xff] %v5289_v49  ;;  %v5293_v38 = vadd.f32 %v10583_v52, %v359_v45  ;;  %v638_v47 = vadd.f32 %v614_v50, %v519_v32  ;;  %v5308_v45 = vld [vmem:[%s5093_s7 + $0x30] sm:$0xff]  ;;  %v5325_v50 = vld [vmem:[%s5093_s7 + $0x38] sm:$0xff] }
  0x2f   : > { %v5305_v0 = vmul.f32 %v5289_v49, %v5101_v8  ;;  %v489_v52 = vadd.f32 %v5107_v10, %v469_v56  ;;  %v4849_v56 = vpop.eup %4848  ;;  %v592_v5 = vadd.f32 %v10396_v57, %v508_v46  ;;  %v5332_v15 = vmul.f32 %v5080_v2, %v5308_v45 }
  0x30   : > { %v767_v27 = vadd.f32 %v5118_v14, %v747_v58  ;;  %10581 = vst [vmem:[#allocation10_spill] sm:$0xff] %v5286_v43  ;;  %v10394_v63 = vrot.slane %v5286_v43, 1  ;;  %v5350_v43 = vmul.f32 %v5098_v7, %v5325_v50  ;;  %v10588_v32 = vrot.slane %v5136_v19, 1 }
  0x31   : > { %10585 = vst [vmem:[#allocation13_spill] sm:$0xff] %v5305_v0  ;;  %v697_v46 = vadd.f32 %v10400_v9, %v592_v5  ;;  %v340_v57 = vrot.slane %v5332_v15, 1  ;;  %v10587_v54 = vrot.slane %v5305_v0, 2 }
  0x32   : > { %v821_v58 = vmul.f32 0.5, %v767_v27  ;;  %v739_v27 = vadd.f32 %v10395_v62, %v638_v47  ;;  %v313_v8 = vadd.f32 %v10394_v63, %v228_v29  ;;  %v833_v47 = vadd.f32 1.0, %v4849_v56 }
  0x33   : > { %v5340_v63 = vperm.slane %v5085_v3, 0  ;;  %v242_v62 = vmul.f32 %v5096_v6, %v5124_v16  ;;  %v522_v3 = vmul.f32 %v5109_v11, %v5127_v17  ;;  %v757_v9 = vadd.f32 %v5317_v55, %v697_v46 }
  0x34   : > { %4850 = vtanh.f32 %v821_v58  ;;  %v5336_v58 = vmul.f32 %v5088_v4, %v5308_v45  ;;  %v759_v29 = vadd.f32 %v5118_v14, %v739_v27  ;;  %v842_v56 = vmul.f32 0.5, %v833_v47 }
  0x35   : > { %v5356_v27 = vmul.f32 %v5111_v12, %v5325_v50  ;;  %v419_v5 = vadd.f32 %v10587_v54, %v313_v8  ;;  %v341_v16 = vsel %vm10420_vm0, %v10588_v32, %v340_v57  ;;  %v619_v47 = vrot.slane %v5350_v43, 1 }
  0x36   : > { %v813_v1 = vmul.f32 0.5, %v759_v29  ;;  %v5367_v13 = vmul.f32 %v842_v56, %v483_v31  ;;  %v362_v17 = vadd.f32 %v341_v16, %v242_v62  ;;  %v776_v54 = vmul.f32 0.5, %v757_v9 }
  0x37   : > { %v720_v49 = vrot.slane %v5356_v27, 2  ;;  %v10590_v8 = vrot.slane %v5336_v58, 2  ;;  %v10591_v46 = vrot.slane %v5144_v21, 2  ;;  %v10592_v32 = vrot.slane %v5164_v30, 1 }
  0x38   : > { %10589 = vst [vmem:[#allocation15_spill] sm:$0xff] %v5367_v13  ;;  %4852 = vtanh.f32 %v813_v1  ;;  %885 = vrot.lane.b32.xlu1 %v5367_v13, %s4987_s8  ;;  %v5382_v16 = vmul.f32 %v5251_v60, %v5192_v40  ;;  %v10593_v21 = vrot.slane %v5175_v34, 2  ;;  %v240_v30 = vmul.f32 %v5096_v6, %v5178_v35 }
  0x39   : > { %v443_v19 = vsel %vm10419_vm1, %v10591_v46, %v10590_v8  ;;  %v620_v43 = vsel %vm10420_vm0, %v10592_v32, %v619_v47  ;;  %v5393_v9 = vmul.f32 %v5261_v48, %v5180_v36  ;;  %4854 = vtanh.f32 %v776_v54  ;;  %v5411_v54 = vld [vmem:[%s5093_s7 + $0x48] sm:$0xff] }
  0x3a   : > { %v4851_v29 = vpop.eup %4850  ;;  %v641_v62 = vadd.f32 %v620_v43, %v522_v3  ;;  %v721_v31 = vsel %vm10419_vm1, %v10593_v21, %v720_v49  ;;  %v10594_v56 = vrot.slane %v5131_v18, 1  ;;  %v10595_v40 = vrot.slane %v5216_v51, 1 }
  0x3b   : > { %v839_v0 = vadd.f32 1.0, %v4851_v29  ;;  %v5401_v29 = vld [vmem:[%s5093_s7 + $0x40] sm:$0xff]  ;;  %v464_v34 = vadd.f32 %v443_v19, %v362_v17  ;;  %v520_v46 = vmul.f32 %v5109_v11, %v5241_v28  ;;  %v10597_v32 = vrot.slane %v5268_v39, 1 }
  0x3c   : > { %v337_v3 = vsel %vm10420_vm0, %v10595_v40, %v10594_v56  ;;  %v742_v8 = vadd.f32 %v721_v31, %v641_v62  ;;  %v481_v51 = vadd.f32 %v5107_v10, %v5293_v38  ;;  %v479_v43 = vadd.f32 %v5340_v63, %v419_v5 }
  0x3d   : > { %v848_v1 = vmul.f32 0.5, %v839_v0  ;;  %v10596_v0 = vrot.slane %v5154_v25, 1  ;;  %v10598_v17 = vrot.slane %v5171_v33, 2  ;;  %v10599_v19 = vrot.slane %v5272_v61, 2 }
  0x3e   : > { %v4853_v25 = vpop.eup %4852  ;;  %v762_v39 = vadd.f32 %v5118_v14, %v742_v8  ;;  %v360_v21 = vadd.f32 %v337_v3, %v240_v30  ;;  %v10600_v5 = vrot.slane %v5140_v20, 2  ;;  %v10601_v33 = vrot.slane %v5245_v44, 2 }
  0x3f   : > { %v616_v36 = vsel %vm10420_vm0, %v10597_v32, %v10596_v0  ;;  %v5413_v18 = vmul.f32 %v848_v1, %v489_v52  ;;  %v717_v62 = vsel %vm10419_vm1, %v10599_v19, %v10598_v17  ;;  %v5426_v52 = vmul.f32 %v5080_v2, %v5401_v29  ;;  %v4855_v44 = vpop.eup %4854  ;;  %v5454_v19 = vld [vmem:[%s5093_s7 + $0x60] sm:$0xff] }
  0x40   : > { %v639_v31 = vadd.f32 %v616_v36, %v520_v46  ;;  %v831_v38 = vadd.f32 1.0, %v4853_v25  ;;  %v439_v61 = vsel %vm10419_vm1, %v10601_v33, %v10600_v5  ;;  %v5437_v1 = vmul.f32 %v5088_v4, %v5401_v29 }
  0x41   : > { %897 = vrot.lane.b32.xlu2 %v5413_v18, %s4987_s8  ;;  %v5441_v30 = vmul.f32 %v5098_v7, %v5411_v54  ;;  %v484_v56 = vadd.f32 %v5107_v10, %v464_v34  ;;  %v816_v40 = vmul.f32 0.5, %v762_v39  ;;  %v523_v20 = vmul.f32 %v5109_v11, %v5325_v50 }
  0x42   : > { %v740_v3 = vadd.f32 %v717_v62, %v639_v31  ;;  %v840_v8 = vmul.f32 0.5, %v831_v38  ;;  %v10410_v46 = vrot.slane %v5426_v52, 1  ;;  %v5450_v32 = vmul.f32 %v5111_v12, %v5411_v54  ;;  %v5465_v38 = vld [vmem:[%s5093_s7 + $0x68] sm:$0xff] }
  0x43   : > { %v10412_v0 = vrot.slane %v5441_v30, 1  ;;  %v794_v36 = vadd.f32 1.0, %v4855_v44  ;;  %4856 = vtanh.f32 %v816_v40  ;;  %v462_v17 = vadd.f32 %v439_v61, %v360_v21 }
  0x44   : > { %v760_v34 = vadd.f32 %v5118_v14, %v740_v3  ;;  %v5456_v62 = vmul.f32 %v840_v8, %v481_v51  ;;  %v243_v25 = vmul.f32 %v5096_v6, %v5308_v45  ;;  %v10414_v39 = vrot.slane %v5437_v1, 2 }
  0x45   : > { %v622_v31 = vsel %vm10420_vm0, %v619_v47, %v10412_v0  ;;  %v803_v5 = vmul.f32 0.5, %v794_v36  ;;  %v10411_v61 = vrot.slane %v5450_v32, 2  ;;  %v343_v51 = vsel %vm10420_vm0, %v340_v57, %v10410_v46 }
  0x46   : > { %10602 = vst [vmem:[#allocation16_spill] sm:$0xff] %v5456_v62  ;;  %v814_v21 = vmul.f32 0.5, %v760_v34  ;;  %v642_v33 = vadd.f32 %v622_v31, %v523_v20  ;;  %881 = vrot.lane.b32.xlu0 %v5456_v62, %s4987_s8  ;;  %v246_v40 = vmul.f32 %v5096_v6, %v5454_v19  ;;  %v322_v47 = vmul.f32 %v5080_v2, %v5454_v19  ;;  %v5484_v20 = vld [vmem:[%s5093_s7 + $0x50] sm:$0xff] }
  0x47   : > { %v5481_v3 = vmul.f32 %v5088_v4, %v5454_v19  ;;  %v5486_v44 = vmul.f32 %v803_v5, %v479_v43  ;;  %v723_v15 = vsel %vm10419_vm1, %v720_v49, %v10411_v61  ;;  %v601_v57 = vmul.f32 %v5098_v7, %v5465_v38 }
  0x48   : > { %4858 = vtanh.f32 %v814_v21  ;;  %v743_v8 = vadd.f32 %v723_v15, %v642_v33  ;;  %v346_v36 = vrot.slane %v322_v47, 1  ;;  %v526_v31 = vmul.f32 %v5109_v11, %v5465_v38 }
  0x49   : > { %v448_v34 = vrot.slane %v5481_v3, 2  ;;  %v4857_v46 = vpop.eup %4856  ;;  %933 = vrot.lane.b32.xlu2 %v5486_v44, %s4987_s8  ;;  %v363_v43 = vadd.f32 %v343_v51, %v243_v25  ;;  %v625_v5 = vrot.slane %v601_v57, 1  ;;  %v705_v49 = vmul.f32 %v5111_v12, %v5465_v38 }
  0x4a   : > { %v321_v27 = vmul.f32 %v5080_v2, %v5484_v20  ;;  %v834_v21 = vadd.f32 1.0, %v4857_v46  ;;  %v10603_v33 = vrot.slane %v5336_v58, 2  ;;  %v763_v3 = vadd.f32 %v5118_v14, %v743_v8  ;;  %v5521_v8 = vld [vmem:[%s5093_s7 + $0x58] sm:$0xff] }
  0x4b   : > { %v10604_v15 = vrot.slane %v5220_v53, 1  ;;  %v482_v51 = vadd.f32 %v5107_v10, %v462_v17  ;;  %v10605_v61 = vrot.slane %v5226_v59, 1  ;;  %v726_v46 = vrot.slane %v705_v49, 2 }
  0x4c   : > { %v445_v47 = vsel %vm10419_vm1, %v10603_v33, %v10414_v39  ;;  %v843_v0 = vmul.f32 0.5, %v834_v21  ;;  %v817_v62 = vmul.f32 0.5, %v763_v3  ;;  %v10606_v58 = vrot.slane %v5184_v37, 2 }
  0x4d   : > { %v349_v25 = vsel %vm10420_vm0, %v346_v36, %v10604_v15  ;;  %v628_v2 = vsel %vm10420_vm0, %v625_v5, %v10605_v61  ;;  %v465_v13 = vadd.f32 %v445_v47, %v363_v43  ;;  %v10607_v15 = vrot.slane %v5198_v42, 2 }
  0x4e   : > { %v366_v57 = vadd.f32 %v349_v25, %v246_v40  ;;  %v451_v33 = vsel %vm10419_vm1, %v448_v34, %v10606_v58  ;;  %v645_v39 = vadd.f32 %v628_v2, %v526_v31  ;;  %v4859_v53 = vpop.eup %4858  ;;  %v344_v40 = vrot.slane %v321_v27, 1 }
  0x4f   : > { %v729_v17 = vsel %vm10419_vm1, %v726_v46, %v10607_v15  ;;  %v426_v59 = vmul.f32 %v5088_v4, %v5484_v20  ;;  %v5528_v61 = vmul.f32 %v843_v0, %v484_v56  ;;  %v832_v49 = vadd.f32 1.0, %v4859_v53 }
  0x50   : > { %4860 = vtanh.f32 %v817_v62  ;;  %v746_v37 = vadd.f32 %v729_v17, %v645_v39  ;;  %v500_v31 = vmul.f32 %v5147_v22, %v5256_v24  ;;  %v468_v21 = vadd.f32 %v451_v33, %v366_v57 }
  0x51   : > { %v245_v43 = vmul.f32 %v5096_v6, %v5484_v20  ;;  %v600_v42 = vmul.f32 %v5098_v7, %v5521_v8  ;;  %887 = vrot.lane.b32.xlu1 %v5528_v61, %s4987_s8  ;;  %v841_v27 = vmul.f32 0.5, %v832_v49  ;;  %v525_v56 = vmul.f32 %v5109_v11, %v5521_v8 }
  0x52   : > { %v766_v4 = vadd.f32 %v5118_v14, %v746_v37  ;;  %v704_v0 = vmul.f32 %v5111_v12, %v5521_v8  ;;  %v540_v24 = vmul.f32 %v5157_v26, %v5236_v23  ;;  %v485_v62 = vadd.f32 %v5107_v10, %v465_v13 }
  0x53   : > { %v347_v39 = vsel %vm10420_vm0, %v344_v40, %v346_v36  ;;  %v623_v7 = vrot.slane %v600_v42, 1  ;;  %v5547_v47 = vmul.f32 %v841_v27, %v482_v51  ;;  %v446_v25 = vrot.slane %v426_v59, 2 }
  0x54   : > { %v820_v3 = vmul.f32 0.5, %v766_v4  ;;  %v724_v57 = vrot.slane %v704_v0, 2  ;;  %v488_v2 = vadd.f32 %v5107_v10, %v468_v21  ;;  %v524_v12 = vmul.f32 %v5109_v11, %v5411_v54 }
  0x55   : > { %v626_v58 = vsel %vm10420_vm0, %v623_v7, %v625_v5  ;;  %v10608_v33 = vrot.slane %v5441_v30, 1  ;;  %883 = vrot.lane.b32.xlu0 %v5547_v47, %s4987_s8  ;;  %v365_v36 = vadd.f32 %v347_v39, %v245_v43  ;;  %v244_v5 = vmul.f32 %v5096_v6, %v5401_v29 }
  0x56   : > { %v4861_v13 = vpop.eup %4860  ;;  %4862 = vtanh.f32 %v820_v3  ;;  %v644_v51 = vadd.f32 %v626_v58, %v525_v56  ;;  %v727_v53 = vsel %vm10419_vm1, %v724_v57, %v726_v46  ;;  %v10609_v11 = vrot.slane %v5450_v32, 2  ;;  %v10612_v58 = vld [vmem:[#allocation11_spill] sm:$0xff] }
  0x57   : > { %v624_v23 = vsel %vm10420_vm0, %v10608_v33, %v623_v7  ;;  %v835_v15 = vadd.f32 1.0, %v4861_v13  ;;  %v449_v59 = vsel %vm10419_vm1, %v446_v25, %v448_v34  ;;  %v10610_v37 = vrot.slane %v5426_v52, 1  ;;  %v10613_v33 = vld [vmem:[#allocation6_spill] sm:$0xff] }
  0x58   : > { %v643_v17 = vadd.f32 %v624_v23, %v524_v12  ;;  %v725_v30 = vsel %vm10419_vm1, %v10609_v11, %v724_v57  ;;  %v745_v49 = vadd.f32 %v727_v53, %v644_v51  ;;  %v261_v43 = vmul.f32 %v5261_v48, %v5178_v35 }
  0x59   : > { %v345_v21 = vsel %vm10420_vm0, %v10610_v37, %v344_v40  ;;  %v844_v46 = vmul.f32 0.5, %v835_v15  ;;  %v279_v27 = vrot.slane %v5393_v9, 1  ;;  %v541_v6 = vmul.f32 %v5157_v26, %v5241_v28 }
  0x5a   : > { %v744_v42 = vadd.f32 %v725_v30, %v643_v17  ;;  %v765_v32 = vadd.f32 %v5118_v14, %v745_v49  ;;  %v10611_v4 = vrot.slane %v5437_v1, 2  ;;  %v280_v56 = vrot.slane %v261_v43, 1  ;;  %v10614_v30 = vld [vmem:[#allocation7_spill] sm:$0xff] }
  0x5b   : > { %v558_v52 = vrot.slane %v540_v24, 1  ;;  %v5577_v0 = vmul.f32 %v844_v46, %v485_v62  ;;  %v559_v39 = vrot.slane %v541_v6, 1  ;;  %v649_v7 = vmul.f32 %v5194_v41, %v5241_v28 }
  0x5c   : > { %v447_v34 = vsel %vm10419_vm1, %v10611_v4, %v446_v25  ;;  %v764_v40 = vadd.f32 %v5118_v14, %v744_v42  ;;  %v4863_v9 = vpop.eup %4862  ;;  %v819_v3 = vmul.f32 0.5, %v765_v32  ;;  %v364_v57 = vadd.f32 %v345_v21, %v244_v5 }
  0x5d   : > { %v370_v12 = vmul.f32 %v10612_v58, %v5178_v35  ;;  %v5586_v1 = vmul.f32 %v5261_v48, %v10613_v33  ;;  %889 = vrot.lane.b32.xlu2 %v5577_v0, %s4987_s8  ;;  %v838_v24 = vadd.f32 1.0, %v4863_v9  ;;  %v281_v14 = vsel %vm10420_vm0, %v279_v27, %v280_v56  ;;  %v10615_v9 = vld [vmem:[#allocation8_spill] sm:$0xff] }
  0x5e   : > { %v818_v62 = vmul.f32 0.5, %v764_v40  ;;  %v560_v25 = vsel %vm10420_vm0, %v558_v52, %v559_v39  ;;  %v467_v23 = vadd.f32 %v449_v59, %v365_v36  ;;  %4864 = vtanh.f32 %v819_v3 }
  0x5f   : > { %v584_v13 = vadd.f32 %v560_v25, %v500_v31  ;;  %v665_v51 = vrot.slane %v649_v7, 2  ;;  %v847_v53 = vmul.f32 0.5, %v838_v24  ;;  %v282_v15 = vrot.slane %v5586_v1, 1  ;;  %v10616_v25 = vld [vmem:[#allocation9_spill] sm:$0xff] }
  0x60   : > { %4866 = vtanh.f32 %v818_v62  ;;  %v5595_v5 = vmul.f32 %v10612_v58, %v10613_v33  ;;  %v305_v17 = vadd.f32 %v281_v14, %v5382_v16  ;;  %v542_v49 = vmul.f32 %v5157_v26, %v10614_v30 }
  0x61   : > { %v689_v11 = vadd.f32 %v665_v51, %v584_v13  ;;  %v5600_v37 = vmul.f32 %v847_v53, %v488_v2  ;;  %v466_v36 = vadd.f32 %v447_v34, %v364_v57  ;;  %v387_v59 = vrot.slane %v370_v12, 2 }
  0x62   : > { %v501_v31 = vmul.f32 %v5147_v22, %v5241_v28  ;;  %v221_v43 = vmul.f32 %v5251_v60, %v5178_v35  ;;  %v561_v46 = vrot.slane %v542_v49, 1  ;;  %v650_v16 = vmul.f32 %v5194_v41, %v10614_v30 }
  0x63   : > { %v749_v21 = vadd.f32 %v5317_v55, %v689_v11  ;;  %895 = vrot.lane.b32.xlu1 %v5600_v37, %s4987_s8  ;;  %v487_v2 = vadd.f32 %v5107_v10, %v467_v23  ;;  %v283_v42 = vsel %vm10420_vm0, %v280_v56, %v282_v15  ;;  %v388_v27 = vrot.slane %v5595_v5, 2 }
  0x64   : > { %v4865_v6 = vpop.eup %4864  ;;  %v411_v28 = vadd.f32 %v387_v59, %v305_v17  ;;  %v562_v4 = vsel %vm10420_vm0, %v559_v39, %v561_v46  ;;  %v666_v34 = vrot.slane %v650_v16, 2  ;;  %v486_v40 = vadd.f32 %v5107_v10, %v466_v36 }
  0x65   : > { %v768_v32 = vmul.f32 0.5, %v749_v21  ;;  %v837_v52 = vadd.f32 1.0, %v4865_v6  ;;  %v585_v7 = vadd.f32 %v562_v4, %v501_v31  ;;  %v263_v3 = vmul.f32 %v5261_v48, %v10615_v9 }
  0x66   : > { %v4867_v35 = vpop.eup %4866  ;;  %v306_v12 = vadd.f32 %v283_v42, %v221_v43  ;;  %v667_v56 = vsel %vm10419_vm1, %v665_v51, %v666_v34  ;;  %v389_v24 = vsel %vm10419_vm1, %v387_v59, %v388_v27  ;;  %v5622_v39 = vmul.f32 %v10612_v58, %v10615_v9 }
  0x67   : > { %v836_v57 = vadd.f32 1.0, %v4867_v35  ;;  %4868 = vtanh.f32 %v768_v32  ;;  %v846_v1 = vmul.f32 0.5, %v837_v52  ;;  %v690_v62 = vadd.f32 %v667_v56, %v585_v7 }
  0x68   : > { %v471_v10 = vadd.f32 %v5340_v63, %v411_v28  ;;  %v543_v23 = vmul.f32 %v5157_v26, %v10616_v25  ;;  %v651_v13 = vmul.f32 %v5194_v41, %v10616_v25  ;;  %v284_v5 = vrot.slane %v263_v3, 1 }
  0x69   : > { %v845_v14 = vmul.f32 0.5, %v836_v57  ;;  %v5629_v53 = vmul.f32 %v846_v1, %v487_v2  ;;  %v750_v51 = vadd.f32 %v5317_v55, %v690_v62  ;;  %v502_v17 = vmul.f32 %v5147_v22, %v10614_v30 }
  0x6a   : > { %v412_v49 = vadd.f32 %v389_v24, %v306_v12  ;;  %v563_v36 = vrot.slane %v543_v23, 1  ;;  %v668_v59 = vrot.slane %v651_v13, 2  ;;  %v222_v21 = vmul.f32 %v5251_v60, %v10613_v33 }
  0x6b   : > { %v5634_v11 = vmul.f32 %v845_v14, %v486_v40  ;;  %893 = vrot.lane.b32.xlu0 %v5629_v53, %s4987_s8  ;;  %v769_v31 = vmul.f32 0.5, %v750_v51  ;;  %v285_v43 = vsel %vm10420_vm0, %v282_v15, %v284_v5  ;;  %v390_v16 = vrot.slane %v5622_v39, 2 }
  0x6c   : > { %v564_v30 = vsel %vm10420_vm0, %v561_v46, %v563_v36  ;;  %v669_v42 = vsel %vm10419_vm1, %v666_v34, %v668_v59  ;;  %v264_v6 = vmul.f32 %v5261_v48, %v5308_v45  ;;  %v544_v28 = vmul.f32 %v5157_v26, %v5325_v50 }
  0x6d   : > { %v4869_v2 = vpop.eup %4868  ;;  %891 = vrot.lane.b32.xlu2 %v5634_v11, %s4987_s8  ;;  %4870 = vtanh.f32 %v769_v31  ;;  %v586_v33 = vadd.f32 %v564_v30, %v502_v17  ;;  %v503_v15 = vmul.f32 %v5147_v22, %v10616_v25  ;;  %v472_v4 = vadd.f32 %v5340_v63, %v412_v49 }
  0x6e   : > { %v786_v32 = vadd.f32 1.0, %v4869_v2  ;;  %v565_v35 = vrot.slane %v544_v28, 1  ;;  %v652_v46 = vmul.f32 %v5194_v41, %v5325_v50  ;;  %v391_v34 = vsel %vm10419_vm1, %v388_v27, %v390_v16 }
  0x6f   : > { %v691_v40 = vadd.f32 %v669_v42, %v586_v33  ;;  %v5658_v7 = vmul.f32 %v5261_v48, %v5401_v29  ;;  %v307_v3 = vadd.f32 %v285_v43, %v222_v21  ;;  %v373_v57 = vmul.f32 %v10612_v58, %v5308_v45 }
  0x70   : > { %v795_v52 = vmul.f32 0.5, %v786_v32  ;;  %v566_v12 = vsel %vm10420_vm0, %v563_v36, %v565_v35  ;;  %v670_v56 = vrot.slane %v652_v46, 2  ;;  %v286_v62 = vrot.slane %v264_v6, 1 }
  0x71   : > { %v751_v24 = vadd.f32 %v5317_v55, %v691_v40  ;;  %v587_v39 = vadd.f32 %v566_v12, %v503_v15  ;;  %v223_v27 = vmul.f32 %v5251_v60, %v10615_v9  ;;  %v288_v25 = vrot.slane %v5658_v7, 1 }
  0x72   : > { %v5663_v1 = vmul.f32 %v795_v52, %v471_v10  ;;  %v671_v14 = vsel %vm10419_vm1, %v668_v59, %v670_v56  ;;  %v5672_v23 = vmul.f32 %v10612_v58, %v5401_v29  ;;  %v287_v51 = vsel %vm10420_vm0, %v284_v5, %v286_v62 }
  0x73   : > { %v4871_v13 = vpop.eup %4870  ;;  %v770_v10 = vmul.f32 0.5, %v751_v24  ;;  %v692_v17 = vadd.f32 %v671_v14, %v587_v39  ;;  %v545_v49 = vmul.f32 %v5157_v26, %v5411_v54  ;;  %v392_v36 = vrot.slane %v373_v57, 2 }
  0x74   : > { %917 = vrot.lane.b32.xlu0 %v5663_v1, %s4987_s8  ;;  %v787_v9 = vadd.f32 1.0, %v4871_v13  ;;  %v504_v59 = vmul.f32 %v5147_v22, %v5325_v50  ;;  %v653_v31 = vmul.f32 %v5194_v41, %v5411_v54  ;;  %v224_v43 = vmul.f32 %v5251_v60, %v5308_v45 }
  0x75   : > { %4872 = vtanh.f32 %v770_v10  ;;  %v752_v21 = vadd.f32 %v5317_v55, %v692_v17  ;;  %v567_v2 = vrot.slane %v545_v49, 1  ;;  %v289_v30 = vsel %vm10420_vm0, %v286_v62, %v288_v25 }
  0x76   : > { %v796_v5 = vmul.f32 0.5, %v787_v9  ;;  %v394_v42 = vrot.slane %v5672_v23, 2  ;;  %v672_v6 = vrot.slane %v653_v31, 2  ;;  %v413_v28 = vadd.f32 %v391_v34, %v307_v3 }
  0x77   : > { %v308_v32 = vadd.f32 %v287_v51, %v223_v27  ;;  %v771_v33 = vmul.f32 0.5, %v752_v21  ;;  %v568_v50 = vsel %vm10420_vm0, %v565_v35, %v567_v2  ;;  %v393_v46 = vsel %vm10419_vm1, %v390_v16, %v392_v36 }
  0x78   : > { %v5689_v15 = vmul.f32 %v796_v5, %v472_v4  ;;  %v588_v52 = vadd.f32 %v568_v50, %v504_v59  ;;  %v673_v40 = vsel %vm10419_vm1, %v670_v56, %v672_v6  ;;  %v309_v45 = vadd.f32 %v289_v30, %v224_v43 }
  0x79   : > { %4874 = vtanh.f32 %v771_v33  ;;  %v395_v34 = vsel %vm10419_vm1, %v392_v36, %v394_v42  ;;  %v546_v35 = vmul.f32 %v5157_v26, %v5521_v8  ;;  %v654_v4 = vmul.f32 %v5194_v41, %v5521_v8 }
  0x7a   : > { %919 = vrot.lane.b32.xlu1 %v5689_v15, %s4987_s8  ;;  %v693_v7 = vadd.f32 %v673_v40, %v588_v52  ;;  %v473_v3 = vadd.f32 %v5340_v63, %v413_v28  ;;  %v414_v57 = vadd.f32 %v393_v46, %v308_v32  ;;  %v266_v12 = vmul.f32 %v5261_v48, %v5484_v20 }
  0x7b   : > { %v4873_v16 = vpop.eup %4872  ;;  %v505_v56 = vmul.f32 %v5147_v22, %v5411_v54  ;;  %v569_v39 = vrot.slane %v546_v35, 1  ;;  %v674_v27 = vrot.slane %v654_v4, 2  ;;  %v415_v14 = vadd.f32 %v395_v34, %v309_v45 }
  0x7c   : > { %v788_v24 = vadd.f32 1.0, %v4873_v16  ;;  %v753_v62 = vadd.f32 %v5317_v55, %v693_v7  ;;  %v474_v9 = vadd.f32 %v5340_v63, %v414_v57  ;;  %v225_v36 = vmul.f32 %v5251_v60, %v5401_v29 }
  0x7d   : > { %v570_v51 = vsel %vm10420_vm0, %v567_v2, %v569_v39  ;;  %v675_v17 = vsel %vm10419_vm1, %v672_v6, %v674_v27  ;;  %v290_v59 = vrot.slane %v266_v12, 1  ;;  %v375_v43 = vmul.f32 %v10612_v58, %v5484_v20 }
  0x7e   : > { %v797_v13 = vmul.f32 0.5, %v788_v24  ;;  %v772_v10 = vmul.f32 0.5, %v753_v62  ;;  %v589_v54 = vadd.f32 %v570_v51, %v505_v56  ;;  %v547_v30 = vmul.f32 %v5157_v26, %v5465_v38 }
  0x7f   : > { %v4875_v49 = vpop.eup %4874  ;;  %v291_v5 = vsel %vm10420_vm0, %v288_v25, %v290_v59  ;;  %v655_v6 = vmul.f32 %v5194_v41, %v5465_v38  ;;  %v475_v28 = vadd.f32 %v5340_v63, %v415_v14  ;;  %v506_v32 = vmul.f32 %v5147_v22, %v5521_v8  ;;  %v10617_v8 = vld [vmem:[#allocation12_spill] sm:$0xff] }
  0x80   : > { %v5713_v31 = vmul.f32 %v797_v13, %v473_v3  ;;  %v789_v21 = vadd.f32 1.0, %v4875_v49  ;;  %4876 = vtanh.f32 %v772_v10  ;;  %v694_v2 = vadd.f32 %v675_v17, %v589_v54 }
  0x81   : > { %v267_v25 = vmul.f32 %v5261_v48, %v5454_v19  ;;  %v571_v50 = vrot.slane %v547_v30, 1  ;;  %v676_v46 = vrot.slane %v655_v6, 2  ;;  %v310_v52 = vadd.f32 %v291_v5, %v225_v36 }
  0x82   : > { %921 = vrot.lane.b32.xlu2 %v5713_v31, %s4987_s8  ;;  %v798_v29 = vmul.f32 0.5, %v789_v21  ;;  %v754_v33 = vadd.f32 %v5317_v55, %v694_v2  ;;  %v396_v41 = vrot.slane %v375_v43, 2  ;;  %v507_v40 = vmul.f32 %v5147_v22, %v5465_v38  ;;  %v10619_v22 = vld [vmem:[#allocation14_spill] sm:$0xff] }
  0x83   : > { %v572_v34 = vsel %vm10420_vm0, %v569_v39, %v571_v50  ;;  %v677_v7 = vsel %vm10419_vm1, %v674_v27, %v676_v46  ;;  %v10618_v35 = vrot.slane %v10617_v8, 1  ;;  %v10620_v38 = vrot.slane %v10619_v22, 2 }
  0x84   : > { %v5730_v26 = vmul.f32 %v798_v29, %v474_v9  ;;  %v773_v45 = vmul.f32 0.5, %v754_v33  ;;  %v397_v48 = vsel %vm10419_vm1, %v394_v42, %v396_v41  ;;  %v590_v3 = vadd.f32 %v572_v34, %v506_v32 }
  0x85   : > { %v574_v4 = vsel %vm10420_vm0, %v571_v50, %v10618_v35  ;;  %v679_v12 = vsel %vm10419_vm1, %v676_v46, %v10620_v38  ;;  %v292_v24 = vrot.slane %v267_v25, 1  ;;  %v376_v62 = vmul.f32 %v10612_v58, %v5454_v19  ;;  %v10621_v58 = vld [vmem:[#allocation10_spill] sm:$0xff] }
  0x86   : > { %v4877_v16 = vpop.eup %4876  ;;  %923 = vrot.lane.b32.xlu0 %v5730_v26, %s4987_s8  ;;  %v591_v57 = vadd.f32 %v574_v4, %v507_v40  ;;  %4878 = vtanh.f32 %v773_v45  ;;  %v695_v39 = vadd.f32 %v677_v7, %v590_v3  ;;  %v416_v13 = vadd.f32 %v397_v48, %v310_v52 }
  0x87   : > { %v790_v56 = vadd.f32 1.0, %v4877_v16  ;;  %v226_v23 = vmul.f32 %v5251_v60, %v5484_v20  ;;  %v293_v42 = vsel %vm10420_vm0, %v290_v59, %v292_v24  ;;  %v227_v51 = vmul.f32 %v5251_v60, %v5454_v19  ;;  %v10623_v19 = vld [vmem:[#allocation13_spill] sm:$0xff] }
  0x88   : > { %v696_v27 = vadd.f32 %v679_v12, %v591_v57  ;;  %v755_v10 = vadd.f32 %v5317_v55, %v695_v39  ;;  %v398_v9 = vrot.slane %v376_v62, 2  ;;  %v10622_v36 = vrot.slane %v10621_v58, 1 }
  0x89   : > { %v799_v14 = vmul.f32 0.5, %v790_v56  ;;  %v476_v20 = vadd.f32 %v5340_v63, %v416_v13  ;;  %v311_v59 = vadd.f32 %v293_v42, %v226_v23  ;;  %v10624_v30 = vrot.slane %v10623_v19, 2 }
  0x8a   : > { %v756_v17 = vadd.f32 %v5317_v55, %v696_v27  ;;  %v295_v54 = vsel %vm10420_vm0, %v292_v24, %v10622_v36  ;;  %v774_v21 = vmul.f32 0.5, %v755_v10  ;;  %v399_v60 = vsel %vm10419_vm1, %v396_v41, %v398_v9  ;;  %v10631_v10 = vld [vmem:[#allocation15_spill] sm:$0xff]  ;;  %v10632_v36 = vld [vmem:[#allocation16_spill] sm:$0xff] }
  0x8b   : > { %v5756_v49 = vmul.f32 %v799_v14, %v475_v28  ;;  %v312_v55 = vadd.f32 %v295_v54, %v227_v51  ;;  %v401_v6 = vsel %vm10419_vm1, %v398_v9, %v10624_v30  ;;  %v417_v28 = vadd.f32 %v399_v60, %v311_v59 }
  0x8c   : > { %v775_v43 = vmul.f32 0.5, %v756_v17  ;;  %v4879_v5 = vpop.eup %4878  ;;  %4880 = vtanh.f32 %v774_v21  ;;  %v173_v50 = vlaneseq  ;;  %v10625_v57 = vmov 0 }
  0x8d   : > { %925 = vrot.lane.b32.xlu1 %v5756_v49, %s4987_s8  ;;  %v791_v2 = vadd.f32 1.0, %v4879_v5  ;;  %v418_v33 = vadd.f32 %v401_v6, %v312_v55  ;;  %v477_v52 = vadd.f32 %v5340_v63, %v417_v28  ;;  %v10628_v22 = vmov 0 }
  0x8e   : > { %4882 = vtanh.f32 %v775_v43  ;;  %v5774_v8 = vand.u32 127, %v173_v50 }
  0x8f   : > { %v800_v29 = vmul.f32 0.5, %v791_v2  ;;  %v478_v40 = vadd.f32 %v5340_v63, %v418_v33 }
  0x90   : > { %v5785_v48 = vadd.s32 128, %v5774_v8  ;;  %v858_v3 = vand.u32 255, %v5774_v8  ;;  %vm1024_vm13 = vcmp.ge.s32.totalorder %v5774_v8, 32  ;;  %vm1026_vm14 = vcmp.lt.s32.totalorder %v5774_v8, 64 }
  0x91   : > { %v5768_v32 = vmul.f32 %v800_v29, %v476_v20  ;;  %vm1018_vm15 = vcmp.ge.s32.totalorder %v5774_v8, 64 }
  0x92   : > { %v4881_v25 = vpop.eup %4880  ;;  %v859_v63 = vand.u32 255, %v5785_v48  ;;  %vm5793_vm4 = vcmp.ge.s32.totalorder %v858_v3, 64  ;;  %v10642_v3 = vmov 0 }
  0x93   : > { %927 = vrot.lane.b32.xlu2 %v5768_v32, %s4987_s8  ;;  %v792_v41 = vadd.f32 1.0, %v4881_v25  ;;  %v10629_v22 = vsel %vm5793_vm4, 4294967295, %v10628_v22 }
  0x94   : > { %v4883_v46 = vpop.eup %4882  ;;  %vm5789_vm3 = vcmp.lt.s32.totalorder %v859_v63, 192  ;;  %10630 = vst [vmem:[#allocation6_spill] sm:$0xff] %v10629_v22  ;;  %v10639_v63 = vmov 0 }
  0x95   : > { %v793_v45 = vadd.f32 1.0, %v4883_v46  ;;  %v801_v34 = vmul.f32 0.5, %v792_v41  ;;  %v10626_v57 = vsel %vm5789_vm3, 4294967295, %v10625_v57  ;;  %v1017_v41 = vand.u32 127, %v5785_v48 }
  0x96   : > { %10627 = vst [vmem:[#allocation11_spill] sm:$0xff] %v10626_v57 }
  0x97   : > { %v802_v7 = vmul.f32 0.5, %v793_v45  ;;  %v5776_v35 = vmul.f32 %v801_v34, %v477_v52  ;;  %vm1019_vm7 = vcmp.ge.s32.totalorder %v1017_v41, 64  ;;  %vm1021_vm8 = vcmp.lt.s32.totalorder %v1017_v41, 96 }
  0x98   : > { %vm1025_vm9 = vcmp.ge.s32.totalorder %v1017_v41, 32  ;;  %vm1027_vm10 = vcmp.lt.s32.totalorder %v1017_v41, 64  ;;  %vm5948_vm11 = vmand %vm1019_vm7, %vm1021_vm8  ;;  %v10633_v45 = vmov 0  ;;  %v10636_v34 = vmov 0 }
  0x99   : > { %v5778_v4 = vmul.f32 %v802_v7, %v478_v40  ;;  %929 = vrot.lane.b32.xlu0 %v5776_v35, %s4987_s8  ;;  %v10634_v45 = vsel %vm5948_vm11, 4294967295, %v10633_v45  ;;  %vm5952_vm12 = vmand %vm1025_vm9, %vm1027_vm10  ;;  %vm1020_vm7 = vcmp.lt.s32.totalorder %v5774_v8, 96  ;;  %vm10432_vm10 = vcmask 916480  }
  0x9a   : > { %10635 = vst [vmem:[#allocation7_spill] sm:$0xff] %v10634_v45  ;;  %v10637_v34 = vsel %vm5952_vm12, 4294967295, %v10636_v34  ;;  %vm5975_vm8 = vmand %vm1024_vm13, %vm1026_vm14 }
  0x9b   : > { %931 = vrot.lane.b32.xlu1 %v5778_v4, %s4987_s8  ;;  %v898_v16 = vpop.permute.xlu2 %897  ;;  %10638 = vst [vmem:[#allocation8_spill] sm:$0xff] %v10637_v34  ;;  %v10640_v63 = vsel %vm5975_vm8, 4294967295, %v10639_v63  ;;  %vm5979_vm9 = vmand %vm1018_vm15, %vm1020_vm7 }
  0x9c   : > { %10641 = vst [vmem:[#allocation9_spill] sm:$0xff] %v10640_v63  ;;  %v10643_v3 = vsel %vm5979_vm9, 4294967295, %v10642_v3 }
  0x9d   : > { %10644 = vst [vmem:[#allocation12_spill] sm:$0xff] %v10643_v3 }
  0xa3   : > { %v934_v38 = vpop.permute.xlu2 %933 }
  0xa4   : > { %v944_v12 = vsel %vm10418_vm2, %v934_v38, %v898_v16 }
  0xa5   : > { %v5801_v56 = vsel %vm5789_vm3, %v944_v12, %v5413_v18  ;;  %v5806_v24 = vsel %vm5793_vm4, %v944_v12, %v5486_v44 }
  0xa6   : > { %1055 = vrot.lane.b32.xlu2 %v5801_v56, %s4988_s9  ;;  %1162 = vrot.lane.b32.xlu1 %v5806_v24, %s4989_s10 }
  0xaa   : > { %v886_v39 = vpop.permute.xlu1 %885 }
  0xae   : > { %1091 = vrot.lane.b32.xlu2 %v5806_v24, %s4988_s9 }
  0xb6   : > { %1164 = vrot.lane.b32.xlu2 %v5801_v56, %s4989_s10 }
  0xb7   : > { %v890_v18 = vpop.permute.xlu2 %889 }
  0xb8   : > { %v882_v62 = vpop.permute.xlu0 %881 }
  0xc3   : > { %v888_v14 = vpop.permute.xlu1 %887 }
  0xc7   : > { %v892_v27 = vpop.permute.xlu2 %891  ;;  %v884_v44 = vpop.permute.xlu0 %883 }
  0xd5   : > { %v896_v17 = vpop.permute.xlu1 %895 }
  0xdc   : > { %v922_v13 = vpop.permute.xlu2 %921 }
  0xdd   : > { %v938_v23 = vsel %vm10418_vm2, %v922_v13, %v886_v39  ;;  %v894_v42 = vpop.permute.xlu0 %893 }
  0xde   : > { %v5820_v51 = vsel %vm5789_vm3, %v938_v23, %v10631_v10  ;;  %v5851_v60 = vsel %vm5793_vm4, %v938_v23, %v5713_v31 }
  0xdf   : > { %1043 = vrot.lane.b32.xlu2 %v5820_v51, %s4988_s9 }
  0xe6   : > { %v918_v9 = vpop.permute.xlu0 %917 }
  0xe7   : > { %v936_v58 = vsel %vm10418_vm2, %v918_v9, %v882_v62 }
  0xe8   : > { %v5828_v54 = vsel %vm5789_vm3, %v936_v58, %v10632_v36 }
  0xe9   : > { %1039 = vrot.lane.b32.xlu0 %v5828_v54, %s4988_s9 }
  0xec   : > { %v920_v21 = vpop.permute.xlu1 %919 }
  0xed   : > { %v937_v43 = vsel %vm10418_vm2, %v920_v21, %v884_v44  ;;  %v928_v5 = vpop.permute.xlu2 %927 }
  0xee   : > { %v5836_v20 = vsel %vm5789_vm3, %v937_v43, %v5547_v47  ;;  %v941_v59 = vsel %vm10418_vm2, %v928_v5, %v892_v27 }
  0xef   : > { %1041 = vrot.lane.b32.xlu1 %v5836_v20, %s4988_s9  ;;  %v5844_v2 = vsel %vm5789_vm3, %v941_v59, %v5634_v11  ;;  %v5866_v11 = vsel %vm5793_vm4, %v941_v59, %v5768_v32 }
  0xf0   : > { %1049 = vrot.lane.b32.xlu2 %v5844_v2, %s4988_s9 }
  0xf8   : > { %v924_v47 = vpop.permute.xlu0 %923  ;;  %1079 = vrot.lane.b32.xlu2 %v5851_v60, %s4988_s9 }
  0xf9   : > { %v939_v55 = vsel %vm10418_vm2, %v924_v47, %v888_v14 }
  0xfa   : > { %v5859_v19 = vsel %vm5789_vm3, %v939_v55, %v5528_v61  ;;  %v5881_v61 = vsel %vm5793_vm4, %v937_v43, %v5689_v15  ;;  %v5922_v50 = vsel %vm5793_vm4, %v939_v55, %v5730_v26 }
  0xfb   : > { %1045 = vrot.lane.b32.xlu0 %v5859_v19, %s4988_s9 }
  0xff   : > { %v926_v31 = vpop.permute.xlu1 %925 }
 0x100   : > { %v940_v30 = vsel %vm10418_vm2, %v926_v31, %v890_v18  ;;  %1085 = vrot.lane.b32.xlu2 %v5866_v11, %s4988_s9  ;;  %v1056_v25 = vpop.permute.xlu2 %1055 }
 0x101   : > { %v5874_v6 = vsel %vm5789_vm3, %v940_v30, %v5577_v0 }
 0x102   : > { %1047 = vrot.lane.b32.xlu1 %v5874_v6, %s4988_s9 }
 0x108   : > { %1134 = vrot.lane.b32.xlu2 %v5881_v61, %s4989_s10 }
 0x10b   : > { %v930_v29 = vpop.permute.xlu0 %929 }
 0x10c   : > { %v942_v28 = vsel %vm10418_vm2, %v930_v29, %v894_v42 }
 0x10d   : > { %v932_v32 = vpop.permute.xlu1 %931  ;;  %v5890_v0 = vsel %vm5789_vm3, %v942_v28, %v5629_v53  ;;  %v5906_v53 = vsel %vm5793_vm4, %v936_v58, %v5663_v1  ;;  %v1092_v1 = vpop.permute.xlu2 %1091 }
 0x10e   : > { %v943_v33 = vsel %vm10418_vm2, %v932_v32, %v896_v17  ;;  %1051 = vrot.lane.b32.xlu0 %v5890_v0, %s4988_s9  ;;  %v1102_v7 = vsel %vm10416_vm6, %v1092_v1, %v1056_v25  ;;  %v1129_v12 = vsel %vm10416_vm6, %v1056_v25, %v1092_v1 }
 0x10f   : > { %v5897_v15 = vsel %vm5789_vm3, %v943_v33, %v5600_v37  ;;  %v5913_v37 = vsel %vm5793_vm4, %v940_v30, %v5756_v49  ;;  %v5933_v49 = vsel %vm5793_vm4, %v942_v28, %v5776_v35  ;;  %v5940_v26 = vsel %vm5793_vm4, %v943_v33, %v5778_v4 }
 0x110   : > { %1053 = vrot.lane.b32.xlu1 %v5897_v15, %s4988_s9  ;;  %1140 = vrot.lane.b32.xlu2 %v5820_v51, %s4989_s10 }
 0x115   : > { %v1165_v46 = vpop.permute.xlu2 %1164 }
 0x116   : > { %1075 = vrot.lane.b32.xlu0 %v5906_v53, %s4988_s9 }
 0x118   : > { %1077 = vrot.lane.b32.xlu1 %v5881_v61, %s4988_s9  ;;  %1146 = vrot.lane.b32.xlu2 %v5913_v37, %s4989_s10  ;;  %v1163_v52 = vpop.permute.xlu1 %1162 }
 0x119   : > { %v1211_v40 = vsel %vm10417_vm5, %v1165_v46, %v1163_v52  ;;  %v1175_v16 = vsel %vm10417_vm5, %v1163_v52, %v1165_v46 }
 0x11a   : > { %v1233_v35 = vsel %vm5952_vm12, %v1211_v40, %v5801_v56  ;;  %v1232_v38 = vsel %vm5975_vm8, %v1175_v16, %v5806_v24 }
 0x11b   : > { %v5962_v4 = vsel %vm5948_vm11, %v1102_v7, %v1233_v35  ;;  %v5991_v56 = vsel %vm5979_vm9, %v1129_v12, %v1232_v38 }
 0x11e   : > { %1081 = vrot.lane.b32.xlu0 %v5922_v50, %s4988_s9 }
 0x120   : > { %1083 = vrot.lane.b32.xlu1 %v5913_v37, %s4988_s9  ;;  %1152 = vrot.lane.b32.xlu2 %v5844_v2, %s4989_s10 }
 0x126   : > { %1087 = vrot.lane.b32.xlu0 %v5933_v49, %s4988_s9 }
 0x128   : > { %1089 = vrot.lane.b32.xlu1 %v5940_v26, %s4988_s9  ;;  %1158 = vrot.lane.b32.xlu2 %v5940_v26, %s4989_s10 }
 0x12e   : > { %1130 = vrot.lane.b32.xlu0 %v5906_v53, %s4989_s10 }
 0x130   : > { %1132 = vrot.lane.b32.xlu1 %v5828_v54, %s4989_s10  ;;  %1295 = vrot.lane.b32.xlu2 %v5962_v4, %s4990_s11 }
 0x136   : > { %1136 = vrot.lane.b32.xlu0 %v5836_v20, %s4989_s10 }
 0x138   : > { %1138 = vrot.lane.b32.xlu1 %v5851_v60, %s4989_s10  ;;  %1331 = vrot.lane.b32.xlu2 %v5991_v56, %s4990_s11 }
 0x139   : > { %v1044_v62 = vpop.permute.xlu2 %1043 }
 0x13e   : > { %1142 = vrot.lane.b32.xlu0 %v5922_v50, %s4989_s10 }
 0x140   : > { %1144 = vrot.lane.b32.xlu1 %v5859_v19, %s4989_s10  ;;  %1404 = vrot.lane.b32.xlu2 %v5962_v4, %s4991_s17 }
 0x146   : > { %1148 = vrot.lane.b32.xlu0 %v5874_v6, %s4989_s10 }
 0x148   : > { %1150 = vrot.lane.b32.xlu1 %v5866_v11, %s4989_s10 }
 0x14a   : > { %v6023_v44 = vpop.permute.xlu2 %1049 }
 0x14e   : > { %1154 = vrot.lane.b32.xlu0 %v5933_v49, %s4989_s10 }
 0x150   : > { %1156 = vrot.lane.b32.xlu1 %v5890_v0, %s4989_s10 }
 0x152   : > { %v1080_v23 = vpop.permute.xlu2 %1079 }
 0x153   : > { %v1096_v46 = vsel %vm10416_vm6, %v1080_v23, %v1044_v62 }
 0x156   : > { %1160 = vrot.lane.b32.xlu0 %v5897_v15, %s4989_s10 }
 0x158   : > { %1402 = vrot.lane.b32.xlu1 %v5991_v56, %s4991_s17 }
 0x15a   : > { %v6035_v9 = vpop.permute.xlu2 %1085 }
 0x15b   : > { %v6015_v24 = vpop.permute.xlu0 %1039 }
 0x161   : > { %v6017_v18 = vpop.permute.xlu1 %1041 }
 0x162   : > { %v6043_v43 = vpop.permute.xlu2 %1134 }
 0x16a   : > { %v1141_v29 = vpop.permute.xlu2 %1140 }
 0x16d   : > { %v6019_v39 = vpop.permute.xlu0 %1045 }
 0x174   : > { %v6021_v27 = vpop.permute.xlu1 %1047 }
 0x180   : > { %v6025_v14 = vpop.permute.xlu0 %1051 }
 0x182   : > { %v6027_v13 = vpop.permute.xlu1 %1053 }
 0x188   : > { %v6029_v42 = vpop.permute.xlu0 %1075 }
 0x189   : > { %v1094_v55 = vsel %vm10416_vm6, %v6029_v42, %v6015_v24 }
 0x18a   : > { %v6031_v10 = vpop.permute.xlu1 %1077 }
 0x18b   : > { %v1095_v25 = vsel %vm10416_vm6, %v6031_v10, %v6017_v18 }
 0x190   : > { %v6033_v17 = vpop.permute.xlu0 %1081 }
 0x191   : > { %v1097_v38 = vsel %vm10416_vm6, %v6033_v17, %v6019_v39 }
 0x192   : > { %v6037_v58 = vpop.permute.xlu1 %1083 }
 0x198   : > { %v6039_v36 = vpop.permute.xlu0 %1087 }
 0x19a   : > { %v6041_v21 = vpop.permute.xlu1 %1089 }
 0x1a0   : > { %v1131_v5 = vpop.permute.xlu0 %1130 }
 0x1a2   : > { %v1133_v59 = vpop.permute.xlu1 %1132 }
 0x1a3   : > { %v1203_v47 = vsel %vm10417_vm5, %v1133_v59, %v1131_v5 }
 0x1a4   : > { %v1217_v31 = vsel %vm5952_vm12, %v1203_v47, %v5828_v54 }
 0x1a5   : > { %v6054_v30 = vsel %vm5948_vm11, %v1094_v55, %v1217_v31 }
 0x1a6   : > { %1279 = vrot.lane.b32.xlu0 %v6054_v30, %s4990_s11 }
 0x1a8   : > { %v1137_v28 = vpop.permute.xlu0 %1136 }
 0x1a9   : > { %v1204_v32 = vsel %vm10417_vm5, %v1137_v28, %v6043_v43 }
 0x1aa   : > { %v1139_v33 = vpop.permute.xlu1 %1138  ;;  %v1219_v54 = vsel %vm5952_vm12, %v1204_v32, %v5836_v20  ;;  %v1147_v20 = vpop.permute.xlu2 %1146 }
 0x1ab   : > { %v1205_v1 = vsel %vm10417_vm5, %v1141_v29, %v1139_v33  ;;  %v6070_v52 = vsel %vm5948_vm11, %v1095_v25, %v1219_v54  ;;  %v1098_v25 = vsel %vm10416_vm6, %v6037_v58, %v6021_v27  ;;  %v1099_v54 = vsel %vm10416_vm6, %v6035_v9, %v6023_v44 }
 0x1ac   : > { %v1221_v41 = vsel %vm5952_vm12, %v1205_v1, %v5820_v51  ;;  %1281 = vrot.lane.b32.xlu1 %v6070_v52, %s4990_s11 }
 0x1ad   : > { %v6079_v40 = vsel %vm5948_vm11, %v1096_v46, %v1221_v41 }
 0x1ae   : > { %1283 = vrot.lane.b32.xlu2 %v6079_v40, %s4990_s11 }
 0x1b0   : > { %v1143_v7 = vpop.permute.xlu0 %1142 }
 0x1b2   : > { %v1145_v35 = vpop.permute.xlu1 %1144  ;;  %v1153_v55 = vpop.permute.xlu2 %1152 }
 0x1b3   : > { %v1206_v16 = vsel %vm10417_vm5, %v1145_v35, %v1143_v7 }
 0x1b4   : > { %v1223_v51 = vsel %vm5952_vm12, %v1206_v16, %v5859_v19 }
 0x1b5   : > { %v6092_v12 = vsel %vm5948_vm11, %v1097_v38, %v1223_v51 }
 0x1b6   : > { %1285 = vrot.lane.b32.xlu0 %v6092_v12, %s4990_s11 }
 0x1b8   : > { %v1149_v47 = vpop.permute.xlu0 %1148 }
 0x1b9   : > { %v1207_v31 = vsel %vm10417_vm5, %v1149_v47, %v1147_v20 }
 0x1ba   : > { %v1151_v32 = vpop.permute.xlu1 %1150  ;;  %v1225_v19 = vsel %vm5952_vm12, %v1207_v31, %v5874_v6  ;;  %v1169_v6 = vsel %vm10417_vm5, %v1139_v33, %v1141_v29 }
 0x1bb   : > { %v1208_v1 = vsel %vm10417_vm5, %v1153_v55, %v1151_v32  ;;  %v6109_v46 = vsel %vm5948_vm11, %v1098_v25, %v1225_v19  ;;  %v1220_v31 = vsel %vm5975_vm8, %v1169_v6, %v5851_v60  ;;  %v1123_v25 = vsel %vm10416_vm6, %v1044_v62, %v1080_v23  ;;  %v1159_v23 = vpop.permute.xlu2 %1158 }
 0x1bc   : > { %v1227_v41 = vsel %vm5952_vm12, %v1208_v1, %v5844_v2  ;;  %1287 = vrot.lane.b32.xlu1 %v6109_v46, %s4990_s11  ;;  %v1100_v1 = vsel %vm10416_vm6, %v6039_v36, %v6025_v14  ;;  %v6136_v29 = vsel %vm5979_vm9, %v1123_v25, %v1220_v31  ;;  %v1167_v60 = vsel %vm10417_vm5, %v1131_v5, %v1133_v59 }
 0x1bd   : > { %v6118_v16 = vsel %vm5948_vm11, %v1099_v54, %v1227_v41  ;;  %v1172_v62 = vsel %vm10417_vm5, %v1151_v32, %v1153_v55  ;;  %v1216_v6 = vsel %vm5975_vm8, %v1167_v60, %v5906_v53  ;;  %v1101_v31 = vsel %vm10416_vm6, %v6041_v21, %v6027_v13 }
 0x1be   : > { %1289 = vrot.lane.b32.xlu2 %v6118_v16, %s4990_s11  ;;  %v1226_v41 = vsel %vm5975_vm8, %v1172_v62, %v5866_v11  ;;  %v1126_v59 = vsel %vm10416_vm6, %v6023_v44, %v6035_v9  ;;  %v1121_v11 = vsel %vm10416_vm6, %v6015_v24, %v6029_v42  ;;  %v1168_v44 = vsel %vm10417_vm5, %v6043_v43, %v1137_v28 }
 0x1bf   : > { %v6175_v53 = vsel %vm5979_vm9, %v1126_v59, %v1226_v41  ;;  %v1170_v24 = vsel %vm10417_vm5, %v1143_v7, %v1145_v35  ;;  %v1218_v42 = vsel %vm5975_vm8, %v1168_v44, %v5881_v61  ;;  %v1122_v43 = vsel %vm10416_vm6, %v6017_v18, %v6031_v10 }
 0x1c0   : > { %v1155_v38 = vpop.permute.xlu0 %1154  ;;  %v1222_v9 = vsel %vm5975_vm8, %v1170_v24, %v5922_v50  ;;  %v1124_v28 = vsel %vm10416_vm6, %v6019_v39, %v6033_v17  ;;  %v6202_v32 = vsel %vm5979_vm9, %v1122_v43, %v1218_v42  ;;  %v1171_v50 = vsel %vm10417_vm5, %v1147_v20, %v1149_v47 }
 0x1c1   : > { %v6208_v61 = vsel %vm5979_vm9, %v1124_v28, %v1222_v9  ;;  %v1224_v39 = vsel %vm5975_vm8, %v1171_v50, %v5913_v37  ;;  %v1125_v17 = vsel %vm10416_vm6, %v6021_v27, %v6037_v58  ;;  %v1127_v20 = vsel %vm10416_vm6, %v6025_v14, %v6039_v36 }
 0x1c2   : > { %v1157_v51 = vpop.permute.xlu1 %1156  ;;  %v6230_v7 = vsel %vm5979_vm9, %v1125_v17, %v1224_v39  ;;  %v1128_v58 = vsel %vm10416_vm6, %v6027_v13, %v6041_v21  ;;  %v10651_v60 = vmov 0  ;;  %v10654_v62 = vmov 0 }
 0x1c3   : > { %v1209_v2 = vsel %vm10417_vm5, %v1157_v51, %v1155_v38  ;;  %v1173_v18 = vsel %vm10417_vm5, %v1155_v38, %v1157_v51  ;;  %v1296_v14 = vpop.permute.xlu2 %1295  ;;  %v10645_v38 = vmov 0  ;;  %v1256_v51 = vand.u32 63, %v5774_v8 }
 0x1c4   : > { %v1229_v19 = vsel %vm5952_vm12, %v1209_v2, %v5890_v0  ;;  %v1228_v10 = vsel %vm5975_vm8, %v1173_v18, %v5933_v49  ;;  %v10648_v2 = vmov 0 }
 0x1c5   : > { %v6140_v33 = vsel %vm5948_vm11, %v1100_v1, %v1229_v19  ;;  %v6236_v37 = vsel %vm5979_vm9, %v1127_v20, %v1228_v10  ;;  %vm1264_vm1 = vcmp.ge.s32.totalorder %v1256_v51, 16  ;;  %vm1266_vm0 = vcmp.lt.s32.totalorder %v1256_v51, 32 }
 0x1c6   : > { %1319 = vrot.lane.b32.xlu2 %v6136_v29, %s4990_s11  ;;  %1291 = vrot.lane.b32.xlu0 %v6140_v33, %s4990_s11 }
 0x1c8   : > { %v1161_v0 = vpop.permute.xlu0 %1160 }
 0x1c9   : > { %v1210_v54 = vsel %vm10417_vm5, %v1161_v0, %v1159_v23  ;;  %v1174_v49 = vsel %vm10417_vm5, %v1159_v23, %v1161_v0  ;;  %vm10431_vm5 = vcmask 130048  }
 0x1ca   : > { %v1231_v5 = vsel %vm5952_vm12, %v1210_v54, %v5897_v15  ;;  %v6179_v15 = vsel %vm5979_vm9, %v1121_v11, %v1216_v6  ;;  %v1230_v27 = vsel %vm5975_vm8, %v1174_v49, %v5940_v26  ;;  %v1257_v26 = vand.u32 63, %v5785_v48  ;;  %v1403_v13 = vpop.permute.xlu1 %1402 }
 0x1cb   : > { %v6169_v55 = vsel %vm5948_vm11, %v1101_v31, %v1231_v5  ;;  %v6251_v36 = vsel %vm5979_vm9, %v1128_v58, %v1230_v27  ;;  %v1332_v35 = vpop.permute.xlu2 %1331  ;;  %vm2293_vm8 = vcmask 7168  }
 0x1cc   : > { %1293 = vrot.lane.b32.xlu1 %v6169_v55, %s4990_s11  ;;  %vm1265_vm13 = vcmp.ge.s32.totalorder %v1257_v26, 16  ;;  %vm1267_vm14 = vcmp.lt.s32.totalorder %v1257_v26, 32  ;;  %vm1259_vm15 = vcmp.ge.s32.totalorder %v1257_v26, 32  ;;  %vm1261_vm7 = vcmp.lt.s32.totalorder %v1257_v26, 48 }
 0x1cd   : > { %vm6273_vm6 = vmand %vm1265_vm13, %vm1267_vm14  ;;  %v1342_v1 = vsel %vm10431_vm5, %v1332_v35, %v1296_v14  ;;  %vm1258_vm13 = vcmp.ge.s32.totalorder %v1256_v51, 32  ;;  %vm1260_vm14 = vcmp.lt.s32.totalorder %v1256_v51, 48  ;;  %v1369_v0 = vsel %vm10431_vm5, %v1296_v14, %v1332_v35 }
 0x1ce   : > { %1325 = vrot.lane.b32.xlu2 %v6175_v53, %s4990_s11  ;;  %1315 = vrot.lane.b32.xlu0 %v6179_v15, %s4990_s11  ;;  %v10646_v38 = vsel %vm6273_vm6, 4294967295, %v10645_v38  ;;  %vm6278_vm2 = vmand %vm1259_vm15, %vm1261_vm7 }
 0x1cf   : > { %10647 = vst [vmem:[#allocation14_spill] sm:$0xff] %v10646_v38  ;;  %v10649_v2 = vsel %vm6278_vm2, 4294967295, %v10648_v2  ;;  %vm6297_vm15 = vmand %vm1264_vm1, %vm1266_vm0  ;;  %vm10437_vm0 = vcmask 982016  }
 0x1d0   : > { %10650 = vst [vmem:[#allocation10_spill] sm:$0xff] %v10649_v2  ;;  %v10652_v60 = vsel %vm6297_vm15, 4294967295, %v10651_v60  ;;  %vm6301_vm7 = vmand %vm1258_vm13, %vm1260_vm14 }
 0x1d1   : > { %10653 = vst [vmem:[#allocation13_spill] sm:$0xff] %v10652_v60  ;;  %v10655_v62 = vsel %vm6301_vm7, 4294967295, %v10654_v62 }
 0x1d2   : > { %10656 = vst [vmem:[#allocation15_spill] sm:$0xff] %v10655_v62 }
 0x1d3   : > { %v1405_v21 = vpop.permute.xlu2 %1404 }
 0x1d4   : > { %1317 = vrot.lane.b32.xlu1 %v6202_v32, %s4990_s11  ;;  %v1451_v47 = vsel %vm10432_vm10, %v1405_v21, %v1403_v13 }
 0x1d5   : > { %v1473_v25 = vsel %vm6273_vm6, %v1451_v47, %v5962_v4  ;;  %v1415_v4 = vsel %vm10432_vm10, %v1403_v13, %v1405_v21 }
 0x1d6   : > { %1374 = vrot.lane.b32.xlu2 %v6202_v32, %s4991_s17  ;;  %1321 = vrot.lane.b32.xlu0 %v6208_v61, %s4990_s11  ;;  %v6290_v19 = vsel %vm6278_vm2, %v1342_v1, %v1473_v25  ;;  %v1472_v23 = vsel %vm6297_vm15, %v1415_v4, %v5991_v56 }
 0x1d7   : > { %v6313_v54 = vsel %vm6301_vm7, %v1369_v0, %v1472_v23 }
 0x1dc   : > { %1323 = vrot.lane.b32.xlu1 %v6230_v7, %s4990_s11 }
 0x1de   : > { %1380 = vrot.lane.b32.xlu2 %v6079_v40, %s4991_s17  ;;  %1327 = vrot.lane.b32.xlu0 %v6236_v37, %s4990_s11 }
 0x1e4   : > { %1329 = vrot.lane.b32.xlu1 %v6251_v36, %s4990_s11 }
 0x1e6   : > { %1386 = vrot.lane.b32.xlu2 %v6230_v7, %s4991_s17  ;;  %1370 = vrot.lane.b32.xlu0 %v6179_v15, %s4991_s17 }
 0x1ec   : > { %1372 = vrot.lane.b32.xlu1 %v6054_v30, %s4991_s17 }
 0x1ee   : > { %1392 = vrot.lane.b32.xlu2 %v6118_v16, %s4991_s17  ;;  %1376 = vrot.lane.b32.xlu0 %v6070_v52, %s4991_s17 }
 0x1f4   : > { %1378 = vrot.lane.b32.xlu1 %v6136_v29, %s4991_s17 }
 0x1f6   : > { %1398 = vrot.lane.b32.xlu2 %v6251_v36, %s4991_s17  ;;  %1382 = vrot.lane.b32.xlu0 %v6208_v61, %s4991_s17 }
 0x1fc   : > { %1384 = vrot.lane.b32.xlu1 %v6092_v12, %s4991_s17 }
 0x1fe   : > { %1388 = vrot.lane.b32.xlu0 %v6109_v46, %s4991_s17  ;;  %1535 = vrot.lane.b32.xlu2 %v6290_v19, %s4992_s19 }
 0x204   : > { %1390 = vrot.lane.b32.xlu1 %v6175_v53, %s4991_s17 }
 0x206   : > { %1394 = vrot.lane.b32.xlu0 %v6236_v37, %s4991_s17  ;;  %1571 = vrot.lane.b32.xlu2 %v6313_v54, %s4992_s19 }
 0x208   : > { %v6333_v31 = vpop.permute.xlu2 %1283 }
 0x20c   : > { %1396 = vrot.lane.b32.xlu1 %v6140_v33, %s4991_s17 }
 0x20e   : > { %1400 = vrot.lane.b32.xlu0 %v6169_v55, %s4991_s17  ;;  %1644 = vrot.lane.b32.xlu2 %v6290_v19, %s4993_s20 }
 0x214   : > { %1642 = vrot.lane.b32.xlu1 %v6313_v54, %s4993_s20 }
 0x218   : > { %v6327_v56 = vpop.permute.xlu0 %1279  ;;  %v6339_v11 = vpop.permute.xlu2 %1289 }
 0x21e   : > { %v6329_v41 = vpop.permute.xlu1 %1281 }
 0x220   : > { %v1320_v42 = vpop.permute.xlu2 %1319 }
 0x228   : > { %v6331_v6 = vpop.permute.xlu0 %1285  ;;  %v6349_v28 = vpop.permute.xlu2 %1325 }
 0x22e   : > { %v6335_v5 = vpop.permute.xlu1 %1287 }
 0x230   : > { %v6357_v10 = vpop.permute.xlu2 %1374 }
 0x238   : > { %v6337_v59 = vpop.permute.xlu0 %1291  ;;  %v1381_v58 = vpop.permute.xlu2 %1380 }
 0x23e   : > { %v6341_v44 = vpop.permute.xlu1 %1293 }
 0x240   : > { %v6343_v24 = vpop.permute.xlu0 %1315  ;;  %v1387_v0 = vpop.permute.xlu2 %1386 }
 0x241   : > { %v1334_v35 = vsel %vm10431_vm5, %v6343_v24, %v6327_v56 }
 0x246   : > { %v6345_v9 = vpop.permute.xlu1 %1317 }
 0x247   : > { %v1335_v26 = vsel %vm10431_vm5, %v6345_v9, %v6329_v41 }
 0x248   : > { %v6347_v43 = vpop.permute.xlu0 %1321 }
 0x24e   : > { %v6351_v50 = vpop.permute.xlu1 %1323 }
 0x250   : > { %v6353_v18 = vpop.permute.xlu0 %1327 }
 0x256   : > { %v6355_v39 = vpop.permute.xlu1 %1329 }
 0x258   : > { %v1371_v17 = vpop.permute.xlu0 %1370 }
 0x25e   : > { %v1373_v20 = vpop.permute.xlu1 %1372 }
 0x25f   : > { %v1443_v27 = vsel %vm10432_vm10, %v1373_v20, %v1371_v17 }
 0x260   : > { %v1377_v49 = vpop.permute.xlu0 %1376  ;;  %v1457_v21 = vsel %vm6273_vm6, %v1443_v27, %v6054_v30  ;;  %v1336_v30 = vsel %vm10431_vm5, %v1320_v42, %v6333_v31 }
 0x261   : > { %v1444_v14 = vsel %vm10432_vm10, %v1377_v49, %v6357_v10  ;;  %v6380_v51 = vsel %vm6278_vm2, %v1334_v35, %v1457_v21  ;;  %v1338_v21 = vsel %vm10431_vm5, %v6351_v50, %v6335_v5 }
 0x262   : > { %v1459_v13 = vsel %vm6273_vm6, %v1444_v14, %v6070_v52  ;;  %1519 = vrot.lane.b32.xlu0 %v6380_v51, %s4992_s19 }
 0x263   : > { %v6376_v47 = vsel %vm6278_vm2, %v1335_v26, %v1459_v13  ;;  %v1337_v26 = vsel %vm10431_vm5, %v6347_v43, %v6331_v6 }
 0x264   : > { %1521 = vrot.lane.b32.xlu1 %v6376_v47, %s4992_s19 }
 0x266   : > { %v1379_v25 = vpop.permute.xlu1 %1378 }
 0x267   : > { %v1445_v1 = vsel %vm10432_vm10, %v1381_v58, %v1379_v25 }
 0x268   : > { %v1383_v52 = vpop.permute.xlu0 %1382  ;;  %v1461_v4 = vsel %vm6273_vm6, %v1445_v1, %v6079_v40 }
 0x269   : > { %v6394_v23 = vsel %vm6278_vm2, %v1336_v30, %v1461_v4 }
 0x26a   : > { %1523 = vrot.lane.b32.xlu2 %v6394_v23, %s4992_s19 }
 0x26e   : > { %v1385_v27 = vpop.permute.xlu1 %1384 }
 0x26f   : > { %v1446_v35 = vsel %vm10432_vm10, %v1385_v27, %v1383_v52 }
 0x270   : > { %v1389_v14 = vpop.permute.xlu0 %1388  ;;  %v1463_v40 = vsel %vm6273_vm6, %v1446_v35, %v6092_v12  ;;  %v1393_v12 = vpop.permute.xlu2 %1392 }
 0x271   : > { %v1447_v13 = vsel %vm10432_vm10, %v1389_v14, %v1387_v0  ;;  %v6414_v30 = vsel %vm6278_vm2, %v1337_v26, %v1463_v40  ;;  %v1409_v40 = vsel %vm10432_vm10, %v1379_v25, %v1381_v58 }
 0x272   : > { %v1465_v1 = vsel %vm6273_vm6, %v1447_v13, %v6109_v46  ;;  %1525 = vrot.lane.b32.xlu0 %v6414_v30, %s4992_s19  ;;  %v1339_v46 = vsel %vm10431_vm5, %v6349_v28, %v6339_v11 }
 0x273   : > { %v6418_v4 = vsel %vm6278_vm2, %v1338_v21, %v1465_v1  ;;  %v1460_v1 = vsel %vm6297_vm15, %v1409_v40, %v6136_v29  ;;  %v1341_v29 = vsel %vm10431_vm5, %v6355_v39, %v6341_v44 }
 0x274   : > { %1527 = vrot.lane.b32.xlu1 %v6418_v4, %s4992_s19 }
 0x276   : > { %v1391_v35 = vpop.permute.xlu1 %1390 }
 0x277   : > { %v1448_v63 = vsel %vm10432_vm10, %v1393_v12, %v1391_v35 }
 0x278   : > { %v1395_v3 = vpop.permute.xlu0 %1394  ;;  %v1467_v26 = vsel %vm6273_vm6, %v1448_v63, %v6118_v16  ;;  %v1399_v45 = vpop.permute.xlu2 %1398  ;;  %v1363_v63 = vsel %vm10431_vm5, %v6333_v31, %v1320_v42  ;;  %v1340_v16 = vsel %vm10431_vm5, %v6353_v18, %v6337_v59 }
 0x279   : > { %v6433_v13 = vsel %vm6278_vm2, %v1339_v46, %v1467_v26  ;;  %v6459_v31 = vsel %vm6301_vm7, %v1363_v63, %v1460_v1 }
 0x27a   : > { %1529 = vrot.lane.b32.xlu2 %v6433_v13, %s4992_s19 }
 0x27e   : > { %v1397_v21 = vpop.permute.xlu1 %1396 }
 0x27f   : > { %v1449_v57 = vsel %vm10432_vm10, %v1397_v21, %v1395_v3 }
 0x280   : > { %v1401_v34 = vpop.permute.xlu0 %1400  ;;  %v1469_v58 = vsel %vm6273_vm6, %v1449_v57, %v6140_v33  ;;  %v1407_v57 = vsel %vm10432_vm10, %v1371_v17, %v1373_v20  ;;  %v1412_v33 = vsel %vm10432_vm10, %v1391_v35, %v1393_v12  ;;  %v1366_v20 = vsel %vm10431_vm5, %v6339_v11, %v6349_v28 }
 0x281   : > { %v1450_v46 = vsel %vm10432_vm10, %v1401_v34, %v1399_v45  ;;  %v6463_v42 = vsel %vm6278_vm2, %v1340_v16, %v1469_v58  ;;  %v1466_v40 = vsel %vm6297_vm15, %v1412_v33, %v6175_v53  ;;  %v1456_v1 = vsel %vm6297_vm15, %v1407_v57, %v6179_v15 }
 0x282   : > { %v1471_v25 = vsel %vm6273_vm6, %v1450_v46, %v6169_v55  ;;  %1559 = vrot.lane.b32.xlu2 %v6459_v31, %s4992_s19  ;;  %1531 = vrot.lane.b32.xlu0 %v6463_v42, %s4992_s19  ;;  %v1408_v55 = vsel %vm10432_vm10, %v6357_v10, %v1377_v49  ;;  %v1361_v10 = vsel %vm10431_vm5, %v6327_v56, %v6343_v24  ;;  %v10667_v16 = vmov 0 }
 0x283   : > { %v6467_v26 = vsel %vm6278_vm2, %v1341_v29, %v1471_v25  ;;  %v1458_v17 = vsel %vm6297_vm15, %v1408_v55, %v6202_v32  ;;  %v1362_v53 = vsel %vm10431_vm5, %v6329_v41, %v6345_v9  ;;  %v6499_v49 = vsel %vm6301_vm7, %v1366_v20, %v1466_v40 }
 0x284   : > { %1533 = vrot.lane.b32.xlu1 %v6467_v26, %s4992_s19  ;;  %v6503_v15 = vsel %vm6301_vm7, %v1361_v10, %v1456_v1  ;;  %v6507_v32 = vsel %vm6301_vm7, %v1362_v53, %v1458_v17  ;;  %v1410_v56 = vsel %vm10432_vm10, %v1383_v52, %v1385_v27  ;;  %v1411_v41 = vsel %vm10432_vm10, %v1387_v0, %v1389_v14 }
 0x285   : > { %v1462_v11 = vsel %vm6297_vm15, %v1410_v56, %v6208_v61  ;;  %v1464_v24 = vsel %vm6297_vm15, %v1411_v41, %v6230_v7  ;;  %v1364_v9 = vsel %vm10431_vm5, %v6331_v6, %v6347_v43  ;;  %v1365_v28 = vsel %vm10431_vm5, %v6335_v5, %v6351_v50 }
 0x286   : > { %v6531_v52 = vsel %vm6301_vm7, %v1364_v9, %v1462_v11  ;;  %v6535_v0 = vsel %vm6301_vm7, %v1365_v28, %v1464_v24  ;;  %v1413_v61 = vsel %vm10432_vm10, %v1395_v3, %v1397_v21  ;;  %v1414_v7 = vsel %vm10432_vm10, %v1399_v45, %v1401_v34  ;;  %v1536_v34 = vpop.permute.xlu2 %1535 }
 0x287   : > { %v1468_v6 = vsel %vm6297_vm15, %v1413_v61, %v6236_v37  ;;  %v1470_v5 = vsel %vm6297_vm15, %v1414_v7, %v6251_v36  ;;  %v1367_v43 = vsel %vm10431_vm5, %v6337_v59, %v6353_v18  ;;  %v1368_v3 = vsel %vm10431_vm5, %v6341_v44, %v6355_v39  ;;  %v1643_v59 = vpop.permute.xlu1 %1642 }
 0x288   : > { %v6559_v50 = vsel %vm6301_vm7, %v1367_v43, %v1468_v6  ;;  %v6563_v45 = vsel %vm6301_vm7, %v1368_v3, %v1470_v5  ;;  %v1497_v36 = vand.u32 31, %v5785_v48  ;;  %v10657_v39 = vmov 0 }
 0x289   : > { %v1496_v27 = vand.u32 31, %v5774_v8  ;;  %vm10440_vm7 = vcmask 64512   ;;  %v10660_v14 = vmov 0  ;;  %vm10670_vm6 = vcmask 64512  }
 0x28a   : > { %1565 = vrot.lane.b32.xlu2 %v6499_v49, %s4992_s19  ;;  %1555 = vrot.lane.b32.xlu0 %v6503_v15, %s4992_s19  ;;  %vm1505_vm1 = vcmp.ge.s32.totalorder %v1497_v36, 8  ;;  %vm1507_vm13 = vcmp.lt.s32.totalorder %v1497_v36, 16  ;;  %vm1499_vm14 = vcmp.ge.s32.totalorder %v1497_v36, 16  ;;  %vm1501_vm5 = vcmp.lt.s32.totalorder %v1497_v36, 24 }
 0x28b   : > { %vm6591_vm10 = vmand %vm1505_vm1, %vm1507_vm13  ;;  %vm1506_vm2 = vcmp.lt.s32.totalorder %v1496_v27, 16  ;;  %vm1498_vm1 = vcmp.ge.s32.totalorder %v1496_v27, 16  ;;  %vm1500_vm13 = vcmp.lt.s32.totalorder %v1496_v27, 24 }
 0x28c   : > { %1557 = vrot.lane.b32.xlu1 %v6507_v32, %s4992_s19  ;;  %v10658_v39 = vsel %vm6591_vm10, 4294967295, %v10657_v39  ;;  %vm6596_vm15 = vmand %vm1499_vm14, %vm1501_vm5  ;;  %vm10663_vm5 = vcmask 982016  }
 0x28d   : > { %10659 = vst [vmem:[#allocation16_spill] sm:$0xff] %v10658_v39  ;;  %v10661_v14 = vsel %vm6596_vm15, 4294967295, %v10660_v14 }
 0x28e   : > { %v1572_v37 = vpop.permute.xlu2 %1571  ;;  %10662 = vst [vmem:[#allocation17_spill] sm:$0xff] %v10661_v14 }
 0x28f   : > { %v1582_v35 = vsel %vm10440_vm7, %v1572_v37, %v1536_v34  ;;  %vm6619_vm7 = vmand %vm1498_vm1, %vm1500_vm13  ;;  %v1609_v58 = vsel %vm10670_vm6, %v1536_v34, %v1572_v37 }
 0x290   : > { %v10668_v16 = vsel %vm6619_vm7, 4294967295, %v10667_v16 }
 0x291   : > { %10669 = vst [vmem:[#allocation19_spill] sm:$0xff] %v10668_v16 }
 0x292   : > { %1614 = vrot.lane.b32.xlu2 %v6507_v32, %s4993_s20  ;;  %1561 = vrot.lane.b32.xlu0 %v6531_v52, %s4992_s19 }
 0x294   : > { %1563 = vrot.lane.b32.xlu1 %v6535_v0, %s4992_s19 }
 0x296   : > { %v1645_v44 = vpop.permute.xlu2 %1644 }
 0x297   : > { %v1691_v18 = vsel %vm10437_vm0, %v1645_v44, %v1643_v59  ;;  %vm1504_vm0 = vcmp.ge.s32.totalorder %v1496_v27, 8  ;;  %v1655_v63 = vsel %vm10663_vm5, %v1643_v59, %v1645_v44 }
 0x298   : > { %v1713_v12 = vsel %vm6591_vm10, %v1691_v18, %v6290_v19  ;;  %vm6615_vm14 = vmand %vm1504_vm0, %vm1506_vm2  ;;  %v10664_v19 = vmov 0 }
 0x299   : > { %v6606_v21 = vsel %vm6596_vm15, %v1582_v35, %v1713_v12  ;;  %v10665_v19 = vsel %vm6615_vm14, 4294967295, %v10664_v19  ;;  %v1712_v46 = vsel %vm6615_vm14, %v1655_v63, %v6313_v54  ;;  %vm10671_vm2 = vmmov %vm10663_vm5 }
 0x29a   : > { %1620 = vrot.lane.b32.xlu2 %v6394_v23, %s4993_s20  ;;  %1567 = vrot.lane.b32.xlu0 %v6559_v50, %s4992_s19  ;;  %10666 = vst [vmem:[#allocation18_spill] sm:$0xff] %v10665_v19  ;;  %v6629_v29 = vsel %vm6619_vm7, %v1609_v58, %v1712_v46  ;;  %vm10672_vm0 = vmmov %vm10671_vm2 }
 0x29b   : > { %vm10673_vm5 = vmmov %vm10670_vm6 }
 0x29c   : > { %1569 = vrot.lane.b32.xlu1 %v6563_v45, %s4992_s19  ;;  %vm10674_vm1 = vmmov %vm10672_vm0 }
 0x29d   : > { %vm10675_vm13 = vmmov %vm10673_vm5 }
 0x2a2   : > { %1626 = vrot.lane.b32.xlu2 %v6535_v0, %s4993_s20  ;;  %1610 = vrot.lane.b32.xlu0 %v6503_v15, %s4993_s20 }
 0x2a4   : > { %1612 = vrot.lane.b32.xlu1 %v6380_v51, %s4993_s20 }
 0x2aa   : > { %1632 = vrot.lane.b32.xlu2 %v6433_v13, %s4993_s20  ;;  %1616 = vrot.lane.b32.xlu0 %v6376_v47, %s4993_s20 }
 0x2ac   : > { %1618 = vrot.lane.b32.xlu1 %v6459_v31, %s4993_s20 }
 0x2b2   : > { %1638 = vrot.lane.b32.xlu2 %v6563_v45, %s4993_s20  ;;  %1622 = vrot.lane.b32.xlu0 %v6531_v52, %s4993_s20 }
 0x2b4   : > { %1624 = vrot.lane.b32.xlu1 %v6414_v30, %s4993_s20 }
 0x2ba   : > { %1628 = vrot.lane.b32.xlu0 %v6418_v4, %s4993_s20  ;;  %1775 = vrot.lane.b32.xlu2 %v6606_v21, %s4994_s24 }
 0x2bc   : > { %1630 = vrot.lane.b32.xlu1 %v6499_v49, %s4993_s20 }
 0x2c2   : > { %1634 = vrot.lane.b32.xlu0 %v6559_v50, %s4993_s20  ;;  %1811 = vrot.lane.b32.xlu2 %v6629_v29, %s4994_s24 }
 0x2c4   : > { %1636 = vrot.lane.b32.xlu1 %v6463_v42, %s4993_s20  ;;  %v1524_v57 = vpop.permute.xlu2 %1523 }
 0x2ca   : > { %1640 = vrot.lane.b32.xlu0 %v6467_v26, %s4993_s20  ;;  %1884 = vrot.lane.b32.xlu2 %v6606_v21, %s4995_s25 }
 0x2cc   : > { %1882 = vrot.lane.b32.xlu1 %v6629_v29, %s4995_s25 }
 0x2d4   : > { %v6643_v54 = vpop.permute.xlu0 %1519  ;;  %v6651_v40 = vpop.permute.xlu2 %1529 }
 0x2d6   : > { %v6645_v25 = vpop.permute.xlu1 %1521 }
 0x2dc   : > { %v1560_v20 = vpop.permute.xlu2 %1559 }
 0x2dd   : > { %v1576_v27 = vsel %vm10675_vm13, %v1560_v20, %v1524_v57  ;;  %vm10679_vm13 = vmmov %vm10673_vm5 }
 0x2e4   : > { %v6647_v33 = vpop.permute.xlu0 %1525  ;;  %v6663_v41 = vpop.permute.xlu2 %1565 }
 0x2e6   : > { %v6649_v55 = vpop.permute.xlu1 %1527 }
 0x2ec   : > { %v6671_v28 = vpop.permute.xlu2 %1614 }
 0x2f4   : > { %v6653_v1 = vpop.permute.xlu0 %1531  ;;  %v1621_v34 = vpop.permute.xlu2 %1620 }
 0x2f6   : > { %v6655_v17 = vpop.permute.xlu1 %1533 }
 0x2fc   : > { %v6657_v10 = vpop.permute.xlu0 %1555 }
 0x2fd   : > { %v1574_v5 = vsel %vm10670_vm6, %v6657_v10, %v6643_v54  ;;  %vm10677_vm6 = vmmov %vm10673_vm5 }
 0x2fe   : > { %v6659_v53 = vpop.permute.xlu1 %1557 }
 0x2ff   : > { %v1575_v44 = vsel %vm10673_vm5, %v6659_v53, %v6645_v25 }
 0x304   : > { %v6661_v56 = vpop.permute.xlu0 %1561 }
 0x306   : > { %v6665_v11 = vpop.permute.xlu1 %1563 }
 0x30c   : > { %v6667_v24 = vpop.permute.xlu0 %1567 }
 0x30e   : > { %v6669_v9 = vpop.permute.xlu1 %1569 }
 0x314   : > { %v1611_v61 = vpop.permute.xlu0 %1610 }
 0x316   : > { %v1613_v7 = vpop.permute.xlu1 %1612 }
 0x317   : > { %v1683_v6 = vsel %vm10671_vm2, %v1613_v7, %v1611_v61  ;;  %vm10676_vm2 = vmmov %vm10672_vm0 }
 0x318   : > { %v1697_v43 = vsel %vm6591_vm10, %v1683_v6, %v6380_v51 }
 0x319   : > { %v6682_v3 = vsel %vm6596_vm15, %v1574_v5, %v1697_v43  ;;  %v1577_v5 = vsel %vm10677_vm6, %v6661_v56, %v6647_v33  ;;  %vm10681_vm6 = vmmov %vm10672_vm0 }
 0x31a   : > { %1759 = vrot.lane.b32.xlu0 %v6682_v3, %s4994_s24 }
 0x31c   : > { %v1617_v37 = vpop.permute.xlu0 %1616 }
 0x31d   : > { %v1684_v36 = vsel %vm10672_vm0, %v1617_v37, %v6671_v28 }
 0x31e   : > { %v1619_v59 = vpop.permute.xlu1 %1618  ;;  %v1699_v51 = vsel %vm6591_vm10, %v1684_v36, %v6376_v47  ;;  %v1627_v47 = vpop.permute.xlu2 %1626 }
 0x31f   : > { %v1685_v18 = vsel %vm10674_vm1, %v1621_v34, %v1619_v59  ;;  %v6698_v12 = vsel %vm6596_vm15, %v1575_v44, %v1699_v51  ;;  %vm10678_vm1 = vmmov %vm10672_vm0 }
 0x320   : > { %v1701_v35 = vsel %vm6591_vm10, %v1685_v18, %v6394_v23  ;;  %1761 = vrot.lane.b32.xlu1 %v6698_v12, %s4994_s24 }
 0x321   : > { %v6707_v63 = vsel %vm6596_vm15, %v1576_v27, %v1701_v35  ;;  %v1578_v27 = vsel %vm10673_vm5, %v6665_v11, %v6649_v55 }
 0x322   : > { %1763 = vrot.lane.b32.xlu2 %v6707_v63, %s4994_s24 }
 0x324   : > { %v1623_v46 = vpop.permute.xlu0 %1622 }
 0x326   : > { %v1625_v58 = vpop.permute.xlu1 %1624  ;;  %v1633_v44 = vpop.permute.xlu2 %1632 }
 0x327   : > { %v1686_v6 = vsel %vm10676_vm2, %v1625_v58, %v1623_v46  ;;  %vm10680_vm2 = vmmov %vm10672_vm0 }
 0x328   : > { %v1703_v23 = vsel %vm6591_vm10, %v1686_v6, %v6414_v30  ;;  %v1579_v6 = vsel %vm10679_vm13, %v6663_v41, %v6651_v40  ;;  %vm10684_vm13 = vmmov %vm10678_vm1 }
 0x329   : > { %v6720_v43 = vsel %vm6596_vm15, %v1577_v5, %v1703_v23 }
 0x32a   : > { %1765 = vrot.lane.b32.xlu0 %v6720_v43, %s4994_s24 }
 0x32c   : > { %v1629_v36 = vpop.permute.xlu0 %1628 }
 0x32d   : > { %v1687_v18 = vsel %vm10672_vm0, %v1629_v36, %v1627_v47  ;;  %vm10682_vm0 = vmmov %vm10673_vm5 }
 0x32e   : > { %v1631_v51 = vpop.permute.xlu1 %1630  ;;  %v1705_v30 = vsel %vm6591_vm10, %v1687_v18, %v6418_v4  ;;  %v1649_v4 = vsel %vm10680_vm2, %v1619_v59, %v1621_v34  ;;  %vm10683_vm5 = vmmov %vm10682_vm0 }
 0x32f   : > { %v1688_v35 = vsel %vm10678_vm1, %v1633_v44, %v1631_v51  ;;  %v6737_v5 = vsel %vm6596_vm15, %v1578_v27, %v1705_v30  ;;  %v1700_v27 = vsel %vm6615_vm14, %v1649_v4, %v6459_v31  ;;  %v1580_v30 = vsel %vm10683_vm5, %v6667_v24, %v6653_v1  ;;  %vm10685_vm2 = vmmov %vm10678_vm1 }
 0x330   : > { %v1707_v23 = vsel %vm6591_vm10, %v1688_v35, %v6433_v13  ;;  %1767 = vrot.lane.b32.xlu1 %v6737_v5, %s4994_s24  ;;  %v1603_v35 = vsel %vm10682_vm0, %v1524_v57, %v1560_v20  ;;  %v1647_v31 = vsel %vm10678_vm1, %v1611_v61, %v1613_v7  ;;  %v1652_v57 = vsel %vm10684_vm13, %v1631_v51, %v1633_v44  ;;  %v1639_v20 = vpop.permute.xlu2 %1638  ;;  %vm10687_vm5 = vmmov %vm10682_vm0 }
 0x331   : > { %v6746_v62 = vsel %vm6596_vm15, %v1579_v6, %v1707_v23  ;;  %v6764_v34 = vsel %vm6619_vm7, %v1603_v35, %v1700_v27  ;;  %v1706_v4 = vsel %vm6615_vm14, %v1652_v57, %v6499_v49  ;;  %v1696_v27 = vsel %vm6615_vm14, %v1647_v31, %v6503_v15  ;;  %vm10688_vm13 = vmmov %vm10678_vm1 }
 0x332   : > { %1769 = vrot.lane.b32.xlu2 %v6746_v62, %s4994_s24  ;;  %v1606_v7 = vsel %vm10682_vm0, %v6651_v40, %v6663_v41  ;;  %v1601_v49 = vsel %vm10687_vm5, %v6643_v54, %v6657_v10  ;;  %v1648_v40 = vsel %vm10678_vm1, %v6671_v28, %v1617_v37  ;;  %v1650_v54 = vsel %vm10688_vm13, %v1623_v46, %v1625_v58 }
 0x333   : > { %v6803_v15 = vsel %vm6619_vm7, %v1606_v7, %v1706_v4  ;;  %v1698_v10 = vsel %vm6615_vm14, %v1648_v40, %v6507_v32  ;;  %v1702_v41 = vsel %vm6615_vm14, %v1650_v54, %v6531_v52  ;;  %v10700_v35 = vmov 0 }
 0x334   : > { %v1635_v18 = vpop.permute.xlu0 %1634  ;;  %v10704_v57 = vmov 0 }
 0x336   : > { %v1637_v60 = vpop.permute.xlu1 %1636 }
 0x337   : > { %v1689_v13 = vsel %vm10681_vm6, %v1637_v60, %v1635_v18  ;;  %vm10686_vm6 = vmmov %vm10682_vm0 }
 0x338   : > { %v1709_v6 = vsel %vm6591_vm10, %v1689_v13, %v6463_v42  ;;  %v1581_v13 = vsel %vm10686_vm6, %v6669_v9, %v6655_v17  ;;  %vm10690_vm6 = vmmov %vm10682_vm0 }
 0x339   : > { %v6768_v59 = vsel %vm6596_vm15, %v1580_v30, %v1709_v6  ;;  %v1604_v37 = vsel %vm10690_vm6, %v6647_v33, %v6661_v56 }
 0x33a   : > { %1799 = vrot.lane.b32.xlu2 %v6764_v34, %s4994_s24  ;;  %1771 = vrot.lane.b32.xlu0 %v6768_v59, %s4994_s24  ;;  %v6836_v32 = vsel %vm6619_vm7, %v1604_v37, %v1702_v41 }
 0x33c   : > { %v1641_v42 = vpop.permute.xlu0 %1640 }
 0x33d   : > { %v1690_v23 = vsel %vm10685_vm2, %v1641_v42, %v1639_v20  ;;  %vm10689_vm2 = vmmov %vm10682_vm0 }
 0x33e   : > { %v1711_v61 = vsel %vm6591_vm10, %v1690_v23, %v6467_v26  ;;  %v6807_v26 = vsel %vm6619_vm7, %v1601_v49, %v1696_v27  ;;  %v1602_v28 = vsel %vm10689_vm2, %v6645_v25, %v6659_v53  ;;  %vm10691_vm0 = vmmov %vm10678_vm1  ;;  %vm10710_vm10 = vcmask 31744  }
 0x33f   : > { %v6797_v44 = vsel %vm6596_vm15, %v1581_v13, %v1711_v61  ;;  %v6830_v51 = vsel %vm6619_vm7, %v1602_v28, %v1698_v10  ;;  %v1651_v52 = vsel %vm10691_vm0, %v1627_v47, %v1629_v36  ;;  %vm10692_vm5 = vmmov %vm10691_vm0  ;;  %v10697_v36 = vmov 0 }
 0x340   : > { %1773 = vrot.lane.b32.xlu1 %v6797_v44, %s4994_s24  ;;  %v1653_v25 = vsel %vm10692_vm5, %v1635_v18, %v1637_v60  ;;  %v1704_v33 = vsel %vm6615_vm14, %v1651_v52, %v6535_v0  ;;  %vm10693_vm1 = vmmov %vm10689_vm2  ;;  %v1736_v18 = vand.u32 15, %v5774_v8 }
 0x341   : > { %v1708_v53 = vsel %vm6615_vm14, %v1653_v25, %v6559_v50  ;;  %v1605_v56 = vsel %vm10693_vm1, %v6649_v55, %v6665_v11  ;;  %vm10694_vm13 = vmmov %vm10693_vm1  ;;  %v1776_v55 = vpop.permute.xlu2 %1775 }
 0x342   : > { %1805 = vrot.lane.b32.xlu2 %v6803_v15, %s4994_s24  ;;  %1795 = vrot.lane.b32.xlu0 %v6807_v26, %s4994_s24  ;;  %v1607_v47 = vsel %vm10694_vm13, %v6653_v1, %v6667_v24  ;;  %v6858_v46 = vsel %vm6619_vm7, %v1605_v56, %v1704_v33  ;;  %vm10695_vm2 = vmmov %vm10691_vm0  ;;  %vm10451_vm0 = vcmask 1014784   ;;  %vm1746_vm15 = vcmp.lt.s32.totalorder %v1736_v18, 8 }
 0x343   : > { %v6864_v60 = vsel %vm6619_vm7, %v1607_v47, %v1708_v53  ;;  %v1654_v0 = vsel %vm10695_vm2, %v1639_v20, %v1641_v42  ;;  %vm10696_vm6 = vmmov %vm10693_vm1  ;;  %v10707_v20 = vmov 0 }
 0x344   : > { %v1710_v50 = vsel %vm6615_vm14, %v1654_v0, %v6563_v45  ;;  %v1608_v1 = vsel %vm10696_vm6, %v6655_v17, %v6669_v9  ;;  %v1737_v45 = vand.u32 15, %v5785_v48  ;;  %v1883_v17 = vpop.permute.xlu1 %1882 }
 0x345   : > { %v6879_v11 = vsel %vm6619_vm7, %v1608_v1, %v1710_v50  ;;  %vm10454_vm7 = vcmask 31744  }
 0x346   : > { %vm1745_vm5 = vcmp.ge.s32.totalorder %v1737_v45, 4  ;;  %vm1747_vm1 = vcmp.lt.s32.totalorder %v1737_v45, 8  ;;  %vm1739_vm13 = vcmp.ge.s32.totalorder %v1737_v45, 8  ;;  %vm1741_vm2 = vcmp.lt.s32.totalorder %v1737_v45, 12 }
 0x347   : > { %vm6901_vm6 = vmand %vm1745_vm5, %vm1747_vm1  ;;  %vm10703_vm5 = vcmask 1014784   ;;  %vm1738_vm1 = vcmp.ge.s32.totalorder %v1736_v18, 8 }
 0x348   : > { %1797 = vrot.lane.b32.xlu1 %v6830_v51, %s4994_s24  ;;  %v10698_v36 = vsel %vm6901_vm6, 4294967295, %v10697_v36  ;;  %vm6906_vm14 = vmand %vm1739_vm13, %vm1741_vm2  ;;  %vm1740_vm13 = vcmp.lt.s32.totalorder %v1736_v18, 12 }
 0x349   : > { %v1812_v24 = vpop.permute.xlu2 %1811  ;;  %10699 = vst [vmem:[#allocation20_spill] sm:$0xff] %v10698_v36  ;;  %v10701_v35 = vsel %vm6906_vm14, 4294967295, %v10700_v35 }
 0x34a   : > { %1854 = vrot.lane.b32.xlu2 %v6830_v51, %s4995_s25  ;;  %1801 = vrot.lane.b32.xlu0 %v6836_v32, %s4994_s24  ;;  %10702 = vst [vmem:[#allocation21_spill] sm:$0xff] %v10701_v35  ;;  %v1822_v6 = vsel %vm10454_vm7, %v1812_v24, %v1776_v55  ;;  %vm6929_vm7 = vmand %vm1738_vm1, %vm1740_vm13  ;;  %v1849_v23 = vsel %vm10710_vm10, %v1776_v55, %v1812_v24 }
 0x34b   : > { %v10708_v20 = vsel %vm6929_vm7, 4294967295, %v10707_v20  ;;  %vm10711_vm10 = vmmov %vm10703_vm5 }
 0x34c   : > { %10709 = vst [vmem:[#allocation23_spill] sm:$0xff] %v10708_v20  ;;  %vm10715_vm1 = vmmov %vm10711_vm10 }
 0x350   : > { %1803 = vrot.lane.b32.xlu1 %v6858_v46, %s4994_s24 }
 0x351   : > { %v1885_v9 = vpop.permute.xlu2 %1884 }
 0x352   : > { %1860 = vrot.lane.b32.xlu2 %v6707_v63, %s4995_s25  ;;  %1807 = vrot.lane.b32.xlu0 %v6864_v60, %s4994_s24  ;;  %v1931_v58 = vsel %vm10451_vm0, %v1885_v9, %v1883_v17  ;;  %vm1744_vm0 = vcmp.ge.s32.totalorder %v1736_v18, 4 }
 0x353   : > { %v1953_v30 = vsel %vm6901_vm6, %v1931_v58, %v6606_v21  ;;  %v1895_v21 = vsel %vm10703_vm5, %v1883_v17, %v1885_v9  ;;  %vm6925_vm2 = vmand %vm1744_vm0, %vm1746_vm15  ;;  %vm10713_vm0 = vcmask 31744  }
 0x354   : > { %v6918_v31 = vsel %vm6906_vm14, %v1822_v6, %v1953_v30  ;;  %v10705_v57 = vsel %vm6925_vm2, 4294967295, %v10704_v57  ;;  %v1952_v42 = vsel %vm6925_vm2, %v1895_v21, %v6629_v29  ;;  %vm10712_vm15 = vmmov %vm10703_vm5 }
 0x355   : > { %10706 = vst [vmem:[#allocation22_spill] sm:$0xff] %v10705_v57  ;;  %v6941_v4 = vsel %vm6929_vm7, %v1849_v23, %v1952_v42  ;;  %vm10714_vm5 = vmmov %vm10713_vm0 }
 0x356   : > { %vm10716_vm13 = vmmov %vm10713_vm0 }
 0x358   : > { %1809 = vrot.lane.b32.xlu1 %v6879_v11, %s4994_s24 }
 0x35a   : > { %1866 = vrot.lane.b32.xlu2 %v6858_v46, %s4995_s25  ;;  %1850 = vrot.lane.b32.xlu0 %v6807_v26, %s4995_s25 }
 0x360   : > { %1852 = vrot.lane.b32.xlu1 %v6682_v3, %s4995_s25 }
 0x362   : > { %1872 = vrot.lane.b32.xlu2 %v6746_v62, %s4995_s25  ;;  %1856 = vrot.lane.b32.xlu0 %v6698_v12, %s4995_s25 }
 0x368   : > { %1858 = vrot.lane.b32.xlu1 %v6764_v34, %s4995_s25 }
 0x36a   : > { %1878 = vrot.lane.b32.xlu2 %v6879_v11, %s4995_s25  ;;  %1862 = vrot.lane.b32.xlu0 %v6836_v32, %s4995_s25 }
 0x370   : > { %1864 = vrot.lane.b32.xlu1 %v6720_v43, %s4995_s25 }
 0x372   : > { %1868 = vrot.lane.b32.xlu0 %v6737_v5, %s4995_s25  ;;  %2015 = vrot.lane.b32.xlu2 %v6918_v31, %s4996_s26 }
 0x378   : > { %1870 = vrot.lane.b32.xlu1 %v6803_v15, %s4995_s25 }
 0x37a   : > { %1874 = vrot.lane.b32.xlu0 %v6864_v60, %s4995_s25  ;;  %2051 = vrot.lane.b32.xlu2 %v6941_v4, %s4996_s26 }
 0x37c   : > { %v6961_v61 = vpop.permute.xlu2 %1763 }
 0x380   : > { %1876 = vrot.lane.b32.xlu1 %v6768_v59, %s4995_s25 }
 0x382   : > { %1880 = vrot.lane.b32.xlu0 %v6797_v44, %s4995_s25  ;;  %2124 = vrot.lane.b32.xlu2 %v6918_v31, %s4997_s27 }
 0x388   : > { %2122 = vrot.lane.b32.xlu1 %v6941_v4, %s4997_s27 }
 0x38c   : > { %v6955_v29 = vpop.permute.xlu0 %1759  ;;  %v6967_v40 = vpop.permute.xlu2 %1769 }
 0x392   : > { %v6957_v27 = vpop.permute.xlu1 %1761 }
 0x394   : > { %v1800_v41 = vpop.permute.xlu2 %1799 }
 0x39c   : > { %v6959_v13 = vpop.permute.xlu0 %1765  ;;  %v6977_v52 = vpop.permute.xlu2 %1805 }
 0x3a2   : > { %v6963_v7 = vpop.permute.xlu1 %1767 }
 0x3a4   : > { %v6985_v56 = vpop.permute.xlu2 %1854 }
 0x3ac   : > { %v6965_v49 = vpop.permute.xlu0 %1771  ;;  %v1861_v24 = vpop.permute.xlu2 %1860 }
 0x3b2   : > { %v6969_v54 = vpop.permute.xlu1 %1773 }
 0x3b4   : > { %v6971_v10 = vpop.permute.xlu0 %1795 }
 0x3b5   : > { %v1814_v45 = vsel %vm10713_vm0, %v6971_v10, %v6955_v29 }
 0x3ba   : > { %v6973_v28 = vpop.permute.xlu1 %1797 }
 0x3bb   : > { %v1815_v17 = vsel %vm10714_vm5, %v6973_v28, %v6957_v27 }
 0x3bc   : > { %v6975_v37 = vpop.permute.xlu0 %1801 }
 0x3c2   : > { %v6979_v25 = vpop.permute.xlu1 %1803 }
 0x3c4   : > { %v6981_v33 = vpop.permute.xlu0 %1807 }
 0x3ca   : > { %v6983_v53 = vpop.permute.xlu1 %1809 }
 0x3cc   : > { %v1851_v47 = vpop.permute.xlu0 %1850 }
 0x3d2   : > { %v1853_v0 = vpop.permute.xlu1 %1852 }
 0x3d3   : > { %v1923_v55 = vsel %vm10711_vm10, %v1853_v0, %v1851_v47  ;;  %vm10717_vm10 = vmmov %vm10715_vm1 }
 0x3d4   : > { %v1857_v50 = vpop.permute.xlu0 %1856  ;;  %v1937_v58 = vsel %vm6901_vm6, %v1923_v55, %v6682_v3  ;;  %v1816_v3 = vsel %vm10716_vm13, %v1800_v41, %v6961_v61  ;;  %v1867_v55 = vpop.permute.xlu2 %1866  ;;  %vm10721_vm13 = vmmov %vm10714_vm5 }
 0x3d5   : > { %v1924_v1 = vsel %vm10712_vm15, %v1857_v50, %v6985_v56  ;;  %v7008_v30 = vsel %vm6906_vm14, %v1814_v45, %v1937_v58  ;;  %vm10718_vm15 = vmmov %vm10713_vm0 }
 0x3d6   : > { %v1939_v9 = vsel %vm6901_vm6, %v1924_v1, %v6698_v12  ;;  %1999 = vrot.lane.b32.xlu0 %v7008_v30, %s4996_s26  ;;  %vm10719_vm0 = vmmov %vm10715_vm1 }
 0x3d7   : > { %v7004_v18 = vsel %vm6906_vm14, %v1815_v17, %v1939_v9  ;;  %v1817_v9 = vsel %vm10718_vm15, %v6975_v37, %v6959_v13  ;;  %vm10723_vm15 = vmmov %vm10719_vm0 }
 0x3d8   : > { %2001 = vrot.lane.b32.xlu1 %v7004_v18, %s4996_s26 }
 0x3da   : > { %v1859_v6 = vpop.permute.xlu1 %1858 }
 0x3db   : > { %v1925_v21 = vsel %vm10715_vm1, %v1861_v24, %v1859_v6  ;;  %vm10720_vm1 = vmmov %vm10719_vm0 }
 0x3dc   : > { %v1863_v12 = vpop.permute.xlu0 %1862  ;;  %v1941_v42 = vsel %vm6901_vm6, %v1925_v21, %v6707_v63  ;;  %v1818_v21 = vsel %vm10714_vm5, %v6979_v25, %v6963_v7 }
 0x3dd   : > { %v7022_v23 = vsel %vm6906_vm14, %v1816_v3, %v1941_v42 }
 0x3de   : > { %2003 = vrot.lane.b32.xlu2 %v7022_v23, %s4996_s26 }
 0x3e2   : > { %v1865_v1 = vpop.permute.xlu1 %1864 }
 0x3e3   : > { %v1926_v17 = vsel %vm10717_vm10, %v1865_v1, %v1863_v12  ;;  %vm10722_vm10 = vmmov %vm10719_vm0 }
 0x3e4   : > { %v1869_v45 = vpop.permute.xlu0 %1868  ;;  %v1943_v63 = vsel %vm6901_vm6, %v1926_v17, %v6720_v43  ;;  %v1873_v43 = vpop.permute.xlu2 %1872 }
 0x3e5   : > { %v1927_v58 = vsel %vm10719_vm0, %v1869_v45, %v1867_v55  ;;  %v7042_v42 = vsel %vm6906_vm14, %v1817_v9, %v1943_v63  ;;  %v1889_v63 = vsel %vm10722_vm10, %v1859_v6, %v1861_v24  ;;  %vm10724_vm0 = vmmov %vm10714_vm5 }
 0x3e6   : > { %v1945_v3 = vsel %vm6901_vm6, %v1927_v58, %v6737_v5  ;;  %2005 = vrot.lane.b32.xlu0 %v7042_v42, %s4996_s26  ;;  %v1819_v5 = vsel %vm10721_vm13, %v6977_v52, %v6967_v40  ;;  %vm10725_vm5 = vmmov %vm10724_vm0 }
 0x3e7   : > { %v7046_v16 = vsel %vm6906_vm14, %v1818_v21, %v1945_v3  ;;  %v1940_v3 = vsel %vm6925_vm2, %v1889_v63, %v6764_v34  ;;  %vm10726_vm13 = vmmov %vm10724_vm0 }
 0x3e8   : > { %2007 = vrot.lane.b32.xlu1 %v7046_v16, %s4996_s26  ;;  %v1821_v34 = vsel %vm10726_vm13, %v6983_v53, %v6969_v54  ;;  %vm10727_vm10 = vmmov %vm10720_vm1 }
 0x3ea   : > { %v1871_v17 = vpop.permute.xlu1 %1870 }
 0x3eb   : > { %v1928_v14 = vsel %vm10720_vm1, %v1873_v43, %v1871_v17 }
 0x3ec   : > { %v1875_v19 = vpop.permute.xlu0 %1874  ;;  %v1947_v9 = vsel %vm6901_vm6, %v1928_v14, %v6746_v62  ;;  %v1879_v39 = vpop.permute.xlu2 %1878  ;;  %v1843_v62 = vsel %vm10724_vm0, %v6961_v61, %v1800_v41  ;;  %v1820_v14 = vsel %vm10725_vm5, %v6981_v33, %v6965_v49  ;;  %vm10729_vm0 = vmmov %vm10720_vm1 }
 0x3ed   : > { %v7061_v58 = vsel %vm6906_vm14, %v1819_v5, %v1947_v9  ;;  %v7087_v61 = vsel %vm6929_vm7, %v1843_v62, %v1940_v3 }
 0x3ee   : > { %2009 = vrot.lane.b32.xlu2 %v7061_v58, %s4996_s26 }
 0x3f2   : > { %v1877_v21 = vpop.permute.xlu1 %1876 }
 0x3f3   : > { %v1929_v38 = vsel %vm10723_vm15, %v1877_v21, %v1875_v19  ;;  %vm10728_vm15 = vmmov %vm10720_vm1 }
 0x3f4   : > { %v1881_v2 = vpop.permute.xlu0 %1880  ;;  %v1949_v24 = vsel %vm6901_vm6, %v1929_v38, %v6768_v59  ;;  %v1887_v38 = vsel %vm10727_vm10, %v1851_v47, %v1853_v0  ;;  %v1892_v59 = vsel %vm10728_vm15, %v1871_v17, %v1873_v43  ;;  %v1846_v0 = vsel %vm10725_vm5, %v6967_v40, %v6977_v52  ;;  %vm10732_vm10 = vmmov %vm10729_vm0 }
 0x3f5   : > { %v1930_v5 = vsel %vm10720_vm1, %v1881_v2, %v1879_v39  ;;  %v7091_v41 = vsel %vm6906_vm14, %v1820_v14, %v1949_v24  ;;  %v1946_v63 = vsel %vm6925_vm2, %v1892_v59, %v6803_v15  ;;  %v1936_v3 = vsel %vm6925_vm2, %v1887_v38, %v6807_v26  ;;  %vm10730_vm1 = vmmov %vm10725_vm5 }
 0x3f6   : > { %v1951_v6 = vsel %vm6901_vm6, %v1930_v5, %v6797_v44  ;;  %2039 = vrot.lane.b32.xlu2 %v7087_v61, %s4996_s26  ;;  %2011 = vrot.lane.b32.xlu0 %v7091_v41, %s4996_s26  ;;  %v1888_v44 = vsel %vm10729_vm0, %v6985_v56, %v1857_v50  ;;  %v1841_v56 = vsel %vm10730_vm1, %v6955_v29, %v6971_v10  ;;  %vm10731_vm13 = vmmov %vm10730_vm1  ;;  %v10750_v14 = vmov 0 }
 0x3f7   : > { %v7095_v9 = vsel %vm6906_vm14, %v1821_v34, %v1951_v6  ;;  %v1938_v47 = vsel %vm6925_vm2, %v1888_v44, %v6830_v51  ;;  %v1842_v15 = vsel %vm10731_vm13, %v6957_v27, %v6973_v28  ;;  %v7127_v50 = vsel %vm6929_vm7, %v1846_v0, %v1946_v63  ;;  %vm10733_vm15 = vmmov %vm10729_vm0 }
 0x3f8   : > { %2013 = vrot.lane.b32.xlu1 %v7095_v9, %s4996_s26  ;;  %v7131_v26 = vsel %vm6929_vm7, %v1841_v56, %v1936_v3  ;;  %v7135_v51 = vsel %vm6929_vm7, %v1842_v15, %v1938_v47  ;;  %v1890_v29 = vsel %vm10732_vm10, %v1863_v12, %v1865_v1  ;;  %v1891_v27 = vsel %vm10733_vm15, %v1867_v55, %v1869_v45  ;;  %vm10734_vm0 = vmmov %vm10730_vm1 }
 0x3f9   : > { %v1942_v40 = vsel %vm6925_vm2, %v1890_v29, %v6836_v32  ;;  %v1944_v10 = vsel %vm6925_vm2, %v1891_v27, %v6858_v46  ;;  %v1844_v28 = vsel %vm10734_vm0, %v6959_v13, %v6975_v37  ;;  %vm10735_vm5 = vmmov %vm10734_vm0  ;;  %v1976_v1 = vand.u32 7, %v5774_v8 }
 0x3fa   : > { %v1845_v52 = vsel %vm10735_vm5, %v6963_v7, %v6979_v25  ;;  %v7159_v12 = vsel %vm6929_vm7, %v1844_v28, %v1942_v40  ;;  %vm10736_vm1 = vmmov %vm10732_vm10  ;;  %v10743_v45 = vmov 0  ;;  %vm10753_vm6 = vcmask 15360  }
 0x3fb   : > { %v7163_v55 = vsel %vm6929_vm7, %v1845_v52, %v1944_v10  ;;  %v1893_v32 = vsel %vm10736_vm1, %v1875_v19, %v1877_v21  ;;  %vm10737_vm13 = vmmov %vm10736_vm1  ;;  %vm1986_vm14 = vcmp.lt.s32.totalorder %v1976_v1, 4 }
 0x3fc   : > { %v1894_v46 = vsel %vm10737_vm13, %v1879_v39, %v1881_v2  ;;  %v1948_v13 = vsel %vm6925_vm2, %v1893_v32, %v6864_v60  ;;  %vm10738_vm10 = vmmov %vm10734_vm0  ;;  %v2016_v39 = vpop.permute.xlu2 %2015 }
 0x3fd   : > { %v1950_v7 = vsel %vm6925_vm2, %v1894_v46, %v6879_v11  ;;  %v1847_v37 = vsel %vm10738_vm10, %v6965_v49, %v6981_v33  ;;  %vm10739_vm15 = vmmov %vm10734_vm0  ;;  %v1977_v11 = vand.u32 7, %v5785_v48  ;;  %vm10473_vm0 = vcmask 1031168   ;;  %v2123_v49 = vpop.permute.xlu1 %2122 }
 0x3fe   : > { %2045 = vrot.lane.b32.xlu2 %v7127_v50, %s4996_s26  ;;  %2035 = vrot.lane.b32.xlu0 %v7131_v26, %s4996_s26  ;;  %v1848_v19 = vsel %vm10739_vm15, %v6969_v54, %v6983_v53  ;;  %v7187_v25 = vsel %vm6929_vm7, %v1847_v37, %v1948_v13  ;;  %v10740_v53 = vmov 0 }
 0x3ff   : > { %v7191_v2 = vsel %vm6929_vm7, %v1848_v19, %v1950_v7  ;;  %vm1985_vm5 = vcmp.ge.s32.totalorder %v1977_v11, 2  ;;  %vm1987_vm1 = vcmp.lt.s32.totalorder %v1977_v11, 4  ;;  %vm1979_vm13 = vcmp.ge.s32.totalorder %v1977_v11, 4 }
 0x400   : > { %2037 = vrot.lane.b32.xlu1 %v7135_v51, %s4996_s26  ;;  %vm1981_vm10 = vcmp.lt.s32.totalorder %v1977_v11, 6  ;;  %vm7219_vm15 = vmand %vm1985_vm5, %vm1987_vm1  ;;  %vm10476_vm7 = vcmask 15360   ;;  %vm10746_vm5 = vcmask 1031168   ;;  %vm1978_vm1 = vcmp.ge.s32.totalorder %v1976_v1, 4 }
 0x401   : > { %v10741_v53 = vsel %vm7219_vm15, 4294967295, %v10740_v53  ;;  %vm7224_vm2 = vmand %vm1979_vm13, %vm1981_vm10  ;;  %vm1980_vm13 = vcmp.lt.s32.totalorder %v1976_v1, 6 }
 0x402   : > { %10742 = vst [vmem:[#allocation24_spill] sm:$0xff] %v10741_v53  ;;  %v10744_v45 = vsel %vm7224_vm2, 4294967295, %v10743_v45 }
 0x403   : > { %10745 = vst [vmem:[#allocation25_spill] sm:$0xff] %v10744_v45 }
 0x404   : > { %v2052_v60 = vpop.permute.xlu2 %2051 }
 0x405   : > { %v2062_v17 = vsel %vm10476_vm7, %v2052_v60, %v2016_v39  ;;  %vm7247_vm7 = vmand %vm1978_vm1, %vm1980_vm13  ;;  %v2089_v24 = vsel %vm10753_vm6, %v2016_v39, %v2052_v60 }
 0x406   : > { %2094 = vrot.lane.b32.xlu2 %v7135_v51, %s4997_s27  ;;  %2041 = vrot.lane.b32.xlu0 %v7159_v12, %s4996_s26  ;;  %v10751_v14 = vsel %vm7247_vm7, 4294967295, %v10750_v14 }
 0x407   : > { %10752 = vst [vmem:[#allocation27_spill] sm:$0xff] %v10751_v14 }
 0x408   : > { %2043 = vrot.lane.b32.xlu1 %v7163_v55, %s4996_s26 }
 0x40c   : > { %v2125_v54 = vpop.permute.xlu2 %2124 }
 0x40d   : > { %v2171_v33 = vsel %vm10473_vm0, %v2125_v54, %v2123_v49  ;;  %vm1984_vm0 = vcmp.ge.s32.totalorder %v1976_v1, 2  ;;  %v2135_v62 = vsel %vm10746_vm5, %v2123_v49, %v2125_v54 }
 0x40e   : > { %2100 = vrot.lane.b32.xlu2 %v7022_v23, %s4997_s27  ;;  %2047 = vrot.lane.b32.xlu0 %v7187_v25, %s4996_s26  ;;  %v2193_v43 = vsel %vm7219_vm15, %v2171_v33, %v6918_v31  ;;  %vm7243_vm10 = vmand %vm1984_vm0, %vm1986_vm14  ;;  %v10747_v31 = vmov 0 }
 0x40f   : > { %v7234_v21 = vsel %vm7224_vm2, %v2062_v17, %v2193_v43  ;;  %v10748_v31 = vsel %vm7243_vm10, 4294967295, %v10747_v31  ;;  %v2192_v5 = vsel %vm7243_vm10, %v2135_v62, %v6941_v4  ;;  %vm10754_vm14 = vmmov %vm10746_vm5 }
 0x410   : > { %2049 = vrot.lane.b32.xlu1 %v7191_v2, %s4996_s26  ;;  %10749 = vst [vmem:[#allocation26_spill] sm:$0xff] %v10748_v31  ;;  %v7257_v34 = vsel %vm7247_vm7, %v2089_v24, %v2192_v5  ;;  %vm10755_vm0 = vmmov %vm10746_vm5 }
 0x411   : > { %vm10756_vm5 = vmmov %vm10753_vm6 }
 0x412   : > { %vm10757_vm1 = vmmov %vm10755_vm0 }
 0x413   : > { %vm10758_vm13 = vmmov %vm10756_vm5 }
 0x416   : > { %2106 = vrot.lane.b32.xlu2 %v7163_v55, %s4997_s27  ;;  %2090 = vrot.lane.b32.xlu0 %v7131_v26, %s4997_s27 }
 0x418   : > { %2092 = vrot.lane.b32.xlu1 %v7008_v30, %s4997_s27 }
 0x41e   : > { %2112 = vrot.lane.b32.xlu2 %v7061_v58, %s4997_s27  ;;  %2096 = vrot.lane.b32.xlu0 %v7004_v18, %s4997_s27 }
 0x420   : > { %2098 = vrot.lane.b32.xlu1 %v7087_v61, %s4997_s27 }
 0x426   : > { %2118 = vrot.lane.b32.xlu2 %v7191_v2, %s4997_s27  ;;  %2102 = vrot.lane.b32.xlu0 %v7159_v12, %s4997_s27 }
 0x428   : > { %2104 = vrot.lane.b32.xlu1 %v7042_v42, %s4997_s27 }
 0x42e   : > { %2108 = vrot.lane.b32.xlu0 %v7046_v16, %s4997_s27  ;;  %2255 = vrot.lane.b32.xlu2 %v7234_v21, %s4998_s28 }
 0x430   : > { %2110 = vrot.lane.b32.xlu1 %v7127_v50, %s4997_s27 }
 0x436   : > { %2114 = vrot.lane.b32.xlu0 %v7187_v25, %s4997_s27  ;;  %2291 = vrot.lane.b32.xlu2 %v7257_v34, %s4998_s28 }
 0x438   : > { %2116 = vrot.lane.b32.xlu1 %v7091_v41, %s4997_s27  ;;  %v2004_v38 = vpop.permute.xlu2 %2003 }
 0x43e   : > { %2120 = vrot.lane.b32.xlu0 %v7095_v9, %s4997_s27  ;;  %2364 = vrot.lane.b32.xlu2 %v7234_v21, %s4999_s29 }
 0x440   : > { %2362 = vrot.lane.b32.xlu1 %v7257_v34, %s4999_s29 }
 0x448   : > { %v7271_v4 = vpop.permute.xlu0 %1999  ;;  %v7279_v63 = vpop.permute.xlu2 %2009 }
 0x44a   : > { %v7273_v6 = vpop.permute.xlu1 %2001 }
 0x450   : > { %v2040_v0 = vpop.permute.xlu2 %2039 }
 0x451   : > { %v2056_v1 = vsel %vm10758_vm13, %v2040_v0, %v2004_v38  ;;  %vm10762_vm13 = vmmov %vm10756_vm5 }
 0x458   : > { %v7275_v59 = vpop.permute.xlu0 %2005  ;;  %v7291_v27 = vpop.permute.xlu2 %2045 }
 0x45a   : > { %v7277_v44 = vpop.permute.xlu1 %2007 }
 0x460   : > { %v7299_v52 = vpop.permute.xlu2 %2094 }
 0x468   : > { %v7281_v3 = vpop.permute.xlu0 %2011  ;;  %v2101_v39 = vpop.permute.xlu2 %2100 }
 0x46a   : > { %v7283_v47 = vpop.permute.xlu1 %2013 }
 0x470   : > { %v7285_v56 = vpop.permute.xlu0 %2035 }
 0x471   : > { %v2054_v7 = vsel %vm10753_vm6, %v7285_v56, %v7271_v4  ;;  %vm10760_vm6 = vmmov %vm10756_vm5 }
 0x472   : > { %v7287_v15 = vpop.permute.xlu1 %2037 }
 0x473   : > { %v2055_v54 = vsel %vm10756_vm5, %v7287_v15, %v7273_v6 }
 0x478   : > { %v7289_v29 = vpop.permute.xlu0 %2041 }
 0x47a   : > { %v7293_v40 = vpop.permute.xlu1 %2043 }
 0x480   : > { %v7295_v10 = vpop.permute.xlu0 %2047 }
 0x482   : > { %v7297_v28 = vpop.permute.xlu1 %2049 }
 0x488   : > { %v2091_v32 = vpop.permute.xlu0 %2090 }
 0x48a   : > { %v2093_v46 = vpop.permute.xlu1 %2092 }
 0x48b   : > { %v2163_v13 = vsel %vm10754_vm14, %v2093_v46, %v2091_v32  ;;  %vm10759_vm14 = vmmov %vm10755_vm0 }
 0x48c   : > { %v2177_v37 = vsel %vm7219_vm15, %v2163_v13, %v7008_v30 }
 0x48d   : > { %v7310_v19 = vsel %vm7224_vm2, %v2054_v7, %v2177_v37  ;;  %v2057_v7 = vsel %vm10760_vm6, %v7289_v29, %v7275_v59  ;;  %vm10764_vm6 = vmmov %vm10755_vm0 }
 0x48e   : > { %2239 = vrot.lane.b32.xlu0 %v7310_v19, %s4998_s28 }
 0x490   : > { %v2097_v60 = vpop.permute.xlu0 %2096 }
 0x491   : > { %v2164_v11 = vsel %vm10755_vm0, %v2097_v60, %v7299_v52 }
 0x492   : > { %v2099_v49 = vpop.permute.xlu1 %2098  ;;  %v2179_v30 = vsel %vm7219_vm15, %v2164_v11, %v7004_v18  ;;  %v2107_v18 = vpop.permute.xlu2 %2106 }
 0x493   : > { %v2165_v33 = vsel %vm10757_vm1, %v2101_v39, %v2099_v49  ;;  %v7326_v43 = vsel %vm7224_vm2, %v2055_v54, %v2179_v30  ;;  %vm10761_vm1 = vmmov %vm10755_vm0 }
 0x494   : > { %v2181_v17 = vsel %vm7219_vm15, %v2165_v33, %v7022_v23  ;;  %2241 = vrot.lane.b32.xlu1 %v7326_v43, %s4998_s28 }
 0x495   : > { %v7335_v62 = vsel %vm7224_vm2, %v2056_v1, %v2181_v17  ;;  %v2058_v1 = vsel %vm10756_vm5, %v7293_v40, %v7277_v44 }
 0x496   : > { %2243 = vrot.lane.b32.xlu2 %v7335_v62, %s4998_s28 }
 0x498   : > { %v2103_v5 = vpop.permute.xlu0 %2102 }
 0x49a   : > { %v2105_v24 = vpop.permute.xlu1 %2104  ;;  %v2113_v54 = vpop.permute.xlu2 %2112 }
 0x49b   : > { %v2166_v13 = vsel %vm10759_vm14, %v2105_v24, %v2103_v5  ;;  %vm10763_vm14 = vmmov %vm10755_vm0 }
 0x49c   : > { %v2183_v23 = vsel %vm7219_vm15, %v2166_v13, %v7042_v42  ;;  %v2059_v13 = vsel %vm10762_vm13, %v7291_v27, %v7279_v63  ;;  %vm10767_vm13 = vmmov %vm10761_vm1 }
 0x49d   : > { %v7348_v37 = vsel %vm7224_vm2, %v2057_v7, %v2183_v23 }
 0x49e   : > { %2245 = vrot.lane.b32.xlu0 %v7348_v37, %s4998_s28 }
 0x4a0   : > { %v2109_v11 = vpop.permute.xlu0 %2108 }
 0x4a1   : > { %v2167_v33 = vsel %vm10755_vm0, %v2109_v11, %v2107_v18  ;;  %vm10765_vm0 = vmmov %vm10756_vm5 }
 0x4a2   : > { %v2111_v30 = vpop.permute.xlu1 %2110  ;;  %v2185_v42 = vsel %vm7219_vm15, %v2167_v33, %v7046_v16  ;;  %v2129_v16 = vsel %vm10763_vm14, %v2099_v49, %v2101_v39  ;;  %vm10766_vm5 = vmmov %vm10765_vm0 }
 0x4a3   : > { %v2168_v17 = vsel %vm10761_vm1, %v2113_v54, %v2111_v30  ;;  %v7365_v7 = vsel %vm7224_vm2, %v2058_v1, %v2185_v42  ;;  %v2180_v1 = vsel %vm7243_vm10, %v2129_v16, %v7087_v61  ;;  %v2060_v42 = vsel %vm10766_vm5, %v7295_v10, %v7281_v3  ;;  %vm10768_vm14 = vmmov %vm10761_vm1 }
 0x4a4   : > { %v2187_v23 = vsel %vm7219_vm15, %v2168_v17, %v7061_v58  ;;  %2247 = vrot.lane.b32.xlu1 %v7365_v7, %s4998_s28  ;;  %v2083_v17 = vsel %vm10765_vm0, %v2004_v38, %v2040_v0  ;;  %v2127_v61 = vsel %vm10761_vm1, %v2091_v32, %v2093_v46  ;;  %v2132_v38 = vsel %vm10767_vm13, %v2111_v30, %v2113_v54  ;;  %v2119_v0 = vpop.permute.xlu2 %2118  ;;  %vm10770_vm5 = vmmov %vm10765_vm0 }
 0x4a5   : > { %v7374_v20 = vsel %vm7224_vm2, %v2059_v13, %v2187_v23  ;;  %v7392_v39 = vsel %vm7247_vm7, %v2083_v17, %v2180_v1  ;;  %v2186_v16 = vsel %vm7243_vm10, %v2132_v38, %v7127_v50  ;;  %v2176_v1 = vsel %vm7243_vm10, %v2127_v61, %v7131_v26  ;;  %vm10771_vm13 = vmmov %vm10761_vm1 }
 0x4a6   : > { %2249 = vrot.lane.b32.xlu2 %v7374_v20, %s4998_s28  ;;  %v2086_v46 = vsel %vm10765_vm0, %v7279_v63, %v7291_v27  ;;  %v2081_v50 = vsel %vm10770_vm5, %v7271_v4, %v7285_v56  ;;  %v2128_v63 = vsel %vm10761_vm1, %v7299_v52, %v2097_v60  ;;  %v2130_v4 = vsel %vm10771_vm13, %v2103_v5, %v2105_v24 }
 0x4a7   : > { %v7431_v26 = vsel %vm7247_vm7, %v2086_v46, %v2186_v16  ;;  %v2178_v56 = vsel %vm7243_vm10, %v2128_v63, %v7135_v51  ;;  %v2182_v27 = vsel %vm7243_vm10, %v2130_v4, %v7159_v12  ;;  %v2216_v16 = vand.u32 3, %v5774_v8 }
 0x4a8   : > { %v2115_v33 = vpop.permute.xlu0 %2114  ;;  %v10783_v8 = vmov 0  ;;  %v10786_v4 = vmov 0 }
 0x4aa   : > { %v2117_v57 = vpop.permute.xlu1 %2116 }
 0x4ab   : > { %v2169_v58 = vsel %vm10764_vm6, %v2117_v57, %v2115_v33  ;;  %vm10769_vm6 = vmmov %vm10765_vm0 }
 0x4ac   : > { %v2189_v13 = vsel %vm7219_vm15, %v2169_v58, %v7091_v41  ;;  %v2061_v58 = vsel %vm10769_vm6, %v7297_v28, %v7283_v47  ;;  %vm10773_vm6 = vmmov %vm10765_vm0 }
 0x4ad   : > { %v7396_v49 = vsel %vm7224_vm2, %v2060_v42, %v2189_v13  ;;  %v2084_v60 = vsel %vm10773_vm6, %v7275_v59, %v7289_v29 }
 0x4ae   : > { %2279 = vrot.lane.b32.xlu2 %v7392_v39, %s4998_s28  ;;  %2251 = vrot.lane.b32.xlu0 %v7396_v49, %s4998_s28  ;;  %v7464_v51 = vsel %vm7247_vm7, %v2084_v60, %v2182_v27 }
 0x4b0   : > { %v2121_v41 = vpop.permute.xlu0 %2120 }
 0x4b1   : > { %v2170_v23 = vsel %vm10768_vm14, %v2121_v41, %v2119_v0  ;;  %vm10772_vm14 = vmmov %vm10765_vm0 }
 0x4b2   : > { %v2191_v32 = vsel %vm7219_vm15, %v2170_v23, %v7095_v9  ;;  %v7435_v9 = vsel %vm7247_vm7, %v2081_v50, %v2176_v1  ;;  %v2082_v52 = vsel %vm10772_vm14, %v7273_v6, %v7287_v15  ;;  %vm10774_vm0 = vmmov %vm10761_vm1  ;;  %v2217_v1 = vand.u32 3, %v5785_v48 }
 0x4b3   : > { %v7425_v54 = vsel %vm7224_vm2, %v2061_v58, %v2191_v32  ;;  %v7458_v30 = vsel %vm7247_vm7, %v2082_v52, %v2178_v56  ;;  %v2131_v12 = vsel %vm10774_vm0, %v2107_v18, %v2109_v11  ;;  %vm10775_vm5 = vmmov %vm10774_vm0  ;;  %v10780_v50 = vmov 0 }
 0x4b4   : > { %2253 = vrot.lane.b32.xlu1 %v7425_v54, %s4998_s28  ;;  %v2133_v6 = vsel %vm10775_vm5, %v2115_v33, %v2117_v57  ;;  %v2184_v59 = vsel %vm7243_vm10, %v2131_v12, %v7163_v55  ;;  %vm10776_vm1 = vmmov %vm10773_vm6  ;;  %vm2226_vm5 = vcmp.lt.s32.totalorder %v2216_v16, 2  ;;  %vm2219_vm2 = vcmp.ge.s32.totalorder %v2217_v1, 2 }
 0x4b5   : > { %v2188_v15 = vsel %vm7243_vm10, %v2133_v6, %v7187_v25  ;;  %v2085_v29 = vsel %vm10776_vm1, %v7277_v44, %v7293_v40  ;;  %vm10777_vm13 = vmmov %vm10776_vm1  ;;  %v2363_v40 = vpop.permute.xlu1 %2362  ;;  %vm2221_vm15 = vcmp.lt.s32.totalorder %v2217_v1, 3  ;;  %v10789_v56 = vmov 0 }
 0x4b6   : > { %2285 = vrot.lane.b32.xlu2 %v7431_v26, %s4998_s28  ;;  %2275 = vrot.lane.b32.xlu0 %v7435_v9, %s4998_s28  ;;  %v2087_v18 = vsel %vm10777_vm13, %v7281_v3, %v7295_v10  ;;  %v7486_v5 = vsel %vm7247_vm7, %v2085_v29, %v2184_v59  ;;  %vm10778_vm14 = vmmov %vm10774_vm0  ;;  %vm2224_vm0 = vcmp.ge.s32.totalorder %v2216_v16, 1  ;;  %vm2227_vm13 = vcmp.lt.s32.totalorder %v2217_v1, 2 }
 0x4b7   : > { %v7492_v57 = vsel %vm7247_vm7, %v2087_v18, %v2188_v15  ;;  %v2134_v55 = vsel %vm10778_vm14, %v2119_v0, %v2121_v41  ;;  %vm10779_vm6 = vmmov %vm10776_vm1  ;;  %vm2225_vm1 = vcmp.ge.s32.totalorder %v2217_v1, 1  ;;  %vm2366_vm14 = vcmask 1039360   ;;  %v7618_v1 = vld [vmem:[#allocation2 + $0x38] sm:$0x80] }
 0x4b8   : > { %v2190_v25 = vsel %vm7243_vm10, %v2134_v55, %v7191_v2  ;;  %v2088_v44 = vsel %vm10779_vm6, %v7283_v47, %v7297_v28  ;;  %v2256_v2 = vpop.permute.xlu2 %2255  ;;  %vm2218_vm6 = vcmp.ge.s32.totalorder %v2216_v16, 2  ;;  %vm7555_vm10 = vmand %vm2224_vm0, %vm2226_vm5  ;;  %10793 = vst [vmem:[#allocation33_spill] sm:$0xff] %v7618_v1 }
 0x4b9   : > { %v7507_v3 = vsel %vm7247_vm7, %v2088_v44, %v2190_v25  ;;  %vm2220_vm7 = vcmp.lt.s32.totalorder %v2216_v16, 3  ;;  %v10781_v50 = vsel %vm7555_vm10, 4294967295, %v10780_v50  ;;  %vm7559_vm9 = vmand %vm2225_vm1, %vm2227_vm13  ;;  %v7616_v16 = vld [vmem:[#allocation2] sm:$0x80]  ;;  %vm10809_vm1 = vcmask 1045504  }
 0x4ba   : > { %10782 = vst [vmem:[#allocation28_spill] sm:$0xff] %v10781_v50  ;;  %v10784_v8 = vsel %vm7559_vm9, 4294967295, %v10783_v8  ;;  %vm7565_vm11 = vmand %vm2218_vm6, %vm2220_vm7  ;;  %vm10574_vm7 = vcmask 1041408  }
 0x4bb   : > { %10785 = vst [vmem:[#allocation29_spill] sm:$0xff] %v10784_v8  ;;  %v10787_v4 = vsel %vm7565_vm11, 4294967295, %v10786_v4  ;;  %vm7569_vm12 = vmand %vm2219_vm2, %vm2221_vm15  ;;  %vm10796_vm2 = vcmask 1046528  }
 0x4bc   : > { %2277 = vrot.lane.b32.xlu1 %v7458_v30, %s4998_s28  ;;  %10788 = vst [vmem:[#allocation30_spill] sm:$0xff] %v10787_v4  ;;  %v10790_v56 = vsel %vm7569_vm12, 4294967295, %v10789_v56  ;;  %vm10797_vm15 = vmmov %vm10796_vm2 }
 0x4bd   : > { %10791 = vst [vmem:[#allocation31_spill] sm:$0xff] %v10790_v56  ;;  %vm10805_vm0 = vmmov %vm10796_vm2 }
 0x4be   : > { %2334 = vrot.lane.b32.xlu2 %v7458_v30, %s4999_s29  ;;  %2281 = vrot.lane.b32.xlu0 %v7464_v51, %s4998_s28  ;;  %10792 = vst [vmem:[#allocation32_spill] sm:$0xff] %v7616_v16  ;;  %vm10807_vm5 = vmmov %vm10805_vm0 }
 0x4bf   : > { %vm10811_vm13 = vmmov %vm10809_vm1 }
 0x4c0   : > { %v2292_v47 = vpop.permute.xlu2 %2291  ;;  %vm10816_vm6 = vmmov %vm10805_vm0 }
 0x4c1   : > { %v2302_v12 = vsel %vm2293_vm8, %v2292_v47, %v2256_v2  ;;  %v2329_v6 = vsel %vm2293_vm8, %v2256_v2, %v2292_v47 }
 0x4c4   : > { %2283 = vrot.lane.b32.xlu1 %v7486_v5, %s4998_s28 }
 0x4c6   : > { %2340 = vrot.lane.b32.xlu2 %v7335_v62, %s4999_s29  ;;  %2287 = vrot.lane.b32.xlu0 %v7492_v57, %s4998_s28 }
 0x4c8   : > { %v2365_v28 = vpop.permute.xlu2 %2364 }
 0x4c9   : > { %v2375_v48 = vsel %vm2366_vm14, %v2363_v40, %v2365_v28  ;;  %v2411_v63 = vsel %vm2366_vm14, %v2365_v28, %v2363_v40 }
 0x4ca   : > { %v2432_v27 = vsel %vm7555_vm10, %v2375_v48, %v7257_v34  ;;  %v2433_v52 = vsel %vm7559_vm9, %v2411_v63, %v7234_v21  ;;  %v7594_v21 = vld [vmem:[%s10375_s1 + $0x10] sm:$0xff] }
 0x4cb   : > { %v7585_v29 = vsel %vm7565_vm11, %v2329_v6, %v2432_v27  ;;  %v7589_v18 = vsel %vm7569_vm12, %v2302_v12, %v2433_v52  ;;  %v7599_v25 = vperm.slane %v7594_v21, 0  ;;  %v7602_v44 = vperm.slane %v7594_v21, 6 }
 0x4cc   : > { %2289 = vrot.lane.b32.xlu1 %v7507_v3, %s4998_s28 }
 0x4ce   : > { %2346 = vrot.lane.b32.xlu2 %v7486_v5, %s4999_s29  ;;  %2330 = vrot.lane.b32.xlu0 %v7435_v9, %s4999_s29 }
 0x4d4   : > { %2332 = vrot.lane.b32.xlu1 %v7310_v19, %s4999_s29 }
 0x4d6   : > { %2352 = vrot.lane.b32.xlu2 %v7374_v20, %s4999_s29  ;;  %2336 = vrot.lane.b32.xlu0 %v7326_v43, %s4999_s29 }
 0x4dc   : > { %2338 = vrot.lane.b32.xlu1 %v7392_v39, %s4999_s29 }
 0x4de   : > { %2358 = vrot.lane.b32.xlu2 %v7507_v3, %s4999_s29  ;;  %2342 = vrot.lane.b32.xlu0 %v7464_v51, %s4999_s29 }
 0x4e4   : > { %2344 = vrot.lane.b32.xlu1 %v7348_v37, %s4999_s29 }
 0x4e6   : > { %2348 = vrot.lane.b32.xlu0 %v7365_v7, %s4999_s29 }
 0x4ec   : > { %2350 = vrot.lane.b32.xlu1 %v7431_v26, %s4999_s29 }
 0x4ee   : > { %2354 = vrot.lane.b32.xlu0 %v7492_v57, %s4999_s29 }
 0x4f0   : > { %v2244_v33 = vpop.permute.xlu2 %2243 }
 0x4f4   : > { %2356 = vrot.lane.b32.xlu1 %v7396_v49, %s4999_s29 }
 0x4f6   : > { %2360 = vrot.lane.b32.xlu0 %v7425_v54, %s4999_s29 }
 0x500   : > { %v2240_v10 = vpop.permute.xlu0 %2239  ;;  %v2250_v13 = vpop.permute.xlu2 %2249 }
 0x506   : > { %v2242_v24 = vpop.permute.xlu1 %2241 }
 0x508   : > { %v2280_v0 = vpop.permute.xlu2 %2279 }
 0x509   : > { %v7605_v2 = vsel %vm2293_vm8, %v2280_v0, %v2244_v33  ;;  %v7608_v47 = vsel %vm2293_vm8, %v2244_v33, %v2280_v0 }
 0x510   : > { %v7539_v11 = vpop.permute.xlu0 %2245  ;;  %v2286_v58 = vpop.permute.xlu2 %2285 }
 0x511   : > { %v7611_v40 = vsel %vm2293_vm8, %v2286_v58, %v2250_v13  ;;  %v7614_v28 = vsel %vm2293_vm8, %v2250_v13, %v2286_v58  ;;  %v7632_v58 = vld [vmem:[%s10375_s1 + $0x8] sm:$0xff] }
 0x512   : > { %v7635_v52 = vperm.slane %v7632_v58, 7 }
 0x516   : > { %v7541_v17 = vpop.permute.xlu1 %2247 }
 0x518   : > { %v2335_v59 = vpop.permute.xlu2 %2334 }
 0x520   : > { %v7543_v42 = vpop.permute.xlu0 %2251  ;;  %v2341_v45 = vpop.permute.xlu2 %2340 }
 0x526   : > { %v7545_v61 = vpop.permute.xlu1 %2253 }
 0x528   : > { %v2276_v38 = vpop.permute.xlu0 %2275 }
 0x529   : > { %v2294_v48 = vsel %vm2293_vm8, %v2276_v38, %v2240_v10  ;;  %v2321_v63 = vsel %vm2293_vm8, %v2240_v10, %v2276_v38  ;;  %v7638_v10 = vperm.slane %v7594_v21, 5 }
 0x52e   : > { %v2278_v41 = vpop.permute.xlu1 %2277 }
 0x52f   : > { %v2295_v27 = vsel %vm2293_vm8, %v2278_v41, %v2242_v24  ;;  %v2322_v0 = vsel %vm2293_vm8, %v2242_v24, %v2278_v41  ;;  %v2645_v24 = vmul.f32 %v7599_v25, %v7616_v16  ;;  %v2923_v41 = vmul.f32 %v7602_v44, %v7618_v1 }
 0x530   : > { %v7547_v23 = vpop.permute.xlu0 %2281 }
 0x531   : > { %v7626_v33 = vsel %vm2293_vm8, %v7547_v23, %v7539_v11 }
 0x536   : > { %v7551_v32 = vpop.permute.xlu1 %2283 }
 0x538   : > { %v7553_v46 = vpop.permute.xlu0 %2287 }
 0x53e   : > { %v7579_v60 = vpop.permute.xlu1 %2289 }
 0x540   : > { %v2331_v15 = vpop.permute.xlu0 %2330 }
 0x546   : > { %v2333_v13 = vpop.permute.xlu1 %2332 }
 0x547   : > { %v2367_v12 = vsel %vm2366_vm14, %v2331_v15, %v2333_v13  ;;  %v2403_v6 = vsel %vm2366_vm14, %v2333_v13, %v2331_v15 }
 0x548   : > { %v2337_v38 = vpop.permute.xlu0 %2336  ;;  %v2416_v14 = vsel %vm7555_vm10, %v2367_v12, %v7435_v9  ;;  %v2417_v31 = vsel %vm7559_vm9, %v2403_v6, %v7310_v19  ;;  %v7664_v9 = vld [vmem:[#allocation2] sm:$0xc0]  ;;  %v7666_v12 = vld [vmem:[#allocation2 + $0x38] sm:$0xc0] }
 0x549   : > { %v2368_v55 = vsel %vm2366_vm14, %v2335_v59, %v2337_v38  ;;  %v2404_v34 = vsel %vm2366_vm14, %v2337_v38, %v2335_v59  ;;  %v2438_v59 = vsel %vm7565_vm11, %v2321_v63, %v2416_v14  ;;  %v2439_v38 = vsel %vm7569_vm12, %v2294_v48, %v2417_v31  ;;  %10794 = vst [vmem:[#allocation34_spill] sm:$0xff] %v7664_v9 }
 0x54a   : > { %v2418_v15 = vsel %vm7555_vm10, %v2368_v55, %v7458_v30  ;;  %v2419_v13 = vsel %vm7559_vm9, %v2404_v34, %v7326_v43  ;;  %10795 = vst [vmem:[#allocation35_spill] sm:$0xff] %v7666_v12  ;;  %v2475_v55 = vrot.slane %v2438_v59, 6  ;;  %v2478_v6 = vrot.slane %v2439_v38, 6 }
 0x54b   : > { %v2440_v19 = vsel %vm7565_vm11, %v2322_v0, %v2418_v15  ;;  %v2441_v30 = vsel %vm7569_vm12, %v2295_v27, %v2419_v13  ;;  %v7675_v43 = vsel %vm2293_vm8, %v7539_v11, %v7547_v23  ;;  %v7678_v31 = vperm.slane %v7594_v21, 1 }
 0x54c   : > { %v2476_v14 = vrot.slane %v2440_v19, 6  ;;  %v2479_v34 = vrot.slane %v2441_v30, 6  ;;  %v2570_v48 = vmul.f32 %v7635_v52, %v7664_v9  ;;  %v2663_v63 = vrot.slane %v2645_v24, 1 }
 0x54d   : > { %v2848_v0 = vmul.f32 %v7638_v10, %v7666_v12  ;;  %v7685_v27 = vperm.slane %v7594_v21, 7  ;;  %v2298_v11 = vsel %vm2293_vm8, %v7551_v32, %v7541_v17  ;;  %v2941_v13 = vrot.slane %v2923_v41, 1 }
 0x54e   : > { %v7691_v23 = vsel %vm10574_vm7, %v2475_v55, %v2476_v14  ;;  %v7694_v15 = vsel %vm10574_vm7, %v2478_v6, %v2479_v34  ;;  %v7699_v24 = vsel %vm2293_vm8, %v7553_v46, %v7543_v42  ;;  %v2325_v59 = vsel %vm2293_vm8, %v7541_v17, %v7551_v32  ;;  %v2339_v38 = vpop.permute.xlu1 %2338  ;;  %v7722_v17 = vld [vmem:[%s10376_s2] sm:$0xff] }
 0x54f   : > { %v7706_v19 = vmul.f32 %v7599_v25, %v7691_v23  ;;  %v7710_v30 = vmul.f32 %v7602_v44, %v7694_v15  ;;  %v7715_v41 = vsel %vm2293_vm8, %v7543_v42, %v7553_v46  ;;  %v2369_v6 = vsel %vm2366_vm14, %v2339_v38, %v2341_v45 }
 0x550   : > { %v2343_v55 = vpop.permute.xlu0 %2342  ;;  %v2405_v53 = vsel %vm2366_vm14, %v2341_v45, %v2339_v38  ;;  %v7725_v32 = vperm.slane %v7722_v17, 5  ;;  %v2420_v35 = vsel %vm7555_vm10, %v2369_v6, %v7392_v39  ;;  %v7736_v45 = vmul.f32 %v7685_v27, %v7694_v15 }
 0x551   : > { %v2421_v42 = vsel %vm7559_vm9, %v2405_v53, %v7335_v62  ;;  %v2664_v46 = vrot.slane %v7706_v19, 1  ;;  %v2442_v38 = vsel %vm7565_vm11, %v7608_v47, %v2420_v35  ;;  %v10516_v39 = vrot.slane %v7710_v30, 1  ;;  %v2347_v35 = vpop.permute.xlu2 %2346 }
 0x552   : > { %v2443_v36 = vsel %vm7569_vm12, %v7605_v2, %v2421_v42  ;;  %v7746_v6 = vperm.slane %v7722_v17, 7  ;;  %v7751_v53 = vsel %vm2293_vm8, %v7579_v60, %v7545_v61  ;;  %v2481_v62 = vrot.slane %v2442_v38, 6 }
 0x553   : > { %v2483_v19 = vrot.slane %v2443_v36, 6  ;;  %v7755_v22 = vmul.f32 %v7678_v31, %v7691_v23  ;;  %v7760_v2 = vsel %vm2293_vm8, %v7545_v61, %v7579_v60  ;;  %v2665_v47 = vsel %vm10796_vm2, %v2663_v63, %v2664_v46  ;;  %vm10819_vm2 = vmmov %vm10805_vm0 }
 0x554   : > { %v2943_v42 = vsel %vm10797_vm15, %v2941_v13, %v10516_v39  ;;  %v7767_v9 = vperm.slane %v7632_v58, 4  ;;  %v7770_v36 = vsel %vm10574_vm7, %v2476_v14, %v2481_v62  ;;  %v3044_v1 = vrot.slane %v7736_v45, 2  ;;  %vm10824_vm15 = vmmov %vm10809_vm1 }
 0x555   : > { %v7773_v38 = vsel %vm10574_vm7, %v2479_v34, %v2483_v19  ;;  %v2967_v12 = vadd.f32 %v2943_v42, %v2848_v0  ;;  %v7778_v61 = vmul.f32 %v7599_v25, %v7770_v36  ;;  %v7781_v60 = vperm.slane %v7632_v58, 5 }
 0x556   : > { %10798 = vst [vmem:[#allocation36_spill] sm:$0xff] %v7767_v9  ;;  %v7784_v63 = vperm.slane %v7632_v58, 6  ;;  %v7787_v13 = vperm.slane %v7594_v21, 2  ;;  %v2345_v14 = vpop.permute.xlu1 %2344  ;;  %v2689_v39 = vadd.f32 %v2665_v47, %v2570_v48  ;;  %v2766_v34 = vrot.slane %v7755_v22, 2 }
 0x557   : > { %10799 = vst [vmem:[#allocation37_spill] sm:$0xff] %v7778_v61  ;;  %v3068_v0 = vadd.f32 %v3044_v1, %v2967_v12  ;;  %v7792_v45 = vmul.f32 %v7602_v44, %v7773_v38  ;;  %v2370_v16 = vsel %vm2366_vm14, %v2343_v55, %v2345_v14  ;;  %v2406_v9 = vsel %vm2366_vm14, %v2345_v14, %v2343_v55 }
 0x558   : > { %10800 = vst [vmem:[#allocation38_spill] sm:$0xff] %v7784_v63  ;;  %v2349_v42 = vpop.permute.xlu0 %2348  ;;  %v10520_v58 = vrot.slane %v7778_v61, 1  ;;  %v7799_v63 = vmul.f32 %v7685_v27, %v7773_v38  ;;  %v2422_v12 = vsel %vm7555_vm10, %v2370_v16, %v7464_v51  ;;  %v2423_v47 = vsel %vm7559_vm9, %v2406_v9, %v7348_v37 }
 0x559   : > { %v2371_v48 = vsel %vm2366_vm14, %v2347_v35, %v2349_v42  ;;  %v2407_v22 = vsel %vm2366_vm14, %v2349_v42, %v2347_v35  ;;  %v2444_v35 = vsel %vm7565_vm11, %v7675_v43, %v2422_v12  ;;  %v2445_v51 = vsel %vm7569_vm12, %v7626_v33, %v2423_v47 }
 0x55a   : > { %10801 = vst [vmem:[#allocation39_spill] sm:$0xff] %v7799_v63  ;;  %v2424_v55 = vsel %vm7555_vm10, %v2371_v48, %v7486_v5  ;;  %v2425_v14 = vsel %vm7559_vm9, %v2407_v22, %v7365_v7  ;;  %v2485_v9 = vrot.slane %v2444_v35, 6  ;;  %v2487_v5 = vrot.slane %v2445_v51, 6 }
 0x55b   : > { %v2446_v16 = vsel %vm7565_vm11, %v2325_v59, %v2424_v55  ;;  %v2447_v37 = vsel %vm7569_vm12, %v2298_v11, %v2425_v14  ;;  %v3088_v7 = vadd.f32 %v7746_v6, %v3068_v0  ;;  %v7828_v22 = vmul.f32 %v7678_v31, %v7770_v36  ;;  %v2353_v11 = vpop.permute.xlu2 %2352 }
 0x55c   : > { %v2489_v42 = vrot.slane %v2446_v16, 6  ;;  %v2491_v48 = vrot.slane %v2447_v37, 6  ;;  %v7831_v43 = vsel %vm10574_vm7, %v2481_v62, %v2485_v9  ;;  %v7834_v33 = vsel %vm10574_vm7, %v2483_v19, %v2487_v5 }
 0x55d   : > { %10802 = vst [vmem:[#allocation40_spill] sm:$0xff] %v7828_v22  ;;  %v2790_v59 = vadd.f32 %v2766_v34, %v2689_v39  ;;  %v7837_v12 = vperm.slane %v7594_v21, 3  ;;  %v3142_v55 = vmul.f32 0.5, %v3088_v7  ;;  %v10521_v14 = vrot.slane %v7792_v45, 1 }
 0x55e   : > { %10803 = vst [vmem:[#allocation41_spill] sm:$0xff] %v7831_v43  ;;  %v7840_v47 = vsel %vm10574_vm7, %v2485_v9, %v2489_v42  ;;  %v7843_v0 = vsel %vm10574_vm7, %v2487_v5, %v2491_v48  ;;  %v2351_v35 = vpop.permute.xlu1 %2350  ;;  %v2571_v62 = vmul.f32 %v7635_v52, %v7691_v23  ;;  %v2667_v39 = vsel %vm10805_vm0, %v2664_v46, %v10520_v58  ;;  %vm10826_vm0 = vmmov %vm10809_vm1 }
 0x55f   : > { %10804 = vst [vmem:[#allocation42_spill] sm:$0xff] %v7834_v33  ;;  %v2849_v19 = vmul.f32 %v7638_v10, %v7694_v15  ;;  %v2372_v37 = vsel %vm2366_vm14, %v2351_v35, %v2353_v11  ;;  %v2408_v9 = vsel %vm2366_vm14, %v2353_v11, %v2351_v35  ;;  %4884 = vtanh.f32 %v3142_v55 }
 0x560   : > { %v2355_v16 = vpop.permute.xlu0 %2354  ;;  %v2426_v7 = vsel %vm7555_vm10, %v2372_v37, %v7431_v26  ;;  %v2427_v46 = vsel %vm7559_vm9, %v2408_v9, %v7374_v20  ;;  %v10806_v58 = vrot.slane %v7710_v30, 1  ;;  %v7870_v11 = vmul.f32 %v7599_v25, %v7831_v43 }
 0x561   : > { %v2448_v55 = vsel %vm7565_vm11, %v7614_v28, %v2426_v7  ;;  %v2449_v26 = vsel %vm7569_vm12, %v7611_v40, %v2427_v46  ;;  %v2810_v20 = vadd.f32 %v7725_v32, %v2790_v59  ;;  %v10808_v30 = vrot.slane %v7799_v63, 2 }
 0x562   : > { %v2945_v51 = vsel %vm10807_vm5, %v10806_v58, %v10521_v14  ;;  %v2493_v37 = vrot.slane %v2448_v55, 6  ;;  %v2495_v9 = vrot.slane %v2449_v26, 6  ;;  %v7884_v14 = vmul.f32 %v7599_v25, %v7840_v47  ;;  %vm10829_vm5 = vmmov %vm10819_vm2 }
 0x563   : > { %v2968_v35 = vadd.f32 %v2945_v51, %v2849_v19  ;;  %v3046_v58 = vsel %vm10809_vm1, %v3044_v1, %v10808_v30  ;;  %v2690_v5 = vadd.f32 %v2667_v39, %v2571_v62  ;;  %v10810_v28 = vrot.slane %v7828_v22, 2  ;;  %v2359_v30 = vpop.permute.xlu2 %2358  ;;  %vm10830_vm1 = vmmov %vm10819_vm2 }
 0x564   : > { %v2573_v40 = vmul.f32 %v7635_v52, %v7831_v43  ;;  %v7892_v59 = vsel %vm10574_vm7, %v2489_v42, %v2493_v37  ;;  %v7895_v19 = vsel %vm10574_vm7, %v2491_v48, %v2495_v9  ;;  %v7900_v51 = vmul.f32 %v7602_v44, %v7834_v33 }
 0x565   : > { %v2768_v7 = vsel %vm10811_vm13, %v2766_v34, %v10810_v28  ;;  %v3069_v61 = vadd.f32 %v3046_v58, %v2968_v35  ;;  %v4885_v62 = vpop.eup %4884  ;;  %v7905_v34 = vmul.f32 %v7678_v31, %v7831_v43  ;;  %v7909_v42 = vmul.f32 %v7678_v31, %v7840_v47  ;;  %vm10832_vm13 = vmmov %vm10826_vm0 }
 0x566   : > { %v2851_v48 = vmul.f32 %v7638_v10, %v7834_v33  ;;  %v2357_v46 = vpop.permute.xlu1 %2356  ;;  %v3160_v55 = vadd.f32 1.0, %v4885_v62  ;;  %v7916_v35 = vmul.f32 %v7602_v44, %v7843_v0  ;;  %v7923_v22 = vmul.f32 %v7685_v27, %v7834_v33 }
 0x567   : > { %v3089_v39 = vadd.f32 %v7746_v6, %v3069_v61  ;;  %v2373_v28 = vsel %vm2366_vm14, %v2355_v16, %v2357_v46  ;;  %v2409_v1 = vsel %vm2366_vm14, %v2357_v46, %v2355_v16  ;;  %v10833_v4 = vrot.slane %v7909_v42, 2 }
 0x568   : > { %v2361_v58 = vpop.permute.xlu0 %2360  ;;  %v2428_v63 = vsel %vm7555_vm10, %v2373_v28, %v7492_v57  ;;  %v2429_v61 = vsel %vm7559_vm9, %v2409_v1, %v7396_v49 }
 0x569   : > { %v3143_v43 = vmul.f32 0.5, %v3089_v39  ;;  %v2374_v62 = vsel %vm2366_vm14, %v2359_v30, %v2361_v58  ;;  %v2410_v26 = vsel %vm2366_vm14, %v2361_v58, %v2359_v30  ;;  %v2450_v46 = vsel %vm7565_vm11, %v7715_v41, %v2428_v63 }
 0x56a   : > { %v2430_v16 = vsel %vm7555_vm10, %v2374_v62, %v7507_v3  ;;  %v2431_v39 = vsel %vm7559_vm9, %v2410_v26, %v7425_v54  ;;  %v2451_v57 = vsel %vm7569_vm12, %v7699_v24, %v2429_v61  ;;  %v2497_v1 = vrot.slane %v2450_v46, 6 }
 0x56b   : > { %v2452_v49 = vsel %vm7565_vm11, %v7760_v2, %v2430_v16  ;;  %v2453_v3 = vsel %vm7569_vm12, %v7751_v53, %v2431_v39  ;;  %v2499_v30 = vrot.slane %v2451_v57, 6  ;;  %v3169_v26 = vmul.f32 0.5, %v3160_v55 }
 0x56c   : > { %v2501_v58 = vrot.slane %v2452_v49, 6  ;;  %v2503_v54 = vrot.slane %v2453_v3, 6  ;;  %4886 = vtanh.f32 %v3143_v43  ;;  %v7952_v41 = vsel %vm10574_vm7, %v2493_v37, %v2497_v1 }
 0x56d   : > { %v10530_v63 = vrot.slane %v7905_v34, 2  ;;  %v10531_v24 = vrot.slane %v7909_v42, 2  ;;  %v2948_v61 = vrot.slane %v7916_v35, 1  ;;  %v10812_v2 = vrot.slane %v7585_v29, 6 }
 0x56e   : > { %v10813_v53 = vrot.slane %v7589_v18, 6  ;;  %v7968_v43 = vsel %vm10574_vm7, %v2495_v9, %v2499_v30  ;;  %v10814_v37 = vrot.slane %v7884_v14, 1  ;;  %v10815_v55 = vrot.slane %v7870_v11, 1 }
 0x56f   : > { %v7960_v28 = vsel %vm10574_vm7, %v2501_v58, %v10812_v2  ;;  %v7977_v29 = vsel %vm10574_vm7, %v2497_v1, %v2501_v58  ;;  %v7979_v35 = vmul.f32 %v3169_v26, %v2810_v20  ;;  %v10818_v18 = vrot.slane %v7900_v51, 1 }
 0x570   : > { %v7965_v62 = vsel %vm10574_vm7, %v2503_v54, %v10813_v53  ;;  %v2671_v16 = vsel %vm10816_vm6, %v10815_v55, %v10814_v37  ;;  %2539 = vst [vmem:[#allocation2 + $0x68] sm:$0xff] %v7960_v28  ;;  %v3031_v9 = vmul.f32 %v7685_v27, %v7843_v0  ;;  %v7988_v46 = vsel %vm10574_vm7, %v2499_v30, %v2503_v54  ;;  %vm10834_vm6 = vmmov %vm10826_vm0 }
 0x571   : > { %10817 = vst [vmem:[#allocation43_spill] sm:$0xff] %v7979_v35  ;;  %v2949_v39 = vsel %vm10819_vm2, %v10818_v18, %v2948_v61  ;;  %v10527_v49 = vrot.slane %v7923_v22, 2  ;;  %v7993_v3 = vmul.f32 %v7599_v25, %v7892_v59  ;;  %3196 = vrot.lane.b32.xlu0 %v7979_v35, %s4987_s8  ;;  %v2791_v20 = vadd.f32 %v2768_v7, %v2690_v5  ;;  %vm10835_vm2 = vmmov %vm10830_vm1 }
 0x572   : > { %2540 = vst [vmem:[#allocation2 + $0x60] sm:$0xff] %v7965_v62  ;;  %v2970_v57 = vadd.f32 %v2949_v39, %v2851_v48  ;;  %v2692_v1 = vadd.f32 %v2671_v16, %v2573_v40  ;;  %v3049_v58 = vrot.slane %v3031_v9, 2  ;;  %v7998_v26 = vperm.slane %v7594_v21, 4  ;;  %v4887_v2 = vpop.eup %4886 }
 0x573   : > { %10820 = vst [vmem:[#allocation44_spill] sm:$0xff] %v7988_v46  ;;  %v8003_v48 = vmul.f32 %v7602_v44, %v7895_v19  ;;  %v8007_v54 = vmul.f32 %v7685_v27, %v7895_v19  ;;  %v8010_v53 = vperm.slane %v7722_v17, 4  ;;  %v3161_v5 = vadd.f32 1.0, %v4887_v2 }
 0x574   : > { %10821 = vst [vmem:[#allocation45_spill] sm:$0xff] %v7993_v3  ;;  %v3050_v21 = vsel %vm10824_vm15, %v10527_v49, %v3049_v58  ;;  %v8017_v7 = vmul.f32 %v7678_v31, %v7892_v59  ;;  %v8020_v40 = vperm.slane %v7722_v17, 6  ;;  %v2772_v37 = vsel %vm10826_vm0, %v10530_v63, %v10531_v24  ;;  %vm10836_vm15 = vmmov %vm10826_vm0 }
 0x575   : > { %10822 = vst [vmem:[#allocation46_spill] sm:$0xff] %v8003_v48  ;;  %v3071_v55 = vadd.f32 %v3050_v21, %v2970_v57  ;;  %v10533_v16 = vrot.slane %v8003_v48, 1  ;;  %v10532_v18 = vrot.slane %v8007_v54, 2  ;;  %v2811_v39 = vadd.f32 %v7725_v32, %v2791_v20  ;;  %vm10837_vm0 = vmmov %vm10830_vm1 }
 0x576   : > { %10823 = vst [vmem:[#allocation47_spill] sm:$0xff] %v8007_v54  ;;  %v3170_v9 = vmul.f32 0.5, %v3161_v5  ;;  %v2793_v2 = vadd.f32 %v2772_v37, %v2692_v1  ;;  %v2852_v49 = vmul.f32 %v7638_v10, %v7843_v0  ;;  %v2574_v30 = vmul.f32 %v7635_v52, %v7840_v47 }
 0x577   : > { %10825 = vst [vmem:[#allocation48_spill] sm:$0xff] %v8017_v7  ;;  %v3091_v17 = vadd.f32 %v7746_v6, %v3071_v55  ;;  %v10827_v56 = vrot.slane %v7993_v3, 1  ;;  %v10828_v57 = vrot.slane %v7884_v14, 1  ;;  %v2951_v20 = vsel %vm10830_vm1, %v2948_v61, %v10533_v16  ;;  %v8043_v5 = vld [vmem:[#allocation2 + $0x68] sm:$0x7f]  ;;  %vm10840_vm1 = vmmov %vm10837_vm0 }
 0x578   : > { %v8045_v1 = vmul.f32 %v3170_v9, %v2811_v39  ;;  %v10541_v37 = vrot.slane %v8017_v7, 2  ;;  %v2971_v55 = vadd.f32 %v2951_v20, %v2852_v49  ;;  %v8050_v63 = vmul.f32 %v7678_v31, %v7960_v28 }
 0x579   : > { %v2673_v21 = vsel %vm10829_vm5, %v10828_v57, %v10827_v56  ;;  %v8052_v24 = vld [vmem:[#allocation2 + $0x60] sm:$0x3f]  ;;  %v3145_v56 = vmul.f32 0.5, %v3091_v17  ;;  %v3052_v61 = vsel %vm10832_vm13, %v3049_v58, %v10532_v18  ;;  %v3035_v9 = vmul.f32 %v7685_v27, %v7965_v62  ;;  %vm10838_vm5 = vmmov %vm10837_vm0 }
 0x57a   : > { %10831 = vst [vmem:[#allocation49_spill] sm:$0xff] %v8045_v1  ;;  %v8054_v14 = vld [vmem:[#allocation2 + $0x60] sm:$0x7f]  ;;  %3198 = vrot.lane.b32.xlu1 %v8045_v1, %s4987_s8  ;;  %v2693_v49 = vadd.f32 %v2673_v21, %v2574_v30  ;;  %v3072_v57 = vadd.f32 %v3052_v61, %v2971_v55  ;;  %v2653_v20 = vmul.f32 %v7599_v25, %v8043_v5  ;;  %v8080_v55 = vld [vmem:[#allocation2 + $0x68] sm:$0x3f]  ;;  %v2779_v61 = vrot.slane %v8050_v63, 2  ;;  %vm10841_vm13 = vmmov %vm10834_vm6 }
 0x57b   : > { %v2931_v39 = vmul.f32 %v7602_v44, %v8054_v14  ;;  %v8069_v17 = vmul.f32 %v7781_v60, %v7691_v23  ;;  %v2813_v58 = vadd.f32 %v7725_v32, %v2793_v2  ;;  %4888 = vtanh.f32 %v3145_v56 }
 0x57c   : > { %v2856_v18 = vmul.f32 %v7638_v10, %v8052_v24  ;;  %v2774_v30 = vsel %vm10834_vm6, %v10833_v4, %v10541_v37  ;;  %v3092_v21 = vadd.f32 %v7746_v6, %v3072_v57  ;;  %v2930_v2 = vmul.f32 %v7602_v44, %v7988_v46 }
 0x57d   : > { %v2956_v16 = vrot.slane %v2931_v39, 1  ;;  %v3057_v8 = vrot.slane %v3035_v9, 2  ;;  %v2652_v39 = vmul.f32 %v7599_v25, %v7977_v29  ;;  %v3034_v50 = vmul.f32 %v7685_v27, %v7988_v46 }
 0x57e   : > { %v2794_v42 = vadd.f32 %v2774_v30, %v2693_v49  ;;  %v3146_v35 = vmul.f32 0.5, %v3092_v21  ;;  %v2678_v4 = vrot.slane %v2653_v20, 1  ;;  %v2954_v37 = vrot.slane %v2930_v2, 1 }
 0x57f   : > { %v2975_v56 = vadd.f32 %v2956_v16, %v2856_v18  ;;  %v2578_v57 = vmul.f32 %v7635_v52, %v8080_v55  ;;  %v2756_v63 = vmul.f32 %v7678_v31, %v7977_v29  ;;  %v2855_v18 = vmul.f32 %v7638_v10, %v7988_v46 }
 0x580   : > { %4890 = vtanh.f32 %v3146_v35  ;;  %v2957_v9 = vsel %vm10835_vm2, %v2954_v37, %v2956_v16  ;;  %v3055_v7 = vrot.slane %v3034_v50, 2  ;;  %v8098_v49 = vmul.f32 %v7599_v25, %v7952_v41  ;;  %vm10844_vm2 = vmmov %vm10834_vm6 }
 0x581   : > { %v3076_v1 = vadd.f32 %v3057_v8, %v2975_v56  ;;  %v4889_v20 = vpop.eup %4888  ;;  %v2577_v21 = vmul.f32 %v7635_v52, %v7977_v29  ;;  %v2676_v2 = vrot.slane %v2652_v39, 1  ;;  %v2974_v56 = vadd.f32 %v2957_v9, %v2855_v18 }
 0x582   : > { %v3163_v3 = vadd.f32 1.0, %v4889_v20  ;;  %v2697_v54 = vadd.f32 %v2678_v4, %v2578_v57  ;;  %v3058_v46 = vsel %vm10836_vm15, %v3055_v7, %v3057_v8  ;;  %v10554_v35 = vrot.slane %v8098_v49, 1  ;;  %vm10849_vm15 = vmmov %vm10837_vm0 }
 0x583   : > { %v3096_v30 = vadd.f32 %v7746_v6, %v3076_v1  ;;  %v2679_v50 = vsel %vm10837_vm0, %v2676_v2, %v2678_v4  ;;  %v3075_v48 = vadd.f32 %v3058_v46, %v2974_v56  ;;  %v8108_v25 = vmul.f32 %v7678_v31, %v7952_v41 }
 0x584   : > { %v3172_v1 = vmul.f32 0.5, %v3163_v3  ;;  %v2777_v33 = vrot.slane %v2756_v63, 2  ;;  %v2576_v39 = vmul.f32 %v7635_v52, %v7952_v41  ;;  %v8114_v57 = vmul.f32 %v7602_v44, %v7968_v43 }
 0x585   : > { %v3150_v16 = vmul.f32 0.5, %v3096_v30  ;;  %v3095_v8 = vadd.f32 %v7746_v6, %v3075_v48  ;;  %v2677_v46 = vsel %vm10838_vm5, %v10554_v35, %v2676_v2  ;;  %v8122_v31 = vmul.f32 %v7685_v27, %v7968_v43  ;;  %vm10853_vm5 = vmmov %vm10844_vm2 }
 0x586   : > { %v4891_v3 = vpop.eup %4890  ;;  %v8124_v4 = vmul.f32 %v3172_v1, %v2813_v58  ;;  %v2696_v63 = vadd.f32 %v2679_v50, %v2577_v21  ;;  %v2854_v18 = vmul.f32 %v7638_v10, %v7968_v43  ;;  %v10556_v44 = vrot.slane %v8114_v57, 1 }
 0x587   : > { %4892 = vtanh.f32 %v3150_v16  ;;  %v3164_v9 = vadd.f32 1.0, %v4891_v3  ;;  %v3149_v20 = vmul.f32 0.5, %v3095_v8  ;;  %v10551_v48 = vrot.slane %v8108_v25, 2 }
 0x588   : > { %10839 = vst [vmem:[#allocation50_spill] sm:$0xff] %v8124_v4  ;;  %v10555_v30 = vrot.slane %v8122_v31, 2  ;;  %3202 = vrot.lane.b32.xlu0 %v8124_v4, %s4987_s8  ;;  %v2814_v27 = vadd.f32 %v7725_v32, %v2794_v42  ;;  %v2798_v2 = vadd.f32 %v2779_v61, %v2697_v54  ;;  %v2695_v58 = vadd.f32 %v2677_v46, %v2576_v39  ;;  %v10842_v54 = vld [vmem:[#allocation36_spill] sm:$0xff]  ;;  %v10854_v4 = vld [vmem:[#allocation35_spill] sm:$0xff] }
 0x589   : > { %v2955_v21 = vsel %vm10840_vm1, %v10556_v44, %v2954_v37  ;;  %v3173_v56 = vmul.f32 0.5, %v3164_v9  ;;  %v2780_v16 = vsel %vm10841_vm13, %v2777_v33, %v2779_v61  ;;  %4894 = vtanh.f32 %v3149_v20  ;;  %vm10857_vm1 = vmmov %vm10837_vm0 }
 0x58a   : > { %v2973_v50 = vadd.f32 %v2955_v21, %v2854_v18  ;;  %v2797_v1 = vadd.f32 %v2780_v16, %v2696_v63  ;;  %v3056_v8 = vsel %vm10834_vm6, %v10555_v30, %v3055_v7  ;;  %v8143_v3 = vmul.f32 %v7837_v12, %v8054_v14  ;;  %v10851_v30 = vld [vmem:[#allocation33_spill] sm:$0xff]  ;;  %vm10858_vm13 = vmmov %vm10837_vm0 }
 0x58b   : > { %v8147_v42 = vmul.f32 %v10842_v54, %v7691_v23  ;;  %v8149_v37 = vmul.f32 %v3173_v56, %v2814_v27  ;;  %v2778_v61 = vsel %vm10844_vm2, %v10551_v48, %v2777_v33  ;;  %v8156_v63 = vmul.f32 %v7998_v26, %v7965_v62  ;;  %vm10860_vm6 = vmmov %vm10844_vm2 }
 0x58c   : > { %v3074_v46 = vadd.f32 %v3056_v8, %v2973_v50  ;;  %v2796_v18 = vadd.f32 %v2778_v61, %v2695_v58  ;;  %v2837_v14 = vmul.f32 %v7787_v13, %v8052_v24  ;;  %v10553_v9 = vrot.slane %v8143_v3, 1 }
 0x58d   : > { %v4893_v39 = vpop.eup %4892  ;;  %10843 = vst [vmem:[#allocation36_spill] sm:$0xff] %v8149_v37  ;;  %3204 = vrot.lane.b32.xlu1 %v8149_v37, %s4987_s8  ;;  %v2818_v20 = vadd.f32 %v7725_v32, %v2798_v2  ;;  %v8167_v33 = vmul.f32 %v7781_v60, %v7770_v36  ;;  %v10558_v62 = vrot.slane %v8069_v17, 1  ;;  %v8172_v58 = vmul.f32 %v7781_v60, %v8043_v5 }
 0x58e   : > { %v3168_v7 = vadd.f32 1.0, %v4893_v39  ;;  %v3094_v27 = vadd.f32 %v7746_v6, %v3074_v46  ;;  %v2921_v24 = vadd.f32 %v10553_v9, %v2837_v14  ;;  %v10552_v56 = vrot.slane %v8156_v63, 2  ;;  %v10846_v39 = vld [vmem:[#allocation38_spill] sm:$0xff] }
 0x58f   : > { %10845 = vst [vmem:[#allocation51_spill] sm:$0xff] %v8167_v33  ;;  %v4895_v16 = vpop.eup %4894  ;;  %v2817_v2 = vadd.f32 %v7725_v32, %v2797_v1  ;;  %v2559_v8 = vmul.f32 %v10842_v54, %v8080_v55  ;;  %v8182_v61 = vmul.f32 %v10846_v39, %v7960_v28  ;;  %v10557_v48 = vrot.slane %v8167_v33, 1 }
 0x590   : > { %v3177_v21 = vmul.f32 0.5, %v3168_v7  ;;  %v3148_v50 = vmul.f32 0.5, %v3094_v27  ;;  %v3167_v5 = vadd.f32 1.0, %v4895_v16  ;;  %v2816_v7 = vadd.f32 %v7725_v32, %v2796_v18 }
 0x591   : > { %v3026_v14 = vadd.f32 %v10552_v56, %v2921_v24  ;;  %v2870_v1 = vmul.f32 %v7837_v12, %v7694_v15  ;;  %v8194_v55 = vmul.f32 %v7837_v12, %v7773_v38  ;;  %v2978_v27 = vmul.f32 %v7998_v26, %v7694_v15 }
 0x592   : > { %v8184_v46 = vmul.f32 %v3177_v21, %v2818_v20  ;;  %4896 = vtanh.f32 %v3148_v50  ;;  %v3176_v28 = vmul.f32 0.5, %v3167_v5  ;;  %v8204_v21 = vmul.f32 %v10846_v39, %v7770_v36 }
 0x593   : > { %v3086_v18 = vadd.f32 %v8020_v40, %v3026_v14  ;;  %v2888_v24 = vrot.slane %v2870_v1, 1  ;;  %v10559_v16 = vrot.slane %v8194_v55, 1  ;;  %v8209_v50 = vmul.f32 %v7998_v26, %v7773_v38 }
 0x594   : > { %10847 = vst [vmem:[#allocation38_spill] sm:$0xff] %v8184_v46  ;;  %3212 = vrot.lane.b32.xlu2 %v8184_v46, %s4987_s8  ;;  %v8211_v56 = vmul.f32 %v3176_v28, %v2817_v2  ;;  %v8215_v14 = vmul.f32 %v10846_v39, %v7691_v23  ;;  %v2830_v9 = vmul.f32 %v7787_v13, %v7694_v15  ;;  %v2994_v2 = vrot.slane %v2978_v27, 2 }
 0x595   : > { %v3105_v5 = vmul.f32 0.5, %v3086_v18  ;;  %v2613_v1 = vsel %vm10849_vm15, %v10558_v62, %v10557_v48  ;;  %v2891_v35 = vsel %vm10837_vm0, %v2888_v24, %v10559_v16  ;;  %v10563_v28 = vrot.slane %v8209_v50, 2  ;;  %v10850_v18 = vld [vmem:[#allocation32_spill] sm:$0xff]  ;;  %vm10869_vm15 = vmmov %vm10837_vm0 }
 0x596   : > { %10848 = vst [vmem:[#allocation52_spill] sm:$0xff] %v8211_v56  ;;  %3210 = vrot.lane.b32.xlu1 %v8211_v56, %s4987_s8  ;;  %v2914_v23 = vadd.f32 %v2891_v35, %v2830_v9  ;;  %v2591_v15 = vmul.f32 %v7781_v60, %v10850_v18  ;;  %v2869_v44 = vmul.f32 %v7837_v12, %v10851_v30  ;;  %v10852_v48 = vrot.slane %v8172_v58, 1 }
 0x597   : > { %4898 = vtanh.f32 %v3105_v5  ;;  %v2996_v27 = vsel %vm10853_vm5, %v2994_v2, %v10563_v28  ;;  %v2829_v5 = vmul.f32 %v7787_v13, %v10854_v4  ;;  %v10566_v9 = vrot.slane %v8182_v61, 2  ;;  %vm10874_vm5 = vmmov %vm10844_vm2 }
 0x598   : > { %v4897_v20 = vpop.eup %4896  ;;  %v2643_v62 = vadd.f32 %v10852_v48, %v2559_v8  ;;  %v3019_v18 = vadd.f32 %v2996_v27, %v2914_v23  ;;  %v2887_v56 = vrot.slane %v2869_v44, 1  ;;  %v2636_v30 = vadd.f32 %v2613_v1, %v8147_v42 }
 0x599   : > { %v3166_v35 = vadd.f32 1.0, %v4897_v20  ;;  %v2716_v37 = vrot.slane %v8215_v14, 2  ;;  %v2850_v48 = vmul.f32 %v7638_v10, %v7773_v38  ;;  %v10855_v8 = vrot.slane %v7900_v51, 1 }
 0x59a   : > { %v10856_v16 = vrot.slane %v7792_v45, 1  ;;  %v3079_v4 = vadd.f32 %v8020_v40, %v3019_v18  ;;  %v2609_v20 = vrot.slane %v2591_v15, 1  ;;  %v2889_v23 = vsel %vm10858_vm13, %v2887_v56, %v2888_v24  ;;  %v10864_v18 = vld [vmem:[#allocation39_spill] sm:$0xff]  ;;  %vm10876_vm13 = vmmov %vm10844_vm2 }
 0x59b   : > { %v3175_v46 = vmul.f32 0.5, %v3166_v35  ;;  %v2748_v44 = vadd.f32 %v10566_v9, %v2643_v62  ;;  %v10859_v42 = vrot.slane %v8204_v21, 2  ;;  %v2913_v1 = vadd.f32 %v2889_v23, %v2829_v5 }
 0x59c   : > { %v2947_v28 = vsel %vm10857_vm1, %v10856_v16, %v10855_v8  ;;  %v3098_v45 = vmul.f32 0.5, %v3079_v4  ;;  %v10862_v16 = vld [vmem:[#allocation34_spill] sm:$0xff]  ;;  %v10863_v15 = vrot.slane %v7923_v22, 2  ;;  %v10865_v56 = vrot.slane %v10864_v18, 2  ;;  %vm10875_vm1 = vmmov %vm10837_vm0 }
 0x59d   : > { %v2718_v14 = vsel %vm10860_vm6, %v2716_v37, %v10859_v42  ;;  %v2969_v27 = vadd.f32 %v2947_v28, %v2850_v48  ;;  %v4899_v51 = vpop.eup %4898  ;;  %v8259_v33 = vmul.f32 %v3175_v46, %v2816_v7  ;;  %v2551_v35 = vmul.f32 %v10842_v54, %v10862_v16  ;;  %v10867_v42 = vld [vmem:[#allocation37_spill] sm:$0xff]  ;;  %v10872_v16 = vld [vmem:[#allocation40_spill] sm:$0xff]  ;;  %vm10879_vm6 = vmmov %vm10837_vm0 }
 0x59e   : > { %v3048_v24 = vsel %vm10844_vm2, %v10865_v56, %v10863_v15  ;;  %v3123_v62 = vadd.f32 1.0, %v4899_v51  ;;  %v3018_v8 = vadd.f32 %v2994_v2, %v2913_v1  ;;  %v10866_v9 = vrot.slane %v7870_v11, 1  ;;  %vm10881_vm2 = vmmov %vm10837_vm0 }
 0x59f   : > { %10861 = vst [vmem:[#allocation32_spill] sm:$0xff] %v8259_v33  ;;  %v10868_v5 = vrot.slane %v10867_v42, 1  ;;  %v3070_v46 = vadd.f32 %v3048_v24, %v2969_v27  ;;  %3208 = vrot.lane.b32.xlu0 %v8259_v33, %s4987_s8  ;;  %v2741_v7 = vadd.f32 %v2718_v14, %v2636_v30  ;;  %4900 = vtanh.f32 %v3098_v45 }
 0x5a0   : > { %v10870_v22 = vrot.slane %v8069_v17, 1  ;;  %v2572_v4 = vmul.f32 %v7635_v52, %v7770_v36  ;;  %v2808_v2 = vadd.f32 %v8010_v53, %v2748_v44  ;;  %v3132_v11 = vmul.f32 0.5, %v3123_v62 }
 0x5a1   : > { %v2669_v28 = vsel %vm10869_vm15, %v10868_v5, %v10866_v9  ;;  %v3078_v23 = vadd.f32 %v8020_v40, %v3018_v8  ;;  %v3090_v9 = vadd.f32 %v7746_v6, %v3070_v46  ;;  %v2873_v27 = vmul.f32 %v7837_v12, %v7843_v0  ;;  %vm10882_vm15 = vmmov %vm10874_vm5 }
 0x5a2   : > { %v2611_v48 = vsel %vm10837_vm0, %v2609_v20, %v10870_v22  ;;  %v2691_v1 = vadd.f32 %v2669_v28, %v2572_v4  ;;  %v8285_v30 = vmul.f32 %v3132_v11, %v2808_v2  ;;  %v2801_v20 = vadd.f32 %v8010_v53, %v2741_v7  ;;  %vm10883_vm0 = vmmov %vm10874_vm5 }
 0x5a3   : > { %v2635_v14 = vadd.f32 %v2611_v48, %v2551_v35  ;;  %v3097_v17 = vmul.f32 0.5, %v3078_v23  ;;  %v3144_v51 = vmul.f32 0.5, %v3090_v9  ;;  %v10871_v45 = vrot.slane %v7905_v34, 2 }
 0x5a4   : > { %v10873_v44 = vrot.slane %v10872_v16, 2  ;;  %v8295_v18 = vmul.f32 %v7781_v60, %v7892_v59  ;;  %v8299_v56 = vmul.f32 %v7837_v12, %v7895_v19  ;;  %3248 = vrot.lane.b32.xlu2 %v8285_v30, %s4987_s8  ;;  %v8305_v35 = vmul.f32 %v7781_v60, %v7840_v47 }
 0x5a5   : > { %4902 = vtanh.f32 %v3097_v17  ;;  %v2981_v34 = vmul.f32 %v7998_v26, %v7843_v0  ;;  %v8311_v24 = vmul.f32 %v7998_v26, %v7895_v19  ;;  %v4901_v62 = vpop.eup %4900  ;;  %v2894_v42 = vrot.slane %v2873_v27, 1 }
 0x5a6   : > { %v2770_v15 = vsel %vm10874_vm5, %v10873_v44, %v10871_v45  ;;  %4904 = vtanh.f32 %v3144_v51  ;;  %v10569_v5 = vrot.slane %v8299_v56, 1  ;;  %v3116_v28 = vadd.f32 1.0, %v4901_v62  ;;  %vm10887_vm5 = vmmov %vm10875_vm1 }
 0x5a7   : > { %v2792_v8 = vadd.f32 %v2770_v15, %v2691_v1  ;;  %v2740_v46 = vadd.f32 %v2716_v37, %v2635_v14  ;;  %v2833_v7 = vmul.f32 %v7787_v13, %v7843_v0  ;;  %v10568_v22 = vrot.slane %v8311_v24, 2  ;;  %v10877_v14 = vld [vmem:[#allocation42_spill] sm:$0xff] }
 0x5a8   : > { %v2555_v48 = vmul.f32 %v10842_v54, %v7840_v47  ;;  %v10567_v4 = vrot.slane %v8295_v18, 1  ;;  %v2897_v2 = vsel %vm10875_vm1, %v2894_v42, %v10569_v5  ;;  %v2999_v11 = vrot.slane %v2981_v34, 2 }
 0x5a9   : > { %v3125_v23 = vmul.f32 0.5, %v3116_v28  ;;  %v2616_v9 = vrot.slane %v8305_v35, 1  ;;  %v8326_v37 = vmul.f32 %v10846_v39, %v7840_v47  ;;  %v2917_v0 = vadd.f32 %v2897_v2, %v2833_v7  ;;  %v10880_v28 = vld [vmem:[#allocation41_spill] sm:$0xff] }
 0x5aa   : > { %v8330_v1 = vmul.f32 %v10846_v39, %v7892_v59  ;;  %v3002_v27 = vsel %vm10876_vm13, %v2999_v11, %v10568_v22  ;;  %v8337_v17 = vmul.f32 %v7837_v12, %v10877_v14  ;;  %v8341_v51 = vmul.f32 %v7998_v26, %v10877_v14  ;;  %vm10891_vm13 = vmmov %vm10883_vm0 }
 0x5ab   : > { %v4903_v45 = vpop.eup %4902  ;;  %v8343_v47 = vmul.f32 %v3125_v23, %v2801_v20  ;;  %v2800_v16 = vadd.f32 %v8010_v53, %v2740_v46  ;;  %v2812_v44 = vadd.f32 %v7725_v32, %v2792_v8  ;;  %v3022_v15 = vadd.f32 %v3002_v27, %v2917_v0 }
 0x5ac   : > { %v4905_v35 = vpop.eup %4904  ;;  %v3115_v34 = vadd.f32 1.0, %v4903_v45  ;;  %v2619_v62 = vsel %vm10879_vm6, %v2616_v9, %v10567_v4  ;;  %v8352_v7 = vmul.f32 %v7781_v60, %v10880_v28  ;;  %v2892_v2 = vrot.slane %v8337_v17, 1  ;;  %vm10896_vm6 = vmmov %vm10875_vm1 }
 0x5ad   : > { %10878 = vst [vmem:[#allocation33_spill] sm:$0xff] %v8343_v47  ;;  %3234 = vrot.lane.b32.xlu1 %v8343_v47, %s4987_s8  ;;  %v3162_v20 = vadd.f32 1.0, %v4905_v35  ;;  %v3082_v46 = vadd.f32 %v8020_v40, %v3022_v15  ;;  %v2832_v8 = vmul.f32 %v7787_v13, %v10877_v14  ;;  %v2997_v23 = vrot.slane %v8341_v51, 2 }
 0x5ae   : > { %v3124_v0 = vmul.f32 0.5, %v3115_v34  ;;  %v2721_v27 = vrot.slane %v8326_v37, 2  ;;  %v10572_v45 = vrot.slane %v8330_v1, 2  ;;  %v2895_v4 = vsel %vm10881_vm2, %v2892_v2, %v2894_v42  ;;  %vm10898_vm2 = vmmov %vm10875_vm1 }
 0x5af   : > { %v3171_v22 = vmul.f32 0.5, %v3162_v20  ;;  %v2639_v5 = vadd.f32 %v2619_v62, %v2555_v48  ;;  %v3101_v47 = vmul.f32 0.5, %v3082_v46  ;;  %v2916_v35 = vadd.f32 %v2895_v4, %v2832_v8  ;;  %v10885_v62 = vld [vmem:[#allocation46_spill] sm:$0xff]  ;;  %v10889_v8 = vld [vmem:[#allocation47_spill] sm:$0xff] }
 0x5b0   : > { %v8366_v33 = vmul.f32 %v3124_v0, %v2800_v16  ;;  %v10573_v15 = vrot.slane %v8352_v7, 1  ;;  %v8371_v14 = vmul.f32 %v10846_v39, %v10880_v28  ;;  %v3000_v37 = vsel %vm10882_vm15, %v2997_v23, %v2999_v11  ;;  %vm10899_vm15 = vmmov %vm10883_vm0 }
 0x5b1   : > { %v8376_v34 = vmul.f32 %v3171_v22, %v2812_v44  ;;  %4906 = vtanh.f32 %v3101_v47  ;;  %v3021_v42 = vadd.f32 %v3000_v37, %v2916_v35  ;;  %v2853_v48 = vmul.f32 %v7638_v10, %v7895_v19  ;;  %v10892_v37 = vld [vmem:[#allocation44_spill] sm:$0xff] }
 0x5b2   : > { %3232 = vrot.lane.b32.xlu0 %v8366_v33, %s4987_s8  ;;  %v2724_v4 = vsel %vm10883_vm0, %v2721_v27, %v10572_v45  ;;  %v10884_v16 = vrot.slane %v8114_v57, 1  ;;  %v10886_v20 = vrot.slane %v10885_v62, 1  ;;  %v2554_v10 = vmul.f32 %v10842_v54, %v10880_v28 }
 0x5b3   : > { %3200 = vrot.lane.b32.xlu2 %v8376_v34, %s4987_s8  ;;  %v2744_v22 = vadd.f32 %v2724_v4, %v2639_v5  ;;  %v3081_v47 = vadd.f32 %v8020_v40, %v3021_v42  ;;  %v2617_v46 = vsel %vm10875_vm1, %v10573_v15, %v2616_v9  ;;  %v10888_v57 = vrot.slane %v8122_v31, 2  ;;  %v10894_v4 = vld [vmem:[#allocation45_spill] sm:$0xff] }
 0x5b4   : > { %v2953_v11 = vsel %vm10887_vm5, %v10886_v20, %v10884_v16  ;;  %v10890_v0 = vrot.slane %v10889_v8, 2  ;;  %v2876_v16 = vmul.f32 %v7837_v12, %v10892_v37  ;;  %v2984_v5 = vmul.f32 %v7998_v26, %v10892_v37  ;;  %vm10904_vm5 = vmmov %vm10883_vm0 }
 0x5b5   : > { %v2972_v44 = vadd.f32 %v2953_v11, %v2853_v48  ;;  %v2719_v28 = vrot.slane %v8371_v14, 2  ;;  %v3100_v42 = vmul.f32 0.5, %v3081_v47  ;;  %v10893_v48 = vrot.slane %v8098_v49, 1 }
 0x5b6   : > { %v3054_v35 = vsel %vm10891_vm13, %v10890_v0, %v10888_v57  ;;  %v10895_v62 = vrot.slane %v10894_v4, 1  ;;  %v2575_v20 = vmul.f32 %v7635_v52, %v7892_v59  ;;  %v2900_v11 = vrot.slane %v2876_v16, 1  ;;  %vm10906_vm13 = vmmov %vm10875_vm1 }
 0x5b7   : > { %v3073_v31 = vadd.f32 %v3054_v35, %v2972_v44  ;;  %v3005_v57 = vrot.slane %v2984_v5, 2  ;;  %v4907_v8 = vpop.eup %4906  ;;  %v2638_v0 = vadd.f32 %v2617_v46, %v2554_v10  ;;  %4908 = vtanh.f32 %v3100_v42  ;;  %v10901_v5 = vld [vmem:[#allocation48_spill] sm:$0xff] }
 0x5b8   : > { %v2675_v9 = vsel %vm10896_vm6, %v10895_v62, %v10893_v48  ;;  %v2836_v47 = vmul.f32 %v7787_v13, %v10892_v37  ;;  %v3119_v15 = vadd.f32 1.0, %v4907_v8  ;;  %v2598_v4 = vmul.f32 %v7781_v60, %v7977_v29  ;;  %vm10908_vm6 = vmmov %vm10875_vm1 }
 0x5b9   : > { %v3093_v45 = vadd.f32 %v7746_v6, %v3073_v31  ;;  %v2694_v49 = vadd.f32 %v2675_v9, %v2575_v20  ;;  %v10897_v44 = vrot.slane %v8143_v3, 1  ;;  %v2804_v52 = vadd.f32 %v8010_v53, %v2744_v22 }
 0x5ba   : > { %v2722_v10 = vsel %vm10899_vm15, %v2719_v28, %v2721_v27  ;;  %v3128_v16 = vmul.f32 0.5, %v3119_v15  ;;  %v10900_v37 = vrot.slane %v8108_v25, 2  ;;  %v10902_v42 = vrot.slane %v10901_v5, 2  ;;  %vm10911_vm15 = vmmov %vm10883_vm0 }
 0x5bb   : > { %v2903_v35 = vsel %vm10898_vm2, %v2900_v11, %v10897_v44  ;;  %v3147_v46 = vmul.f32 0.5, %v3093_v45  ;;  %v10903_v62 = vrot.slane %v8156_v63, 2  ;;  %v2875_v22 = vmul.f32 %v7837_v12, %v7968_v43  ;;  %vm10909_vm2 = vmmov %vm10883_vm0 }
 0x5bc   : > { %v2920_v6 = vadd.f32 %v2903_v35, %v2836_v47  ;;  %v2776_v48 = vsel %vm10883_vm0, %v10902_v42, %v10900_v37  ;;  %v2743_v9 = vadd.f32 %v2722_v10, %v2638_v0  ;;  %v8439_v27 = vmul.f32 %v10846_v39, %v7977_v29 }
 0x5bd   : > { %v3008_v3 = vsel %vm10904_vm5, %v3005_v57, %v10903_v62  ;;  %4910 = vtanh.f32 %v3147_v46  ;;  %v8441_v15 = vmul.f32 %v3128_v16, %v2804_v52  ;;  %v2795_v25 = vadd.f32 %v2776_v48, %v2694_v49  ;;  %v4909_v8 = vpop.eup %4908  ;;  %vm10913_vm5 = vmmov %vm10875_vm1 }
 0x5be   : > { %v3025_v45 = vadd.f32 %v3008_v3, %v2920_v6  ;;  %v2622_v31 = vrot.slane %v2598_v4, 1  ;;  %v2898_v20 = vrot.slane %v2875_v22, 1  ;;  %v8446_v47 = vmul.f32 %v7781_v60, %v7952_v41 }
 0x5bf   : > { %v2835_v12 = vmul.f32 %v7787_v13, %v7968_v43  ;;  %v2983_v0 = vmul.f32 %v7998_v26, %v7968_v43  ;;  %3240 = vrot.lane.b32.xlu1 %v8441_v15, %s4987_s8  ;;  %v3118_v44 = vadd.f32 1.0, %v4909_v8  ;;  %v2558_v49 = vmul.f32 %v10842_v54, %v7977_v29 }
 0x5c0   : > { %v3085_v63 = vadd.f32 %v8020_v40, %v3025_v45  ;;  %v10905_v4 = vrot.slane %v8172_v58, 1  ;;  %v2901_v60 = vsel %vm10906_vm13, %v2898_v20, %v2900_v11  ;;  %v2727_v52 = vrot.slane %v8439_v27, 2  ;;  %vm10918_vm13 = vmmov %vm10875_vm1 }
 0x5c1   : > { %v2919_v46 = vadd.f32 %v2901_v60, %v2835_v12  ;;  %v3003_v6 = vrot.slane %v2983_v0, 2  ;;  %v2803_v43 = vadd.f32 %v8010_v53, %v2743_v9  ;;  %v3127_v26 = vmul.f32 0.5, %v3118_v44 }
 0x5c2   : > { %v2625_v35 = vsel %vm10875_vm1, %v2622_v31, %v10905_v4  ;;  %v3104_v10 = vmul.f32 0.5, %v3085_v63  ;;  %v2831_v16 = vmul.f32 %v7787_v13, %v7773_v38  ;;  %v10907_v29 = vrot.slane %v8194_v55, 1 }
 0x5c3   : > { %v4911_v37 = vpop.eup %4910  ;;  %v2642_v5 = vadd.f32 %v2625_v35, %v2558_v49  ;;  %v2620_v11 = vrot.slane %v8446_v47, 1  ;;  %v3006_v42 = vsel %vm10909_vm2, %v3003_v6, %v3005_v57  ;;  %v8471_v48 = vmul.f32 %v3127_v26, %v2803_v43  ;;  %vm10921_vm2 = vmmov %vm10883_vm0 }
 0x5c4   : > { %v2893_v58 = vsel %vm10908_vm6, %v10907_v29, %v2892_v2  ;;  %4912 = vtanh.f32 %v3104_v10  ;;  %v3165_v62 = vadd.f32 1.0, %v4911_v37  ;;  %v3024_v3 = vadd.f32 %v3006_v42, %v2919_v46  ;;  %vm10920_vm6 = vmmov %vm10883_vm0 }
 0x5c5   : > { %v2915_v22 = vadd.f32 %v2893_v58, %v2831_v16  ;;  %v2815_v38 = vadd.f32 %v7725_v32, %v2795_v25  ;;  %v10910_v17 = vrot.slane %v8182_v61, 2  ;;  %v2705_v2 = vmul.f32 %v10846_v39, %v7952_v41  ;;  %3238 = vrot.lane.b32.xlu0 %v8471_v48, %s4987_s8 }
 0x5c6   : > { %v10912_v9 = vrot.slane %v8209_v50, 2  ;;  %v3174_v27 = vmul.f32 0.5, %v3165_v62  ;;  %v3084_v45 = vadd.f32 %v8020_v40, %v3024_v3  ;;  %v2834_v61 = vmul.f32 %v7787_v13, %v7895_v19  ;;  %v10916_v19 = vld [vmem:[#allocation51_spill] sm:$0xff] }
 0x5c7   : > { %v2730_v55 = vsel %vm10911_vm15, %v2727_v52, %v10910_v17  ;;  %v2623_v8 = vsel %vm10913_vm5, %v2620_v11, %v2622_v31  ;;  %v10914_v39 = vrot.slane %v8299_v56, 1  ;;  %v2557_v0 = vmul.f32 %v10842_v54, %v7952_v41  ;;  %vm10923_vm15 = vmmov %vm10883_vm0 }
 0x5c8   : > { %v2998_v57 = vsel %vm10883_vm0, %v10912_v9, %v2997_v23  ;;  %v2747_v25 = vadd.f32 %v2730_v55, %v2642_v5  ;;  %v8493_v50 = vmul.f32 %v3174_v27, %v2815_v38  ;;  %v3103_v23 = vmul.f32 0.5, %v3084_v45  ;;  %vm10925_vm0 = vmmov %vm10875_vm1 }
 0x5c9   : > { %v3020_v32 = vadd.f32 %v2998_v57, %v2915_v22  ;;  %v2899_v51 = vsel %vm10875_vm1, %v10914_v39, %v2898_v20  ;;  %v2725_v44 = vrot.slane %v2705_v2, 2  ;;  %v10915_v13 = vrot.slane %v8352_v7, 1  ;;  %vm10927_vm5 = vmmov %vm10921_vm2 }
 0x5ca   : > { %v2918_v47 = vadd.f32 %v2899_v51, %v2834_v61  ;;  %v4913_v12 = vpop.eup %4912  ;;  %v10917_v49 = vrot.slane %v10916_v19, 1  ;;  %v10919_v56 = vrot.slane %v8311_v24, 2  ;;  %3206 = vrot.lane.b32.xlu2 %v8493_v50, %s4987_s8  ;;  %4914 = vtanh.f32 %v3103_v23  ;;  %v10957_v51 = vld [vmem:[#allocation12_spill] sm:$0xff] }
 0x5cb   : > { %v3080_v63 = vadd.f32 %v8020_v40, %v3020_v32  ;;  %v3122_v4 = vadd.f32 1.0, %v4913_v12  ;;  %v2641_v10 = vadd.f32 %v2623_v8, %v2557_v0  ;;  %v2553_v41 = vmul.f32 %v10842_v54, %v7770_v36 }
 0x5cc   : > { %v2615_v31 = vsel %vm10918_vm13, %v10917_v49, %v10915_v13  ;;  %v3004_v20 = vsel %vm10920_vm6, %v10919_v56, %v3003_v6  ;;  %v2807_v7 = vadd.f32 %v8010_v53, %v2747_v25  ;;  %v2728_v6 = vsel %vm10921_vm2, %v2725_v44, %v2727_v52  ;;  %v10933_v49 = vld [vmem:[#allocation49_spill] sm:$0xff] }
 0x5cd   : > { %v3099_v35 = vmul.f32 0.5, %v3080_v63  ;;  %v3023_v60 = vadd.f32 %v3004_v20, %v2918_v47  ;;  %v3131_v46 = vmul.f32 0.5, %v3122_v4  ;;  %v2637_v24 = vadd.f32 %v2615_v31, %v2553_v41  ;;  %v10935_v4 = vld [vmem:[#allocation43_spill] sm:$0xff] }
 0x5ce   : > { %v2746_v29 = vadd.f32 %v2728_v6, %v2641_v10  ;;  %v10922_v36 = vrot.slane %v8204_v21, 2  ;;  %v10924_v62 = vrot.slane %v8295_v18, 1  ;;  %v2556_v17 = vmul.f32 %v10842_v54, %v7892_v59 }
 0x5cf   : > { %4916 = vtanh.f32 %v3099_v35  ;;  %v3083_v43 = vadd.f32 %v8020_v40, %v3023_v60  ;;  %v8512_v26 = vmul.f32 %v3131_v46, %v2807_v7  ;;  %vm10928_vm1 = vcmask 523264  }
 0x5d0   : > { %v4915_v58 = vpop.eup %4914  ;;  %v2720_v37 = vsel %vm10923_vm15, %v10922_v36, %v2719_v28  ;;  %v2621_v52 = vsel %vm10925_vm0, %v10924_v62, %v2620_v11  ;;  %v2806_v3 = vadd.f32 %v8010_v53, %v2746_v29  ;;  %v10926_v11 = vrot.slane %v8330_v1, 2  ;;  %v10930_v1 = vld [vmem:[#allocation38_spill] sm:$0xff]  ;;  %vm10932_vm13 = vmmov %vm10928_vm1  ;;  %v10943_v62 = vld [vmem:[#allocation52_spill] sm:$0xff] }
 0x5d1   : > { %v3102_v16 = vmul.f32 0.5, %v3083_v43  ;;  %3246 = vrot.lane.b32.xlu1 %v8512_v26, %s4987_s8  ;;  %v3121_v5 = vadd.f32 1.0, %v4915_v58  ;;  %v2742_v40 = vadd.f32 %v2720_v37, %v2637_v24  ;;  %v2640_v55 = vadd.f32 %v2621_v52, %v2556_v17  ;;  %vm10934_vm6 = vmmov %vm10928_vm1  ;;  %v10938_v43 = vld [vmem:[#allocation36_spill] sm:$0xff]  ;;  %v10940_v58 = vld [vmem:[#allocation50_spill] sm:$0xff] }
 0x5d2   : > { %v2726_v57 = vsel %vm10927_vm5, %v10926_v11, %v2725_v44  ;;  %vm10936_vm2 = vmmov %vm10928_vm1 }
 0x5d3   : > { %4918 = vtanh.f32 %v3102_v16  ;;  %v3130_v22 = vmul.f32 0.5, %v3121_v5  ;;  %v2802_v21 = vadd.f32 %v8010_v53, %v2742_v40  ;;  %v2745_v27 = vadd.f32 %v2726_v57, %v2640_v55  ;;  %vm10937_vm15 = vmmov %vm10928_vm1 }
 0x5d4   : > { %vm10939_vm0 = vmmov %vm10928_vm1 }
 0x5d5   : > { %v4917_v42 = vpop.eup %4916  ;;  %v8528_v14 = vmul.f32 %v3130_v22, %v2806_v3  ;;  %v2805_v54 = vadd.f32 %v8010_v53, %v2745_v27  ;;  %vm10941_vm5 = vmmov %vm10939_vm0  ;;  %v10948_v27 = vld [vmem:[#allocation8_spill] sm:$0xff] }
 0x5d6   : > { %v3117_v38 = vadd.f32 1.0, %v4917_v42 }
 0x5d7   : > { %3244 = vrot.lane.b32.xlu0 %v8528_v14, %s4987_s8 }
 0x5d8   : > { %v3126_v28 = vmul.f32 0.5, %v3117_v38  ;;  %v10945_v38 = vld [vmem:[#allocation32_spill] sm:$0xff] }
 0x5d9   : > { %v4919_v2 = vpop.eup %4918 }
 0x5da   : > { %v3135_v18 = vmul.f32 %v3126_v28, %v2802_v21  ;;  %v3120_v9 = vadd.f32 1.0, %v4919_v2  ;;  %v10946_v21 = vld [vmem:[#allocation33_spill] sm:$0xff] }
 0x5dc   : > { %3236 = vrot.lane.b32.xlu2 %v3135_v18, %s4987_s8  ;;  %v3129_v59 = vmul.f32 0.5, %v3120_v9 }
 0x5de   : > { %v3138_v45 = vmul.f32 %v3129_v59, %v2805_v54 }
 0x5e3   : > { %v3197_v63 = vpop.permute.xlu0 %3196 }
 0x5e4   : > { %3242 = vrot.lane.b32.xlu2 %v3138_v45, %s4987_s8  ;;  %s161_s8 = sand.u32 1, %s4976_s13  }
 0x5ec   : > { %v3199_v53 = vpop.permute.xlu1 %3198 }
 0x5ee   : > { %v3213_v32 = vpop.permute.xlu2 %3212 }
 0x5fa   : > { %v3203_v12 = vpop.permute.xlu0 %3202 }
 0x5fe   : > { %v3249_v61 = vpop.permute.xlu2 %3248 }
 0x5ff   : > { %v3258_v25 = vsel %vm10928_vm1, %v3249_v61, %v3213_v32  ;;  %v3205_v47 = vpop.permute.xlu1 %3204  ;;  %vm10942_vm1 = vmmov %vm10939_vm0 }
 0x600   : > { %v8543_v39 = vsel %vm5793_vm4, %v3258_v25, %v8285_v30  ;;  %v8548_v23 = vsel %vm5789_vm3, %v3258_v25, %v10930_v1  ;;  %v10954_v25 = vld [vmem:[#allocation9_spill] sm:$0xff] }
 0x601   : > { %3453 = vrot.lane.b32.xlu1 %v8543_v39, %s4989_s10  ;;  %3347 = vrot.lane.b32.xlu2 %v8548_v23, %s4988_s9 }
 0x608   : > { %v3211_v30 = vpop.permute.xlu1 %3210 }
 0x609   : > { %3383 = vrot.lane.b32.xlu2 %v8543_v39, %s4988_s9 }
 0x60d   : > { %v3201_v44 = vpop.permute.xlu2 %3200 }
 0x611   : > { %3455 = vrot.lane.b32.xlu2 %v8548_v23, %s4989_s10  ;;  %v3209_v0 = vpop.permute.xlu0 %3208 }
 0x61f   : > { %v3235_v13 = vpop.permute.xlu1 %3234 }
 0x620   : > { %v3251_v19 = vsel %vm10932_vm13, %v3235_v13, %v3199_v53  ;;  %vm10944_vm13 = vmmov %vm10939_vm0 }
 0x621   : > { %v8562_v31 = vsel %vm5789_vm3, %v3251_v19, %v10933_v49  ;;  %v8631_v28 = vsel %vm5793_vm4, %v3251_v19, %v10946_v21 }
 0x622   : > { %3333 = vrot.lane.b32.xlu1 %v8562_v31, %s4988_s9 }
 0x624   : > { %v3233_v56 = vpop.permute.xlu0 %3232  ;;  %v3207_v60 = vpop.permute.xlu2 %3206 }
 0x625   : > { %v3250_v20 = vsel %vm10934_vm6, %v3233_v56, %v3197_v63  ;;  %vm10950_vm6 = vcmask 261120  }
 0x626   : > { %v8570_v35 = vsel %vm5789_vm3, %v3250_v20, %v10935_v4  ;;  %v8644_v2 = vsel %vm5793_vm4, %v3250_v20, %v8366_v33 }
 0x627   : > { %3331 = vrot.lane.b32.xlu0 %v8570_v35, %s4988_s9 }
 0x631   : > { %v3241_v10 = vpop.permute.xlu1 %3240 }
 0x632   : > { %v3254_v7 = vsel %vm10936_vm2, %v3241_v10, %v3205_v47 }
 0x633   : > { %v8579_v24 = vsel %vm5789_vm3, %v3254_v7, %v10938_v43 }
 0x634   : > { %3339 = vrot.lane.b32.xlu1 %v8579_v24, %s4988_s9 }
 0x636   : > { %v3237_v41 = vpop.permute.xlu2 %3236 }
 0x637   : > { %v3252_v46 = vsel %vm10937_vm15, %v3237_v41, %v3201_v44  ;;  %v3239_v16 = vpop.permute.xlu0 %3238 }
 0x638   : > { %v8584_v6 = vsel %vm5789_vm3, %v3252_v46, %v8376_v34  ;;  %v3253_v29 = vsel %vm10939_vm0, %v3239_v16, %v3203_v12  ;;  %v8614_v3 = vsel %vm5793_vm4, %v3252_v46, %v3135_v18  ;;  %v8651_v18 = vsel %vm5793_vm4, %v3254_v7, %v8441_v15 }
 0x639   : > { %3335 = vrot.lane.b32.xlu2 %v8584_v6, %s4988_s9  ;;  %v8594_v36 = vsel %vm5789_vm3, %v3253_v29, %v10940_v58  ;;  %v8660_v9 = vsel %vm5793_vm4, %v3253_v29, %v8471_v48  ;;  %vm10955_vm0 = vnez %v10954_v25 }
 0x63a   : > { %3337 = vrot.lane.b32.xlu0 %v8594_v36, %s4988_s9 }
 0x63e   : > { %v3243_v37 = vpop.permute.xlu2 %3242 }
 0x63f   : > { %v3255_v34 = vsel %vm10941_vm5, %v3243_v37, %v3207_v60  ;;  %vm10956_vm5 = vmmov %vm10950_vm6 }
 0x640   : > { %v8602_v5 = vsel %vm5789_vm3, %v3255_v34, %v8493_v50  ;;  %v8635_v55 = vsel %vm5793_vm4, %v3255_v34, %v3138_v45  ;;  %v10951_v45 = vld [vmem:[#allocation7_spill] sm:$0xff] }
 0x641   : > { %3341 = vrot.lane.b32.xlu2 %v8602_v5, %s4988_s9  ;;  %vm10952_vm2 = vnez %v10951_v45 }
 0x643   : > { %v3247_v40 = vpop.permute.xlu1 %3246 }
 0x644   : > { %v3257_v42 = vsel %vm10942_vm1, %v3247_v40, %v3211_v30  ;;  %vm10958_vm1 = vnez %v10957_v51 }
 0x645   : > { %v8610_v52 = vsel %vm5789_vm3, %v3257_v42, %v10943_v62  ;;  %v8667_v33 = vsel %vm5793_vm4, %v3257_v42, %v8512_v26 }
 0x646   : > { %3345 = vrot.lane.b32.xlu1 %v8610_v52, %s4988_s9 }
 0x649   : > { %3371 = vrot.lane.b32.xlu2 %v8614_v3, %s4988_s9  ;;  %v3245_v50 = vpop.permute.xlu0 %3244 }
 0x64a   : > { %v3256_v22 = vsel %vm10944_vm13, %v3245_v50, %v3209_v0 }
 0x64b   : > { %v8624_v17 = vsel %vm5789_vm3, %v3256_v22, %v10945_v38  ;;  %v8676_v48 = vsel %vm5793_vm4, %v3256_v22, %v8528_v14  ;;  %vm10947_vm3 = vcmask 785408   ;;  %vm10949_vm4 = vnez %v10948_v27 }
 0x64c   : > { %3343 = vrot.lane.b32.xlu0 %v8624_v17, %s4988_s9  ;;  %vm10953_vm15 = vmmov %vm10947_vm3 }
 0x64d   : > { %vm10959_vm13 = vmmov %vm10947_vm3 }
 0x64e   : > { %3369 = vrot.lane.b32.xlu1 %v8631_v28, %s4988_s9 }
 0x651   : > { %3377 = vrot.lane.b32.xlu2 %v8635_v55, %s4988_s9 }
 0x654   : > { %3367 = vrot.lane.b32.xlu0 %v8644_v2, %s4988_s9 }
 0x656   : > { %3375 = vrot.lane.b32.xlu1 %v8651_v18, %s4988_s9 }
 0x659   : > { %3425 = vrot.lane.b32.xlu2 %v8631_v28, %s4989_s10 }
 0x65b   : > { %v3348_v15 = vpop.permute.xlu2 %3347 }
 0x65c   : > { %3373 = vrot.lane.b32.xlu0 %v8660_v9, %s4988_s9 }
 0x65e   : > { %3381 = vrot.lane.b32.xlu1 %v8667_v33, %s4988_s9 }
 0x661   : > { %3431 = vrot.lane.b32.xlu2 %v8584_v6, %s4989_s10 }
 0x663   : > { %v3384_v26 = vpop.permute.xlu2 %3383 }
 0x664   : > { %3379 = vrot.lane.b32.xlu0 %v8676_v48, %s4988_s9  ;;  %v3393_v54 = vsel %vm10950_vm6, %v3384_v26, %v3348_v15  ;;  %v3420_v1 = vsel %vm10956_vm5, %v3348_v15, %v3384_v26  ;;  %vm10961_vm6 = vmmov %vm10959_vm13  ;;  %s4784_s9 = sshll.u32 %s161_s8, 7 }
 0x666   : > { %3423 = vrot.lane.b32.xlu1 %v8570_v35, %s4989_s10 }
 0x669   : > { %3437 = vrot.lane.b32.xlu2 %v8651_v18, %s4989_s10 }
 0x66b   : > { %v3456_v14 = vpop.permute.xlu2 %3455 }
 0x66c   : > { %3421 = vrot.lane.b32.xlu0 %v8644_v2, %s4989_s10 }
 0x66e   : > { %3429 = vrot.lane.b32.xlu1 %v8614_v3, %s4989_s10 }
 0x671   : > { %3443 = vrot.lane.b32.xlu2 %v8602_v5, %s4989_s10 }
 0x673   : > { %v3454_v11 = vpop.permute.xlu1 %3453 }
 0x674   : > { %3427 = vrot.lane.b32.xlu0 %v8562_v31, %s4989_s10  ;;  %v3501_v57 = vsel %vm10947_vm3, %v3456_v14, %v3454_v11  ;;  %v3465_v61 = vsel %vm10953_vm15, %v3454_v11, %v3456_v14  ;;  %vm10960_vm3 = vmmov %vm10956_vm5 }
 0x675   : > { %v3519_v59 = vsel %vm10949_vm4, %v3501_v57, %v8548_v23  ;;  %v3518_v8 = vsel %vm10955_vm0, %v3465_v61, %v8543_v39  ;;  %vm10962_vm15 = vmmov %vm10960_vm3 }
 0x676   : > { %3435 = vrot.lane.b32.xlu1 %v8594_v36, %s4989_s10  ;;  %v8703_v32 = vsel %vm10952_vm2, %v3393_v54, %v3519_v59  ;;  %v8722_v23 = vsel %vm10958_vm1, %v3420_v1, %v3518_v8  ;;  %vm10963_vm5 = vmmov %vm10961_vm6 }
 0x679   : > { %3449 = vrot.lane.b32.xlu2 %v8667_v33, %s4989_s10 }
 0x67c   : > { %3433 = vrot.lane.b32.xlu0 %v8660_v9, %s4989_s10 }
 0x67e   : > { %3441 = vrot.lane.b32.xlu1 %v8635_v55, %s4989_s10 }
 0x681   : > { %3563 = vrot.lane.b32.xlu2 %v8703_v32, %s4990_s11 }
 0x684   : > { %3439 = vrot.lane.b32.xlu0 %v8579_v24, %s4989_s10 }
 0x686   : > { %3447 = vrot.lane.b32.xlu1 %v8624_v17, %s4989_s10 }
 0x689   : > { %3599 = vrot.lane.b32.xlu2 %v8722_v23, %s4990_s11 }
 0x68c   : > { %3445 = vrot.lane.b32.xlu0 %v8676_v48, %s4989_s10 }
 0x68e   : > { %3669 = vrot.lane.b32.xlu1 %v8722_v23, %s4991_s17 }
 0x691   : > { %3671 = vrot.lane.b32.xlu2 %v8703_v32, %s4991_s17 }
 0x693   : > { %v3336_v53 = vpop.permute.xlu2 %3335 }
 0x694   : > { %3451 = vrot.lane.b32.xlu0 %v8610_v52, %s4989_s10  ;;  %v8734_v39 = vpop.permute.xlu1 %3333  ;;  %s10189_s10 = scalar_lea.vmem [#allocation3], %s4784_s9 }
 0x699   : > { %v8736_v63 = vpop.permute.xlu0 %3331 }
 0x69b   : > { %v8740_v12 = vpop.permute.xlu2 %3341 }
 0x6a3   : > { %v3372_v44 = vpop.permute.xlu2 %3371 }
 0x6a4   : > { %v3387_v40 = vsel %vm10962_vm15, %v3372_v44, %v3336_v53 }
 0x6a6   : > { %v8738_v47 = vpop.permute.xlu1 %3339 }
 0x6ab   : > { %v3378_v56 = vpop.permute.xlu2 %3377 }
 0x6ac   : > { %v8742_v30 = vpop.permute.xlu0 %3337 }
 0x6b3   : > { %v3426_v10 = vpop.permute.xlu2 %3425 }
 0x6b8   : > { %v8744_v0 = vpop.permute.xlu1 %3345 }
 0x6bb   : > { %v3432_v46 = vpop.permute.xlu2 %3431 }
 0x6be   : > { %v8746_v13 = vpop.permute.xlu0 %3343 }
 0x6c0   : > { %v8748_v19 = vpop.permute.xlu1 %3369 }
 0x6c6   : > { %v8750_v49 = vpop.permute.xlu0 %3367 }
 0x6c7   : > { %v3385_v58 = vsel %vm10960_vm3, %v8750_v49, %v8736_v63 }
 0x6c8   : > { %v8752_v20 = vpop.permute.xlu1 %3375 }
 0x6ce   : > { %v8754_v4 = vpop.permute.xlu0 %3373 }
 0x6d0   : > { %v8756_v60 = vpop.permute.xlu1 %3381 }
 0x6d6   : > { %v8758_v41 = vpop.permute.xlu0 %3379 }
 0x6d8   : > { %v3424_v7 = vpop.permute.xlu1 %3423 }
 0x6de   : > { %v3422_v43 = vpop.permute.xlu0 %3421 }
 0x6df   : > { %v3493_v16 = vsel %vm10959_vm13, %v3424_v7, %v3422_v43  ;;  %vm10964_vm13 = vmmov %vm10960_vm3 }
 0x6e0   : > { %v3430_v29 = vpop.permute.xlu1 %3429  ;;  %v3503_v37 = vsel %vm10949_vm4, %v3493_v16, %v8570_v35  ;;  %v8784_v35 = vpop.permute.xlu2 %3437  ;;  %vm10965_vm3 = vmmov %vm10963_vm5 }
 0x6e1   : > { %v3495_v34 = vsel %vm10961_vm6, %v3432_v46, %v3430_v29  ;;  %v8771_v42 = vsel %vm10952_vm2, %v3385_v58, %v3503_v37  ;;  %vm10966_vm6 = vmmov %vm10964_vm13 }
 0x6e2   : > { %v3507_v62 = vsel %vm10949_vm4, %v3495_v34, %v8584_v6  ;;  %3547 = vrot.lane.b32.xlu0 %v8771_v42, %s4990_s11  ;;  %v3386_v6 = vsel %vm10964_vm13, %v8748_v19, %v8734_v39  ;;  %v3388_v54 = vsel %vm10966_vm6, %v8754_v4, %v8742_v30  ;;  %vm10967_vm15 = vmmov %vm10965_vm3 }
 0x6e3   : > { %v8780_v50 = vsel %vm10952_vm2, %v3387_v40, %v3507_v62  ;;  %vm10969_vm13 = vmmov %vm10965_vm3 }
 0x6e4   : > { %3551 = vrot.lane.b32.xlu2 %v8780_v50, %s4990_s11 }
 0x6e6   : > { %v3428_v22 = vpop.permute.xlu0 %3427 }
 0x6e7   : > { %v3494_v38 = vsel %vm10963_vm5, %v3428_v22, %v3426_v10  ;;  %vm10968_vm5 = vmmov %vm10966_vm6 }
 0x6e8   : > { %v3436_v21 = vpop.permute.xlu1 %3435  ;;  %v3505_v15 = vsel %vm10949_vm4, %v3494_v38, %v8562_v31  ;;  %v3444_v11 = vpop.permute.xlu2 %3443  ;;  %v3390_v8 = vsel %vm10968_vm5, %v3378_v56, %v8740_v12  ;;  %vm10970_vm6 = vmmov %vm10968_vm5 }
 0x6e9   : > { %v8795_v26 = vsel %vm10952_vm2, %v3386_v6, %v3505_v15  ;;  %v3389_v40 = vsel %vm10970_vm6, %v8752_v20, %v8738_v47 }
 0x6ea   : > { %3549 = vrot.lane.b32.xlu1 %v8795_v26, %s4990_s11 }
 0x6ee   : > { %v3434_v14 = vpop.permute.xlu0 %3433 }
 0x6ef   : > { %v3496_v57 = vsel %vm10965_vm3, %v3436_v21, %v3434_v14 }
 0x6f0   : > { %v3442_v59 = vpop.permute.xlu1 %3441  ;;  %v3509_v31 = vsel %vm10949_vm4, %v3496_v57, %v8594_v36  ;;  %v3459_v36 = vsel %vm10969_vm13, %v3430_v29, %v3432_v46  ;;  %vm10973_vm13 = vmmov %vm10965_vm3 }
 0x6f1   : > { %v3498_v61 = vsel %vm10967_vm15, %v3444_v11, %v3442_v59  ;;  %v8811_v1 = vsel %vm10952_vm2, %v3388_v54, %v3509_v31  ;;  %vm10971_vm15 = vmmov %vm10968_vm5  ;;  %v3450_v31 = vpop.permute.xlu2 %3449 }
 0x6f2   : > { %v3513_v16 = vsel %vm10949_vm4, %v3498_v61, %v8602_v5  ;;  %3553 = vrot.lane.b32.xlu0 %v8811_v1, %s4990_s11  ;;  %v3506_v5 = vsel %vm10955_vm0, %v3459_v36, %v8614_v3  ;;  %v3414_v38 = vsel %vm10971_vm15, %v3336_v53, %v3372_v44  ;;  %vm10972_vm5 = vmmov %vm10965_vm3  ;;  %v10992_v36 = vld [vmem:[#allocation10_spill] sm:$0xff] }
 0x6f3   : > { %v8820_v58 = vsel %vm10952_vm2, %v3390_v8, %v3513_v16  ;;  %v8845_v3 = vsel %vm10958_vm1, %v3414_v38, %v3506_v5  ;;  %v3462_v29 = vsel %vm10972_vm5, %v3442_v59, %v3444_v11  ;;  %vm10976_vm15 = vmmov %vm10972_vm5  ;;  %v10995_v5 = vld [vmem:[#allocation13_spill] sm:$0xff] }
 0x6f4   : > { %3557 = vrot.lane.b32.xlu2 %v8820_v58, %s4990_s11  ;;  %v3512_v44 = vsel %vm10955_vm0, %v3462_v29, %v8635_v55  ;;  %v3457_v59 = vsel %vm10976_vm15, %v3422_v43, %v3424_v7 }
 0x6f6   : > { %v3440_v37 = vpop.permute.xlu0 %3439 }
 0x6f7   : > { %v3497_v34 = vsel %vm10965_vm3, %v3440_v37, %v8784_v35  ;;  %vm10974_vm3 = vmmov %vm10970_vm6 }
 0x6f8   : > { %v3511_v62 = vsel %vm10949_vm4, %v3497_v34, %v8579_v24  ;;  %v3448_v6 = vpop.permute.xlu1 %3447  ;;  %v3391_v15 = vsel %vm10974_vm3, %v8758_v41, %v8746_v13  ;;  %vm10975_vm6 = vmmov %vm10974_vm3  ;;  %v3412_v7 = vsel %vm10974_vm3, %v8736_v63, %v8750_v49 }
 0x6f9   : > { %v8839_v46 = vsel %vm10952_vm2, %v3389_v40, %v3511_v62  ;;  %v3417_v54 = vsel %vm10975_vm6, %v8740_v12, %v3378_v56  ;;  %v3502_v56 = vsel %vm10955_vm0, %v3457_v59, %v8644_v2  ;;  %vm10978_vm6 = vmmov %vm10974_vm3  ;;  %v10998_v62 = vld [vmem:[#allocation15_spill] sm:$0xff] }
 0x6fa   : > { %3555 = vrot.lane.b32.xlu1 %v8839_v46, %s4990_s11  ;;  %v8870_v55 = vsel %vm10958_vm1, %v3417_v54, %v3512_v44  ;;  %vm10979_vm15 = vmmov %vm10974_vm3 }
 0x6fb   : > { %v3413_v2 = vsel %vm10979_vm15, %v8734_v39, %v8748_v19 }
 0x6fc   : > { %3587 = vrot.lane.b32.xlu2 %v8845_v3, %s4990_s11 }
 0x6fe   : > { %v3446_v24 = vpop.permute.xlu0 %3445 }
 0x6ff   : > { %v3499_v53 = vsel %vm10973_vm13, %v3448_v6, %v3446_v24  ;;  %vm10977_vm13 = vmmov %vm10972_vm5 }
 0x700   : > { %v3515_v57 = vsel %vm10949_vm4, %v3499_v53, %v8624_v17  ;;  %v3458_v17 = vsel %vm10972_vm5, %v3426_v10, %v3428_v22  ;;  %v3392_v10 = vsel %vm10978_vm6, %v8756_v60, %v8744_v0  ;;  %v3670_v25 = vpop.permute.xlu1 %3669 }
 0x701   : > { %v8864_v11 = vsel %vm10952_vm2, %v3391_v15, %v3515_v57  ;;  %v3504_v8 = vsel %vm10955_vm0, %v3458_v17, %v8631_v28  ;;  %v8901_v28 = vsel %vm10958_vm1, %v3412_v7, %v3502_v56 }
 0x702   : > { %3559 = vrot.lane.b32.xlu0 %v8864_v11, %s4990_s11 }
 0x704   : > { %3593 = vrot.lane.b32.xlu2 %v8870_v55, %s4990_s11 }
 0x706   : > { %v3452_v12 = vpop.permute.xlu0 %3451 }
 0x707   : > { %v3500_v61 = vsel %vm10977_vm13, %v3452_v12, %v3450_v31 }
 0x708   : > { %v3517_v43 = vsel %vm10949_vm4, %v3500_v61, %v8610_v52  ;;  %v8909_v52 = vsel %vm10958_vm1, %v3413_v2, %v3504_v8  ;;  %vm10980_vm4 = vmmov %vm10972_vm5 }
 0x709   : > { %v8897_v22 = vsel %vm10952_vm2, %v3392_v10, %v3517_v43  ;;  %v3460_v27 = vsel %vm10980_vm4, %v3434_v14, %v3436_v21  ;;  %vm10981_vm2 = vmmov %vm10974_vm3 }
 0x70a   : > { %3561 = vrot.lane.b32.xlu1 %v8897_v22, %s4990_s11  ;;  %3583 = vrot.lane.b32.xlu0 %v8901_v28, %s4990_s11  ;;  %v3508_v45 = vsel %vm10955_vm0, %v3460_v27, %v8660_v9  ;;  %v3415_v39 = vsel %vm10981_vm2, %v8742_v30, %v8754_v4  ;;  %vm10982_vm5 = vmmov %vm10980_vm4  ;;  %v3564_v4 = vpop.permute.xlu2 %3563 }
 0x70b   : > { %v8922_v63 = vsel %vm10958_vm1, %v3415_v39, %v3508_v45  ;;  %v3461_v19 = vsel %vm10982_vm5, %v8784_v35, %v3440_v37  ;;  %vm10983_vm13 = vmmov %vm10980_vm4  ;;  %vm10993_vm5 = vnez %v10992_v36 }
 0x70c   : > { %3641 = vrot.lane.b32.xlu2 %v8909_v52, %s4991_s17  ;;  %v3463_v49 = vsel %vm10983_vm13, %v3446_v24, %v3448_v6  ;;  %v3510_v9 = vsel %vm10955_vm0, %v3461_v19, %v8651_v18  ;;  %vm10984_vm3 = vmmov %vm10981_vm2 }
 0x70d   : > { %v3514_v30 = vsel %vm10955_vm0, %v3463_v49, %v8676_v48  ;;  %v3416_v21 = vsel %vm10984_vm3, %v8738_v47, %v8752_v20  ;;  %vm10985_vm6 = vmmov %vm10981_vm2  ;;  %vm10996_vm3 = vnez %v10995_v5 }
 0x70e   : > { %v3418_v35 = vsel %vm10985_vm6, %v8746_v13, %v8758_v41  ;;  %v8947_v14 = vsel %vm10958_vm1, %v3416_v21, %v3510_v9  ;;  %vm10986_vm15 = vmmov %vm10980_vm4 }
 0x70f   : > { %v8951_v18 = vsel %vm10958_vm1, %v3418_v35, %v3514_v30  ;;  %v3464_v48 = vsel %vm10986_vm15, %v3450_v31, %v3452_v12  ;;  %vm10987_vm4 = vmmov %vm10981_vm2  ;;  %vm10991_vm2 = vcmask 130048   ;;  %vm10999_vm15 = vnez %v10998_v62 }
 0x710   : > { %v3516_v47 = vsel %vm10955_vm0, %v3464_v48, %v8667_v33  ;;  %v3419_v13 = vsel %vm10987_vm4, %v8744_v0, %v8756_v60  ;;  %vm10988_vm0 = vcmask 916480   ;;  %v10989_v0 = vld [vmem:[#allocation14_spill] sm:$0xff]  ;;  %vm10997_vm6 = vmmov %vm10991_vm2 }
 0x711   : > { %v8968_v41 = vsel %vm10958_vm1, %v3419_v13, %v3516_v47  ;;  %vm10990_vm1 = vnez %v10989_v0  ;;  %vm10994_vm13 = vmmov %vm10988_vm0 }
 0x712   : > { %3585 = vrot.lane.b32.xlu1 %v8909_v52, %s4990_s11  ;;  %3589 = vrot.lane.b32.xlu0 %v8922_v63, %s4990_s11  ;;  %v3600_v20 = vpop.permute.xlu2 %3599  ;;  %vm11000_vm4 = vmmov %vm10988_vm0 }
 0x713   : > { %v3609_v16 = vsel %vm10991_vm2, %v3600_v20, %v3564_v4  ;;  %v3636_v40 = vsel %vm10997_vm6, %v3564_v4, %v3600_v20  ;;  %vm11002_vm6 = vmmov %vm10988_vm0 }
 0x714   : > { %3647 = vrot.lane.b32.xlu2 %v8780_v50, %s4991_s17 }
 0x71a   : > { %3591 = vrot.lane.b32.xlu1 %v8947_v14, %s4990_s11  ;;  %3595 = vrot.lane.b32.xlu0 %v8951_v18, %s4990_s11  ;;  %v3672_v33 = vpop.permute.xlu2 %3671 }
 0x71b   : > { %v3717_v51 = vsel %vm10988_vm0, %v3672_v33, %v3670_v25  ;;  %v3681_v34 = vsel %vm10994_vm13, %v3670_v25, %v3672_v33  ;;  %vm11001_vm13 = vmmov %vm10991_vm2 }
 0x71c   : > { %3653 = vrot.lane.b32.xlu2 %v8947_v14, %s4991_s17  ;;  %v3735_v60 = vsel %vm10990_vm1, %v3717_v51, %v8703_v32  ;;  %v3734_v32 = vsel %vm10996_vm3, %v3681_v34, %v8722_v23 }
 0x71d   : > { %v8993_v37 = vsel %vm10993_vm5, %v3609_v16, %v3735_v60  ;;  %v9008_v38 = vsel %vm10999_vm15, %v3636_v40, %v3734_v32 }
 0x722   : > { %3597 = vrot.lane.b32.xlu1 %v8968_v41, %s4990_s11  ;;  %3637 = vrot.lane.b32.xlu0 %v8901_v28, %s4991_s17 }
 0x724   : > { %3659 = vrot.lane.b32.xlu2 %v8820_v58, %s4991_s17 }
 0x72a   : > { %3639 = vrot.lane.b32.xlu1 %v8771_v42, %s4991_s17  ;;  %3643 = vrot.lane.b32.xlu0 %v8795_v26, %s4991_s17 }
 0x72c   : > { %3665 = vrot.lane.b32.xlu2 %v8968_v41, %s4991_s17 }
 0x732   : > { %3645 = vrot.lane.b32.xlu1 %v8845_v3, %s4991_s17  ;;  %3649 = vrot.lane.b32.xlu0 %v8922_v63, %s4991_s17 }
 0x734   : > { %3779 = vrot.lane.b32.xlu2 %v8993_v37, %s4992_s19 }
 0x73a   : > { %3651 = vrot.lane.b32.xlu1 %v8811_v1, %s4991_s17  ;;  %3655 = vrot.lane.b32.xlu0 %v8839_v46, %s4991_s17 }
 0x73c   : > { %3815 = vrot.lane.b32.xlu2 %v9008_v38, %s4992_s19 }
 0x73e   : > { %v3552_v24 = vpop.permute.xlu2 %3551 }
 0x742   : > { %3657 = vrot.lane.b32.xlu1 %v8870_v55, %s4991_s17  ;;  %3661 = vrot.lane.b32.xlu0 %v8951_v18, %s4991_s17 }
 0x744   : > { %3887 = vrot.lane.b32.xlu2 %v8993_v37, %s4993_s20 }
 0x74a   : > { %3663 = vrot.lane.b32.xlu1 %v8864_v11, %s4991_s17  ;;  %3667 = vrot.lane.b32.xlu0 %v8897_v22, %s4991_s17  ;;  %s4793_s17 = sshll.u32 %s5042_s16, 7  ;;  %s4715_s16 = sshll.u32 %s10189_s10, 4  ;;  %s4716_s16 = int_to_ptr.vmem [resolvable:$true] %s4715_s16 }
 0x74e   : > { %v9034_v15 = vpop.permute.xlu2 %3557 }
 0x752   : > { %3885 = vrot.lane.b32.xlu1 %v9008_v38, %s4993_s20 }
 0x754   : > { %v9024_v23 = vpop.permute.xlu0 %3547 }
 0x756   : > { %v3588_v59 = vpop.permute.xlu2 %3587 }
 0x75c   : > { %v9026_v29 = vpop.permute.xlu1 %3549 }
 0x75e   : > { %v9044_v12 = vpop.permute.xlu2 %3593 }
 0x764   : > { %v9028_v6 = vpop.permute.xlu0 %3553 }
 0x766   : > { %v3642_v8 = vpop.permute.xlu2 %3641 }
 0x76c   : > { %v9030_v53 = vpop.permute.xlu1 %3555 }
 0x76e   : > { %v3648_v27 = vpop.permute.xlu2 %3647 }
 0x774   : > { %v9032_v44 = vpop.permute.xlu0 %3559 }
 0x776   : > { %v3654_v13 = vpop.permute.xlu2 %3653 }
 0x77c   : > { %v9036_v57 = vpop.permute.xlu0 %3583  ;;  %v9038_v54 = vpop.permute.xlu1 %3561 }
 0x77d   : > { %v3601_v19 = vsel %vm10991_vm2, %v9036_v57, %v9024_v23 }
 0x784   : > { %v9040_v17 = vpop.permute.xlu0 %3589  ;;  %v9042_v31 = vpop.permute.xlu1 %3585 }
 0x785   : > { %v3602_v49 = vsel %vm11001_vm13, %v9042_v31, %v9026_v29 }
 0x78c   : > { %v9046_v56 = vpop.permute.xlu0 %3595  ;;  %v9048_v61 = vpop.permute.xlu1 %3591 }
 0x794   : > { %v9050_v7 = vpop.permute.xlu0 %3637  ;;  %v9052_v10 = vpop.permute.xlu1 %3597 }
 0x79c   : > { %v3644_v43 = vpop.permute.xlu0 %3643  ;;  %v3640_v2 = vpop.permute.xlu1 %3639 }
 0x79d   : > { %v3710_v45 = vsel %vm11000_vm4, %v3644_v43, %v3642_v8  ;;  %v3709_v39 = vsel %vm10988_vm0, %v3640_v2, %v9050_v7  ;;  %vm11003_vm4 = vmmov %vm10991_vm2 }
 0x79e   : > { %v3721_v9 = vsel %vm10990_vm1, %v3710_v45, %v8795_v26  ;;  %v3719_v30 = vsel %vm10990_vm1, %v3709_v39, %v8771_v42  ;;  %v3603_v42 = vsel %vm11003_vm4, %v3588_v59, %v3552_v24  ;;  %vm11004_vm2 = vmmov %vm10988_vm0  ;;  %v3660_v39 = vpop.permute.xlu2 %3659 }
 0x79f   : > { %v9071_v4 = vsel %vm10993_vm5, %v3602_v49, %v3721_v9  ;;  %v9075_v21 = vsel %vm10993_vm5, %v3601_v19, %v3719_v30  ;;  %vm11005_vm13 = vmmov %vm11003_vm4 }
 0x7a0   : > { %3765 = vrot.lane.b32.xlu1 %v9071_v4, %s4992_s19  ;;  %3763 = vrot.lane.b32.xlu0 %v9075_v21, %s4992_s19  ;;  %v3604_v16 = vsel %vm11005_vm13, %v9040_v17, %v9028_v6 }
 0x7a4   : > { %v9081_v35 = vpop.permute.xlu0 %3649  ;;  %v3646_v26 = vpop.permute.xlu1 %3645 }
 0x7a5   : > { %v3711_v48 = vsel %vm11002_vm6, %v3648_v27, %v3646_v26  ;;  %vm11006_vm6 = vmmov %vm11003_vm4 }
 0x7a6   : > { %v3723_v47 = vsel %vm10990_vm1, %v3711_v48, %v8780_v50  ;;  %v3605_v50 = vsel %vm11006_vm6, %v9048_v61, %v9030_v53  ;;  %vm11007_vm4 = vmmov %vm10988_vm0  ;;  %v3675_v48 = vsel %vm11004_vm2, %v3646_v26, %v3648_v27 }
 0x7a7   : > { %v9090_v20 = vsel %vm10993_vm5, %v3603_v42, %v3723_v47  ;;  %v3666_v42 = vpop.permute.xlu2 %3665 }
 0x7a8   : > { %3767 = vrot.lane.b32.xlu2 %v9090_v20, %s4992_s19 }
 0x7ac   : > { %v3656_v25 = vpop.permute.xlu0 %3655  ;;  %v3652_v33 = vpop.permute.xlu1 %3651 }
 0x7ad   : > { %v3713_v51 = vsel %vm10988_vm0, %v3656_v25, %v3654_v13  ;;  %v3712_v60 = vsel %vm11004_vm2, %v3652_v33, %v9081_v35  ;;  %vm11008_vm0 = vmmov %vm11006_vm6 }
 0x7ae   : > { %v3727_v34 = vsel %vm10990_vm1, %v3713_v51, %v8839_v46  ;;  %v3725_v32 = vsel %vm10990_vm1, %v3712_v60, %v8811_v1  ;;  %v3606_v1 = vsel %vm11008_vm0, %v9044_v12, %v9034_v15  ;;  %v3722_v60 = vsel %vm10996_vm3, %v3675_v48, %v8845_v3  ;;  %vm11009_vm13 = vmmov %vm11008_vm0  ;;  %v11035_v48 = vld [vmem:[#allocation19_spill] sm:$0xff] }
 0x7af   : > { %v9111_v40 = vsel %vm10993_vm5, %v3605_v50, %v3727_v34  ;;  %v9115_v45 = vsel %vm10993_vm5, %v3604_v16, %v3725_v32  ;;  %v3630_v16 = vsel %vm11009_vm13, %v3552_v24, %v3588_v59  ;;  %vm11010_vm6 = vmmov %vm11004_vm2  ;;  %v3607_v34 = vsel %vm11008_vm0, %v9046_v56, %v9032_v44 }
 0x7b0   : > { %3771 = vrot.lane.b32.xlu1 %v9111_v40, %s4992_s19  ;;  %3769 = vrot.lane.b32.xlu0 %v9115_v45, %s4992_s19  ;;  %v9159_v59 = vsel %vm10999_vm15, %v3630_v16, %v3722_v60 }
 0x7b4   : > { %v3662_v46 = vpop.permute.xlu0 %3661  ;;  %v3658_v19 = vpop.permute.xlu1 %3657 }
 0x7b5   : > { %v3714_v49 = vsel %vm11007_vm4, %v3660_v39, %v3658_v19  ;;  %vm11011_vm4 = vmmov %vm11004_vm2 }
 0x7b6   : > { %v3729_v9 = vsel %vm10990_vm1, %v3714_v49, %v8820_v58  ;;  %vm11012_vm2 = vmmov %vm11008_vm0 }
 0x7b7   : > { %v9130_v30 = vsel %vm10993_vm5, %v3606_v1, %v3729_v9  ;;  %v3608_v27 = vsel %vm11012_vm2, %v9052_v10, %v9038_v54  ;;  %vm11013_vm13 = vmmov %vm11011_vm4  ;;  %v11032_v1 = vld [vmem:[#allocation18_spill] sm:$0xff] }
 0x7b8   : > { %3773 = vrot.lane.b32.xlu2 %v9130_v30, %s4992_s19 }
 0x7bc   : > { %v3668_v47 = vpop.permute.xlu0 %3667  ;;  %v3664_v51 = vpop.permute.xlu1 %3663 }
 0x7bd   : > { %v3716_v58 = vsel %vm11010_vm6, %v3668_v47, %v3666_v42  ;;  %v3715_v50 = vsel %vm11011_vm4, %v3664_v51, %v3662_v46 }
 0x7be   : > { %v3733_v26 = vsel %vm10990_vm1, %v3716_v58, %v8897_v22  ;;  %v3731_v3 = vsel %vm10990_vm1, %v3715_v50, %v8864_v11  ;;  %v3674_v11 = vsel %vm11013_vm13, %v3642_v8, %v3644_v43  ;;  %vm11014_vm1 = vmmov %vm11011_vm4 }
 0x7bf   : > { %v9155_v24 = vsel %vm10993_vm5, %v3608_v27, %v3733_v26  ;;  %v9163_v32 = vsel %vm10993_vm5, %v3607_v34, %v3731_v3  ;;  %v3678_v22 = vsel %vm11014_vm1, %v3658_v19, %v3660_v39  ;;  %vm11015_vm6 = vmmov %vm11014_vm1  ;;  %v3720_v36 = vsel %vm10996_vm3, %v3674_v11, %v8909_v52  ;;  %v11029_v39 = vld [vmem:[#allocation17_spill] sm:$0xff] }
 0x7c0   : > { %3777 = vrot.lane.b32.xlu1 %v9155_v24, %s4992_s19  ;;  %3803 = vrot.lane.b32.xlu2 %v9159_v59, %s4992_s19  ;;  %v3673_v0 = vsel %vm11015_vm6, %v9050_v7, %v3640_v2  ;;  %v3728_v49 = vsel %vm10996_vm3, %v3678_v22, %v8870_v55  ;;  %vm11016_vm5 = vmmov %vm11008_vm0  ;;  %v3628_v52 = vsel %vm11008_vm0, %v9024_v23, %v9036_v57 }
 0x7c1   : > { %3775 = vrot.lane.b32.xlu0 %v9163_v32, %s4992_s19  ;;  %v3718_v8 = vsel %vm10996_vm3, %v3673_v0, %v8901_v28  ;;  %v3633_v43 = vsel %vm11016_vm5, %v9034_v15, %v9044_v12  ;;  %vm11017_vm4 = vmmov %vm11008_vm0 }
 0x7c2   : > { %v3629_v7 = vsel %vm11017_vm4, %v9026_v29, %v9042_v31  ;;  %v9199_v55 = vsel %vm10999_vm15, %v3633_v43, %v3728_v49  ;;  %v9207_v28 = vsel %vm10999_vm15, %v3628_v52, %v3718_v8  ;;  %vm11018_vm2 = vmmov %vm11014_vm1 }
 0x7c3   : > { %v9195_v2 = vsel %vm10999_vm15, %v3629_v7, %v3720_v36  ;;  %v3677_v23 = vsel %vm11018_vm2, %v3654_v13, %v3656_v25  ;;  %vm11019_vm13 = vmmov %vm11014_vm1 }
 0x7c4   : > { %v3676_v29 = vsel %vm11019_vm13, %v9081_v35, %v3652_v33  ;;  %v3726_v15 = vsel %vm10996_vm3, %v3677_v23, %v8947_v14  ;;  %vm11020_vm1 = vmmov %vm11008_vm0  ;;  %v3886_v62 = vpop.permute.xlu1 %3885  ;;  %vm11028_vm13 = vcmask 64512  }
 0x7c5   : > { %v3724_v57 = vsel %vm10996_vm3, %v3676_v29, %v8922_v63  ;;  %v3632_v31 = vsel %vm11020_vm1, %v9030_v53, %v9048_v61  ;;  %vm11021_vm6 = vmmov %vm11008_vm0  ;;  %v3635_v61 = vsel %vm11008_vm0, %v9038_v54, %v9052_v10  ;;  %vm11030_vm1 = vnez %v11029_v39 }
 0x7c6   : > { %v3631_v12 = vsel %vm11021_vm6, %v9028_v6, %v9040_v17  ;;  %v9228_v13 = vsel %vm10999_vm15, %v3632_v31, %v3726_v15  ;;  %vm11022_vm5 = vmmov %vm11018_vm2 }
 0x7c7   : > { %v9236_v63 = vsel %vm10999_vm15, %v3631_v12, %v3724_v57  ;;  %v3680_v14 = vsel %vm11022_vm5, %v3666_v42, %v3668_v47  ;;  %vm11023_vm4 = vmmov %vm11018_vm2  ;;  %vm11033_vm5 = vnez %v11032_v1 }
 0x7c8   : > { %3801 = vrot.lane.b32.xlu1 %v9195_v2, %s4992_s19  ;;  %3809 = vrot.lane.b32.xlu2 %v9199_v55, %s4992_s19  ;;  %v3679_v6 = vsel %vm11023_vm4, %v3662_v46, %v3664_v51  ;;  %v3732_v53 = vsel %vm10996_vm3, %v3680_v14, %v8968_v41  ;;  %vm11024_vm2 = vmmov %vm11008_vm0  ;;  %v3780_v41 = vpop.permute.xlu2 %3779  ;;  %vm11036_vm0 = vnez %v11035_v48 }
 0x7c9   : > { %3799 = vrot.lane.b32.xlu0 %v9207_v28, %s4992_s19  ;;  %v3730_v17 = vsel %vm10996_vm3, %v3679_v6, %v8951_v18  ;;  %v3634_v35 = vsel %vm11024_vm2, %v9032_v44, %v9046_v56  ;;  %v9256_v25 = vsel %vm10999_vm15, %v3635_v61, %v3732_v53  ;;  %vm11025_vm3 = vcmask 982016   ;;  %v11026_v56 = vld [vmem:[#allocation16_spill] sm:$0xff]  ;;  %vm11034_vm4 = vmmov %vm11028_vm13 }
 0x7ca   : > { %v9264_v18 = vsel %vm10999_vm15, %v3634_v35, %v3730_v17  ;;  %vm11027_vm15 = vnez %v11026_v56  ;;  %vm11031_vm6 = vmmov %vm11025_vm3 }
 0x7cb   : > { %vm11037_vm2 = vmmov %vm11034_vm4 }
 0x7d0   : > { %3807 = vrot.lane.b32.xlu1 %v9228_v13, %s4992_s19  ;;  %3857 = vrot.lane.b32.xlu2 %v9195_v2, %s4993_s20  ;;  %v3816_v5 = vpop.permute.xlu2 %3815 }
 0x7d1   : > { %3805 = vrot.lane.b32.xlu0 %v9236_v63, %s4992_s19  ;;  %v3825_v33 = vsel %vm11028_vm13, %v3816_v5, %v3780_v41  ;;  %v3852_v9 = vsel %vm11034_vm4, %v3780_v41, %v3816_v5  ;;  %vm11039_vm13 = vmmov %vm11037_vm2 }
 0x7d2   : > { %vm11041_vm4 = vmmov %vm11037_vm2 }
 0x7d8   : > { %3813 = vrot.lane.b32.xlu1 %v9256_v25, %s4992_s19  ;;  %3863 = vrot.lane.b32.xlu2 %v9090_v20, %s4993_s20  ;;  %v3888_v44 = vpop.permute.xlu2 %3887 }
 0x7d9   : > { %3811 = vrot.lane.b32.xlu0 %v9264_v18, %s4992_s19  ;;  %v3933_v54 = vsel %vm11025_vm3, %v3888_v44, %v3886_v62  ;;  %v3897_v19 = vsel %vm11031_vm6, %v3886_v62, %v3888_v44  ;;  %vm11038_vm3 = vmmov %vm11037_vm2 }
 0x7da   : > { %v3951_v10 = vsel %vm11027_vm15, %v3933_v54, %v8993_v37  ;;  %v3950_v37 = vsel %vm11033_vm5, %v3897_v19, %v9008_v38  ;;  %vm11040_vm6 = vmmov %vm11037_vm2 }
 0x7db   : > { %v9293_v46 = vsel %vm11030_vm1, %v3825_v33, %v3951_v10  ;;  %v9308_v42 = vsel %vm11036_vm0, %v3852_v9, %v3950_v37 }
 0x7e0   : > { %3855 = vrot.lane.b32.xlu1 %v9075_v21, %s4993_s20  ;;  %3869 = vrot.lane.b32.xlu2 %v9228_v13, %s4993_s20 }
 0x7e1   : > { %3853 = vrot.lane.b32.xlu0 %v9207_v28, %s4993_s20 }
 0x7e8   : > { %3861 = vrot.lane.b32.xlu1 %v9159_v59, %s4993_s20  ;;  %3875 = vrot.lane.b32.xlu2 %v9130_v30, %s4993_s20 }
 0x7e9   : > { %3859 = vrot.lane.b32.xlu0 %v9071_v4, %s4993_s20 }
 0x7f0   : > { %3867 = vrot.lane.b32.xlu1 %v9115_v45, %s4993_s20  ;;  %3881 = vrot.lane.b32.xlu2 %v9256_v25, %s4993_s20 }
 0x7f1   : > { %3865 = vrot.lane.b32.xlu0 %v9236_v63, %s4993_s20 }
 0x7f8   : > { %3873 = vrot.lane.b32.xlu1 %v9199_v55, %s4993_s20  ;;  %3995 = vrot.lane.b32.xlu2 %v9293_v46, %s4994_s24 }
 0x7f9   : > { %3871 = vrot.lane.b32.xlu0 %v9111_v40, %s4993_s20 }
 0x800   : > { %3879 = vrot.lane.b32.xlu1 %v9163_v32, %s4993_s20  ;;  %4031 = vrot.lane.b32.xlu2 %v9308_v42, %s4994_s24 }
 0x801   : > { %3877 = vrot.lane.b32.xlu0 %v9264_v18, %s4993_s20 }
 0x802   : > { %v9322_v51 = vpop.permute.xlu2 %3767 }
 0x808   : > { %4101 = vrot.lane.b32.xlu1 %v9308_v42, %s4995_s25  ;;  %4103 = vrot.lane.b32.xlu2 %v9293_v46, %s4995_s25 }
 0x809   : > { %3883 = vrot.lane.b32.xlu0 %v9155_v24, %s4993_s20 }
 0x812   : > { %v3766_v38 = vpop.permute.xlu1 %3765  ;;  %v3764_v47 = vpop.permute.xlu0 %3763 }
 0x813   : > { %v9324_v58 = vpop.permute.xlu2 %3773 }
 0x81b   : > { %v3804_v27 = vpop.permute.xlu2 %3803 }
 0x822   : > { %v3772_v60 = vpop.permute.xlu1 %3771  ;;  %v3770_v16 = vpop.permute.xlu0 %3769 }
 0x823   : > { %v9336_v0 = vpop.permute.xlu2 %3809 }
 0x82b   : > { %v9351_v29 = vpop.permute.xlu2 %3857 }
 0x832   : > { %v9326_v50 = vpop.permute.xlu1 %3777 }
 0x833   : > { %v9328_v34 = vpop.permute.xlu0 %3775  ;;  %v3864_v53 = vpop.permute.xlu2 %3863 }
 0x83a   : > { %v3802_v26 = vpop.permute.xlu1 %3801 }
 0x83b   : > { %v3800_v3 = vpop.permute.xlu0 %3799  ;;  %v9331_v11 = vsel %vm11037_vm2, %v3766_v38, %v3802_v26 }
 0x83c   : > { %v9334_v22 = vsel %vm11038_vm3, %v3764_v47, %v3800_v3  ;;  %vm11042_vm3 = vcmask 982016  }
 0x842   : > { %v3808_v36 = vpop.permute.xlu1 %3807 }
 0x843   : > { %v3806_v49 = vpop.permute.xlu0 %3805  ;;  %v9339_v8 = vsel %vm11039_vm13, %v3772_v60, %v3808_v36  ;;  %vm11043_vm13 = vmmov %vm11037_vm2 }
 0x844   : > { %v9342_v43 = vsel %vm11040_vm6, %v3770_v16, %v3806_v49  ;;  %v3817_v14 = vsel %vm11043_vm13, %v3800_v3, %v3764_v47  ;;  %vm11044_vm6 = vmmov %vm11042_vm3 }
 0x84a   : > { %v9344_v7 = vpop.permute.xlu1 %3813 }
 0x84b   : > { %v3812_v52 = vpop.permute.xlu0 %3811  ;;  %v9349_v23 = vsel %vm11041_vm4, %v9326_v50, %v9344_v7  ;;  %vm11045_vm4 = vmmov %vm11037_vm2 }
 0x84c   : > { %v9355_v15 = vsel %vm11037_vm2, %v9328_v34, %v3812_v52  ;;  %v3819_v5 = vsel %vm11045_vm4, %v3804_v27, %v9322_v51  ;;  %vm11046_vm2 = vmmov %vm11042_vm3 }
 0x84d   : > { %vm11048_vm13 = vmmov %vm11046_vm2 }
 0x852   : > { %v3856_v57 = vpop.permute.xlu1 %3855 }
 0x853   : > { %v3854_v31 = vpop.permute.xlu0 %3853 }
 0x854   : > { %v3925_v12 = vsel %vm11042_vm3, %v3856_v57, %v3854_v31  ;;  %vm11047_vm3 = vmmov %vm11045_vm4 }
 0x855   : > { %v3935_v6 = vsel %vm11027_vm15, %v3925_v12, %v9075_v21  ;;  %v3818_v44 = vsel %vm11047_vm3, %v3802_v26, %v3766_v38  ;;  %vm11050_vm4 = vmmov %vm11046_vm2 }
 0x856   : > { %v9364_v17 = vsel %vm11030_vm1, %v3817_v14, %v3935_v6 }
 0x857   : > { %3979 = vrot.lane.b32.xlu0 %v9364_v17, %s4994_s24 }
 0x85a   : > { %v3862_v61 = vpop.permute.xlu1 %3861 }
 0x85b   : > { %v3860_v35 = vpop.permute.xlu0 %3859  ;;  %v3927_v41 = vsel %vm11044_vm6, %v3864_v53, %v3862_v61  ;;  %vm11049_vm6 = vmmov %vm11047_vm3 }
 0x85c   : > { %v3926_v62 = vsel %vm11046_vm2, %v3860_v35, %v9351_v29  ;;  %v3939_v21 = vsel %vm11027_vm15, %v3927_v41, %v9090_v20  ;;  %v3870_v20 = vpop.permute.xlu2 %3869  ;;  %vm11051_vm2 = vmmov %vm11047_vm3 }
 0x85d   : > { %v3937_v54 = vsel %vm11027_vm15, %v3926_v62, %v9071_v4  ;;  %v9382_v10 = vsel %vm11030_vm1, %v3819_v5, %v3939_v21  ;;  %v3820_v4 = vsel %vm11049_vm6, %v3806_v49, %v3770_v16  ;;  %v3822_v16 = vsel %vm11051_vm2, %v9336_v0, %v9324_v58  ;;  %vm11052_vm3 = vmmov %vm11050_vm4 }
 0x85e   : > { %v9386_v33 = vsel %vm11030_vm1, %v3818_v44, %v3937_v54  ;;  %3983 = vrot.lane.b32.xlu2 %v9382_v10, %s4994_s24  ;;  %vm11054_vm6 = vmmov %vm11052_vm3 }
 0x85f   : > { %3981 = vrot.lane.b32.xlu1 %v9386_v33, %s4994_s24  ;;  %v3891_v21 = vsel %vm11054_vm6, %v3862_v61, %v3864_v53 }
 0x862   : > { %v3868_v19 = vpop.permute.xlu1 %3867 }
 0x863   : > { %v3866_v37 = vpop.permute.xlu0 %3865 }
 0x864   : > { %v3928_v9 = vsel %vm11048_vm13, %v3868_v19, %v3866_v37  ;;  %v3876_v26 = vpop.permute.xlu2 %3875  ;;  %vm11053_vm13 = vmmov %vm11051_vm2 }
 0x865   : > { %v3941_v38 = vsel %vm11027_vm15, %v3928_v9, %v9115_v45  ;;  %v3821_v6 = vsel %vm11053_vm13, %v3808_v36, %v3772_v60 }
 0x866   : > { %v9399_v47 = vsel %vm11030_vm1, %v3820_v4, %v3941_v38 }
 0x867   : > { %3985 = vrot.lane.b32.xlu0 %v9399_v47, %s4994_s24 }
 0x86a   : > { %v3874_v3 = vpop.permute.xlu1 %3873 }
 0x86b   : > { %v3872_v12 = vpop.permute.xlu0 %3871  ;;  %v3930_v14 = vsel %vm11050_vm4, %v3876_v26, %v3874_v3  ;;  %vm11055_vm4 = vmmov %vm11051_vm2 }
 0x86c   : > { %v3929_v49 = vsel %vm11052_vm3, %v3872_v12, %v3870_v20  ;;  %v3945_v45 = vsel %vm11027_vm15, %v3930_v14, %v9130_v30  ;;  %v3846_v36 = vsel %vm11055_vm4, %v9322_v51, %v3804_v27  ;;  %vm11056_vm2 = vmmov %vm11052_vm3  ;;  %v3882_v27 = vpop.permute.xlu2 %3881 }
 0x86d   : > { %v3943_v41 = vsel %vm11027_vm15, %v3929_v49, %v9111_v40  ;;  %v9417_v5 = vsel %vm11030_vm1, %v3822_v16, %v3945_v45  ;;  %v3938_v40 = vsel %vm11033_vm5, %v3891_v21, %v9159_v59  ;;  %vm11057_vm3 = vmmov %vm11055_vm4  ;;  %v11076_v16 = vld [vmem:[#allocation23_spill] sm:$0xff] }
 0x86e   : > { %v9421_v62 = vsel %vm11030_vm1, %v3821_v6, %v3943_v41  ;;  %3989 = vrot.lane.b32.xlu2 %v9417_v5, %s4994_s24  ;;  %v3823_v54 = vsel %vm11057_vm3, %v3812_v52, %v9328_v34  ;;  %v9441_v61 = vsel %vm11036_vm0, %v3846_v36, %v3938_v40  ;;  %vm11058_vm13 = vmmov %vm11056_vm2 }
 0x86f   : > { %3987 = vrot.lane.b32.xlu1 %v9421_v62, %s4994_s24  ;;  %v3894_v51 = vsel %vm11058_vm13, %v3874_v3, %v3876_v26  ;;  %vm11059_vm6 = vmmov %vm11056_vm2 }
 0x870   : > { %v3889_v34 = vsel %vm11059_vm6, %v3854_v31, %v3856_v57  ;;  %vm11060_vm4 = vmmov %vm11057_vm3  ;;  %v3824_v57 = vsel %vm11057_vm3, %v9344_v7, %v9326_v50 }
 0x871   : > { %v3934_v52 = vsel %vm11033_vm5, %v3889_v34, %v9207_v28  ;;  %v3849_v4 = vsel %vm11060_vm4, %v9324_v58, %v9336_v0  ;;  %vm11061_vm13 = vmmov %vm11056_vm2 }
 0x872   : > { %v3880_v30 = vpop.permute.xlu1 %3879  ;;  %v9482_v58 = vsel %vm11036_vm0, %v9334_v22, %v3934_v52  ;;  %v3890_v56 = vsel %vm11061_vm13, %v9351_v29, %v3860_v35 }
 0x873   : > { %v3878_v60 = vpop.permute.xlu0 %3877  ;;  %v3936_v39 = vsel %vm11033_vm5, %v3890_v56, %v9195_v2 }
 0x874   : > { %v3931_v44 = vsel %vm11056_vm2, %v3880_v30, %v3878_v60  ;;  %v9500_v22 = vsel %vm11036_vm0, %v9331_v11, %v3936_v39 }
 0x875   : > { %v3947_v53 = vsel %vm11027_vm15, %v3931_v44, %v9163_v32  ;;  %v3944_v32 = vsel %vm11033_vm5, %v3894_v51, %v9199_v55 }
 0x876   : > { %4019 = vrot.lane.b32.xlu2 %v9441_v61, %s4994_s24  ;;  %v9447_v59 = vsel %vm11030_vm1, %v3823_v54, %v3947_v53  ;;  %v9471_v31 = vsel %vm11036_vm0, %v3849_v4, %v3944_v32 }
 0x877   : > { %3991 = vrot.lane.b32.xlu0 %v9447_v59, %s4994_s24 }
 0x87b   : > { %v3884_v9 = vpop.permute.xlu0 %3883 }
 0x87c   : > { %v3932_v38 = vsel %vm11056_vm2, %v3884_v9, %v3882_v27 }
 0x87d   : > { %v3949_v55 = vsel %vm11027_vm15, %v3932_v38, %v9155_v24  ;;  %vm11062_vm15 = vmmov %vm11056_vm2 }
 0x87e   : > { %v9475_v28 = vsel %vm11030_vm1, %v3824_v57, %v3949_v55  ;;  %4025 = vrot.lane.b32.xlu2 %v9471_v31, %s4994_s24  ;;  %v3892_v24 = vsel %vm11062_vm15, %v3866_v37, %v3868_v19  ;;  %vm11063_vm1 = vmmov %vm11056_vm2  ;;  %vm11069_vm2 = vcmask 31744   ;;  %v11070_v37 = vld [vmem:[#allocation21_spill] sm:$0xff] }
 0x87f   : > { %3993 = vrot.lane.b32.xlu1 %v9475_v28, %s4994_s24  ;;  %4015 = vrot.lane.b32.xlu0 %v9482_v58, %s4994_s24  ;;  %v3940_v50 = vsel %vm11033_vm5, %v3892_v24, %v9236_v63  ;;  %v3893_v2 = vsel %vm11063_vm1, %v3870_v20, %v3872_v12  ;;  %vm11064_vm6 = vmmov %vm11063_vm1  ;;  %vm11071_vm3 = vnez %v11070_v37  ;;  %v11073_v12 = vld [vmem:[#allocation22_spill] sm:$0xff] }
 0x880   : > { %v9507_v0 = vsel %vm11036_vm0, %v9342_v43, %v3940_v50  ;;  %v3895_v63 = vsel %vm11064_vm6, %v3878_v60, %v3880_v30  ;;  %v3942_v11 = vsel %vm11033_vm5, %v3893_v2, %v9228_v13  ;;  %vm11065_vm4 = vmmov %vm11063_vm1  ;;  %vm11074_vm15 = vnez %v11073_v12 }
 0x881   : > { %v3946_v7 = vsel %vm11033_vm5, %v3895_v63, %v9264_v18  ;;  %v9524_v43 = vsel %vm11036_vm0, %v9339_v8, %v3942_v11  ;;  %v3896_v13 = vsel %vm11065_vm4, %v3882_v27, %v3884_v9  ;;  %v3996_v18 = vpop.permute.xlu2 %3995  ;;  %vm11075_vm1 = vmmov %vm11069_vm2  ;;  %vm11077_vm6 = vnez %v11076_v16 }
 0x882   : > { %v9531_v29 = vsel %vm11036_vm0, %v9355_v15, %v3946_v7  ;;  %v3948_v8 = vsel %vm11033_vm5, %v3896_v13, %v9256_v25  ;;  %v4102_v25 = vpop.permute.xlu1 %4101  ;;  %vm11066_vm5 = vcmask 1014784   ;;  %vm11078_vm4 = vmmov %vm11075_vm1 }
 0x883   : > { %v9544_v35 = vsel %vm11036_vm0, %v9349_v23, %v3948_v8  ;;  %v11067_v23 = vld [vmem:[#allocation20_spill] sm:$0xff]  ;;  %vm11072_vm13 = vmmov %vm11066_vm5 }
 0x884   : > { %vm11068_vm0 = vnez %v11067_v23  ;;  %vm11096_vm7 = vmmov %vm11075_vm1 }
 0x886   : > { %4073 = vrot.lane.b32.xlu2 %v9500_v22, %s4995_s25 }
 0x887   : > { %4017 = vrot.lane.b32.xlu1 %v9500_v22, %s4994_s24  ;;  %4021 = vrot.lane.b32.xlu0 %v9507_v0, %s4994_s24 }
 0x889   : > { %v4032_v15 = vpop.permute.xlu2 %4031 }
 0x88a   : > { %v4041_v19 = vsel %vm11069_vm2, %v4032_v15, %v3996_v18  ;;  %v4068_v14 = vsel %vm11075_vm1, %v3996_v18, %v4032_v15  ;;  %vm11080_vm2 = vmmov %vm11075_vm1 }
 0x88e   : > { %4079 = vrot.lane.b32.xlu2 %v9382_v10, %s4995_s25 }
 0x88f   : > { %4023 = vrot.lane.b32.xlu1 %v9524_v43, %s4994_s24  ;;  %4027 = vrot.lane.b32.xlu0 %v9531_v29, %s4994_s24 }
 0x891   : > { %v4104_v1 = vpop.permute.xlu2 %4103 }
 0x892   : > { %v4149_v48 = vsel %vm11066_vm5, %v4104_v1, %v4102_v25  ;;  %v4113_v3 = vsel %vm11072_vm13, %v4102_v25, %v4104_v1  ;;  %vm11079_vm5 = vmmov %vm11075_vm1 }
 0x893   : > { %v4167_v20 = vsel %vm11068_vm0, %v4149_v48, %v9293_v46  ;;  %v4166_v46 = vsel %vm11074_vm15, %v4113_v3, %v9308_v42  ;;  %vm11081_vm13 = vmmov %vm11075_vm1 }
 0x894   : > { %v9571_v26 = vsel %vm11071_vm3, %v4041_v19, %v4167_v20  ;;  %v9586_v49 = vsel %vm11077_vm6, %v4068_v14, %v4166_v46 }
 0x896   : > { %4085 = vrot.lane.b32.xlu2 %v9524_v43, %s4995_s25 }
 0x897   : > { %4029 = vrot.lane.b32.xlu1 %v9544_v35, %s4994_s24  ;;  %4069 = vrot.lane.b32.xlu0 %v9482_v58, %s4995_s25  ;;  %s4714_s24 = scalar_lea.hbm %s10377_s3, %s4793_s17 }
 0x89e   : > { %4091 = vrot.lane.b32.xlu2 %v9417_v5, %s4995_s25 }
 0x89f   : > { %4071 = vrot.lane.b32.xlu1 %v9364_v17, %s4995_s25  ;;  %4075 = vrot.lane.b32.xlu0 %v9386_v33, %s4995_s25 }
 0x8a6   : > { %4097 = vrot.lane.b32.xlu2 %v9544_v35, %s4995_s25 }
 0x8a7   : > { %4077 = vrot.lane.b32.xlu1 %v9441_v61, %s4995_s25  ;;  %4081 = vrot.lane.b32.xlu0 %v9507_v0, %s4995_s25 }
 0x8ae   : > { %4211 = vrot.lane.b32.xlu2 %v9571_v26, %s4996_s26 }
 0x8af   : > { %4083 = vrot.lane.b32.xlu1 %v9399_v47, %s4995_s25  ;;  %4087 = vrot.lane.b32.xlu0 %v9421_v62, %s4995_s25 }
 0x8b6   : > { %4247 = vrot.lane.b32.xlu2 %v9586_v49, %s4996_s26 }
 0x8b7   : > { %4089 = vrot.lane.b32.xlu1 %v9471_v31, %s4995_s25  ;;  %4093 = vrot.lane.b32.xlu0 %v9531_v29, %s4995_s25 }
 0x8b8   : > { %v9602_v41 = vpop.permute.xlu2 %3983 }
 0x8be   : > { %4319 = vrot.lane.b32.xlu2 %v9571_v26, %s4997_s27 }
 0x8bf   : > { %4095 = vrot.lane.b32.xlu1 %v9447_v59, %s4995_s25  ;;  %4099 = vrot.lane.b32.xlu0 %v9475_v28, %s4995_s25  ;;  %s4717_s25 = sshll.u32 %s4714_s24, 4  ;;  %s4718_s25 = int_to_ptr.hbm [resolvable:$true] %s4717_s25 }
 0x8c7   : > { %4317 = vrot.lane.b32.xlu1 %v9586_v49, %s4997_s27 }
 0x8c8   : > { %v9606_v30 = vpop.permute.xlu2 %3989 }
 0x8c9   : > { %v3980_v42 = vpop.permute.xlu0 %3979 }
 0x8d0   : > { %v4020_v54 = vpop.permute.xlu2 %4019 }
 0x8d1   : > { %v3982_v45 = vpop.permute.xlu1 %3981 }
 0x8d8   : > { %v9619_v27 = vpop.permute.xlu2 %4025 }
 0x8d9   : > { %v3986_v6 = vpop.permute.xlu0 %3985 }
 0x8e0   : > { %v9628_v57 = vpop.permute.xlu2 %4073 }
 0x8e1   : > { %v3988_v21 = vpop.permute.xlu1 %3987 }
 0x8e8   : > { %v4080_v2 = vpop.permute.xlu2 %4079 }
 0x8e9   : > { %v9604_v40 = vpop.permute.xlu0 %3991 }
 0x8f0   : > { %v4086_v19 = vpop.permute.xlu2 %4085 }
 0x8f1   : > { %v4016_v60 = vpop.permute.xlu0 %4015  ;;  %v9608_v36 = vpop.permute.xlu1 %3993 }
 0x8f2   : > { %v9611_v44 = vsel %vm11078_vm4, %v3980_v42, %v4016_v60  ;;  %vm11082_vm4 = vmmov %vm11075_vm1 }
 0x8f9   : > { %v4022_v53 = vpop.permute.xlu0 %4021  ;;  %v4018_v51 = vpop.permute.xlu1 %4017 }
 0x8fa   : > { %v9614_v34 = vsel %vm11079_vm5, %v3986_v6, %v4022_v53  ;;  %v9617_v32 = vsel %vm11080_vm2, %v3982_v45, %v4018_v51  ;;  %vm11083_vm5 = vcmask 1014784   ;;  %v4034_v13 = vsel %vm11075_vm1, %v4018_v51, %v3982_v45 }
 0x8fb   : > { %vm11084_vm2 = vmmov %vm11083_vm5 }
 0x901   : > { %v4028_v52 = vpop.permute.xlu0 %4027  ;;  %v4024_v9 = vpop.permute.xlu1 %4023 }
 0x902   : > { %v9623_v4 = vsel %vm11081_vm13, %v9604_v40, %v4028_v52  ;;  %v9626_v38 = vsel %vm11075_vm1, %v3988_v21, %v4024_v9  ;;  %vm11085_vm13 = vmmov %vm11075_vm1 }
 0x903   : > { %v4033_v7 = vsel %vm11085_vm13, %v4016_v60, %v3980_v42  ;;  %vm11088_vm13 = vmmov %vm11084_vm2  ;;  %v4036_v60 = vsel %vm11075_vm1, %v4022_v53, %v3986_v6  ;;  %v4092_v6 = vpop.permute.xlu2 %4091 }
 0x909   : > { %v9630_v55 = vpop.permute.xlu0 %4069  ;;  %v4030_v56 = vpop.permute.xlu1 %4029 }
 0x90a   : > { %v9634_v24 = vsel %vm11082_vm4, %v9608_v36, %v4030_v56  ;;  %vm11086_vm4 = vmmov %vm11084_vm2 }
 0x911   : > { %v4076_v39 = vpop.permute.xlu0 %4075  ;;  %v4072_v50 = vpop.permute.xlu1 %4071 }
 0x912   : > { %v4142_v63 = vsel %vm11083_vm5, %v4076_v39, %v9628_v57  ;;  %v4141_v11 = vsel %vm11084_vm2, %v4072_v50, %v9630_v55  ;;  %vm11087_vm5 = vmmov %vm11075_vm1 }
 0x913   : > { %v4153_v18 = vsel %vm11068_vm0, %v4142_v63, %v9386_v33  ;;  %v4151_v8 = vsel %vm11068_vm0, %v4141_v11, %v9364_v17  ;;  %v4035_v17 = vsel %vm11087_vm5, %v4020_v54, %v9602_v41  ;;  %vm11090_vm5 = vmmov %vm11084_vm2 }
 0x914   : > { %v9650_v15 = vsel %vm11071_vm3, %v4034_v13, %v4153_v18  ;;  %v9654_v25 = vsel %vm11071_vm3, %v4033_v7, %v4151_v8  ;;  %v4098_v8 = vpop.permute.xlu2 %4097 }
 0x915   : > { %4197 = vrot.lane.b32.xlu1 %v9650_v15, %s4996_s26  ;;  %4195 = vrot.lane.b32.xlu0 %v9654_v25, %s4996_s26 }
 0x919   : > { %v4082_v1 = vpop.permute.xlu0 %4081  ;;  %v4078_v33 = vpop.permute.xlu1 %4077 }
 0x91a   : > { %v4143_v48 = vsel %vm11086_vm4, %v4080_v2, %v4078_v33  ;;  %vm11089_vm4 = vmmov %vm11075_vm1 }
 0x91b   : > { %v4155_v20 = vsel %vm11068_vm0, %v4143_v48, %v9382_v10  ;;  %v4037_v51 = vsel %vm11089_vm4, %v4024_v9, %v3988_v21  ;;  %vm11093_vm4 = vmmov %vm11090_vm5 }
 0x91c   : > { %v9668_v3 = vsel %vm11071_vm3, %v4035_v17, %v4155_v20 }
 0x91d   : > { %4199 = vrot.lane.b32.xlu2 %v9668_v3, %s4996_s26 }
 0x921   : > { %v4088_v46 = vpop.permute.xlu0 %4087  ;;  %v4084_v14 = vpop.permute.xlu1 %4083 }
 0x922   : > { %v4145_v42 = vsel %vm11084_vm2, %v4088_v46, %v4086_v19  ;;  %v4144_v45 = vsel %vm11088_vm13, %v4084_v14, %v4082_v1  ;;  %vm11091_vm2 = vmmov %vm11075_vm1 }
 0x923   : > { %v4159_v10 = vsel %vm11068_vm0, %v4145_v42, %v9421_v62  ;;  %v4157_v63 = vsel %vm11068_vm0, %v4144_v45, %v9399_v47  ;;  %v4038_v47 = vsel %vm11091_vm2, %v9619_v27, %v9606_v30  ;;  %vm11092_vm13 = vmmov %vm11090_vm5  ;;  %v4062_v42 = vsel %vm11075_vm1, %v9602_v41, %v4020_v54 }
 0x924   : > { %v9684_v11 = vsel %vm11071_vm3, %v4037_v51, %v4159_v10  ;;  %v9688_v7 = vsel %vm11071_vm3, %v4036_v60, %v4157_v63  ;;  %v4107_v18 = vsel %vm11092_vm13, %v4078_v33, %v4080_v2  ;;  %vm11095_vm2 = vmmov %vm11075_vm1  ;;  %v4040_v2 = vsel %vm11096_vm7, %v4030_v56, %v9608_v36  ;;  %v11112_v10 = vld [vmem:[#allocation26_spill] sm:$0xff] }
 0x925   : > { %4203 = vrot.lane.b32.xlu1 %v9684_v11, %s4996_s26  ;;  %4201 = vrot.lane.b32.xlu0 %v9688_v7, %s4996_s26  ;;  %v4154_v48 = vsel %vm11074_vm15, %v4107_v18, %v9441_v61  ;;  %v4039_v60 = vsel %vm11095_vm2, %v4028_v52, %v9604_v40  ;;  %vm11097_vm7 = vmmov %vm11093_vm4 }
 0x926   : > { %v9731_v54 = vsel %vm11077_vm6, %v4062_v42, %v4154_v48 }
 0x929   : > { %v4094_v62 = vpop.permute.xlu0 %4093  ;;  %v4090_v21 = vpop.permute.xlu1 %4089 }
 0x92a   : > { %v4146_v53 = vsel %vm11090_vm5, %v4092_v6, %v4090_v21  ;;  %vm11094_vm5 = vmmov %vm11093_vm4 }
 0x92b   : > { %v4161_v9 = vsel %vm11068_vm0, %v4146_v53, %v9417_v5 }
 0x92c   : > { %v9703_v13 = vsel %vm11071_vm3, %v4038_v47, %v4161_v9 }
 0x92d   : > { %4205 = vrot.lane.b32.xlu2 %v9703_v13, %s4996_s26 }
 0x931   : > { %v4100_v17 = vpop.permute.xlu0 %4099  ;;  %v4096_v20 = vpop.permute.xlu1 %4095 }
 0x932   : > { %v4148_v5 = vsel %vm11093_vm4, %v4100_v17, %v4098_v8  ;;  %v4147_v45 = vsel %vm11094_vm5, %v4096_v20, %v4094_v62 }
 0x933   : > { %v4165_v33 = vsel %vm11068_vm0, %v4148_v5, %v9475_v28  ;;  %v4163_v61 = vsel %vm11068_vm0, %v4147_v45, %v9447_v59  ;;  %v4106_v59 = vsel %vm11097_vm7, %v9628_v57, %v4076_v39  ;;  %vm11098_vm0 = vmmov %vm11093_vm4  ;;  %vm11108_vm7 = vcmask 15360  }
 0x934   : > { %v9727_v41 = vsel %vm11071_vm3, %v4040_v2, %v4165_v33  ;;  %v9735_v40 = vsel %vm11071_vm3, %v4039_v60, %v4163_v61  ;;  %v4110_v28 = vsel %vm11098_vm0, %v4090_v21, %v4092_v6  ;;  %vm11099_vm13 = vmmov %vm11098_vm0  ;;  %v4152_v37 = vsel %vm11074_vm15, %v4106_v59, %v9500_v22  ;;  %v11115_v6 = vld [vmem:[#allocation27_spill] sm:$0xff] }
 0x935   : > { %4209 = vrot.lane.b32.xlu1 %v9727_v41, %s4996_s26  ;;  %4235 = vrot.lane.b32.xlu2 %v9731_v54, %s4996_s26  ;;  %v4105_v23 = vsel %vm11099_vm13, %v9630_v55, %v4072_v50  ;;  %v4160_v36 = vsel %vm11074_vm15, %v4110_v28, %v9471_v31  ;;  %vm11100_vm3 = vmmov %vm11075_vm1  ;;  %v9763_v55 = vsel %vm11077_vm6, %v9617_v32, %v4152_v37 }
 0x936   : > { %4207 = vrot.lane.b32.xlu0 %v9735_v40, %s4996_s26  ;;  %v4150_v52 = vsel %vm11074_vm15, %v4105_v23, %v9482_v58  ;;  %v4065_v57 = vsel %vm11100_vm3, %v9606_v30, %v9619_v27  ;;  %vm11101_vm1 = vmmov %vm11098_vm0  ;;  %vm11113_vm3 = vnez %v11112_v10 }
 0x937   : > { %v9767_v22 = vsel %vm11077_vm6, %v4065_v57, %v4160_v36  ;;  %v9776_v31 = vsel %vm11077_vm6, %v9611_v44, %v4150_v52  ;;  %v4109_v58 = vsel %vm11101_vm1, %v4086_v19, %v4088_v46  ;;  %vm11102_vm4 = vmmov %vm11098_vm0  ;;  %v11109_v46 = vld [vmem:[#allocation25_spill] sm:$0xff] }
 0x938   : > { %v4108_v30 = vsel %vm11102_vm4, %v4082_v1, %v4084_v14  ;;  %v4158_v32 = vsel %vm11074_vm15, %v4109_v58, %v9524_v43  ;;  %vm11103_vm5 = vmmov %vm11098_vm0  ;;  %vm11116_vm4 = vnez %v11115_v6 }
 0x939   : > { %v4156_v27 = vsel %vm11074_vm15, %v4108_v30, %v9507_v0  ;;  %v9791_v44 = vsel %vm11077_vm6, %v9626_v38, %v4158_v32  ;;  %v4112_v43 = vsel %vm11103_vm5, %v4098_v8, %v4100_v17  ;;  %vm11104_vm2 = vmmov %vm11098_vm0  ;;  %v4318_v12 = vpop.permute.xlu1 %4317  ;;  %vm11110_vm0 = vnez %v11109_v46 }
 0x93a   : > { %v9800_v56 = vsel %vm11077_vm6, %v9614_v34, %v4156_v27  ;;  %v4111_v0 = vsel %vm11104_vm2, %v4094_v62, %v4096_v20  ;;  %v4164_v38 = vsel %vm11074_vm15, %v4112_v43, %v9544_v35  ;;  %vm11114_vm1 = vmmov %vm11108_vm7 }
 0x93b   : > { %v4162_v39 = vsel %vm11074_vm15, %v4111_v0, %v9531_v29  ;;  %v9815_v34 = vsel %vm11077_vm6, %v9634_v24, %v4164_v38  ;;  %v4212_v29 = vpop.permute.xlu2 %4211  ;;  %vm11105_vm15 = vcmask 1031168   ;;  %v11106_v24 = vld [vmem:[#allocation24_spill] sm:$0xff]  ;;  %vm11117_vm5 = vmmov %vm11114_vm1 }
 0x93c   : > { %v9824_v50 = vsel %vm11077_vm6, %v9623_v4, %v4162_v39  ;;  %vm11107_vm6 = vnez %v11106_v24  ;;  %vm11111_vm13 = vmmov %vm11105_vm15 }
 0x93d   : > { %4233 = vrot.lane.b32.xlu1 %v9763_v55, %s4996_s26  ;;  %4241 = vrot.lane.b32.xlu2 %v9767_v22, %s4996_s26  ;;  %vm11118_vm2 = vmmov %vm11114_vm1 }
 0x93e   : > { %4231 = vrot.lane.b32.xlu0 %v9776_v31, %s4996_s26 }
 0x943   : > { %v4248_v35 = vpop.permute.xlu2 %4247 }
 0x944   : > { %v4257_v19 = vsel %vm11108_vm7, %v4248_v35, %v4212_v29  ;;  %v4284_v63 = vsel %vm11114_vm1, %v4212_v29, %v4248_v35  ;;  %vm11120_vm7 = vmmov %vm11114_vm1 }
 0x945   : > { %4239 = vrot.lane.b32.xlu1 %v9791_v44, %s4996_s26  ;;  %4289 = vrot.lane.b32.xlu2 %v9763_v55, %s4997_s27 }
 0x946   : > { %4237 = vrot.lane.b32.xlu0 %v9800_v56, %s4996_s26 }
 0x94b   : > { %v4320_v16 = vpop.permute.xlu2 %4319 }
 0x94c   : > { %v4365_v4 = vsel %vm11105_vm15, %v4320_v16, %v4318_v12  ;;  %v4329_v51 = vsel %vm11111_vm13, %v4318_v12, %v4320_v16  ;;  %vm11119_vm15 = vmmov %vm11114_vm1 }
 0x94d   : > { %4245 = vrot.lane.b32.xlu1 %v9815_v34, %s4996_s26  ;;  %4295 = vrot.lane.b32.xlu2 %v9668_v3, %s4997_s27  ;;  %v4383_v1 = vsel %vm11107_vm6, %v4365_v4, %v9571_v26  ;;  %v4382_v26 = vsel %vm11113_vm3, %v4329_v51, %v9586_v49  ;;  %vm11121_vm13 = vmmov %vm11114_vm1 }
 0x94e   : > { %4243 = vrot.lane.b32.xlu0 %v9824_v50, %s4996_s26  ;;  %v9853_v14 = vsel %vm11110_vm0, %v4257_v19, %v4383_v1  ;;  %v9868_v62 = vsel %vm11116_vm4, %v4284_v63, %v4382_v26  ;;  %s4703_s26 = scalar_lea.sflag [#allocation4], %s161_s8 }
 0x955   : > { %4287 = vrot.lane.b32.xlu1 %v9654_v25, %s4997_s27  ;;  %4301 = vrot.lane.b32.xlu2 %v9791_v44, %s4997_s27 }
 0x956   : > { %4285 = vrot.lane.b32.xlu0 %v9776_v31, %s4997_s27 }
 0x95d   : > { %4293 = vrot.lane.b32.xlu1 %v9731_v54, %s4997_s27  ;;  %4307 = vrot.lane.b32.xlu2 %v9703_v13, %s4997_s27 }
 0x95e   : > { %4291 = vrot.lane.b32.xlu0 %v9650_v15, %s4997_s27 }
 0x965   : > { %4299 = vrot.lane.b32.xlu1 %v9688_v7, %s4997_s27  ;;  %4313 = vrot.lane.b32.xlu2 %v9815_v34, %s4997_s27 }
 0x966   : > { %4297 = vrot.lane.b32.xlu0 %v9800_v56, %s4997_s27 }
 0x96d   : > { %4305 = vrot.lane.b32.xlu1 %v9767_v22, %s4997_s27  ;;  %4427 = vrot.lane.b32.xlu2 %v9853_v14, %s4998_s28 }
 0x96e   : > { %4303 = vrot.lane.b32.xlu0 %v9684_v11, %s4997_s27 }
 0x975   : > { %4311 = vrot.lane.b32.xlu1 %v9735_v40, %s4997_s27  ;;  %4463 = vrot.lane.b32.xlu2 %v9868_v62, %s4998_s28 }
 0x976   : > { %4309 = vrot.lane.b32.xlu0 %v9824_v50, %s4997_s27 }
 0x977   : > { %v9878_v53 = vpop.permute.xlu2 %4199 }
 0x97e   : > { %4315 = vrot.lane.b32.xlu0 %v9727_v41, %s4997_s27  ;;  %s4936_s27 = sshra.s32 %s4718_s25, 4  ;;  %s4937_s27 = int_to_ptr.hbm [resolvable:$true] %s4936_s27 }
 0x97f   : > { %p4943_p0 = scmp.lt.s32.totalorder %s4937_s27, %s10377_s3 }
 0x987   : > { %v4198_v21 = vpop.permute.xlu1 %4197  ;;  %v4196_v49 = vpop.permute.xlu0 %4195 }
 0x988   : > { %v9880_v18 = vpop.permute.xlu2 %4205 }
 0x990   : > { %v4236_v17 = vpop.permute.xlu2 %4235 }
 0x997   : > { %v4204_v47 = vpop.permute.xlu1 %4203  ;;  %v4202_v9 = vpop.permute.xlu0 %4201 }
 0x998   : > { %v9892_v60 = vpop.permute.xlu2 %4241 }
 0x9a0   : > { %v9907_v36 = vpop.permute.xlu2 %4289 }
 0x9a7   : > { %v9882_v8 = vpop.permute.xlu1 %4209 }
 0x9a8   : > { %v9884_v48 = vpop.permute.xlu0 %4207  ;;  %v4296_v43 = vpop.permute.xlu2 %4295 }
 0x9af   : > { %v4234_v20 = vpop.permute.xlu1 %4233 }
 0x9b0   : > { %v4232_v42 = vpop.permute.xlu0 %4231  ;;  %v9887_v5 = vsel %vm11117_vm5, %v4198_v21, %v4234_v20  ;;  %vm11122_vm5 = vcmask 1031168   ;;  %v4250_v16 = vsel %vm11114_vm1, %v4234_v20, %v4198_v21 }
 0x9b1   : > { %v9890_v45 = vsel %vm11118_vm2, %v4196_v49, %v4232_v42  ;;  %vm11123_vm2 = vmmov %vm11114_vm1 }
 0x9b2   : > { %v4249_v32 = vsel %vm11123_vm2, %v4232_v42, %v4196_v49  ;;  %vm11127_vm2 = vmmov %vm11114_vm1 }
 0x9b7   : > { %v4240_v2 = vpop.permute.xlu1 %4239 }
 0x9b8   : > { %v4238_v33 = vpop.permute.xlu0 %4237  ;;  %v9895_v61 = vsel %vm11119_vm15, %v4204_v47, %v4240_v2  ;;  %vm11124_vm15 = vmmov %vm11122_vm5 }
 0x9b9   : > { %v9898_v59 = vsel %vm11120_vm7, %v4202_v9, %v4238_v33  ;;  %vm11125_vm7 = vmmov %vm11114_vm1 }
 0x9ba   : > { %v4251_v35 = vsel %vm11125_vm7, %v4236_v17, %v9878_v53  ;;  %vm11129_vm7 = vmmov %vm11114_vm1 }
 0x9bf   : > { %v9900_v28 = vpop.permute.xlu1 %4245 }
 0x9c0   : > { %v4244_v23 = vpop.permute.xlu0 %4243  ;;  %v9905_v37 = vsel %vm11121_vm13, %v9882_v8, %v9900_v28  ;;  %vm11126_vm13 = vmmov %vm11122_vm5 }
 0x9c1   : > { %v9911_v52 = vsel %vm11114_vm1, %v9884_v48, %v4244_v23 }
 0x9c7   : > { %v4288_v57 = vpop.permute.xlu1 %4287 }
 0x9c8   : > { %v4286_v58 = vpop.permute.xlu0 %4285 }
 0x9c9   : > { %v4357_v30 = vsel %vm11122_vm5, %v4288_v57, %v4286_v58 }
 0x9ca   : > { %v4367_v27 = vsel %vm11107_vm6, %v4357_v30, %v9654_v25 }
 0x9cb   : > { %v9920_v0 = vsel %vm11110_vm0, %v4249_v32, %v4367_v27  ;;  %v4253_v27 = vsel %vm11114_vm1, %v4240_v2, %v4204_v47 }
 0x9cc   : > { %4411 = vrot.lane.b32.xlu0 %v9920_v0, %s4998_s28 }
 0x9cf   : > { %v4294_v38 = vpop.permute.xlu1 %4293 }
 0x9d0   : > { %v4292_v39 = vpop.permute.xlu0 %4291  ;;  %v4359_v29 = vsel %vm11124_vm15, %v4296_v43, %v4294_v38  ;;  %vm11128_vm15 = vmmov %vm11122_vm5 }
 0x9d1   : > { %v4358_v12 = vsel %vm11126_vm13, %v4292_v39, %v9907_v36  ;;  %v4371_v25 = vsel %vm11107_vm6, %v4359_v29, %v9668_v3  ;;  %v4302_v3 = vpop.permute.xlu2 %4301  ;;  %vm11130_vm13 = vmmov %vm11122_vm5 }
 0x9d2   : > { %v4369_v4 = vsel %vm11107_vm6, %v4358_v12, %v9650_v15  ;;  %v9938_v1 = vsel %vm11110_vm0, %v4251_v35, %v4371_v25  ;;  %v4252_v15 = vsel %vm11127_vm2, %v4238_v33, %v4202_v9  ;;  %v4254_v9 = vsel %vm11129_vm7, %v9892_v60, %v9880_v18  ;;  %vm11131_vm2 = vmmov %vm11114_vm1 }
 0x9d3   : > { %v9942_v19 = vsel %vm11110_vm0, %v4250_v16, %v4369_v4  ;;  %4415 = vrot.lane.b32.xlu2 %v9938_v1, %s4998_s28  ;;  %v4323_v25 = vsel %vm11122_vm5, %v4294_v38, %v4296_v43  ;;  %v4278_v2 = vsel %vm11131_vm2, %v9878_v53, %v4236_v17  ;;  %vm11133_vm7 = vmmov %vm11114_vm1 }
 0x9d4   : > { %4413 = vrot.lane.b32.xlu1 %v9942_v19, %s4998_s28  ;;  %v4255_v4 = vsel %vm11133_vm7, %v4244_v23, %v9884_v48  ;;  %vm11135_vm1 = vmmov %vm11122_vm5 }
 0x9d5   : > { %v4321_v48 = vsel %vm11135_vm1, %v4286_v58, %v4288_v57  ;;  %vm11139_vm7 = vmmov %vm11135_vm1 }
 0x9d6   : > { %v4366_v23 = vsel %vm11113_vm3, %v4321_v48, %v9776_v31  ;;  %v4322_v24 = vsel %vm11139_vm7, %v9907_v36, %v4292_v39 }
 0x9d7   : > { %v4300_v51 = vpop.permute.xlu1 %4299  ;;  %v4368_v46 = vsel %vm11113_vm3, %v4322_v24, %v9763_v55 }
 0x9d8   : > { %v4298_v26 = vpop.permute.xlu0 %4297 }
 0x9d9   : > { %v4360_v63 = vsel %vm11122_vm5, %v4300_v51, %v4298_v26  ;;  %v4308_v20 = vpop.permute.xlu2 %4307 }
 0x9da   : > { %v4373_v21 = vsel %vm11107_vm6, %v4360_v63, %v9688_v7 }
 0x9db   : > { %v9955_v49 = vsel %vm11110_vm0, %v4252_v15, %v4373_v21 }
 0x9dc   : > { %4417 = vrot.lane.b32.xlu0 %v9955_v49, %s4998_s28 }
 0x9df   : > { %v4306_v42 = vpop.permute.xlu1 %4305 }
 0x9e0   : > { %v4304_v30 = vpop.permute.xlu0 %4303  ;;  %v4362_v32 = vsel %vm11128_vm15, %v4308_v20, %v4306_v42  ;;  %vm11132_vm15 = vmmov %vm11122_vm5 }
 0x9e1   : > { %v4361_v33 = vsel %vm11130_vm13, %v4304_v30, %v4302_v3  ;;  %v4377_v7 = vsel %vm11107_vm6, %v4362_v32, %v9703_v13  ;;  %vm11134_vm13 = vmmov %vm11122_vm5  ;;  %v4314_v17 = vpop.permute.xlu2 %4313 }
 0x9e2   : > { %v4375_v29 = vsel %vm11107_vm6, %v4361_v33, %v9684_v11  ;;  %v9973_v35 = vsel %vm11110_vm0, %v4254_v9, %v4377_v7  ;;  %v4370_v11 = vsel %vm11113_vm3, %v4323_v25, %v9731_v54  ;;  %v4326_v53 = vsel %vm11134_vm13, %v4306_v42, %v4308_v20  ;;  %vm11136_vm5 = vmmov %vm11131_vm2 }
 0x9e3   : > { %v9977_v12 = vsel %vm11110_vm0, %v4253_v27, %v4375_v29  ;;  %4421 = vrot.lane.b32.xlu2 %v9973_v35, %s4998_s28  ;;  %v9997_v38 = vsel %vm11116_vm4, %v4278_v2, %v4370_v11  ;;  %v4281_v15 = vsel %vm11136_vm5, %v9880_v18, %v9892_v60  ;;  %vm11137_vm2 = vmmov %vm11135_vm1  ;;  %v10038_v18 = vsel %vm11116_vm4, %v9890_v45, %v4366_v23 }
 0x9e4   : > { %4419 = vrot.lane.b32.xlu1 %v9977_v12, %s4998_s28  ;;  %v10056_v45 = vsel %vm11116_vm4, %v9887_v5, %v4368_v46 }
 0x9e7   : > { %v4312_v13 = vpop.permute.xlu1 %4311 }
 0x9e8   : > { %v4310_v47 = vpop.permute.xlu0 %4309 }
 0x9e9   : > { %v4363_v16 = vsel %vm11132_vm15, %v4312_v13, %v4310_v47  ;;  %vm11138_vm15 = vmmov %vm11136_vm5 }
 0x9ea   : > { %v4379_v43 = vsel %vm11107_vm6, %v4363_v16, %v9735_v40  ;;  %v4376_v40 = vsel %vm11113_vm3, %v4326_v53, %v9767_v22  ;;  %v4256_v57 = vsel %vm11138_vm15, %v9900_v28, %v9882_v8 }
 0x9eb   : > { %4451 = vrot.lane.b32.xlu2 %v9997_v38, %s4998_s28  ;;  %v10003_v54 = vsel %vm11110_vm0, %v4255_v4, %v4379_v43  ;;  %v10027_v58 = vsel %vm11116_vm4, %v4281_v15, %v4376_v40 }
 0x9ec   : > { %4423 = vrot.lane.b32.xlu0 %v10003_v54, %s4998_s28 }
 0x9f0   : > { %v4316_v63 = vpop.permute.xlu0 %4315 }
 0x9f1   : > { %v4364_v21 = vsel %vm11137_vm2, %v4316_v63, %v4314_v17 }
 0x9f2   : > { %v4381_v22 = vsel %vm11107_vm6, %v4364_v21, %v9727_v41  ;;  %vm11140_vm6 = vmmov %vm11135_vm1 }
 0x9f3   : > { %v10031_v31 = vsel %vm11110_vm0, %v4256_v57, %v4381_v22  ;;  %4457 = vrot.lane.b32.xlu2 %v10027_v58, %s4998_s28  ;;  %v4324_v41 = vsel %vm11140_vm6, %v4298_v26, %v4300_v51  ;;  %vm11141_vm0 = vmmov %vm11135_vm1 }
 0x9f4   : > { %4425 = vrot.lane.b32.xlu1 %v10031_v31, %s4998_s28  ;;  %4447 = vrot.lane.b32.xlu0 %v10038_v18, %s4998_s28  ;;  %v4372_v8 = vsel %vm11113_vm3, %v4324_v41, %v9800_v56  ;;  %v4325_v55 = vsel %vm11141_vm0, %v4302_v3, %v4304_v30  ;;  %vm11142_vm13 = vmmov %vm11141_vm0 }
 0x9f5   : > { %v10063_v60 = vsel %vm11116_vm4, %v9898_v59, %v4372_v8  ;;  %v4327_v56 = vsel %vm11142_vm13, %v4310_v47, %v4312_v13  ;;  %v4374_v5 = vsel %vm11113_vm3, %v4325_v55, %v9791_v44  ;;  %vm11143_vm1 = vmmov %vm11141_vm0 }
 0x9f6   : > { %v4378_v28 = vsel %vm11113_vm3, %v4327_v56, %v9824_v50  ;;  %v10080_v59 = vsel %vm11116_vm4, %v9895_v61, %v4374_v5  ;;  %v4328_v44 = vsel %vm11143_vm1, %v4314_v17, %v4316_v63 }
 0x9f7   : > { %v10087_v36 = vsel %vm11116_vm4, %v9911_v52, %v4378_v28  ;;  %v4380_v50 = vsel %vm11113_vm3, %v4328_v44, %v9815_v34  ;;  %v10136_v34 = vpop.permute.xlu2 %4427  ;;  %vm11148_vm3 = vcmask 1041408  }
 0x9f8   : > { %v10100_v61 = vsel %vm11116_vm4, %v9905_v37, %v4380_v50  ;;  %vm11149_vm4 = vmmov %vm11148_vm3 }
 0x9f9   : > { %vm11150_vm5 = vmmov %vm11148_vm3 }
 0x9fa   : > { %vm11151_vm2 = vmmov %vm11148_vm3 }
 0x9fb   : > { %4505 = vrot.lane.b32.xlu2 %v10056_v45, %s4999_s29  ;;  %vm11152_vm15 = vmmov %vm11151_vm2 }
 0x9fc   : > { %4449 = vrot.lane.b32.xlu1 %v10056_v45, %s4998_s28  ;;  %4453 = vrot.lane.b32.xlu0 %v10063_v60, %s4998_s28  ;;  %vm11153_vm7 = vmmov %vm11151_vm2 }
 0x9fd   : > { %vm11154_vm6 = vmmov %vm11151_vm2 }
 0x9fe   : > { %vm11155_vm0 = vmmov %vm11151_vm2 }
 0x9ff   : > { %v10138_v10 = vpop.permute.xlu2 %4463  ;;  %vm11156_vm13 = vmmov %vm11155_vm0 }
 0xa00   : > { %vm11157_vm1 = vmmov %vm11155_vm0 }
 0xa03   : > { %4511 = vrot.lane.b32.xlu2 %v9938_v1, %s4999_s29 }
 0xa04   : > { %4455 = vrot.lane.b32.xlu1 %v10080_v59, %s4998_s28  ;;  %4459 = vrot.lane.b32.xlu0 %v10087_v36, %s4998_s28 }
 0xa0b   : > { %4517 = vrot.lane.b32.xlu2 %v10080_v59, %s4999_s29 }
 0xa0c   : > { %4461 = vrot.lane.b32.xlu1 %v10100_v61, %s4998_s28  ;;  %4501 = vrot.lane.b32.xlu0 %v10038_v18, %s4999_s29  ;;  %s4938_s28 = scalar_lea.hbm %s4937_s27, 128 }
 0xa0d   : > { %p4939_p11 = scmp.ne.s32.totalorder %s4937_s27, %s4938_s28  ;;  %p4944_p1 = scmp.lt.s32.totalorder %s4942_s5, %s4938_s28 }
 0xa0f   : > { %p4940_p12 = pnand %p4939_p11, %p5059_p5  ;;  %p4945_p2 = por %p4944_p1, %p4943_p0 }
 0xa11   : > { %p4941_p13 = pneg %p4940_p12 }
 0xa13   : > { %4523 = vrot.lane.b32.xlu2 %v9973_v35, %s4999_s29  ;;  %p4946_p3 = pnand %p4945_p2, %p4941_p13 }
 0xa14   : > { %4503 = vrot.lane.b32.xlu1 %v9920_v0, %s4999_s29  ;;  %4507 = vrot.lane.b32.xlu0 %v9942_v19, %s4999_s29 }
 0xa1b   : > { %4529 = vrot.lane.b32.xlu2 %v10100_v61, %s4999_s29 }
 0xa1c   : > { %4509 = vrot.lane.b32.xlu1 %v9997_v38, %s4999_s29  ;;  %4513 = vrot.lane.b32.xlu0 %v10063_v60, %s4999_s29 }
 0xa23   : > { %4535 = vrot.lane.b32.xlu2 %v9853_v14, %s4999_s29 }
 0xa24   : > { %4515 = vrot.lane.b32.xlu1 %v9955_v49, %s4999_s29  ;;  %4519 = vrot.lane.b32.xlu0 %v9977_v12, %s4999_s29 }
 0xa2c   : > { %4521 = vrot.lane.b32.xlu1 %v10027_v58, %s4999_s29  ;;  %4525 = vrot.lane.b32.xlu0 %v10087_v36, %s4999_s29 }
 0xa2d   : > { %v4416_v37 = vpop.permute.xlu2 %4415 }
 0xa34   : > { %4527 = vrot.lane.b32.xlu1 %v10003_v54, %s4999_s29  ;;  %4531 = vrot.lane.b32.xlu0 %v10031_v31, %s4999_s29 }
 0xa3c   : > { %4533 = vrot.lane.b32.xlu1 %v9868_v62, %s4999_s29 }
 0xa3d   : > { %v10142_v3 = vpop.permute.xlu2 %4421 }
 0xa3e   : > { %v4412_v6 = vpop.permute.xlu0 %4411 }
 0xa45   : > { %v4452_v30 = vpop.permute.xlu2 %4451 }
 0xa46   : > { %v4414_v52 = vpop.permute.xlu1 %4413 }
 0xa4d   : > { %v10150_v33 = vpop.permute.xlu2 %4457 }
 0xa4e   : > { %v10140_v39 = vpop.permute.xlu0 %4417 }
 0xa55   : > { %v4506_v29 = vpop.permute.xlu2 %4505 }
 0xa56   : > { %v10144_v51 = vpop.permute.xlu1 %4419 }
 0xa5d   : > { %v4512_v13 = vpop.permute.xlu2 %4511 }
 0xa5e   : > { %v10146_v26 = vpop.permute.xlu0 %4423 }
 0xa66   : > { %v4448_v20 = vpop.permute.xlu0 %4447  ;;  %v10148_v42 = vpop.permute.xlu1 %4425 }
 0xa67   : > { %v4465_v47 = vsel %vm2293_vm8, %v4448_v20, %v4412_v6  ;;  %v4492_v2 = vsel %vm2293_vm8, %v4412_v6, %v4448_v20 }
 0xa6e   : > { %v4454_v32 = vpop.permute.xlu0 %4453  ;;  %v4450_v9 = vpop.permute.xlu1 %4449 }
 0xa6f   : > { %v4466_v16 = vsel %vm2293_vm8, %v4450_v9, %v4414_v52  ;;  %v4493_v4 = vsel %vm2293_vm8, %v4414_v52, %v4450_v9  ;;  %v4467_v9 = vsel %vm2293_vm8, %v4452_v30, %v4416_v37 }
 0xa76   : > { %v10152_v7 = vpop.permute.xlu0 %4459  ;;  %v4456_v27 = vpop.permute.xlu1 %4455 }
 0xa7e   : > { %v4502_v25 = vpop.permute.xlu0 %4501  ;;  %v10154_v11 = vpop.permute.xlu1 %4461 }
 0xa86   : > { %v4508_v43 = vpop.permute.xlu0 %4507  ;;  %v4504_v53 = vpop.permute.xlu1 %4503 }
 0xa87   : > { %v4538_v48 = vsel %vm2366_vm14, %v4506_v29, %v4508_v43  ;;  %v4574_v40 = vsel %vm2366_vm14, %v4508_v43, %v4506_v29  ;;  %v4537_v17 = vsel %vm2366_vm14, %v4502_v25, %v4504_v53  ;;  %v4573_v23 = vsel %vm2366_vm14, %v4504_v53, %v4502_v25  ;;  %v4518_v25 = vpop.permute.xlu2 %4517 }
 0xa88   : > { %v4584_v15 = vsel %vm7555_vm10, %v4538_v48, %v10056_v45  ;;  %v4585_v57 = vsel %vm7559_vm9, %v4574_v40, %v9942_v19  ;;  %v4582_v22 = vsel %vm7555_vm10, %v4537_v17, %v10038_v18  ;;  %v4583_v24 = vsel %vm7559_vm9, %v4573_v23, %v9920_v0 }
 0xa89   : > { %v4602_v46 = vsel %vm7565_vm11, %v4493_v4, %v4584_v15  ;;  %v4603_v55 = vsel %vm7569_vm12, %v4466_v16, %v4585_v57  ;;  %v4600_v45 = vsel %vm7565_vm11, %v4492_v2, %v4582_v22  ;;  %v4601_v19 = vsel %vm7569_vm12, %v4465_v47, %v4583_v24 }
 0xa8a   : > { %v4637_v56 = vrot.slane %v4602_v46, 6  ;;  %v4640_v5 = vrot.slane %v4603_v55, 6  ;;  %v4636_v28 = vrot.slane %v4600_v45, 6  ;;  %v4639_v18 = vrot.slane %v4601_v19, 6 }
 0xa8b   : > { %v4494_v29 = vsel %vm2293_vm8, %v4416_v37, %v4452_v30  ;;  %v4495_v30 = vsel %vm2293_vm8, %v10140_v39, %v4454_v32  ;;  %v4496_v48 = vsel %vm2293_vm8, %v10144_v51, %v4456_v27 }
 0xa8c   : > { %v4638_v44 = vsel %vm11148_vm3, %v4636_v28, %v4637_v56  ;;  %v4641_v0 = vsel %vm11149_vm4, %v4639_v18, %v4640_v5  ;;  %vm11158_vm3 = vmmov %vm11155_vm0 }
 0xa8d   : > { %4686 = vst [vmem:[%s10189_s10] sm:$0xff] %v4638_v44  ;;  %vm11159_vm4 = vmmov %vm11155_vm0 }
 0xa8e   : > { %4687 = vst [vmem:[%s10189_s10 + $0x8] sm:$0xff] %v4641_v0  ;;  %v4514_v50 = vpop.permute.xlu0 %4513  ;;  %v4510_v6 = vpop.permute.xlu1 %4509 }
 0xa8f   : > { %v4539_v52 = vsel %vm2366_vm14, %v4510_v6, %v4512_v13  ;;  %v4575_v20 = vsel %vm2366_vm14, %v4512_v13, %v4510_v6  ;;  %v4524_v55 = vpop.permute.xlu2 %4523 }
 0xa90   : > { %v4586_v47 = vsel %vm7555_vm10, %v4539_v52, %v9997_v38  ;;  %v4587_v2 = vsel %vm7559_vm9, %v4575_v20, %v9938_v1  ;;  %v4468_v38 = vsel %vm2293_vm8, %v4454_v32, %v10140_v39  ;;  %v4469_v1 = vsel %vm2293_vm8, %v4456_v27, %v10144_v51 }
 0xa91   : > { %v4604_v16 = vsel %vm7565_vm11, %v4494_v29, %v4586_v47  ;;  %v4605_v13 = vsel %vm7569_vm12, %v4467_v9, %v4587_v2  ;;  %v4470_v52 = vsel %vm2293_vm8, %v10150_v33, %v10142_v3  ;;  %v4497_v20 = vsel %vm2293_vm8, %v10142_v3, %v10150_v33 }
 0xa92   : > { %v4642_v4 = vrot.slane %v4604_v16, 6  ;;  %v4644_v43 = vrot.slane %v4605_v13, 6 }
 0xa94   : > { %v4643_v53 = vsel %vm11150_vm5, %v4637_v56, %v4642_v4  ;;  %v4645_v37 = vsel %vm11151_vm2, %v4640_v5, %v4644_v43  ;;  %vm11160_vm5 = vmmov %vm11155_vm0 }
 0xa95   : > { %4688 = vst [vmem:[%s10189_s10 + $0x10] sm:$0xff] %v4643_v53  ;;  %vm11161_vm2 = vmmov %vm11155_vm0 }
 0xa96   : > { %4689 = vst [vmem:[%s10189_s10 + $0x18] sm:$0xff] %v4645_v37  ;;  %v4520_v40 = vpop.permute.xlu0 %4519  ;;  %v4516_v17 = vpop.permute.xlu1 %4515 }
 0xa97   : > { %v4541_v23 = vsel %vm2366_vm14, %v4518_v25, %v4520_v40  ;;  %v4577_v15 = vsel %vm2366_vm14, %v4520_v40, %v4518_v25  ;;  %v4540_v57 = vsel %vm2366_vm14, %v4514_v50, %v4516_v17  ;;  %v4576_v22 = vsel %vm2366_vm14, %v4516_v17, %v4514_v50  ;;  %v4530_v13 = vpop.permute.xlu2 %4529 }
 0xa98   : > { %v4590_v39 = vsel %vm7555_vm10, %v4541_v23, %v10080_v59  ;;  %v4591_v32 = vsel %vm7559_vm9, %v4577_v15, %v9977_v12  ;;  %v4588_v51 = vsel %vm7555_vm10, %v4540_v57, %v10063_v60  ;;  %v4589_v27 = vsel %vm7559_vm9, %v4576_v22, %v9955_v49 }
 0xa99   : > { %v4608_v24 = vsel %vm7565_vm11, %v4496_v48, %v4590_v39  ;;  %v4609_v59 = vsel %vm7569_vm12, %v4469_v1, %v4591_v32  ;;  %v4606_v12 = vsel %vm7565_vm11, %v4495_v30, %v4588_v51  ;;  %v4607_v46 = vsel %vm7569_vm12, %v4468_v38, %v4589_v27 }
 0xa9a   : > { %v4650_v60 = vrot.slane %v4608_v24, 6  ;;  %v4652_v45 = vrot.slane %v4609_v59, 6  ;;  %v4646_v19 = vrot.slane %v4606_v12, 6  ;;  %v4648_v56 = vrot.slane %v4607_v46, 6 }
 0xa9b   : > { %v4473_v12 = vsel %vm2293_vm8, %v10138_v10, %v10136_v34  ;;  %v4500_v46 = vsel %vm2293_vm8, %v10136_v34, %v10138_v10 }
 0xa9c   : > { %v4647_v49 = vsel %vm11152_vm15, %v4642_v4, %v4646_v19  ;;  %v4649_v5 = vsel %vm11153_vm7, %v4644_v43, %v4648_v56  ;;  %v4651_v28 = vsel %vm11154_vm6, %v4646_v19, %v4650_v60  ;;  %v4653_v18 = vsel %vm11155_vm0, %v4648_v56, %v4652_v45 }
 0xa9d   : > { %4690 = vst [vmem:[%s10189_s10 + $0x20] sm:$0xff] %v4647_v49  ;;  %v4472_v4 = vsel %vm2293_vm8, %v10154_v11, %v10148_v42  ;;  %v4499_v43 = vsel %vm2293_vm8, %v10148_v42, %v10154_v11 }
 0xa9e   : > { %4691 = vst [vmem:[%s10189_s10 + $0x28] sm:$0xff] %v4649_v5  ;;  %v4526_v44 = vpop.permute.xlu0 %4525  ;;  %v4522_v0 = vpop.permute.xlu1 %4521 }
 0xa9f   : > { %4692 = vst [vmem:[%s10189_s10 + $0x30] sm:$0xff] %v4651_v28  ;;  %v4542_v50 = vsel %vm2366_vm14, %v4522_v0, %v4524_v55  ;;  %v4578_v6 = vsel %vm2366_vm14, %v4524_v55, %v4522_v0  ;;  %v4536_v51 = vpop.permute.xlu2 %4535 }
 0xaa0   : > { %4693 = vst [vmem:[%s10189_s10 + $0x38] sm:$0xff] %v4653_v18  ;;  %v4592_v9 = vsel %vm7555_vm10, %v4542_v50, %v10027_v58  ;;  %v4593_v29 = vsel %vm7559_vm9, %v4578_v6, %v9973_v35  ;;  %v4471_v58 = vsel %vm2293_vm8, %v10152_v7, %v10146_v26  ;;  %v4498_v35 = vsel %vm2293_vm8, %v10146_v26, %v10152_v7  ;;  %vm11162_vm8 = vmmov %vm11155_vm0 }
 0xaa1   : > { %v4610_v25 = vsel %vm7565_vm11, %v4497_v20, %v4592_v9  ;;  %v4611_v47 = vsel %vm7569_vm12, %v4470_v52, %v4593_v29 }
 0xaa2   : > { %v4654_v2 = vrot.slane %v4610_v25, 6  ;;  %v4656_v16 = vrot.slane %v4611_v47, 6 }
 0xaa4   : > { %v4655_v3 = vsel %vm11156_vm13, %v4650_v60, %v4654_v2  ;;  %v4657_v33 = vsel %vm11157_vm1, %v4652_v45, %v4656_v16 }
 0xaa5   : > { %4694 = vst [vmem:[%s10189_s10 + $0x40] sm:$0xff] %v4655_v3 }
 0xaa6   : > { %4695 = vst [vmem:[%s10189_s10 + $0x48] sm:$0xff] %v4657_v33  ;;  %v4532_v53 = vpop.permute.xlu0 %4531  ;;  %v4528_v37 = vpop.permute.xlu1 %4527 }
 0xaa7   : > { %v4544_v38 = vsel %vm2366_vm14, %v4530_v13, %v4532_v53  ;;  %v4580_v30 = vsel %vm2366_vm14, %v4532_v53, %v4530_v13  ;;  %v4543_v1 = vsel %vm2366_vm14, %v4526_v44, %v4528_v37  ;;  %v4579_v26 = vsel %vm2366_vm14, %v4528_v37, %v4526_v44 }
 0xaa8   : > { %v4596_v7 = vsel %vm7555_vm10, %v4544_v38, %v10100_v61  ;;  %v4597_v42 = vsel %vm7559_vm9, %v4580_v30, %v10031_v31  ;;  %v4594_v11 = vsel %vm7555_vm10, %v4543_v1, %v10087_v36  ;;  %v4595_v48 = vsel %vm7559_vm9, %v4579_v26, %v10003_v54 }
 0xaa9   : > { %v4614_v40 = vsel %vm7565_vm11, %v4499_v43, %v4596_v7  ;;  %v4615_v61 = vsel %vm7569_vm12, %v4472_v4, %v4597_v42  ;;  %v4612_v17 = vsel %vm7565_vm11, %v4498_v35, %v4594_v11  ;;  %v4613_v31 = vsel %vm7569_vm12, %v4471_v58, %v4595_v48 }
 0xaaa   : > { %v4662_v23 = vrot.slane %v4614_v40, 6  ;;  %v4664_v36 = vrot.slane %v4615_v61, 6  ;;  %v4658_v15 = vrot.slane %v4612_v17, 6  ;;  %v4660_v57 = vrot.slane %v4613_v31, 6 }
 0xaac   : > { %v4659_v54 = vsel %vm11158_vm3, %v4654_v2, %v4658_v15  ;;  %v4661_v22 = vsel %vm11159_vm4, %v4656_v16, %v4660_v57  ;;  %v4663_v39 = vsel %vm11160_vm5, %v4658_v15, %v4662_v23  ;;  %v4665_v32 = vsel %vm11161_vm2, %v4660_v57, %v4664_v36 }
 0xaad   : > { %4696 = vst [vmem:[%s10189_s10 + $0x50] sm:$0xff] %v4659_v54 }
 0xaae   : > { %4697 = vst [vmem:[%s10189_s10 + $0x58] sm:$0xff] %v4661_v22  ;;  %v4534_v27 = vpop.permute.xlu1 %4533 }
 0xaaf   : > { %4698 = vst [vmem:[%s10189_s10 + $0x60] sm:$0xff] %v4663_v39  ;;  %v4545_v24 = vsel %vm2366_vm14, %v4534_v27, %v4536_v51  ;;  %v4581_v59 = vsel %vm2366_vm14, %v4536_v51, %v4534_v27  ;;  %vm11163_vm14 = vmmov %vm11155_vm0 }
 0xab0   : > { %4699 = vst [vmem:[%s10189_s10 + $0x68] sm:$0xff] %v4665_v32  ;;  %v4598_v55 = vsel %vm7555_vm10, %v4545_v24, %v9868_v62  ;;  %v4599_v60 = vsel %vm7559_vm9, %v4581_v59, %v9853_v14 }
 0xab1   : > { %v4616_v45 = vsel %vm7565_vm11, %v4500_v46, %v4598_v55  ;;  %v4617_v19 = vsel %vm7569_vm12, %v4473_v12, %v4599_v60 }
 0xab2   : > { %v4666_v34 = vrot.slane %v4616_v45, 6  ;;  %v4668_v10 = vrot.slane %v4617_v19, 6 }
 0xab4   : > { %v4667_v56 = vsel %vm11162_vm8, %v4662_v23, %v4666_v34  ;;  %v4669_v62 = vsel %vm11163_vm14, %v4664_v36, %v4668_v10 }
 0xab5   : > { %4700 = vst [vmem:[%s10189_s10 + $0x70] sm:$0xff] %v4667_v56 }
 0xab6   : > { %4701 = vst [vmem:[%s10189_s10 + $0x78] sm:$0xff] %v4669_v62 }
 0xab7   : > { %4949 = shalt.err (!%p4946_p3)
}
 0xab8   : > { %s5000_s30 = smov 256  }
 0xab9   : > { %4794 = dma.vmem_to_hbm [thread:$0]  (%p5059_p5), %s4716_s16, 2048, %s4718_s25, %s4703_s26, %s5000_s30, %s5000_s30, %s4990_s11  }
 0xaba PF: > { %p4800_p4 = scmp.ge.s32.totalorder %s4984_s15, 2  ;;  %s4732_s8 = sand.u32 1, %s4972_s12  }
 0xabb   : > { %s4733_s9 = scalar_lea.sflag [#allocation4], %s4732_s8 }
 0xabc   : > { %p4797_p7 = pnand %p4800_p4, %p5063_p6 }
 0xabe   : > { %p4798_p8 = pneg %p4797_p7 }
 0xac0   : > { %4967 = dma.done.wait (%p4798_p8), %s4733_s9, 2048  }
 0xac1   : > { %4969 = vsyncadd (%p4798_p8), %s4733_s9, 4294965248  ;;  %p13_p9 = scmp.ge.s32.totalorder %s5046_s18, 4   ;;  %s11164_s12 = smov %s4976_s13 }
 0xac2   : > { %s11165_s13 = smov %s4980_s14  ;;  %s11166_s14 = smov %s5057_s21 }
 0xac3   : > { %s11167_s15 = smov %s5046_s18  ;;  %15 = sbr.rel (!%p13_p9) target bundleno = 3 (0x3), region = 67 }
 0xac8   :  { %4739 = vsyncpa [#allocation4], 1 }
 0xac9   :  { %4741 = vsyncpa [#allocation4 + $0x1], 1 }

</bundles_post_ra>
